<compile_context>
chip_gen: v7x
topology: tpu7x:2x2x1
jax: 0.10.0
libtpu: 0.0.40
codegen_flags: <defaults>
</compile_context>

<pallas_src>
import functools

import jax
import jax.numpy as jnp
from jax.experimental import pallas as pl
from jax.experimental.pallas import tpu as pltpu

EMB_DIM = 300            # hard-coded "300" in GNN.forward
D_PAD = 384              # 300 padded to a lane multiple
H_PAD = 768              # 2*300 padded to a lane multiple
NUM_LAYER = 5            # reshape(300, 6) -> num_layer + 1 == 6
NUM_ATOM_TYPE = 120
NUM_CHIRALITY_TAG = 3
NUM_BOND_TYPE = 6
NUM_BOND_DIRECTION = 3
BN_EPS = 1e-5
GRAPH_BLOCK = 64         # graphs handled per grid step in the attention+gate kernel
NEG_INF = -1e30          # finite "-inf" for softmax masking (avoids inf/NaN paths)


def _round_up(x, m):
    return ((x + m - 1) // m) * m


def _vmem_limit_bytes():
    """Per-generation VMEM budget: ~3/4 of physical, capped at 100 MiB."""
    try:
        cap = pltpu.get_tpu_info().vmem_capacity_bytes
    except Exception:
        cap = 64 * 1024 * 1024          # conservative (v7x-sized) fallback
    return int(max(32 * 1024 * 1024, min(cap * 3 // 4, 100 * 1024 * 1024)))


# ----------------------------------------------------------------------------
# Kernel 1: fused GIN stack + per-layer graph pooling.
#   grid step 0 : h <- h0,                              T[0] = P @ h
#   grid step l : h <- relu?(BN(MLP(A @ h + Eagg_l))),  T[l] = P @ h
# A, P, h0 are resident (constant block index); weights / edge-agg stream per
# layer.  h is carried across grid steps in a bf16 VMEM scratch so both MXU
# matmuls (A @ h and P @ h) consume bf16 operands.
# ----------------------------------------------------------------------------
def gin_stack_kernel(a_ref, p_ref, h0_ref, eagg_ref,
                     w1_ref, b1_ref, w2_ref, b2_ref,
                     t_ref, h_scr):
    l = pl.program_id(0)

    @pl.when(l == 0)
    def _():
        h_scr[...] = h0_ref[...]                              # bf16 initial features

    @pl.when(l > 0)
    def _():
        agg = (jnp.dot(a_ref[...], h_scr[...],
                       preferred_element_type=jnp.float32)
               + eagg_ref[0].astype(jnp.float32))
        h1 = (jnp.dot(agg.astype(jnp.bfloat16), w1_ref[0],
                      preferred_element_type=jnp.float32) + b1_ref[0])
        h1 = jnp.maximum(h1, 0.0)                             # GIN-MLP ReLU
        h2 = (jnp.dot(h1.astype(jnp.bfloat16), w2_ref[0],
                      preferred_element_type=jnp.float32) + b2_ref[0])
        # BN is already folded into w2/b2. ReLU on all layers except the last.
        relu_floor = jnp.where(l < NUM_LAYER, jnp.float32(0.0),
                               jnp.float32(-jnp.inf))
        h_scr[...] = jnp.maximum(h2, relu_floor).astype(jnp.bfloat16)

    # scatter_sum over batch, expressed as the pooling matmul P @ h (bf16 MXU)
    t_ref[0] = jnp.dot(p_ref[...], h_scr[...],
                       preferred_element_type=jnp.float32)


def gin_stack(A, P, h0, eagg, W1s, b1s, W2s, b2s):
    L, N_pad, D_pad = eagg.shape
    G_pad = P.shape[0]
    H_pad = W1s.shape[2]
    n_steps = L + 1

    flops = (L * (2 * N_pad * N_pad * D_pad + 4 * N_pad * D_pad * H_pad)
             + n_steps * 2 * G_pad * N_pad * D_pad)
    bytes_accessed = (A.size * 2 + P.size * 2 + h0.size * 2 + eagg.size * 2
                      + W1s.size * 2 + W2s.size * 2 + b1s.size * 4
                      + b2s.size * 4 + n_steps * G_pad * D_pad * 4)

    # Streamed per-layer operands have exactly L slabs; grid step l>0 uses
    # layer l-1 and step 0 simply prefetches layer 0 (same block as step 1).
    stream = lambda l: (jnp.maximum(l, 1) - 1, 0, 0)

    return pl.pallas_call(
        gin_stack_kernel,
        out_shape=jax.ShapeDtypeStruct((n_steps, G_pad, D_pad), jnp.float32),
        grid_spec=pltpu.PrefetchScalarGridSpec(
            num_scalar_prefetch=0,
            grid=(n_steps,),
            in_specs=[
                pl.BlockSpec((N_pad, N_pad), lambda l: (0, 0)),   # A  (resident, bf16)
                pl.BlockSpec((G_pad, N_pad), lambda l: (0, 0)),   # P  (resident, bf16)
                pl.BlockSpec((N_pad, D_pad), lambda l: (0, 0)),   # h0 (resident, bf16)
                pl.BlockSpec((1, N_pad, D_pad), stream),          # edge agg / layer (bf16)
                pl.BlockSpec((1, D_pad, H_pad), stream),          # W1 / layer (bf16)
                pl.BlockSpec((1, 1, H_pad), stream),              # b1 / layer
                pl.BlockSpec((1, H_pad, D_pad), stream),          # W2 (BN folded, bf16)
                pl.BlockSpec((1, 1, D_pad), stream),              # b2 (BN folded)
            ],
            out_specs=pl.BlockSpec((1, G_pad, D_pad), lambda l: (l, 0, 0)),
            scratch_shapes=[pltpu.VMEM((N_pad, D_pad), jnp.bfloat16)],  # carried h
        ),
        compiler_params=pltpu.CompilerParams(
            dimension_semantics=("arbitrary",),        # layers are sequential
            vmem_limit_bytes=_vmem_limit_bytes(),
        ),
        cost_estimate=pl.CostEstimate(flops=flops, transcendentals=0,
                                      bytes_accessed=bytes_accessed),
    )(A, P, h0, eagg, W1s, b1s, W2s, b2s)


# ----------------------------------------------------------------------------
# Kernel 2: per-graph layer attention (q/k/v over the (300, 6) reshape) fused
# with the gate head (Linear -> folded-BN -> ReLU -> Linear).
# Input tile per graph is layer-major and lane-dense:
#   tg (8, 384):  rows 0..5 = columns of the torch (300,6) matrix (i.e. its
#                 transpose), row 6 = ones (bias), row 7 = zeros;
#                 lanes 0..299 = the 300 "rows", lanes 300..383 = zero pad.
# ----------------------------------------------------------------------------
def attn_gate_kernel(t_ref, wqkv_ref, wg1_ref, bg1_ref, wg2_ref, bg2_ref,
                     out_ref, node_scr, *, scale, block_g):
    # lanes >= 300 are padding: mask their logit columns before the softmax
    col_ok = jax.lax.broadcasted_iota(jnp.int32, (D_PAD, D_PAD), 1) < EMB_DIM
    wqkv = wqkv_ref[...]                                   # (8, 8): cols q, k, v
    wq_col = wqkv[:, 0:1]                                  # (8, 1)

    def body(g, carry):
        tg = t_ref[g]                                      # (8, 384) f32
        # q/k/v rows in one tiny matmul: proj[c, i] = sum_l wqkv[l, c] * tg[l, i]
        proj = jax.lax.dot_general(wqkv, tg, (((0,), (0,)), ((), ())),
                                   preferred_element_type=jnp.float32)  # (8, 384)
        k_row = proj[1:2, :] * jnp.float32(scale)          # (1, 384)
        v_row = proj[2:3, :]                               # (1, 384)
        # logits[i, j] = q[i] * k[j] * scale, built with one K=8 matmul:
        outer_w = (wq_col * k_row).astype(jnp.bfloat16)    # (8, 384) = wq ⊗ (scale*k)
        logits = jax.lax.dot_general(tg.astype(jnp.bfloat16), outer_w,
                                     (((0,), (0,)), ((), ())),
                                     preferred_element_type=jnp.float32)  # (384, 384)
        logits = jnp.where(col_ok, logits, jnp.float32(NEG_INF))
        m = jnp.max(logits, axis=-1, keepdims=True)
        e = jnp.exp(logits - m)
        denom = jnp.sum(e, axis=-1, keepdims=True)
        probs = e * pl.reciprocal(denom, approx=True)      # softmax(dim=-1)
        # out[i] = sum_j probs[i, j] * v[j], laid out directly as a (1, 384) row
        out_row = jax.lax.dot_general(v_row.astype(jnp.bfloat16),
                                      probs.astype(jnp.bfloat16),
                                      (((1,), (1,)), ((), ())),
                                      preferred_element_type=jnp.float32)
        node_scr[pl.ds(g, 1), :] = out_row
        return carry

    jax.lax.fori_loop(0, block_g, body, 0)

    # gate: Linear1 (BN folded) -> ReLU -> Linear2, bf16 MXU with f32 accum.
    node_bf = node_scr[...].astype(jnp.bfloat16)
    z = (jnp.dot(node_bf, wg1_ref[...], preferred_element_type=jnp.float32)
         + bg1_ref[...])
    z = jnp.maximum(z, 0.0)
    out_ref[...] = (jnp.dot(z.astype(jnp.bfloat16), wg2_ref[...],
                            preferred_element_type=jnp.float32) + bg2_ref[...])


def attn_gate(T_lm, wqkv, Wg1, bg1, Wg2, bg2, *, scale, block_g=GRAPH_BLOCK):
    G_pad, L2, D_pad = T_lm.shape
    GD_pad = Wg1.shape[1]
    return pl.pallas_call(
        functools.partial(attn_gate_kernel, scale=scale, block_g=block_g),
        out_shape=jax.ShapeDtypeStruct((G_pad, GD_pad), jnp.float32),
        grid_spec=pltpu.PrefetchScalarGridSpec(
            num_scalar_prefetch=0,
            grid=(G_pad // block_g,),
            in_specs=[
                pl.BlockSpec((block_g, L2, D_pad), lambda i: (i, 0, 0)),  # T (layer-major)
                pl.BlockSpec((L2, L2), lambda i: (0, 0)),                 # [wq|wk|wv] (+bias)
                pl.BlockSpec((D_pad, GD_pad), lambda i: (0, 0)),          # gate W1 (BN folded, bf16)
                pl.BlockSpec((1, GD_pad), lambda i: (0, 0)),
                pl.BlockSpec((GD_pad, GD_pad), lambda i: (0, 0)),         # gate W2 (bf16)
                pl.BlockSpec((1, GD_pad), lambda i: (0, 0)),
            ],
            out_specs=pl.BlockSpec((block_g, GD_pad), lambda i: (i, 0)),
            scratch_shapes=[pltpu.VMEM((block_g, D_PAD), jnp.float32)],   # attention rows
        ),
        compiler_params=pltpu.CompilerParams(
            dimension_semantics=("parallel",),   # graph blocks shard across v7x's 2 TCs
        ),
    )(T_lm, wqkv, Wg1, bg1, Wg2, bg2)


# ----------------------------------------------------------------------------
# Parameter construction (deterministic, synthetic; mirrors _initialize_weights)
# ----------------------------------------------------------------------------
def init_params(key, gate_dim):
    keys = iter(jax.random.split(key, 64))

    def nrm(shape, s=0.01):
        return jax.random.normal(next(keys), shape, jnp.float32) * s

    p = {
        'x_emb1': nrm((NUM_ATOM_TYPE, EMB_DIM), 0.05),
        'x_emb2': nrm((NUM_CHIRALITY_TAG, EMB_DIM), 0.05),
        'gin': [],
    }
    for _ in range(NUM_LAYER):
        p['gin'].append({
            'W1': nrm((EMB_DIM, 2 * EMB_DIM)),
            'b1': jnp.zeros((2 * EMB_DIM,), jnp.float32),
            'W2': nrm((2 * EMB_DIM, EMB_DIM)),
            'b2': jnp.zeros((EMB_DIM,), jnp.float32),
            'edge_emb1': nrm((NUM_BOND_TYPE, EMB_DIM), 0.05),
            'edge_emb2': nrm((NUM_BOND_DIRECTION, EMB_DIM), 0.05),
            'bn_gamma': jnp.ones((EMB_DIM,), jnp.float32),
            'bn_beta': jnp.zeros((EMB_DIM,), jnp.float32),
            'bn_mean': jnp.zeros((EMB_DIM,), jnp.float32),
            'bn_var': jnp.ones((EMB_DIM,), jnp.float32),
        })
    # q, k, v : Linear(6, 1)
    for name in ('q', 'k', 'v'):
        p['w' + name] = nrm((NUM_LAYER + 1, 1))
        p['b' + name] = jnp.zeros((1,), jnp.float32)
    # gate: Linear(300, gate_dim) -> BN -> ReLU -> Linear(gate_dim, gate_dim)
    p['gate_W1'] = nrm((EMB_DIM, gate_dim))
    p['gate_b1'] = jnp.zeros((gate_dim,), jnp.float32)
    p['gate_bn_gamma'] = jnp.ones((gate_dim,), jnp.float32)
    p['gate_bn_beta'] = jnp.zeros((gate_dim,), jnp.float32)
    p['gate_bn_mean'] = jnp.zeros((gate_dim,), jnp.float32)
    p['gate_bn_var'] = jnp.ones((gate_dim,), jnp.float32)
    p['gate_W2'] = nrm((gate_dim, gate_dim))
    p['gate_b2'] = jnp.zeros((gate_dim,), jnp.float32)
    return p


# ----------------------------------------------------------------------------
# Full forward pass (glue in plain JAX, hot paths in the two Pallas kernels)
# ----------------------------------------------------------------------------
def my_pretrainnn_forward(p, x, edge_index, edge_attr, batch, *, num_graphs):
    N = x.shape[0]
    gate_dim = p['gate_W1'].shape[1]
    src, dst = edge_index[0], edge_index[1]

    # add_self_loops + self-loop edge attr ([4, 0])
    loop = jnp.arange(N, dtype=src.dtype)
    src_f = jnp.concatenate([src, loop])
    dst_f = jnp.concatenate([dst, loop])
    self_loop_attr = jnp.stack(
        [jnp.full((N,), 4, dtype=edge_attr.dtype),
         jnp.zeros((N,), dtype=edge_attr.dtype)], axis=1)
    ea_f = jnp.concatenate([edge_attr, self_loop_attr], axis=0)

    N_pad = _round_up(N, 128)
    G_pad1 = _round_up(num_graphs, 8)                    # pooling-output padding
    G_pad2 = max(_round_up(num_graphs, GRAPH_BLOCK), 2 * GRAPH_BLOCK)
    GD_pad = _round_up(gate_dim, 128)

    # dense (dst, src) adjacency-count operator; bf16 is exact for counts < 256
    A = jnp.zeros((N_pad, N_pad), jnp.float32).at[dst_f, src_f].add(1.0)
    A = A.astype(jnp.bfloat16)

    # graph-pooling operator  P[g, n] = [batch[n] == g]  (0/1 exact in bf16)
    P = (batch[None, :] == jnp.arange(G_pad1, dtype=batch.dtype)[:, None])
    P = jnp.pad(P.astype(jnp.float32), ((0, 0), (0, N_pad - N))).astype(jnp.bfloat16)

    # atom embeddings -> h0 (zero-padded: pad features stay exactly zero)
    h0 = (jnp.take(p['x_emb1'], x[:, 0], axis=0)
          + jnp.take(p['x_emb2'], x[:, 1], axis=0))
    h0 = jnp.pad(h0, ((0, N_pad - N), (0, D_PAD - EMB_DIM))).astype(jnp.bfloat16)

    # per-layer edge-embedding aggregation (replaces a dense S @ e_emb matmul)
    # plus per-layer MLP weights with eval-mode BN folded into W2/b2.
    eagg_slabs, w1_l, b1_l, w2_l, b2_l = [], [], [], [], []
    for layer in range(NUM_LAYER):
        lp = p['gin'][layer]
        e_emb = (jnp.take(lp['edge_emb1'], ea_f[:, 0], axis=0)
                 + jnp.take(lp['edge_emb2'], ea_f[:, 1], axis=0))
        eagg = jax.ops.segment_sum(e_emb, dst_f, num_segments=N_pad)
        eagg_slabs.append(jnp.pad(eagg, ((0, 0), (0, D_PAD - EMB_DIM))
                                  ).astype(jnp.bfloat16))

        bn_scale = lp['bn_gamma'] * jax.lax.rsqrt(lp['bn_var'] + BN_EPS)
        bn_bias = lp['bn_beta'] - lp['bn_mean'] * bn_scale
        w1_l.append(jnp.pad(lp['W1'], ((0, D_PAD - EMB_DIM),
                                       (0, H_PAD - 2 * EMB_DIM))
                            ).astype(jnp.bfloat16))
        b1_l.append(jnp.pad(lp['b1'], ((0, H_PAD - 2 * EMB_DIM),)))
        W2f = lp['W2'] * bn_scale[None, :]
        b2f = lp['b2'] * bn_scale + bn_bias
        w2_l.append(jnp.pad(W2f, ((0, H_PAD - 2 * EMB_DIM),
                                  (0, D_PAD - EMB_DIM))).astype(jnp.bfloat16))
        b2_l.append(jnp.pad(b2f, ((0, D_PAD - EMB_DIM),)))

    eagg = jnp.stack(eagg_slabs, axis=0)                 # (L, N_pad, 384) bf16
    W1s = jnp.stack(w1_l, axis=0)                        # (L, 384, 768) bf16
    b1s = jnp.stack(b1_l, axis=0)[:, None, :]            # (L, 1, 768)
    W2s = jnp.stack(w2_l, axis=0)                        # (L, 768, 384) bf16
    b2s = jnp.stack(b2_l, axis=0)[:, None, :]            # (L, 1, 384)

    # ---- fused GIN stack + per-layer pooling (Pallas kernel 1) ------------
    T = gin_stack(A, P, h0, eagg, W1s, b1s, W2s, b2s)    # (6, G_pad1, 384) f32
    T = T[:, :num_graphs, :EMB_DIM]                      # (6, G, 300)

    # per-graph (6,300) -> (300,6) flat reinterpretation, exactly as torch's
    # `.reshape(300, 6)`, then transposed to a layer-major lane-dense tile.
    M = jnp.transpose(T, (1, 0, 2)).reshape(num_graphs, EMB_DIM, NUM_LAYER + 1)
    Mt = jnp.transpose(M, (0, 2, 1))                     # (G, 6, 300)
    T_lm = jnp.concatenate(
        [Mt,
         jnp.ones((num_graphs, 1, EMB_DIM), jnp.float32),   # bias row
         jnp.zeros((num_graphs, 1, EMB_DIM), jnp.float32)], axis=1)  # (G, 8, 300)
    T_lm = jnp.pad(T_lm, ((0, G_pad2 - num_graphs), (0, 0),
                          (0, D_PAD - EMB_DIM)))         # (G_pad2, 8, 384)

    # fused [wq | wk | wv] projection weights with biases as row 6
    wq_ext = jnp.concatenate([p['wq'][:, 0], p['bq']])   # (7,)
    wk_ext = jnp.concatenate([p['wk'][:, 0], p['bk']])
    wv_ext = jnp.concatenate([p['wv'][:, 0], p['bv']])
    wqkv = jnp.pad(jnp.stack([wq_ext, wk_ext, wv_ext], axis=1),
                   ((0, 1), (0, 5)))                     # (8, 8)

    # gate: fold eval-mode BN into linear1; pad everything to 128-lane slabs
    gs = p['gate_bn_gamma'] * jax.lax.rsqrt(p['gate_bn_var'] + BN_EPS)
    gb = p['gate_bn_beta'] - p['gate_bn_mean'] * gs
    Wg1 = jnp.pad(p['gate_W1'] * gs[None, :],
                  ((0, D_PAD - EMB_DIM), (0, GD_pad - gate_dim))).astype(jnp.bfloat16)
    bg1 = jnp.pad(p['gate_b1'] * gs + gb, ((0, GD_pad - gate_dim),))[None, :]
    Wg2 = jnp.pad(p['gate_W2'], ((0, GD_pad - gate_dim),
                                 (0, GD_pad - gate_dim))).astype(jnp.bfloat16)
    bg2 = jnp.pad(p['gate_b2'], ((0, GD_pad - gate_dim),))[None, :]

    # ---- fused layer-attention + gate head (Pallas kernel 2) --------------
    scale = float(NUM_LAYER + 1) ** (-0.5)               # matches torch: 6 ** -0.5
    z = attn_gate(T_lm, wqkv, Wg1, bg1, Wg2, bg2, scale=scale)
    return z[:num_graphs, :gate_dim]


# ----------------------------------------------------------------------------
if __name__ == "__main__":
    key = jax.random.PRNGKey(0)
    gate_dim = 300                                       # gate() default

    # small synthetic molecular batch: 3 graphs, 16 nodes total
    sizes = [6, 5, 5]
    offsets = [0, 6, 11]
    N = sum(sizes)
    batch = jnp.asarray(sum(([g] * s for g, s in enumerate(sizes)), []),
                        dtype=jnp.int32)
    num_graphs = int(batch[-1]) + 1

    k_x1, k_x2, k_e, k_a1, k_a2, k_p = jax.random.split(key, 6)
    x = jnp.stack([jax.random.randint(k_x1, (N,), 0, NUM_ATOM_TYPE),
                   jax.random.randint(k_x2, (N,), 0, NUM_CHIRALITY_TAG)],
                  axis=1).astype(jnp.int32)

    src_l, dst_l = [], []
    ke = k_e
    for off, sz in zip(offsets, sizes):
        ke, k1, k2 = jax.random.split(ke, 3)
        ne = 2 * sz
        src_l.append(jax.random.randint(k1, (ne,), 0, sz) + off)
        dst_l.append(jax.random.randint(k2, (ne,), 0, sz) + off)
    edge_index = jnp.stack([jnp.concatenate(src_l),
                            jnp.concatenate(dst_l)], axis=0).astype(jnp.int32)
    E = edge_index.shape[1]
    edge_attr = jnp.stack(
        [jax.random.randint(k_a1, (E,), 0, NUM_BOND_TYPE),
         jax.random.randint(k_a2, (E,), 0, NUM_BOND_DIRECTION)],
        axis=1).astype(jnp.int32)

    params = init_params(k_p, gate_dim)

    fwd = jax.jit(my_pretrainnn_forward, static_argnames=('num_graphs',))
    out = fwd(params, x, edge_index, edge_attr, batch, num_graphs=num_graphs)
    out = jax.block_until_ready(out)
    assert out.shape == (num_graphs, gate_dim), out.shape
    assert bool(jnp.all(jnp.isfinite(out)))
    print("KERNEL_OK")
</pallas_src>

<mosaic_0001>
module attributes {stable_mosaic.version = 11 : i64} {
  func.func private @main(%arg0: i32) attributes {dimension_semantics = [#tpu.dimension_semantics<core_parallel>], iteration_bounds = array<i64: 2>, tpu.core_type = #tpu.core_type<sc_scalar_subcore>, window_params = []} {
    return
  }
}

module attributes {stable_mosaic.version = 11 : i64} {
  func.func private @main(%arg0: i32) attributes {dimension_semantics = [#tpu.dimension_semantics<core_parallel>], iteration_bounds = array<i64: 2>, tpu.core_type = #tpu.core_type<sc_scalar_subcore>, window_params = []} {
    return
  }
}

module attributes {stable_mosaic.version = 11 : i64} {
  func.func @gin_stack_kernel(%arg0: i32, %arg1: memref<128x128xbf16, #tpu.memory_space<vmem>>, %arg2: memref<8x128xbf16, #tpu.memory_space<vmem>>, %arg3: memref<128x384xbf16, #tpu.memory_space<vmem>>, %arg4: memref<1x128x384xbf16, #tpu.memory_space<vmem>>, %arg5: memref<1x384x768xbf16, #tpu.memory_space<vmem>>, %arg6: memref<1x1x768xf32, #tpu.memory_space<vmem>>, %arg7: memref<1x768x384xbf16, #tpu.memory_space<vmem>>, %arg8: memref<1x1x384xf32, #tpu.memory_space<vmem>>, %arg9: memref<1x8x384xf32, #tpu.memory_space<vmem>>, %arg10: memref<128x384xbf16, #tpu.memory_space<vmem>>) attributes {dimension_semantics = [#tpu.dimension_semantics<arbitrary>], iteration_bounds = array<i64: 6>, scalar_prefetch = 0 : i64, scratch_operands = 1 : i64, tpu.core_type = #tpu.core_type<tc>, window_params = [{pipeline_mode = #tpu.pipeline_mode<synchronous>, transform_indices = @transform_0, window_bounds = array<i64: 128, 128>}, {pipeline_mode = #tpu.pipeline_mode<synchronous>, transform_indices = @transform_1, window_bounds = array<i64: 8, 128>}, {pipeline_mode = #tpu.pipeline_mode<synchronous>, transform_indices = @transform_2, window_bounds = array<i64: 128, 384>}, {transform_indices = @transform_3, window_bounds = array<i64: 1, 128, 384>}, {transform_indices = @transform_4, window_bounds = array<i64: 1, 384, 768>}, {transform_indices = @transform_5, window_bounds = array<i64: 1, 1, 768>}, {transform_indices = @transform_6, window_bounds = array<i64: 1, 768, 384>}, {transform_indices = @transform_7, window_bounds = array<i64: 1, 1, 384>}, {transform_indices = @transform_8, window_bounds = array<i64: 1, 8, 384>}]} {
    %c0_i32 = arith.constant 0 : i32
    %0 = arith.cmpi eq, %arg0, %c0_i32 : i32
    %1 = arith.extui %0 : i1 to i32
    %c0_i32_0 = arith.constant 0 : i32
    %2 = arith.cmpi ne, %1, %c0_i32_0 : i32
    scf.if %2 {
      %c0_9 = arith.constant 0 : index
      %c0_10 = arith.constant 0 : index
      %12 = vector.load %arg3[%c0_9, %c0_10] : memref<128x384xbf16, #tpu.memory_space<vmem>>, vector<128x384xbf16>
      %c0_11 = arith.constant 0 : index
      %c0_12 = arith.constant 0 : index
      %13 = vector.load %arg10[%c0_11, %c0_12] : memref<128x384xbf16, #tpu.memory_space<vmem>>, vector<128x384xbf16>
      tpu.vector_store %arg10[%c0_11, %c0_12], %12 {strides = array<i32>} : memref<128x384xbf16, #tpu.memory_space<vmem>>, vector<128x384xbf16>,
    } else {
    }
    %c0_i32_1 = arith.constant 0 : i32
    %3 = arith.cmpi sgt, %arg0, %c0_i32_1 : i32
    %4 = arith.extui %3 : i1 to i32
    %c0_i32_2 = arith.constant 0 : i32
    %5 = arith.cmpi ne, %4, %c0_i32_2 : i32
    scf.if %5 {
      %c0_9 = arith.constant 0 : index
      %c0_10 = arith.constant 0 : index
      %12 = vector.load %arg1[%c0_9, %c0_10] : memref<128x128xbf16, #tpu.memory_space<vmem>>, vector<128x128xbf16>
      %c0_11 = arith.constant 0 : index
      %c0_12 = arith.constant 0 : index
      %13 = vector.load %arg10[%c0_11, %c0_12] : memref<128x384xbf16, #tpu.memory_space<vmem>>, vector<128x384xbf16>
      %cst_13 = arith.constant dense<0.000000e+00> : vector<128x384xf32>
      %14 = tpu.matmul %12, %13, %cst_13 {dimension_numbers = #tpu.dot_dimension_numbers<[1], [0], [0], [1], [0, 0, 1, 1], [], []>} : vector<128x128xbf16>, vector<128x384xbf16>, vector<128x384xf32> -> vector<128x384xf32>
      %c0_14 = arith.constant 0 : index
      %c0_15 = arith.constant 0 : index
      %c0_16 = arith.constant 0 : index
      %15 = vector.load %arg4[%c0_14, %c0_15, %c0_16] : memref<1x128x384xbf16, #tpu.memory_space<vmem>>, vector<1x128x384xbf16>
      %16 = vector.shape_cast %15 : vector<1x128x384xbf16> to vector<128x384xbf16>
      %17 = arith.extf %16 : vector<128x384xbf16> to vector<128x384xf32>
      %18 = arith.addf %14, %17 : vector<128x384xf32>
      %19 = arith.truncf %18 : vector<128x384xf32> to vector<128x384xbf16>
      %c0_17 = arith.constant 0 : index
      %c0_18 = arith.constant 0 : index
      %c0_19 = arith.constant 0 : index
      %20 = vector.load %arg5[%c0_17, %c0_18, %c0_19] : memref<1x384x768xbf16, #tpu.memory_space<vmem>>, vector<1x384x768xbf16>
      %21 = vector.shape_cast %20 : vector<1x384x768xbf16> to vector<384x768xbf16>
      %cst_20 = arith.constant dense<0.000000e+00> : vector<128x768xf32>
      %22 = tpu.matmul %19, %21, %cst_20 {dimension_numbers = #tpu.dot_dimension_numbers<[1], [0], [0], [1], [0, 0, 1, 1], [], []>} : vector<128x384xbf16>, vector<384x768xbf16>, vector<128x768xf32> -> vector<128x768xf32>
      %c0_21 = arith.constant 0 : index
      %c0_22 = arith.constant 0 : index
      %c0_23 = arith.constant 0 : index
      %23 = vector.load %arg6[%c0_21, %c0_22, %c0_23] : memref<1x1x768xf32, #tpu.memory_space<vmem>>, vector<1x1x768xf32>
      %24 = vector.shape_cast %23 : vector<1x1x768xf32> to vector<1x768xf32>
      %25 = vector.broadcast %24 : vector<1x768xf32> to vector<128x768xf32>
      %26 = arith.addf %22, %25 : vector<128x768xf32>
      %cst_24 = arith.constant 0.000000e+00 : f32
      %27 = vector.broadcast %cst_24 : f32 to vector<128x768xf32>
      %28 = arith.maximumf %26, %27 : vector<128x768xf32>
      %29 = arith.truncf %28 : vector<128x768xf32> to vector<128x768xbf16>
      %c0_25 = arith.constant 0 : index
      %c0_26 = arith.constant 0 : index
      %c0_27 = arith.constant 0 : index
      %30 = vector.load %arg7[%c0_25, %c0_26, %c0_27] : memref<1x768x384xbf16, #tpu.memory_space<vmem>>, vector<1x768x384xbf16>
      %31 = vector.shape_cast %30 : vector<1x768x384xbf16> to vector<768x384xbf16>
      %cst_28 = arith.constant dense<0.000000e+00> : vector<128x384xf32>
      %32 = tpu.matmul %29, %31, %cst_28 {dimension_numbers = #tpu.dot_dimension_numbers<[1], [0], [0], [1], [0, 0, 1, 1], [], []>} : vector<128x768xbf16>, vector<768x384xbf16>, vector<128x384xf32> -> vector<128x384xf32>
      %c0_29 = arith.constant 0 : index
      %c0_30 = arith.constant 0 : index
      %c0_31 = arith.constant 0 : index
      %33 = vector.load %arg8[%c0_29, %c0_30, %c0_31] : memref<1x1x384xf32, #tpu.memory_space<vmem>>, vector<1x1x384xf32>
      %34 = vector.shape_cast %33 : vector<1x1x384xf32> to vector<1x384xf32>
      %35 = vector.broadcast %34 : vector<1x384xf32> to vector<128x384xf32>
      %36 = arith.addf %32, %35 : vector<128x384xf32>
      %c5_i32 = arith.constant 5 : i32
      %37 = arith.cmpi slt, %arg0, %c5_i32 : i32
      %cst_32 = arith.constant 0.000000e+00 : f32
      %cst_33 = arith.constant 0xFF800000 : f32
      %38 = arith.select %37, %cst_32, %cst_33 : f32
      %39 = vector.broadcast %38 : f32 to vector<128x384xf32>
      %40 = arith.maximumf %36, %39 : vector<128x384xf32>
      %41 = arith.truncf %40 : vector<128x384xf32> to vector<128x384xbf16>
      %c0_34 = arith.constant 0 : index
      %c0_35 = arith.constant 0 : index
      %42 = vector.load %arg10[%c0_34, %c0_35] : memref<128x384xbf16, #tpu.memory_space<vmem>>, vector<128x384xbf16>
      tpu.vector_store %arg10[%c0_34, %c0_35], %41 {strides = array<i32>} : memref<128x384xbf16, #tpu.memory_space<vmem>>, vector<128x384xbf16>,
    } else {
    }
    %c0 = arith.constant 0 : index
    %c0_3 = arith.constant 0 : index
    %6 = vector.load %arg2[%c0, %c0_3] : memref<8x128xbf16, #tpu.memory_space<vmem>>, vector<8x128xbf16>
    %c0_4 = arith.constant 0 : index
    %c0_5 = arith.constant 0 : index
    %7 = vector.load %arg10[%c0_4, %c0_5] : memref<128x384xbf16, #tpu.memory_space<vmem>>, vector<128x384xbf16>
    %cst = arith.constant dense<0.000000e+00> : vector<8x384xf32>
    %8 = tpu.matmul %6, %7, %cst {dimension_numbers = #tpu.dot_dimension_numbers<[1], [0], [0], [1], [0, 0, 1, 1], [], []>} : vector<8x128xbf16>, vector<128x384xbf16>, vector<8x384xf32> -> vector<8x384xf32>
    %c0_6 = arith.constant 0 : index
    %c0_7 = arith.constant 0 : index
    %c0_8 = arith.constant 0 : index
    %9 = vector.load %arg9[%c0_6, %c0_7, %c0_8] : memref<1x8x384xf32, #tpu.memory_space<vmem>>, vector<1x8x384xf32>
    %10 = vector.shape_cast %9 : vector<1x8x384xf32> to vector<8x384xf32>
    %11 = vector.shape_cast %8 : vector<8x384xf32> to vector<1x8x384xf32>
    tpu.vector_store %arg9[%c0_6, %c0_7, %c0_8], %11 {strides = array<i32>} : memref<1x8x384xf32, #tpu.memory_space<vmem>>, vector<1x8x384xf32>,
    return
  }
  func.func @transform_0(%arg0: i32) -> (i32, i32) {
    %c0_i32 = arith.constant 0 : i32
    %c0_i32_0 = arith.constant 0 : i32
    %c0_i32_1 = arith.constant 0 : i32
    return %c0_i32, %c0_i32_0 : i32, i32
  }
  func.func @transform_1(%arg0: i32) -> (i32, i32) {
    %c0_i32 = arith.constant 0 : i32
    %c0_i32_0 = arith.constant 0 : i32
    %c0_i32_1 = arith.constant 0 : i32
    return %c0_i32, %c0_i32_0 : i32, i32
  }
  func.func @transform_2(%arg0: i32) -> (i32, i32) {
    %c0_i32 = arith.constant 0 : i32
    %c0_i32_0 = arith.constant 0 : i32
    %c0_i32_1 = arith.constant 0 : i32
    return %c0_i32, %c0_i32_0 : i32, i32
  }
  func.func @transform_3(%arg0: i32) -> (i32, i32, i32) {
    %c1_i32 = arith.constant 1 : i32
    %0 = arith.maxsi %arg0, %c1_i32 : i32
    %c1_i32_0 = arith.constant 1 : i32
    %1 = arith.subi %0, %c1_i32_0 : i32
    %c0_i32 = arith.constant 0 : i32
    %c0_i32_1 = arith.constant 0 : i32
    %c0_i32_2 = arith.constant 0 : i32
    return %1, %c0_i32, %c0_i32_1 : i32, i32, i32
  }
  func.func @transform_4(%arg0: i32) -> (i32, i32, i32) {
    %c1_i32 = arith.constant 1 : i32
    %0 = arith.maxsi %arg0, %c1_i32 : i32
    %c1_i32_0 = arith.constant 1 : i32
    %1 = arith.subi %0, %c1_i32_0 : i32
    %c0_i32 = arith.constant 0 : i32
    %c0_i32_1 = arith.constant 0 : i32
    %c0_i32_2 = arith.constant 0 : i32
    return %1, %c0_i32, %c0_i32_1 : i32, i32, i32
  }
  func.func @transform_5(%arg0: i32) -> (i32, i32, i32) {
    %c1_i32 = arith.constant 1 : i32
    %0 = arith.maxsi %arg0, %c1_i32 : i32
    %c1_i32_0 = arith.constant 1 : i32
    %1 = arith.subi %0, %c1_i32_0 : i32
    %c0_i32 = arith.constant 0 : i32
    %c0_i32_1 = arith.constant 0 : i32
    %c0_i32_2 = arith.constant 0 : i32
    return %1, %c0_i32, %c0_i32_1 : i32, i32, i32
  }
  func.func @transform_6(%arg0: i32) -> (i32, i32, i32) {
    %c1_i32 = arith.constant 1 : i32
    %0 = arith.maxsi %arg0, %c1_i32 : i32
    %c1_i32_0 = arith.constant 1 : i32
    %1 = arith.subi %0, %c1_i32_0 : i32
    %c0_i32 = arith.constant 0 : i32
    %c0_i32_1 = arith.constant 0 : i32
    %c0_i32_2 = arith.constant 0 : i32
    return %1, %c0_i32, %c0_i32_1 : i32, i32, i32
  }
  func.func @transform_7(%arg0: i32) -> (i32, i32, i32) {
    %c1_i32 = arith.constant 1 : i32
    %0 = arith.maxsi %arg0, %c1_i32 : i32
    %c1_i32_0 = arith.constant 1 : i32
    %1 = arith.subi %0, %c1_i32_0 : i32
    %c0_i32 = arith.constant 0 : i32
    %c0_i32_1 = arith.constant 0 : i32
    %c0_i32_2 = arith.constant 0 : i32
    return %1, %c0_i32, %c0_i32_1 : i32, i32, i32
  }
  func.func @transform_8(%arg0: i32) -> (i32, i32, i32) {
    %c0_i32 = arith.constant 0 : i32
    %c0_i32_0 = arith.constant 0 : i32
    %c0_i32_1 = arith.constant 0 : i32
    return %arg0, %c0_i32, %c0_i32_0 : i32, i32, i32
  }
}

module attributes {stable_mosaic.version = 11 : i64} {
  func.func @attn_gate_kernel(%arg0: i32, %arg1: memref<64x8x384xf32, #tpu.memory_space<vmem>>, %arg2: memref<8x8xf32, #tpu.memory_space<vmem>>, %arg3: memref<384x384xbf16, #tpu.memory_space<vmem>>, %arg4: memref<1x384xf32, #tpu.memory_space<vmem>>, %arg5: memref<384x384xbf16, #tpu.memory_space<vmem>>, %arg6: memref<1x384xf32, #tpu.memory_space<vmem>>, %arg7: memref<64x384xf32, #tpu.memory_space<vmem>>, %arg8: memref<64x384xf32, #tpu.memory_space<vmem>>) attributes {dimension_semantics = [#tpu.dimension_semantics<parallel>], iteration_bounds = array<i64: 2>, scalar_prefetch = 0 : i64, scratch_operands = 1 : i64, tpu.core_type = #tpu.core_type<tc>, window_params = [{transform_indices = @transform_0, window_bounds = array<i64: 64, 8, 384>}, {pipeline_mode = #tpu.pipeline_mode<synchronous>, transform_indices = @transform_1, window_bounds = array<i64: 8, 8>}, {pipeline_mode = #tpu.pipeline_mode<synchronous>, transform_indices = @transform_2, window_bounds = array<i64: 384, 384>}, {pipeline_mode = #tpu.pipeline_mode<synchronous>, transform_indices = @transform_3, window_bounds = array<i64: 1, 384>}, {pipeline_mode = #tpu.pipeline_mode<synchronous>, transform_indices = @transform_4, window_bounds = array<i64: 384, 384>}, {pipeline_mode = #tpu.pipeline_mode<synchronous>, transform_indices = @transform_5, window_bounds = array<i64: 1, 384>}, {transform_indices = @transform_6, window_bounds = array<i64: 64, 384>}]} {
    %0 = tpu.iota {dimensions = array<i32: 1>} : vector<384x384xi32>
    %c300_i32 = arith.constant 300 : i32
    %1 = vector.broadcast %c300_i32 : i32 to vector<384x384xi32>
    %2 = arith.cmpi slt, %0, %1 : vector<384x384xi32>
    %c0 = arith.constant 0 : index
    %c0_0 = arith.constant 0 : index
    %3 = vector.load %arg2[%c0, %c0_0] : memref<8x8xf32, #tpu.memory_space<vmem>>, vector<8x8xf32>
    %4 = vector.extract_strided_slice %3 {offsets = [0, 0], sizes = [8, 1], strides = [1, 1]} : vector<8x8xf32> to vector<8x1xf32>
    %c0_i32 = arith.constant 0 : i32
    %c64_i32 = arith.constant 64 : i32
    %5 = arith.addi %c0_i32, %c64_i32 : i32
    %c1_i32 = arith.constant 1 : i32
    scf.for %arg9 = %c0_i32 to %5 step %c1_i32  : i32 {
      %22 = arith.index_cast %arg9 : i32 to index
      %c0_16 = arith.constant 0 : index
      %c0_17 = arith.constant 0 : index
      %23 = vector.load %arg1[%22, %c0_16, %c0_17] : memref<64x8x384xf32, #tpu.memory_space<vmem>>, vector<1x8x384xf32>
      %24 = vector.shape_cast %23 : vector<1x8x384xf32> to vector<8x384xf32>
      %cst_18 = arith.constant dense<0.000000e+00> : vector<8x384xf32>
      %25 = tpu.matmul %3, %24, %cst_18 {dimension_numbers = #tpu.dot_dimension_numbers<[0], [0], [1], [1], [0, 1, 1, 1], [], []>} : vector<8x8xf32>, vector<8x384xf32>, vector<8x384xf32> -> vector<8x384xf32>
      %26 = vector.extract_strided_slice %25 {offsets = [1, 0], sizes = [1, 384], strides = [1, 1]} : vector<8x384xf32> to vector<1x384xf32>
      %cst_19 = arith.constant 0.408248305 : f32
      %27 = vector.broadcast %cst_19 : f32 to vector<1x384xf32>
      %28 = arith.mulf %26, %27 : vector<1x384xf32>
      %29 = vector.extract_strided_slice %25 {offsets = [2, 0], sizes = [1, 384], strides = [1, 1]} : vector<8x384xf32> to vector<1x384xf32>
      %30 = vector.broadcast %4 : vector<8x1xf32> to vector<8x384xf32>
      %31 = vector.broadcast %28 : vector<1x384xf32> to vector<8x384xf32>
      %32 = arith.mulf %30, %31 : vector<8x384xf32>
      %33 = arith.truncf %32 : vector<8x384xf32> to vector<8x384xbf16>
      %34 = arith.truncf %24 : vector<8x384xf32> to vector<8x384xbf16>
      %cst_20 = arith.constant dense<0.000000e+00> : vector<384x384xf32>
      %35 = tpu.matmul %34, %33, %cst_20 {dimension_numbers = #tpu.dot_dimension_numbers<[0], [0], [1], [1], [0, 1, 1, 1], [], []>} : vector<8x384xbf16>, vector<8x384xbf16>, vector<384x384xf32> -> vector<384x384xf32>
      %cst_21 = arith.constant -1.000000e+30 : f32
      %36 = vector.broadcast %cst_21 : f32 to vector<384x384xf32>
      %37 = arith.select %2, %35, %36 : vector<384x384xi1>, vector<384x384xf32>
      %cst_22 = arith.constant dense<0xFF800000> : vector<384xf32>
      %38 = vector.multi_reduction <maximumf>, %37, %cst_22 [1] : vector<384x384xf32> to vector<384xf32>
      %39 = vector.shape_cast %38 : vector<384xf32> to vector<384x1xf32>
      %40 = vector.broadcast %39 : vector<384x1xf32> to vector<384x384xf32>
      %41 = arith.subf %37, %40 : vector<384x384xf32>
      %42 = math.exp %41 : vector<384x384xf32>
      %cst_23 = arith.constant dense<0.000000e+00> : vector<384xf32>
      %43 = vector.multi_reduction <add>, %42, %cst_23 [1] : vector<384x384xf32> to vector<384xf32>
      %44 = vector.shape_cast %43 : vector<384xf32> to vector<384x1xf32>
      %45 = tpu.reciprocal %44 {approx = true} : vector<384x1xf32> -> vector<384x1xf32>
      %46 = vector.broadcast %45 : vector<384x1xf32> to vector<384x384xf32>
      %47 = arith.mulf %42, %46 : vector<384x384xf32>
      %48 = arith.truncf %29 : vector<1x384xf32> to vector<1x384xbf16>
      %49 = arith.truncf %47 : vector<384x384xf32> to vector<384x384xbf16>
      %cst_24 = arith.constant dense<0.000000e+00> : vector<1x384xf32>
      %50 = tpu.matmul %48, %49, %cst_24 {dimension_numbers = #tpu.dot_dimension_numbers<[1], [1], [0], [0], [0, 0, 1, 0], [], []>} : vector<1x384xbf16>, vector<384x384xbf16>, vector<1x384xf32> -> vector<1x384xf32>
      %51 = arith.index_cast %arg9 : i32 to index
      %c0_25 = arith.constant 0 : index
      %52 = vector.load %arg8[%51, %c0_25] : memref<64x384xf32, #tpu.memory_space<vmem>>, vector<1x384xf32>
      tpu.vector_store %arg8[%51, %c0_25], %50 {strides = array<i32>} : memref<64x384xf32, #tpu.memory_space<vmem>>, vector<1x384xf32>,
    }
    %c64_i32_1 = arith.constant 64 : i32
    %c0_2 = arith.constant 0 : index
    %c0_3 = arith.constant 0 : index
    %6 = vector.load %arg8[%c0_2, %c0_3] : memref<64x384xf32, #tpu.memory_space<vmem>>, vector<64x384xf32>
    %7 = arith.truncf %6 : vector<64x384xf32> to vector<64x384xbf16>
    %c0_4 = arith.constant 0 : index
    %c0_5 = arith.constant 0 : index
    %8 = vector.load %arg3[%c0_4, %c0_5] : memref<384x384xbf16, #tpu.memory_space<vmem>>, vector<384x384xbf16>
    %cst = arith.constant dense<0.000000e+00> : vector<64x384xf32>
    %9 = tpu.matmul %7, %8, %cst {dimension_numbers = #tpu.dot_dimension_numbers<[1], [0], [0], [1], [0, 0, 1, 1], [], []>} : vector<64x384xbf16>, vector<384x384xbf16>, vector<64x384xf32> -> vector<64x384xf32>
    %c0_6 = arith.constant 0 : index
    %c0_7 = arith.constant 0 : index
    %10 = vector.load %arg4[%c0_6, %c0_7] : memref<1x384xf32, #tpu.memory_space<vmem>>, vector<1x384xf32>
    %11 = vector.broadcast %10 : vector<1x384xf32> to vector<64x384xf32>
    %12 = arith.addf %9, %11 : vector<64x384xf32>
    %cst_8 = arith.constant 0.000000e+00 : f32
    %13 = vector.broadcast %cst_8 : f32 to vector<64x384xf32>
    %14 = arith.maximumf %12, %13 : vector<64x384xf32>
    %15 = arith.truncf %14 : vector<64x384xf32> to vector<64x384xbf16>
    %c0_9 = arith.constant 0 : index
    %c0_10 = arith.constant 0 : index
    %16 = vector.load %arg5[%c0_9, %c0_10] : memref<384x384xbf16, #tpu.memory_space<vmem>>, vector<384x384xbf16>
    %cst_11 = arith.constant dense<0.000000e+00> : vector<64x384xf32>
    %17 = tpu.matmul %15, %16, %cst_11 {dimension_numbers = #tpu.dot_dimension_numbers<[1], [0], [0], [1], [0, 0, 1, 1], [], []>} : vector<64x384xbf16>, vector<384x384xbf16>, vector<64x384xf32> -> vector<64x384xf32>
    %c0_12 = arith.constant 0 : index
    %c0_13 = arith.constant 0 : index
    %18 = vector.load %arg6[%c0_12, %c0_13] : memref<1x384xf32, #tpu.memory_space<vmem>>, vector<1x384xf32>
    %19 = vector.broadcast %18 : vector<1x384xf32> to vector<64x384xf32>
    %20 = arith.addf %17, %19 : vector<64x384xf32>
    %c0_14 = arith.constant 0 : index
    %c0_15 = arith.constant 0 : index
    %21 = vector.load %arg7[%c0_14, %c0_15] : memref<64x384xf32, #tpu.memory_space<vmem>>, vector<64x384xf32>
    tpu.vector_store %arg7[%c0_14, %c0_15], %20 {strides = array<i32>} : memref<64x384xf32, #tpu.memory_space<vmem>>, vector<64x384xf32>,
    return
  }
  func.func @transform_0(%arg0: i32) -> (i32, i32, i32) {
    %c0_i32 = arith.constant 0 : i32
    %c0_i32_0 = arith.constant 0 : i32
    %c0_i32_1 = arith.constant 0 : i32
    return %arg0, %c0_i32, %c0_i32_0 : i32, i32, i32
  }
  func.func @transform_1(%arg0: i32) -> (i32, i32) {
    %c0_i32 = arith.constant 0 : i32
    %c0_i32_0 = arith.constant 0 : i32
    %c0_i32_1 = arith.constant 0 : i32
    return %c0_i32, %c0_i32_0 : i32, i32
  }
  func.func @transform_2(%arg0: i32) -> (i32, i32) {
    %c0_i32 = arith.constant 0 : i32
    %c0_i32_0 = arith.constant 0 : i32
    %c0_i32_1 = arith.constant 0 : i32
    return %c0_i32, %c0_i32_0 : i32, i32
  }
  func.func @transform_3(%arg0: i32) -> (i32, i32) {
    %c0_i32 = arith.constant 0 : i32
    %c0_i32_0 = arith.constant 0 : i32
    %c0_i32_1 = arith.constant 0 : i32
    return %c0_i32, %c0_i32_0 : i32, i32
  }
  func.func @transform_4(%arg0: i32) -> (i32, i32) {
    %c0_i32 = arith.constant 0 : i32
    %c0_i32_0 = arith.constant 0 : i32
    %c0_i32_1 = arith.constant 0 : i32
    return %c0_i32, %c0_i32_0 : i32, i32
  }
  func.func @transform_5(%arg0: i32) -> (i32, i32) {
    %c0_i32 = arith.constant 0 : i32
    %c0_i32_0 = arith.constant 0 : i32
    %c0_i32_1 = arith.constant 0 : i32
    return %c0_i32, %c0_i32_0 : i32, i32
  }
  func.func @transform_6(%arg0: i32) -> (i32, i32) {
    %c0_i32 = arith.constant 0 : i32
    %c0_i32_0 = arith.constant 0 : i32
    return %arg0, %c0_i32 : i32, i32
  }
}

</mosaic_0001>

<bundles_post_ra>
// kernel: my_pretrainnn_forward.3
= control target key start
LH: loop header
LB: loop body
LE: loop exit
PB: predicated region body
PF: predicated region fallthrough
CT: control target
= control target key end

     0   :  { %s5485_s21 = smov 0   ;;  %s7871_s0 = inlined_call_operand.vmem [shape: f32[128,8,384], index: 0, kind: input, shape index: {}]   ;;  %s7872_s1 = inlined_call_operand.vmem [shape: f32[8,8], index: 1, kind: input, shape index: {}]   ;;  %s7873_s2 = inlined_call_operand.vmem [shape: bf16[384,384], index: 2, kind: input, shape index: {}]   ;;  %s7874_s3 = inlined_call_operand.vmem [shape: f32[1,384], index: 3, kind: input, shape index: {}]   ;;  %s7875_s4 = inlined_call_operand.vmem [shape: bf16[384,384], index: 4, kind: input, shape index: {}]   ;;  %s7876_s5 = inlined_call_operand.vmem [shape: f32[1,384], index: 5, kind: input, shape index: {}]   ;;  %s7877_s6 = inlined_call_operand.vmem [shape: f32[128,384], index: 6, kind: output, shape index: {}]  }
   0x1 LB: > { %s4264_s22 = sadd.s32 4294967295, %s5439_s21   ;;  %p4268_p0 = scmp.ge.s32.totalorder %s5439_s21, 1  ;;  %s5439_s21 = sphi %s5485_s21, %s16_s21  }
   0x2   : > { %p214_p1 = scmp.lt.s32.totalorder %s5439_s21, 3 }
   0x4   : > { %p215_p2 = pnand %p4268_p0, %p214_p1 }
   0x6   : > { %218 = sbr.rel (%p215_p2) target bundleno = 1985 (0x7c1), region = 44 }
   0xd   : > { %s4269_s23 = sshll.u32 %s4264_s22, 6  ;;  %s4271_s24 = sshll.u32 %s4264_s22, 3  ;;  %v7878_v0 = vlaneseq  ;;  %v5496_v1 = vld [vmem:[%s7872_s1] sm:$0xff] }
   0xe   : > { %8124 = vst [vmem:[#allocation3_spill] sm:$0xff] %v5496_v1  ;;  %p247_p3 = scmp.lt.s32.totalorder %s4269_s23, 127  ;;  %p254_p4 = scmp.lt.s32.totalorder %s4271_s24, 15 }
   0xf   : > { %v262_v2 = vand.u32 127, %v7878_v0  ;;  %s5512_s11 = smov 0  }
  0x10   : > { %s8625_s23 = smov (!%p247_p3, %s4269_s23), 127  ;;  %s8627_s24 = smov (!%p254_p4, %s4271_s24), 15 }
  0x11   : > { %v5499_v3 = vadd.s32 256, %v262_v2  ;;  %s4829_s27 = smul.u32 24, %s8625_s23 }
  0x12   : > { %s4830_s28 = smul.u32 24, %s8627_s24 }
  0x13   : > { %8125 = vst [vmem:[#allocation4_spill] sm:$0xff] %v5499_v3  ;;  %vm267_vm0 = vcmp.lt.s32.totalorder %v5499_v3, 300  ;;  %s5505_s7 = scalar_lea.vmem %s7871_s0, %s4829_s27 }
  0x14   : > { %s5510_s10 = scalar_lea.vmem %s7877_s6, %s4830_s28 }
  0x15 LB: >> { %v8127_v1 = vld [vmem:[#allocation3_spill] sm:$0xff]  ;;  %v7879_v4 = vmov 0.0   ;;  %s4472_s12 = smul.u32 24, %s5443_s11  ;;  %vm5446_vm1 = vmmov 0   ;;  %v5447_v10 = vmov 0   ;;  %vm313_vm2 = vcmask 64512   ;;  %s5443_s11 = sphi %s5512_s11, %s274_s11  }
  0x16   : >> { %281 = vxpose.xlu0.b32.start.end [1/1] (short) (narrow) %v8127_v1, 8  ;;  %4631 = vmatprep.subr.mxu1 %v7879_v4  ;;  %v8128_v0 = vlaneseq  ;;  %vm607_vm3 = vcmask 1043456   ;;  %s2544_s14 = sshra.s32 %s5443_s11, 3  ;;  %s2547_s16 = sand.u32 7, %s5443_s11 }
  0x17   : >> { %381 = vmatprep.mubr.f32.mxu0 %v7879_v4  ;;  %4633 = vmatprep.mubr.msk.f32.mxu1 %vm5446_vm1, %v7879_v4  ;;  %s277_s13 = scalar_lea.vmem %s5505_s7, %s4472_s12  ;;  %s4325_s15 = smul.u32 24, %s2544_s14 }
  0x18   : >> { %v279_v5 = vld [vmem:[%s277_s13 + $0x8] sm:$0xff]  ;;  %v278_v6 = vld [vmem:[%s277_s13] sm:$0xff]  ;;  %v280_v7 = vld [vmem:[%s277_s13 + $0x10] sm:$0xff]  ;;  %v5541_v23 = vshrl.u32 %v8128_v0, 7  ;;  %s274_s11 = sadd.s32 1, %s5443_s11  }
  0x19   : >> { %317 = vmatprep.subr.mxu0 %v279_v5  ;;  %4632 = vmatpush3.msra.mxu1 %v280_v7  ;;  %v484_v8 = vpack.c.bf16 %v278_v6, %v278_v6  ;;  %v486_v9 = vpack.c.bf16 %v280_v7, %v280_v7  ;;  %v485_v11 = vpack.c.bf16 %v279_v5, %v279_v5  ;;  %s2550_s17 = sadd.s32 %s4325_s15, %s2547_s16  ;;  %p271_p5 = scmp.ge.s32.totalorder %s274_s11, 64  }
  0x1a   : >> { %318 = vmatpush1.msra.mxu0 %v278_v6  ;;  %8129 = vst [vmem:[#allocation5_spill] sm:$0xff] %v5541_v23  ;;  %v5544_v24 = vsub.s32 1, %v5541_v23  ;;  %s2551_s18 = scalar_lea.vmem [#allocation2], %s2550_s17 }
  0x1b   : >> { %487 = vxpose.xlu1.c.b16.start.end [1/1] (short) %v484_v8, 128 }
  0x1c   : >> { %8130 = vst [vmem:[#allocation6_spill] sm:$0xff] %v5544_v24 }
  0x38   : >> { %519 = vxpose.xlu1.c.b16.start.end [1/1] (short) %v486_v9, 128 }
  0x3f   : >> { %4852 = vset.pattern.permute.xlu0 %v5447_v10 }
  0x40   : >> { %463 = vperm.xlu0 %4852, %v8127_v1  }
  0x55   : >> { %503 = vxpose.xlu1.c.b16.start.end [1/1] (short) %v485_v11, 128 }
  0x81   : >> { %v495_v13 = vpop.trf.xlu1 }
  0x85   : >> { %v496_v14 = vpop.trf.xlu1 }
  0x89   : >> { %v497_v15 = vpop.trf.xlu1 }
  0x8d   : >> { %v498_v16 = vpop.trf.xlu1 }
  0x91   : >> { %v499_v17 = vpop.trf.xlu1 }
  0x95   : >> { %v5530_v18 = vpop.trf.xlu1 }
  0x96   : >> { %v297_v12 = vpop.trf.xlu0 }
  0x97   : >> { %4274 = vmatmul.mubr.msk.f32.vlgmr.msra.gmra.mrb[0].mxu0 %vm313_vm2, %v297_v12  ;;  %4634 = vmatmul.mubr.msk.f32.vlgmr.msra.gmra.mrb[0].mxu1 %vm313_vm2, %v297_v12 }
  0x98   : >> { %849 = vmatprep.mubr.bf16.mxu1 %v5447_v10  ;;  %649 = vmatprep.mubr.bf16.mxu0 %v5447_v10 }
  0x99   : >> { %v5532_v19 = vpop.trf.xlu1 }
  0x9d   : >> { %v5534_v20 = vpop.trf.xlu1 }
  0xa1   : >> { %v5536_v21 = vpop.trf.xlu1 }
  0xa5   : >> { %v5538_v22 = vpop.trf.xlu1 }
  0xa9   : >> { %v5546_v25 = vpop.trf.xlu1 }
  0xad   : >> { %v5560_v38 = vpop.trf.xlu1 }
  0xb1   : >> { %v5562_v45 = vpop.trf.xlu1 }
  0xb5   : >> { %v5569_v47 = vpop.trf.xlu1 }
  0xb9   : >> { %v533_v48 = vpop.trf.xlu1 }
  0xbd   : >> { %v534_v49 = vpop.trf.xlu1 }
  0xbf   : >> { %v464_v33 = vpop.permute.xlu0 %463 }
  0xc1   : >> { %v511_v50 = vpop.trf.xlu1 }
  0xc5   : >> { %v512_v51 = vpop.trf.xlu1 }
  0xc9   : >> { %v513_v52 = vpop.trf.xlu1 }
  0xcd   : >> { %v514_v53 = vpop.trf.xlu1 }
  0xd1   : >> { %v515_v54 = vpop.trf.xlu1 }
  0xd5   : >> { %v516_v55 = vpop.trf.xlu1 }
  0xd9   : >> { %v517_v56 = vpop.trf.xlu1 }
  0xdd   : >> { %v518_v57 = vpop.trf.xlu1 }
 0x16a   : >> { %v5548_v26 = vpop.f32.mrb[0].mxu0  ;;  %v5550_v27 = vpop.f32.mrb[0].mxu1 }
 0x16b   : >> { %8131 = vst [vmem:[#allocation7_spill] sm:$0xff] %v5548_v26  ;;  %8132 = vst [vmem:[#allocation8_spill] sm:$0xff] %v5550_v27  ;;  %v458_v28 = vmul.f32 0.4082483, %v5548_v26  ;;  %v460_v29 = vmul.f32 0.4082483, %v5550_v27 }
 0x16c   : >> { %v4635_v30 = vpop.f32.mrb[1].mxu1  ;;  %v5554_v31 = vpop.f32.mrb[1].mxu0 }
 0x16d   : >> { %v459_v32 = vmul.f32 0.4082483, %v5554_v31  ;;  %v469_v34 = vrot.slane %v458_v28, %v5544_v24  ;;  %v477_v35 = vrot.slane %v460_v29, %v5544_v24  ;;  %v2268_v58 = vpack.c.bf16 %v5554_v31, %v5554_v31 }
 0x16f   : >> { %v473_v36 = vrot.slane %v459_v32, %v5544_v24  ;;  %v478_v37 = vmul.f32 %v469_v34, %v464_v33  ;;  %v480_v40 = vmul.f32 %v477_v35, %v464_v33  ;;  %v2346_v59 = vrot.slane %v2268_v58, 1 }
 0x171   : >> { %v479_v39 = vmul.f32 %v473_v36, %v464_v33  ;;  %v481_v41 = vpack.c.bf16 %v478_v37, %v478_v37  ;;  %v483_v44 = vpack.c.bf16 %v480_v40, %v480_v40 }
 0x173   : >> { %v482_v42 = vpack.c.bf16 %v479_v39, %v479_v39  ;;  %v609_v43 = vsel %vm607_vm3, %v481_v41, 0  ;;  %v615_v46 = vsel %vm607_vm3, %v483_v44, 0 }
 0x175   : >> { %4276 = vmatprep.subr.msk.bf16.mxu0 %vm607_vm3, %v482_v42  ;;  %4754 = vmatprep.subr.msk.bf16.mxu1 %vm607_vm3, %v482_v42 }
 0x176   : >> { %618 = vmatpush1.bf16.msra.mxu0 %v609_v43  ;;  %4755 = vmatpush1.bf16.msra.mxu1 %v609_v43 }
 0x177   : >> { %4828 = vmatprep.subr.msk.bf16.mxu1 %vm607_vm3, %v483_v44 }
 0x179   : >> { %4277 = vmatmul.mubr.msk.bf16.vlgmr.msra.gmra.mrb[4].mxu0 %vm313_vm2, %v495_v13  ;;  %4297 = vmatmul.mubr.msk.bf16.vlgmr.msra.gmra.mrb[4].mxu1 %vm313_vm2, %v5562_v45 }
 0x17a   : >> { %4637 = vmatpush3.bf16.msra.mxu1 %v615_v46  ;;  %659 = vmatprep.mubr.bf16.mxu0 %v5447_v10 }
 0x17b   : >> { %859 = vmatprep.mubr.bf16.mxu1 %v5447_v10 }
 0x181   : >> { %4278 = vmatmul.mubr.msk.bf16.gmra.mrb[8].mxu0 %vm313_vm2, %v496_v14  ;;  %4298 = vmatmul.mubr.msk.bf16.gmra.mrb[8].mxu1 %vm313_vm2, %v5569_v47 }
 0x182   : >> { %669 = vmatprep.mubr.bf16.mxu0 %v5447_v10  ;;  %869 = vmatprep.mubr.bf16.mxu1 %v5447_v10 }
 0x189   : >> { %4279 = vmatmul.mubr.msk.bf16.gmra.mrb[12].mxu0 %vm313_vm2, %v497_v15  ;;  %4299 = vmatmul.mubr.msk.bf16.gmra.mrb[12].mxu1 %vm313_vm2, %v533_v48 }
 0x18a   : >> { %679 = vmatprep.mubr.bf16.mxu0 %v5447_v10  ;;  %879 = vmatprep.mubr.bf16.mxu1 %v5447_v10 }
 0x191   : >> { %4280 = vmatmul.mubr.msk.bf16.gmra.mrb[16].mxu0 %vm313_vm2, %v498_v16  ;;  %4300 = vmatmul.mubr.msk.bf16.gmra.mrb[16].mxu1 %vm313_vm2, %v534_v49 }
 0x192   : >> { %4638 = vmatprep.mubr.msk.bf16.mxu1 %vm313_vm2, %v495_v13  ;;  %689 = vmatprep.mubr.bf16.mxu0 %v5447_v10 }
 0x199   : >> { %4281 = vmatmul.mubr.msk.bf16.gmra.mrb[20].mxu0 %vm313_vm2, %v499_v17  ;;  %4639 = vmatmul.mubr.msk.bf16.vlgmr.msra.gmra.mrb[20].mxu1 %vm313_vm2, %v496_v14 }
 0x19a   : >> { %4642 = vmatprep.mubr.msk.bf16.mxu1 %vm313_vm2, %v497_v15  ;;  %699 = vmatprep.mubr.bf16.mxu0 %v5447_v10 }
 0x1a1   : >> { %4282 = vmatmul.mubr.msk.bf16.gmra.mrb[24].mxu0 %vm313_vm2, %v5530_v18  ;;  %4643 = vmatmul.mubr.msk.bf16.gmra.mrb[24].mxu1 %vm313_vm2, %v498_v16 }
 0x1a2   : >> { %4646 = vmatprep.mubr.msk.bf16.mxu1 %vm313_vm2, %v499_v17  ;;  %709 = vmatprep.mubr.bf16.mxu0 %v5447_v10 }
 0x1a9   : >> { %4283 = vmatmul.mubr.msk.bf16.gmra.mrb[28].mxu0 %vm313_vm2, %v5532_v19  ;;  %4647 = vmatmul.mubr.msk.bf16.gmra.mrb[28].mxu1 %vm313_vm2, %v5530_v18 }
 0x1aa   : >> { %4650 = vmatprep.mubr.msk.bf16.mxu1 %vm313_vm2, %v5532_v19  ;;  %719 = vmatprep.mubr.bf16.mxu0 %v5447_v10 }
 0x1b1   : >> { %4284 = vmatmul.mubr.msk.bf16.gmra.mrb[32].mxu0 %vm313_vm2, %v5534_v20  ;;  %4651 = vmatmul.mubr.msk.bf16.gmra.mrb[32].mxu1 %vm313_vm2, %v5534_v20 }
 0x1b2   : >> { %729 = vmatprep.mubr.bf16.mxu0 %v5447_v10  ;;  %4654 = vmatprep.mubr.msk.bf16.mxu1 %vm313_vm2, %v511_v50 }
 0x1b9   : >> { %4285 = vmatmul.mubr.msk.bf16.gmra.mrb[36].mxu0 %vm313_vm2, %v511_v50  ;;  %4655 = vmatmul.mubr.msk.bf16.gmra.mrb[36].mxu1 %vm313_vm2, %v512_v51 }
 0x1ba   : >> { %739 = vmatprep.mubr.bf16.mxu0 %v5447_v10  ;;  %4658 = vmatprep.mubr.msk.bf16.mxu1 %vm313_vm2, %v513_v52 }
 0x1c1   : >> { %4286 = vmatmul.mubr.msk.bf16.gmra.mrb[40].mxu0 %vm313_vm2, %v512_v51  ;;  %4659 = vmatmul.mubr.msk.bf16.gmra.mrb[40].mxu1 %vm313_vm2, %v514_v53 }
 0x1c2   : >> { %749 = vmatprep.mubr.bf16.mxu0 %v5447_v10  ;;  %4662 = vmatprep.mubr.msk.bf16.mxu1 %vm313_vm2, %v515_v54 }
 0x1c9   : >> { %4287 = vmatmul.mubr.msk.bf16.gmra.mrb[44].mxu0 %vm313_vm2, %v513_v52  ;;  %4663 = vmatmul.mubr.msk.bf16.gmra.mrb[44].mxu1 %vm313_vm2, %v516_v55 }
 0x1ca   : >> { %759 = vmatprep.mubr.bf16.mxu0 %v5447_v10  ;;  %4666 = vmatprep.mubr.msk.bf16.mxu1 %vm313_vm2, %v517_v56 }
 0x1d1   : >> { %4288 = vmatmul.mubr.msk.bf16.gmra.mrb[48].mxu0 %vm313_vm2, %v514_v53  ;;  %4667 = vmatmul.mubr.msk.bf16.gmra.mrb[48].mxu1 %vm313_vm2, %v518_v57 }
 0x1d2   : >> { %4670 = vmatprep.mubr.msk.bf16.mxu1 %vm313_vm2, %v5536_v21  ;;  %769 = vmatprep.mubr.bf16.mxu0 %v5447_v10 }
 0x1d9   : >> { %4289 = vmatmul.mubr.msk.bf16.gmra.mrb[52].mxu0 %vm313_vm2, %v515_v54  ;;  %4671 = vmatmul.mubr.msk.bf16.gmra.mrb[52].mxu1 %vm313_vm2, %v5538_v22 }
 0x1da   : >> { %4674 = vmatprep.mubr.msk.bf16.mxu1 %vm313_vm2, %v5546_v25  ;;  %779 = vmatprep.mubr.bf16.mxu0 %v5447_v10 }
 0x1e1   : >> { %4290 = vmatmul.mubr.msk.bf16.gmra.mrb[56].mxu0 %vm313_vm2, %v516_v55  ;;  %4675 = vmatmul.mubr.msk.bf16.gmra.mrb[56].mxu1 %vm313_vm2, %v5560_v38 }
 0x1e2   : >> { %4678 = vmatprep.mubr.msk.bf16.mxu1 %vm313_vm2, %v5562_v45  ;;  %789 = vmatprep.mubr.bf16.mxu0 %v5447_v10 }
 0x1e9   : >> { %4291 = vmatmul.mubr.msk.bf16.gmra.mrb[60].mxu0 %vm313_vm2, %v517_v56  ;;  %4679 = vmatmul.mubr.msk.bf16.gmra.mrb[60].mxu1 %vm313_vm2, %v5569_v47 }
 0x1ea   : >> { %4682 = vmatprep.mubr.msk.bf16.mxu1 %vm313_vm2, %v533_v48  ;;  %799 = vmatprep.mubr.bf16.mxu0 %v5447_v10 }
 0x1f1   : >> { %4292 = vmatmul.mubr.msk.bf16.gmra.mrb[64].mxu0 %vm313_vm2, %v518_v57  ;;  %4683 = vmatmul.mubr.msk.bf16.gmra.mrb[64].mxu1 %vm313_vm2, %v534_v49 }
 0x1f2   : >> { %2383 = vmatprep.mubr.bf16.mxu1 %v2346_v59  ;;  %809 = vmatprep.mubr.bf16.mxu0 %v5447_v10 }
 0x1f9   : >> { %4293 = vmatmul.mubr.msk.bf16.gmra.mrb[68].mxu0 %vm313_vm2, %v5536_v21 }
 0x1fa   : >> { %819 = vmatprep.mubr.bf16.mxu0 %v5447_v10 }
 0x201   : >> { %4294 = vmatmul.mubr.msk.bf16.gmra.mrb[72].mxu0 %vm313_vm2, %v5538_v22 }
 0x202   : >> { %829 = vmatprep.mubr.bf16.mxu0 %v5447_v10 }
 0x209   : >> { %4295 = vmatmul.mubr.msk.bf16.gmra.mrb[76].mxu0 %vm313_vm2, %v5546_v25 }
 0x20a   : >> { %839 = vmatprep.mubr.bf16.mxu0 %v5447_v10 }
 0x211   : >> { %4296 = vmatmul.mubr.msk.bf16.gmra.mrb[80].mxu0 %vm313_vm2, %v5560_v38 }
 0x212   : >> { %2465 = vmatprep.mubr.bf16.mxu0 %v2346_v59 }
 0x24c   : >> { %v5656_v60 = vpop.f32.mrb[4].mxu0  ;;  %v5658_v61 = vpop.f32.mrb[4].mxu1 }
 0x24d   : >> { %8133 = vst [vmem:[#allocation9_spill] sm:$0xff] %v5658_v61  ;;  %v5660_v62 = vpop.f32.mrb[5].mxu0  ;;  %v5662_v63 = vpop.f32.mrb[5].mxu1 }
 0x24e   : >> { %8134 = vst [vmem:[#allocation10_spill] sm:$0xff] %v5662_v63  ;;  %v1259_v2 = vmax.f32 %v5656_v60, %v5660_v62  ;;  %v5666_v5 = vpop.f32.mrb[6].mxu0  ;;  %v5670_v7 = vpop.f32.mrb[6].mxu1 }
 0x24f   : >> { %8135 = vst [vmem:[#allocation11_spill] sm:$0xff] %v5670_v7  ;;  %v5672_v8 = vpop.f32.mrb[7].mxu0  ;;  %v5674_v9 = vpop.f32.mrb[7].mxu1 }
 0x250   : >> { %8136 = vst [vmem:[#allocation12_spill] sm:$0xff] %v5674_v9  ;;  %v1263_v10 = vmax.f32 %v5666_v5, %v5672_v8 }
 0x254   : >> { %v5680_v12 = vpop.f32.mrb[8].mxu0  ;;  %v5682_v13 = vpop.f32.mrb[8].mxu1 }
 0x255   : >> { %v5684_v14 = vpop.f32.mrb[9].mxu0  ;;  %v5686_v15 = vpop.f32.mrb[9].mxu1 }
 0x256   : >> { %v1267_v16 = vmax.f32 %v5680_v12, %v5684_v14  ;;  %v5690_v17 = vpop.f32.mrb[10].mxu0  ;;  %v5694_v19 = vpop.f32.mrb[10].mxu1 }
 0x257   : >> { %8137 = vst [vmem:[#allocation13_spill] sm:$0xff] %v5694_v19  ;;  %v5696_v20 = vpop.f32.mrb[11].mxu0  ;;  %v5698_v21 = vpop.f32.mrb[11].mxu1 }
 0x258   : >> { %8138 = vst [vmem:[#allocation14_spill] sm:$0xff] %v5698_v21  ;;  %v1271_v22 = vmax.f32 %v5690_v17, %v5696_v20 }
 0x25c   : >> { %v5704_v28 = vpop.f32.mrb[12].mxu0  ;;  %v5706_v29 = vpop.f32.mrb[12].mxu1 }
 0x25d   : >> { %8139 = vst [vmem:[#allocation15_spill] sm:$0xff] %v5706_v29  ;;  %v5708_v30 = vpop.f32.mrb[13].mxu0  ;;  %v5710_v31 = vpop.f32.mrb[13].mxu1 }
 0x25e   : >> { %8140 = vst [vmem:[#allocation16_spill] sm:$0xff] %v5710_v31  ;;  %v1275_v32 = vmax.f32 %v5704_v28, %v5708_v30  ;;  %v5714_v33 = vpop.f32.mrb[14].mxu0  ;;  %v5718_v35 = vpop.f32.mrb[14].mxu1 }
 0x25f   : >> { %8141 = vst [vmem:[#allocation17_spill] sm:$0xff] %v5718_v35  ;;  %v5720_v36 = vpop.f32.mrb[15].mxu0  ;;  %v5722_v37 = vpop.f32.mrb[15].mxu1 }
 0x260   : >> { %8142 = vst [vmem:[#allocation18_spill] sm:$0xff] %v5722_v37  ;;  %v1279_v38 = vmax.f32 %v5714_v33, %v5720_v36 }
 0x264   : >> { %v5728_v40 = vpop.f32.mrb[16].mxu0  ;;  %v5730_v41 = vpop.f32.mrb[16].mxu1 }
 0x265   : >> { %8143 = vst [vmem:[#allocation19_spill] sm:$0xff] %v5730_v41  ;;  %v5732_v42 = vpop.f32.mrb[17].mxu0  ;;  %v5734_v43 = vpop.f32.mrb[17].mxu1 }
 0x266   : >> { %8144 = vst [vmem:[#allocation20_spill] sm:$0xff] %v5734_v43  ;;  %v1283_v44 = vmax.f32 %v5728_v40, %v5732_v42  ;;  %v5738_v45 = vpop.f32.mrb[18].mxu0  ;;  %v5742_v47 = vpop.f32.mrb[18].mxu1 }
 0x267   : >> { %8145 = vst [vmem:[#allocation21_spill] sm:$0xff] %v5742_v47  ;;  %v5744_v48 = vpop.f32.mrb[19].mxu0  ;;  %v5746_v49 = vpop.f32.mrb[19].mxu1 }
 0x268   : >> { %8146 = vst [vmem:[#allocation22_spill] sm:$0xff] %v5746_v49 }
 0x26c   : >> { %v5752_v52 = vpop.f32.mrb[20].mxu0  ;;  %v4640_v53 = vpop.f32.mrb[20].mxu1 }
 0x26d   : >> { %v5754_v54 = vpop.f32.mrb[21].mxu0  ;;  %v924_v55 = vpop.f32.mrb[21].mxu1  ;;  %v5769_v46 = vsel %vm267_vm0, %v4640_v53, -1e+30 }
 0x26e   : >> { %v5760_v57 = vsel %vm267_vm0, %v924_v55, -1e+30  ;;  %v5762_v58 = vpop.f32.mrb[22].mxu0  ;;  %v4641_v59 = vpop.f32.mrb[22].mxu1  ;;  %v1268_v25 = vmax.f32 %v1267_v16, %v5769_v46 }
 0x26f   : >> { %v5764_v0 = vpop.f32.mrb[23].mxu0  ;;  %v927_v4 = vpop.f32.mrb[23].mxu1  ;;  %v1260_v51 = vmax.f32 %v1259_v2, %v5760_v57  ;;  %v5781_v2 = vsel %vm267_vm0, %v4641_v59, -1e+30 }
 0x270   : >> { %8147 = vst [vmem:[#allocation23_spill] sm:$0xff] %v5764_v0  ;;  %v1295_v39 = vmax.f32 %v5762_v58, %v5764_v0  ;;  %v5775_v34 = vsel %vm267_vm0, %v927_v4, -1e+30  ;;  %v1272_v56 = vmax.f32 %v1271_v22, %v5781_v2 }
 0x271   : >> { %1261 = vmax.xlane.f32.xlu0 %v1260_v51  ;;  %v1264_v55 = vmax.f32 %v1263_v10, %v5775_v34 }
 0x273   : >> { %1265 = vmax.xlane.f32.xlu1 %v1264_v55 }
 0x274   : >> { %v5783_v18 = vpop.f32.mrb[24].mxu0  ;;  %v4644_v53 = vpop.f32.mrb[24].mxu1 }
 0x275   : >> { %8148 = vst [vmem:[#allocation24_spill] sm:$0xff] %v5783_v18  ;;  %v940_v11 = vpop.f32.mrb[25].mxu1  ;;  %1269 = vmax.xlane.f32.xlu0 %v1268_v25  ;;  %v5785_v6 = vpop.f32.mrb[25].mxu0 }
 0x276   : >> { %8149 = vst [vmem:[#allocation25_spill] sm:$0xff] %v5785_v6  ;;  %v1299_v4 = vmax.f32 %v5783_v18, %v5785_v6  ;;  %v5789_v51 = vpop.f32.mrb[26].mxu0  ;;  %v4645_v10 = vpop.f32.mrb[26].mxu1  ;;  %v5796_v59 = vsel %vm267_vm0, %v940_v11, -1e+30 }
 0x277   : >> { %v5791_v55 = vpop.f32.mrb[27].mxu0  ;;  %v943_v16 = vpop.f32.mrb[27].mxu1  ;;  %v1276_v50 = vmax.f32 %v1275_v32, %v5796_v59 }
 0x278   : >> { %v1303_v25 = vmax.f32 %v5789_v51, %v5791_v55  ;;  %v5803_v1 = vsel %vm267_vm0, %v943_v16, -1e+30 }
 0x279   : >> { %1273 = vmax.xlane.f32.xlu0 %v1272_v56  ;;  %v1280_v47 = vmax.f32 %v1279_v38, %v5803_v1  ;;  %v5834_v38 = vsel %vm267_vm0, %v4645_v10, -1e+30 }
 0x27c   : >> { %v5805_v24 = vpop.f32.mrb[28].mxu0  ;;  %v4648_v23 = vpop.f32.mrb[28].mxu1 }
 0x27d   : >> { %8150 = vst [vmem:[#allocation26_spill] sm:$0xff] %v5805_v24  ;;  %v956_v27 = vpop.f32.mrb[29].mxu1  ;;  %1277 = vmax.xlane.f32.xlu0 %v1276_v50  ;;  %v5807_v22 = vpop.f32.mrb[29].mxu0  ;;  %v5822_v50 = vsel %vm267_vm0, %v4644_v53, -1e+30 }
 0x27e   : >> { %8151 = vst [vmem:[#allocation27_spill] sm:$0xff] %v5807_v22  ;;  %v1307_v11 = vmax.f32 %v5805_v24, %v5807_v22  ;;  %v5811_v26 = vpop.f32.mrb[30].mxu0  ;;  %v4649_v49 = vpop.f32.mrb[30].mxu1  ;;  %v8159_v24 = vmax.f32 %v5738_v45, %v5744_v48 }
 0x27f   : >> { %8152 = vst [vmem:[#allocation28_spill] sm:$0xff] %v5811_v26  ;;  %v5815_v32 = vsel %vm267_vm0, %v4649_v49, -1e+30  ;;  %v5817_v56 = vpop.f32.mrb[31].mxu0  ;;  %v959_v16 = vpop.f32.mrb[31].mxu1  ;;  %v1284_v49 = vmax.f32 %v1283_v44, %v5822_v50 }
 0x280   : >> { %8153 = vst [vmem:[#allocation29_spill] sm:$0xff] %v5817_v56  ;;  %v1311_v43 = vmax.f32 %v5811_v26, %v5817_v56  ;;  %v1304_v41 = vmax.f32 %v1303_v25, %v5815_v32  ;;  %v5829_v37 = vsel %vm267_vm0, %v959_v16, -1e+30  ;;  %v1288_v26 = vmax.f32 %v8159_v24, %v5834_v38 }
 0x281   : >> { %8154 = vst [vmem:[#allocation30_spill] sm:$0xff] %v5829_v37  ;;  %1281 = vmax.xlane.f32.xlu0 %v1280_v47  ;;  %v1296_v22 = vmax.f32 %v1295_v39, %v5829_v37  ;;  %v5853_v39 = vsel %vm267_vm0, %v4648_v23, -1e+30  ;;  %v5865_v24 = vsel %vm267_vm0, %v956_v27, -1e+30 }
 0x282   : >> { %1305 = vmax.xlane.f32.xlu1 %v1304_v41  ;;  %8160 = vst [vmem:[#allocation35_spill] sm:$0xff] %v5853_v39  ;;  %8162 = vst [vmem:[#allocation37_spill] sm:$0xff] %v5865_v24 }
 0x284   : >> { %v5836_v35 = vpop.f32.mrb[32].mxu0  ;;  %v4652_v53 = vpop.f32.mrb[32].mxu1 }
 0x285   : >> { %8155 = vst [vmem:[#allocation31_spill] sm:$0xff] %v5836_v35  ;;  %v972_v56 = vpop.f32.mrb[33].mxu1  ;;  %1285 = vmax.xlane.f32.xlu0 %v1284_v49  ;;  %v5839_v25 = vpop.f32.mrb[33].mxu0 }
 0x286   : >> { %8156 = vst [vmem:[#allocation32_spill] sm:$0xff] %v5839_v25  ;;  %v1315_v16 = vmax.f32 %v5836_v35, %v5839_v25  ;;  %v4653_v47 = vpop.f32.mrb[34].mxu1  ;;  %1297 = vmax.xlane.f32.xlu1 %v1296_v22  ;;  %v5843_v41 = vpop.f32.mrb[34].mxu0  ;;  %v1300_v35 = vmax.f32 %v1299_v4, %v5853_v39  ;;  %v5888_v39 = vsel %vm267_vm0, %v972_v56, -1e+30 }
 0x287   : >> { %8157 = vst [vmem:[#allocation33_spill] sm:$0xff] %v5843_v41  ;;  %v5845_v44 = vpop.f32.mrb[35].mxu0  ;;  %v975_v10 = vpop.f32.mrb[35].mxu1  ;;  %v5869_v23 = vsel %vm267_vm0, %v4653_v47, -1e+30  ;;  %8169 = vst [vmem:[#allocation43_spill] sm:$0xff] %v5888_v39 }
 0x288   : >> { %8158 = vst [vmem:[#allocation34_spill] sm:$0xff] %v5845_v44  ;;  %v1319_v49 = vmax.f32 %v5843_v41, %v5845_v44  ;;  %v5859_v22 = vsel %vm267_vm0, %v975_v10, -1e+30  ;;  %8163 = vst [vmem:[#allocation38_spill] sm:$0xff] %v5869_v23  ;;  %v8168_v41 = vmax.f32 %v5752_v52, %v5754_v54 }
 0x289   : >> { %8161 = vst [vmem:[#allocation36_spill] sm:$0xff] %v5859_v22  ;;  %1289 = vmax.xlane.f32.xlu0 %v1288_v26  ;;  %v1312_v25 = vmax.f32 %v1311_v43, %v5859_v22 }
 0x28a   : >> { %v1320_v43 = vmax.f32 %v1319_v49, %v5869_v23 }
 0x28b   : >> { %1313 = vmax.xlane.f32.xlu1 %v1312_v25 }
 0x28c   : >> { %v5871_v31 = vpop.f32.mrb[36].mxu0  ;;  %v4656_v44 = vpop.f32.mrb[36].mxu1 }
 0x28d   : >> { %8164 = vst [vmem:[#allocation39_spill] sm:$0xff] %v5871_v31  ;;  %1301 = vmax.xlane.f32.xlu0 %v1300_v35  ;;  %v5873_v10 = vpop.f32.mrb[37].mxu0  ;;  %v988_v26 = vpop.f32.mrb[37].mxu1  ;;  %v1292_v35 = vmax.f32 %v8168_v41, %v5865_v24 }
 0x28e   : >> { %8165 = vst [vmem:[#allocation40_spill] sm:$0xff] %v5873_v10  ;;  %v1323_v4 = vmax.f32 %v5871_v31, %v5873_v10  ;;  %v5878_v25 = vpop.f32.mrb[38].mxu0  ;;  %v4657_v27 = vpop.f32.mrb[38].mxu1  ;;  %v1308_v10 = vmax.f32 %v1307_v11, %v5888_v39 }
 0x28f   : >> { %8166 = vst [vmem:[#allocation41_spill] sm:$0xff] %v5878_v25  ;;  %1321 = vmax.xlane.f32.xlu1 %v1320_v43  ;;  %v5880_v22 = vpop.f32.mrb[39].mxu0  ;;  %v991_v47 = vpop.f32.mrb[39].mxu1 }
 0x290   : >> { %8167 = vst [vmem:[#allocation42_spill] sm:$0xff] %v5880_v22  ;;  %v1327_v49 = vmax.f32 %v5878_v25, %v5880_v22  ;;  %v5894_v23 = vsel %vm267_vm0, %v991_v47, -1e+30  ;;  %v5904_v22 = vsel %vm267_vm0, %v4652_v53, -1e+30 }
 0x291   : >> { %8170 = vst [vmem:[#allocation44_spill] sm:$0xff] %v5894_v23  ;;  %1293 = vmax.xlane.f32.xlu0 %v1292_v35  ;;  %8173 = vst [vmem:[#allocation47_spill] sm:$0xff] %v5904_v22  ;;  %v5908_v47 = vsel %vm267_vm0, %v988_v26, -1e+30 }
 0x292   : >> { %v1328_v43 = vmax.f32 %v1327_v49, %v5894_v23  ;;  %8174 = vst [vmem:[#allocation48_spill] sm:$0xff] %v5908_v47  ;;  %v1316_v23 = vmax.f32 %v1315_v16, %v5904_v22  ;;  %v1324_v26 = vmax.f32 %v1323_v4, %v5908_v47 }
 0x294   : >> { %1329 = vmax.xlane.f32.xlu1 %v1328_v43  ;;  %v5898_v31 = vpop.f32.mrb[40].mxu0  ;;  %v4660_v41 = vpop.f32.mrb[40].mxu1 }
 0x295   : >> { %8171 = vst [vmem:[#allocation45_spill] sm:$0xff] %v5898_v31  ;;  %1309 = vmax.xlane.f32.xlu0 %v1308_v10  ;;  %v5900_v24 = vpop.f32.mrb[41].mxu0  ;;  %v1004_v56 = vpop.f32.mrb[41].mxu1  ;;  %v5916_v10 = vsel %vm267_vm0, %v4657_v27, -1e+30 }
 0x296   : >> { %8172 = vst [vmem:[#allocation46_spill] sm:$0xff] %v5900_v24  ;;  %v1331_v35 = vmax.f32 %v5898_v31, %v5900_v24  ;;  %v5912_v11 = vpop.f32.mrb[42].mxu0  ;;  %v4661_v49 = vpop.f32.mrb[42].mxu1  ;;  %8176 = vst [vmem:[#allocation50_spill] sm:$0xff] %v5916_v10  ;;  %v5926_v24 = vsel %vm267_vm0, %v4656_v44, -1e+30 }
 0x297   : >> { %8175 = vst [vmem:[#allocation49_spill] sm:$0xff] %v5912_v11  ;;  %v5918_v43 = vpop.f32.mrb[43].mxu0  ;;  %v1007_v53 = vpop.f32.mrb[43].mxu1  ;;  %8178 = vst [vmem:[#allocation52_spill] sm:$0xff] %v5926_v24  ;;  %v5942_v44 = vsel %vm267_vm0, %v1004_v56, -1e+30 }
 0x298   : >> { %8177 = vst [vmem:[#allocation51_spill] sm:$0xff] %v5918_v43  ;;  %v1335_v25 = vmax.f32 %v5912_v11, %v5918_v43  ;;  %v1332_v22 = vmax.f32 %v1331_v35, %v5926_v24  ;;  %8182 = vst [vmem:[#allocation56_spill] sm:$0xff] %v5942_v44  ;;  %v5962_v11 = vsel %vm267_vm0, %v4660_v41, -1e+30 }
 0x299   : >> { %1317 = vmax.xlane.f32.xlu0 %v1316_v23  ;;  %8187 = vst [vmem:[#allocation61_spill] sm:$0xff] %v5962_v11 }
 0x29a   : >> { %v1336_v31 = vmax.f32 %v1335_v25, %v5916_v10 }
 0x29c   : >> { %1337 = vmax.xlane.f32.xlu1 %v1336_v31  ;;  %v5929_v27 = vpop.f32.mrb[44].mxu0  ;;  %v5931_v39 = vpop.f32.mrb[44].mxu1 }
 0x29d   : >> { %8179 = vst [vmem:[#allocation53_spill] sm:$0xff] %v5929_v27  ;;  %1325 = vmax.xlane.f32.xlu0 %v1324_v26  ;;  %v5933_v16 = vpop.f32.mrb[45].mxu0  ;;  %v1020_v43 = vpop.f32.mrb[45].mxu1  ;;  %v5950_v26 = vsel %vm267_vm0, %v1007_v53, -1e+30 }
 0x29e   : >> { %8180 = vst [vmem:[#allocation54_spill] sm:$0xff] %v5933_v16  ;;  %v1339_v23 = vmax.f32 %v5929_v27, %v5933_v16  ;;  %v5938_v4 = vpop.f32.mrb[46].mxu0  ;;  %v5944_v31 = vpop.f32.mrb[46].mxu1  ;;  %8184 = vst [vmem:[#allocation58_spill] sm:$0xff] %v5950_v26 }
 0x29f   : >> { %8181 = vst [vmem:[#allocation55_spill] sm:$0xff] %v5938_v4  ;;  %v5946_v25 = vpop.f32.mrb[47].mxu0  ;;  %v1023_v10 = vpop.f32.mrb[47].mxu1 }
 0x2a0   : >> { %8183 = vst [vmem:[#allocation57_spill] sm:$0xff] %v5946_v25  ;;  %v1343_v35 = vmax.f32 %v5938_v4, %v5946_v25  ;;  %v1340_v16 = vmax.f32 %v1339_v23, %v5942_v44 }
 0x2a1   : >> { %1333 = vmax.xlane.f32.xlu0 %v1332_v22 }
 0x2a2   : >> { %v1344_v27 = vmax.f32 %v1343_v35, %v5950_v26 }
 0x2a4   : >> { %1345 = vmax.xlane.f32.xlu1 %v1344_v27  ;;  %v5956_v56 = vpop.f32.mrb[48].mxu0  ;;  %v5958_v24 = vpop.f32.mrb[48].mxu1  ;;  %v5976_v27 = vsel %vm267_vm0, %v4661_v49, -1e+30  ;;  %v5992_v49 = vsel %vm267_vm0, %v1020_v43, -1e+30 }
 0x2a5   : >> { %8185 = vst [vmem:[#allocation59_spill] sm:$0xff] %v5956_v56  ;;  %8186 = vst [vmem:[#allocation60_spill] sm:$0xff] %v5958_v24  ;;  %1341 = vmax.xlane.f32.xlu0 %v1340_v16  ;;  %v5964_v53 = vpop.f32.mrb[49].mxu0  ;;  %v5966_v47 = vpop.f32.mrb[49].mxu1 }
 0x2a6   : >> { %8188 = vst [vmem:[#allocation62_spill] sm:$0xff] %v5964_v53  ;;  %v1347_v22 = vmax.f32 %v5956_v56, %v5964_v53  ;;  %v5970_v23 = vpop.f32.mrb[50].mxu0  ;;  %v5972_v35 = vpop.f32.mrb[50].mxu1  ;;  %8191 = vst [vmem:[#allocation65_spill] sm:$0xff] %v5976_v27 }
 0x2a7   : >> { %8189 = vst [vmem:[#allocation63_spill] sm:$0xff] %v5970_v23  ;;  %8190 = vst [vmem:[#allocation64_spill] sm:$0xff] %v5972_v35  ;;  %v5978_v44 = vpop.f32.mrb[51].mxu0  ;;  %v5980_v41 = vpop.f32.mrb[51].mxu1 }
 0x2a8   : >> { %8192 = vst [vmem:[#allocation66_spill] sm:$0xff] %v5978_v44  ;;  %8193 = vst [vmem:[#allocation67_spill] sm:$0xff] %v5980_v41  ;;  %v1351_v16 = vmax.f32 %v5970_v23, %v5978_v44  ;;  %v1348_v26 = vmax.f32 %v1347_v22, %v5962_v11  ;;  %v6004_v22 = vsel %vm267_vm0, %v1023_v10, -1e+30  ;;  %v6095_v41 = vsel %vm267_vm0, %v5931_v39, -1e+30 }
 0x2a9   : >> { %8195 = vst [vmem:[#allocation69_spill] sm:$0xff] %v5992_v49  ;;  %8198 = vst [vmem:[#allocation72_spill] sm:$0xff] %v6004_v22 }
 0x2aa   : >> { %1349 = vmax.xlane.f32.xlu0 %v1348_v26  ;;  %v1352_v53 = vmax.f32 %v1351_v16, %v5976_v27  ;;  %8218 = vst [vmem:[#allocation90_spill] sm:$0xff] %v6095_v41 }
 0x2ac   : >> { %v5986_v56 = vpop.f32.mrb[52].mxu1  ;;  %1353 = vmax.xlane.f32.xlu1 %v1352_v53  ;;  %v5988_v25 = vpop.f32.mrb[52].mxu0 }
 0x2ad   : >> { %8194 = vst [vmem:[#allocation68_spill] sm:$0xff] %v5988_v25  ;;  %v5994_v4 = vpop.f32.mrb[53].mxu0  ;;  %v1052_v35 = vpop.f32.mrb[53].mxu1 }
 0x2ae   : >> { %8196 = vst [vmem:[#allocation70_spill] sm:$0xff] %v5994_v4  ;;  %v1355_v44 = vmax.f32 %v5988_v25, %v5994_v4  ;;  %v5998_v23 = vpop.f32.mrb[54].mxu0  ;;  %v6000_v26 = vpop.f32.mrb[54].mxu1 }
 0x2af   : >> { %8197 = vst [vmem:[#allocation71_spill] sm:$0xff] %v5998_v23  ;;  %v6006_v53 = vpop.f32.mrb[55].mxu0  ;;  %v1055_v16 = vpop.f32.mrb[55].mxu1 }
 0x2b0   : >> { %8199 = vst [vmem:[#allocation73_spill] sm:$0xff] %v6006_v53  ;;  %v1359_v43 = vmax.f32 %v5998_v23, %v6006_v53  ;;  %v1356_v27 = vmax.f32 %v1355_v44, %v5992_v49  ;;  %v6113_v39 = vsel %vm267_vm0, %v1055_v16, -1e+30 }
 0x2b2   : >> { %1357 = vmax.xlane.f32.xlu0 %v1356_v27  ;;  %v1360_v11 = vmax.f32 %v1359_v43, %v6004_v22 }
 0x2b4   : >> { %v6012_v4 = vpop.f32.mrb[56].mxu1  ;;  %1361 = vmax.xlane.f32.xlu1 %v1360_v11  ;;  %v6014_v25 = vpop.f32.mrb[56].mxu0 }
 0x2b5   : >> { %8200 = vst [vmem:[#allocation74_spill] sm:$0xff] %v6014_v25  ;;  %v6016_v24 = vpop.f32.mrb[57].mxu0  ;;  %v6018_v10 = vpop.f32.mrb[57].mxu1 }
 0x2b6   : >> { %8201 = vst [vmem:[#allocation75_spill] sm:$0xff] %v6016_v24  ;;  %v1363_v29 = vmax.f32 %v6014_v25, %v6016_v24  ;;  %v6022_v6 = vpop.f32.mrb[58].mxu0  ;;  %v6024_v53 = vpop.f32.mrb[58].mxu1 }
 0x2b7   : >> { %8202 = vst [vmem:[#allocation76_spill] sm:$0xff] %v6022_v6  ;;  %v6026_v44 = vpop.f32.mrb[59].mxu0  ;;  %v6028_v27 = vpop.f32.mrb[59].mxu1 }
 0x2b8   : >> { %8203 = vst [vmem:[#allocation77_spill] sm:$0xff] %v6026_v44  ;;  %v1367_v11 = vmax.f32 %v6022_v6, %v6026_v44  ;;  %v8207_v6 = vmax.f32 %v5658_v61, %v5662_v63 }
 0x2bc   : >> { %v6032_v43 = vpop.f32.mrb[60].mxu0  ;;  %v6034_v22 = vpop.f32.mrb[60].mxu1 }
 0x2bd   : >> { %8204 = vst [vmem:[#allocation78_spill] sm:$0xff] %v6032_v43  ;;  %v6036_v23 = vpop.f32.mrb[61].mxu0  ;;  %v1084_v49 = vpop.f32.mrb[61].mxu1 }
 0x2be   : >> { %8205 = vst [vmem:[#allocation79_spill] sm:$0xff] %v6036_v23  ;;  %v6042_v25 = vsel %vm267_vm0, %v1084_v49, -1e+30  ;;  %v6044_v21 = vpop.f32.mrb[62].mxu0  ;;  %v6046_v19 = vpop.f32.mrb[62].mxu1  ;;  %v8209_v49 = vmax.f32 %v5670_v7, %v5674_v9 }
 0x2bf   : >> { %8206 = vst [vmem:[#allocation80_spill] sm:$0xff] %v6042_v25  ;;  %v6048_v18 = vpop.f32.mrb[63].mxu0  ;;  %v1087_v44 = vpop.f32.mrb[63].mxu1  ;;  %v1420_v37 = vmax.f32 %v8207_v6, %v6042_v25 }
 0x2c0   : >> { %v6058_v24 = vsel %vm267_vm0, %v1087_v44, -1e+30 }
 0x2c1   : >> { %8208 = vst [vmem:[#allocation81_spill] sm:$0xff] %v6058_v24  ;;  %1421 = vmax.xlane.f32.xlu0 %v1420_v37  ;;  %v1424_v0 = vmax.f32 %v8209_v49, %v6058_v24 }
 0x2c3   : >> { %1425 = vmax.xlane.f32.xlu1 %v1424_v0 }
 0x2c4   : >> { %v6064_v23 = vpop.f32.mrb[64].mxu0  ;;  %v6066_v43 = vpop.f32.mrb[64].mxu1 }
 0x2c5   : >> { %8210 = vst [vmem:[#allocation82_spill] sm:$0xff] %v6064_v23  ;;  %v6068_v63 = vpop.f32.mrb[65].mxu0  ;;  %v6070_v6 = vpop.f32.mrb[65].mxu1 }
 0x2c6   : >> { %8211 = vst [vmem:[#allocation83_spill] sm:$0xff] %v6068_v63  ;;  %v6074_v44 = vpop.f32.mrb[66].mxu0  ;;  %v6076_v37 = vpop.f32.mrb[66].mxu1 }
 0x2c7   : >> { %8212 = vst [vmem:[#allocation84_spill] sm:$0xff] %v6074_v44  ;;  %8213 = vst [vmem:[#allocation85_spill] sm:$0xff] %v6076_v37  ;;  %v6078_v25 = vpop.f32.mrb[67].mxu0  ;;  %v6080_v9 = vpop.f32.mrb[67].mxu1  ;;  %v6099_v37 = vsel %vm267_vm0, %v1052_v35, -1e+30 }
 0x2c8   : >> { %8214 = vst [vmem:[#allocation86_spill] sm:$0xff] %v6078_v25 }
 0x2cc   : >> { %v6084_v49 = vpop.f32.mrb[68].mxu0 }
 0x2cd   : >> { %8215 = vst [vmem:[#allocation87_spill] sm:$0xff] %v6084_v49  ;;  %v6086_v24 = vpop.f32.mrb[69].mxu0 }
 0x2ce   : >> { %8216 = vst [vmem:[#allocation88_spill] sm:$0xff] %v6086_v24  ;;  %v1387_v7 = vmax.f32 %v6084_v49, %v6086_v24  ;;  %v6090_v61 = vpop.f32.mrb[70].mxu0  ;;  %v6109_v24 = vsel %vm267_vm0, %v5944_v31, -1e+30  ;;  %v1364_v49 = vmax.f32 %v1363_v29, %v6095_v41 }
 0x2cf   : >> { %8217 = vst [vmem:[#allocation89_spill] sm:$0xff] %v6090_v61  ;;  %v6101_v63 = vpop.f32.mrb[71].mxu0  ;;  %8220 = vst [vmem:[#allocation92_spill] sm:$0xff] %v6109_v24 }
 0x2d0   : >> { %8219 = vst [vmem:[#allocation91_spill] sm:$0xff] %v6101_v63  ;;  %v1391_v0 = vmax.f32 %v6090_v61, %v6101_v63  ;;  %v1388_v25 = vmax.f32 %v1387_v7, %v6099_v37  ;;  %v1368_v63 = vmax.f32 %v1367_v11, %v6109_v24 }
 0x2d2   : >> { %1389 = vmax.xlane.f32.xlu0 %v1388_v25  ;;  %v1392_v35 = vmax.f32 %v1391_v0, %v6113_v39  ;;  %v6129_v25 = vsel %vm267_vm0, %v5986_v56, -1e+30  ;;  %v6139_v0 = vsel %vm267_vm0, %v6000_v26, -1e+30 }
 0x2d3   : >> { %8221 = vst [vmem:[#allocation93_spill] sm:$0xff] %v6139_v0 }
 0x2d4   : >> { %1393 = vmax.xlane.f32.xlu1 %v1392_v35  ;;  %v6117_v44 = vpop.f32.mrb[72].mxu0 }
 0x2d5   : >> { %v6120_v7 = vpop.f32.mrb[73].mxu0 }
 0x2d6   : >> { %v1395_v31 = vmax.f32 %v6117_v44, %v6120_v7  ;;  %1365 = vmax.xlane.f32.xlu0 %v1364_v49  ;;  %v6124_v61 = vpop.f32.mrb[74].mxu0 }
 0x2d7   : >> { %v6131_v16 = vpop.f32.mrb[75].mxu0 }
 0x2d8   : >> { %v1399_v29 = vmax.f32 %v6124_v61, %v6131_v16  ;;  %1369 = vmax.xlane.f32.xlu1 %v1368_v63  ;;  %v1396_v11 = vmax.f32 %v1395_v31, %v6129_v25  ;;  %v6153_v63 = vsel %vm267_vm0, %v6018_v10, -1e+30 }
 0x2d9   : >> { %8225 = vst [vmem:[#allocation97_spill] sm:$0xff] %v6153_v63 }
 0x2da   : >> { %1397 = vmax.xlane.f32.xlu0 %v1396_v11  ;;  %v1400_v49 = vmax.f32 %v1399_v29, %v6139_v0  ;;  %v6163_v11 = vsel %vm267_vm0, %v6028_v27, -1e+30 }
 0x2db   : >> { %8227 = vst [vmem:[#allocation99_spill] sm:$0xff] %v6163_v11 }
 0x2dc   : >> { %1401 = vmax.xlane.f32.xlu1 %v1400_v49  ;;  %v6142_v35 = vpop.f32.mrb[76].mxu0 }
 0x2dd   : >> { %8222 = vst [vmem:[#allocation94_spill] sm:$0xff] %v6142_v35  ;;  %v6144_v56 = vpop.f32.mrb[77].mxu0 }
 0x2de   : >> { %8223 = vst [vmem:[#allocation95_spill] sm:$0xff] %v6144_v56  ;;  %v1403_v24 = vmax.f32 %v6142_v35, %v6144_v56  ;;  %v6148_v41 = vpop.f32.mrb[78].mxu0 }
 0x2df   : >> { %8224 = vst [vmem:[#allocation96_spill] sm:$0xff] %v6148_v41  ;;  %v6155_v26 = vpop.f32.mrb[79].mxu0 }
 0x2e0   : >> { %8226 = vst [vmem:[#allocation98_spill] sm:$0xff] %v6155_v26  ;;  %v1407_v31 = vmax.f32 %v6148_v41, %v6155_v26  ;;  %v1404_v29 = vmax.f32 %v1403_v24, %v6153_v63  ;;  %v6177_v24 = vsel %vm267_vm0, %v6012_v4, -1e+30 }
 0x2e1   : >> { %8231 = vst [vmem:[#allocation103_spill] sm:$0xff] %v6177_v24 }
 0x2e2   : >> { %1405 = vmax.xlane.f32.xlu0 %v1404_v29  ;;  %v1408_v49 = vmax.f32 %v1407_v31, %v6163_v11 }
 0x2e4   : >> { %1409 = vmax.xlane.f32.xlu1 %v1408_v49  ;;  %v6166_v56 = vpop.f32.mrb[80].mxu0  ;;  %v6187_v49 = vsel %vm267_vm0, %v6024_v53, -1e+30 }
 0x2e5   : >> { %8228 = vst [vmem:[#allocation100_spill] sm:$0xff] %v6166_v56  ;;  %v6168_v10 = vpop.f32.mrb[81].mxu0  ;;  %8233 = vst [vmem:[#allocation105_spill] sm:$0xff] %v6187_v49 }
 0x2e6   : >> { %8229 = vst [vmem:[#allocation101_spill] sm:$0xff] %v6168_v10  ;;  %v1411_v35 = vmax.f32 %v6166_v56, %v6168_v10  ;;  %v6172_v0 = vpop.f32.mrb[82].mxu0 }
 0x2e7   : >> { %8230 = vst [vmem:[#allocation102_spill] sm:$0xff] %v6172_v0  ;;  %v6179_v27 = vpop.f32.mrb[83].mxu0 }
 0x2e8   : >> { %8232 = vst [vmem:[#allocation104_spill] sm:$0xff] %v6179_v27  ;;  %v1415_v31 = vmax.f32 %v6172_v0, %v6179_v27  ;;  %v1412_v29 = vmax.f32 %v1411_v35, %v6177_v24 }
 0x2ea   : >> { %1413 = vmax.xlane.f32.xlu0 %v1412_v29  ;;  %v1416_v10 = vmax.f32 %v1415_v31, %v6187_v49 }
 0x2ec   : >> { %1417 = vmax.xlane.f32.xlu1 %v1416_v10 }
 0x2fe   : >> { %v1262_v56 = vpop.xlane.xlu0 %1261 }
 0x2ff   : >> { %v1451_v4 = vsub.f32 %v5656_v60, %v1262_v56  ;;  %v1452_v11 = vsub.f32 %v5660_v62, %v1262_v56 }
 0x300   : >> { %v1266_v60 = vpop.xlane.xlu1 %1265 }
 0x301   : >> { %v1595_v35 = vmul.f32 1.442695, %v1451_v4  ;;  %v1597_v0 = vmul.f32 1.442695, %v1452_v11  ;;  %v1456_v4 = vsub.f32 %v5775_v34, %v1266_v60 }
 0x302   : >> { %v1270_v26 = vpop.xlane.xlu0 %1269 }
 0x303   : >> { %v1457_v41 = vsub.f32 %v5680_v12, %v1270_v26  ;;  %v1458_v27 = vsub.f32 %v5684_v14, %v1270_v26  ;;  %v1459_v53 = vsub.f32 %v5769_v46, %v1270_v26  ;;  %4853 = vpow2.f32 %v1595_v35 }
 0x304   : >> { %4855 = vpow2.f32 %v1597_v0  ;;  %v1453_v12 = vsub.f32 %v5760_v57, %v1262_v56  ;;  %v1454_v46 = vsub.f32 %v5666_v5, %v1266_v60 }
 0x305   : >> { %v1607_v24 = vmul.f32 1.442695, %v1457_v41  ;;  %v1609_v29 = vmul.f32 1.442695, %v1458_v27  ;;  %v1611_v11 = vmul.f32 1.442695, %v1459_v53 }
 0x306   : >> { %v1274_v63 = vpop.xlane.xlu0 %1273  ;;  %v1601_v27 = vmul.f32 1.442695, %v1454_v46 }
 0x307   : >> { %v1460_v31 = vsub.f32 %v5690_v17, %v1274_v63  ;;  %v1461_v10 = vsub.f32 %v5696_v20, %v1274_v63  ;;  %4857 = vpow2.f32 %v1607_v24  ;;  %v1462_v41 = vsub.f32 %v5781_v2, %v1274_v63 }
 0x308   : >> { %4859 = vpow2.f32 %v1609_v29  ;;  %v1455_v17 = vsub.f32 %v5672_v8, %v1266_v60  ;;  %v1599_v20 = vmul.f32 1.442695, %v1453_v12 }
 0x309   : >> { %v1613_v62 = vmul.f32 1.442695, %v1460_v31  ;;  %v1615_v49 = vmul.f32 1.442695, %v1461_v10  ;;  %v1617_v0 = vmul.f32 1.442695, %v1462_v41 }
 0x30a   : >> { %v1278_v14 = vpop.xlane.xlu0 %1277  ;;  %v1603_v57 = vmul.f32 1.442695, %v1455_v17 }
 0x30b   : >> { %4861 = vpow2.f32 %v1613_v62  ;;  %v1463_v5 = vsub.f32 %v5704_v28, %v1278_v14  ;;  %v1464_v8 = vsub.f32 %v5708_v30, %v1278_v14  ;;  %v1465_v34 = vsub.f32 %v5796_v59, %v1278_v14 }
 0x30c   : >> { %4863 = vpow2.f32 %v1615_v49  ;;  %v1605_v49 = vmul.f32 1.442695, %v1456_v4 }
 0x30d   : >> { %4865 = vpow2.f32 %v1611_v11  ;;  %v6202_v56 = vpop.eup %4853  ;;  %v1619_v10 = vmul.f32 1.442695, %v1463_v5  ;;  %v1621_v60 = vmul.f32 1.442695, %v1464_v8  ;;  %v1623_v11 = vmul.f32 1.442695, %v1465_v34 }
 0x30e   : >> { %v1282_v26 = vpop.xlane.xlu0 %1281  ;;  %8234 = vst [vmem:[#allocation106_spill] sm:$0xff] %v6202_v56  ;;  %4867 = vpow2.f32 %v1599_v20  ;;  %v6204_v35 = vpop.eup %4855 }
 0x30f   : >> { %8235 = vst [vmem:[#allocation107_spill] sm:$0xff] %v6204_v35  ;;  %4869 = vpow2.f32 %v1617_v0  ;;  %v1466_v28 = vsub.f32 %v5714_v33, %v1282_v26  ;;  %v1306_v59 = vpop.xlane.xlu1 %1305  ;;  %v1467_v41 = vsub.f32 %v5720_v36, %v1282_v26  ;;  %v1883_v33 = vadd.f32 %v6204_v35, %v6202_v56 }
 0x310   : >> { %4871 = vpow2.f32 %v1601_v27  ;;  %v1468_v20 = vsub.f32 %v5803_v1, %v1282_v26 }
 0x311   : >> { %v6207_v2 = vpop.eup %4857  ;;  %4873 = vpow2.f32 %v1603_v57  ;;  %v1625_v0 = vmul.f32 1.442695, %v1466_v28  ;;  %v6243_v57 = vsel %vm267_vm0, %v6034_v22, -1e+30  ;;  %v1627_v26 = vmul.f32 1.442695, %v1467_v41 }
 0x312   : >> { %v1286_v24 = vpop.xlane.xlu0 %1285  ;;  %v6210_v63 = vpop.eup %4859  ;;  %4875 = vpow2.f32 %v1605_v49  ;;  %v1629_v28 = vmul.f32 1.442695, %v1468_v20 }
 0x313   : >> { %v1469_v62 = vsub.f32 %v5728_v40, %v1286_v24  ;;  %v1891_v30 = vadd.f32 %v6210_v63, %v6207_v2  ;;  %v1470_v14 = vsub.f32 %v5732_v42, %v1286_v24  ;;  %4877 = vpow2.f32 %v1619_v10  ;;  %v1298_v22 = vpop.xlane.xlu1 %1297 }
 0x314   : >> { %4879 = vpow2.f32 %v1621_v60  ;;  %v1484_v42 = vsub.f32 %v5789_v51, %v1306_v59  ;;  %v1471_v5 = vsub.f32 %v5822_v50, %v1286_v24  ;;  %v6261_v24 = vsel %vm267_vm0, %v5966_v47, -1e+30 }
 0x315   : >> { %v6213_v53 = vpop.eup %4861  ;;  %v1631_v36 = vmul.f32 1.442695, %v1469_v62  ;;  %4881 = vpow2.f32 %v1623_v11  ;;  %v1633_v8 = vmul.f32 1.442695, %v1470_v14  ;;  %v1478_v41 = vsub.f32 %v5762_v58, %v1298_v22 }
 0x316   : >> { %8236 = vst [vmem:[#allocation108_spill] sm:$0xff] %v6213_v53  ;;  %v6215_v29 = vpop.xlane.xlu0 %1289  ;;  %v6217_v31 = vpop.eup %4863  ;;  %4883 = vpow2.f32 %v1625_v0  ;;  %v1661_v62 = vmul.f32 1.442695, %v1484_v42  ;;  %v1635_v11 = vmul.f32 1.442695, %v1471_v5 }
 0x317   : >> { %8237 = vst [vmem:[#allocation109_spill] sm:$0xff] %v6217_v31  ;;  %v6223_v12 = vpop.eup %4865  ;;  %v1895_v40 = vadd.f32 %v6217_v31, %v6213_v53  ;;  %v1472_v49 = vsub.f32 %v5738_v45, %v6215_v29  ;;  %v1473_v60 = vsub.f32 %v5744_v48, %v6215_v29  ;;  %v1485_v45 = vsub.f32 %v5791_v55, %v1306_v59 }
 0x318   : >> { %8238 = vst [vmem:[#allocation110_spill] sm:$0xff] %v6223_v12  ;;  %v1892_v46 = vadd.f32 %v6223_v12, %v1891_v30  ;;  %v6235_v27 = vpop.eup %4867  ;;  %4885 = vpow2.f32 %v1631_v36  ;;  %v1486_v30 = vsub.f32 %v5815_v32, %v1306_v59  ;;  %v8243_v48 = vmax.f32 %v5682_v13, %v5686_v15 }
 0x319   : >> { %8239 = vst [vmem:[#allocation111_spill] sm:$0xff] %v6235_v27  ;;  %v6238_v4 = vpop.eup %4869  ;;  %v1884_v51 = vadd.f32 %v6235_v27, %v1883_v33  ;;  %4887 = vpow2.f32 %v1633_v8  ;;  %v1637_v47 = vmul.f32 1.442695, %v1472_v49  ;;  %v6277_v32 = vsel %vm267_vm0, %v6046_v19, -1e+30  ;;  %v8250_v49 = vld [vmem:[#allocation23_spill] sm:$0xff] }
 0x31a   : >> { %v6228_v17 = vpop.xlane.xlu0 %1301  ;;  %1893 = vadd.xlane.f32.xlu0 %v1892_v46  ;;  %8240 = vst [vmem:[#allocation112_spill] sm:$0xff] %v6238_v4  ;;  %v6246_v1 = vpop.eup %4871  ;;  %v1896_v34 = vadd.f32 %v6238_v4, %v1895_v40  ;;  %v1428_v14 = vmax.f32 %v8243_v48, %v6243_v57  ;;  %4889 = vpow2.f32 %v1627_v26  ;;  %v1474_v59 = vsub.f32 %v5834_v38, %v6215_v29  ;;  %v8246_v38 = vld [vmem:[#allocation78_spill] sm:$0xff]  ;;  %v8247_v29 = vld [vmem:[#allocation79_spill] sm:$0xff] }
 0x31b   : >> { %8241 = vst [vmem:[#allocation113_spill] sm:$0xff] %v6246_v1  ;;  %v6252_v10 = vpop.eup %4873  ;;  %4891 = vpow2.f32 %v1629_v28  ;;  %v1639_v33 = vmul.f32 1.442695, %v1473_v60  ;;  %v1663_v40 = vmul.f32 1.442695, %v1485_v45  ;;  %v8248_v5 = vmax.f32 %v8246_v38, %v8247_v29  ;;  %v8252_v28 = vld [vmem:[#allocation67_spill] sm:$0xff] }
 0x31c   : >> { %8242 = vst [vmem:[#allocation114_spill] sm:$0xff] %v6252_v10  ;;  %1897 = vadd.xlane.f32.xlu1 %v1896_v34  ;;  %v1887_v55 = vadd.f32 %v6252_v10, %v6246_v1  ;;  %v6272_v46 = vpop.eup %4875  ;;  %4893 = vpow2.f32 %v1661_v62  ;;  %v1665_v42 = vmul.f32 1.442695, %v1486_v30  ;;  %v1649_v34 = vmul.f32 1.442695, %v1478_v41  ;;  %v8253_v45 = vld [vmem:[#allocation30_spill] sm:$0xff] }
 0x31d   : >> { %8244 = vst [vmem:[#allocation115_spill] sm:$0xff] %v6272_v46  ;;  %v6284_v0 = vpop.eup %4877  ;;  %4895 = vpow2.f32 %v1635_v11  ;;  %v1372_v8 = vmax.f32 %v8248_v5, %v6261_v24  ;;  %v6307_v60 = vsel %vm267_vm0, %v8252_v28, -1e+30  ;;  %v1480_v62 = vsub.f32 %v8253_v45, %v1298_v22  ;;  %v6310_v11 = vpop.xlane.xlu1 %1313  ;;  %v8255_v41 = vld [vmem:[#allocation13_spill] sm:$0xff] }
 0x31e   : >> { %v6256_v50 = vpop.xlane.xlu0 %1293  ;;  %1885 = vadd.xlane.f32.xlu0 %v1884_v51  ;;  %v1888_v20 = vadd.f32 %v6272_v46, %v1887_v55  ;;  %8245 = vst [vmem:[#allocation116_spill] sm:$0xff] %v6284_v0  ;;  %v6294_v26 = vpop.eup %4879  ;;  %v1479_v51 = vsub.f32 %v8250_v49, %v1298_v22  ;;  %4897 = vpow2.f32 %v1637_v47  ;;  %v1641_v30 = vmul.f32 1.442695, %v1474_v59  ;;  %v8256_v47 = vld [vmem:[#allocation14_spill] sm:$0xff]  ;;  %v8259_v22 = vld [vmem:[#allocation25_spill] sm:$0xff]  ;;  %v8260_v49 = vld [vmem:[#allocation15_spill] sm:$0xff] }
 0x31f   : >> { %v1475_v58 = vsub.f32 %v5752_v52, %v6256_v50  ;;  %v1476_v19 = vsub.f32 %v5754_v54, %v6256_v50  ;;  %8249 = vst [vmem:[#allocation78_spill] sm:$0xff] %v6294_v26  ;;  %v6299_v52 = vsel %vm267_vm0, %v6070_v6, -1e+30  ;;  %v6302_v54 = vpop.eup %4881  ;;  %4899 = vpow2.f32 %v1639_v33  ;;  %v8254_v6 = vld [vmem:[#allocation24_spill] sm:$0xff] }
 0x320   : >> { %1889 = vadd.xlane.f32.xlu1 %v1888_v20  ;;  %8251 = vst [vmem:[#allocation79_spill] sm:$0xff] %v6302_v54  ;;  %4901 = vpow2.f32 %v1663_v40  ;;  %v1481_v48 = vsub.f32 %v8254_v6, %v6228_v17  ;;  %v8257_v55 = vmax.f32 %v8255_v41, %v8256_v47  ;;  %v6318_v5 = vpop.eup %4883  ;;  %v1482_v33 = vsub.f32 %v8259_v22, %v6228_v17  ;;  %v8261_v40 = vld [vmem:[#allocation16_spill] sm:$0xff] }
 0x321   : >> { %8258 = vst [vmem:[#allocation23_spill] sm:$0xff] %v6318_v5  ;;  %4903 = vpow2.f32 %v1665_v42  ;;  %v1645_v59 = vmul.f32 1.442695, %v1476_v19  ;;  %v8262_v28 = vmax.f32 %v8260_v49, %v8261_v40  ;;  %v1899_v42 = vadd.f32 %v6294_v26, %v6284_v0  ;;  %v8266_v19 = vld [vmem:[#allocation37_spill] sm:$0xff] }
 0x322   : >> { %1429 = vmax.xlane.f32.xlu0 %v1428_v14  ;;  %v6288_v36 = vpop.xlane.xlu0 %1309  ;;  %v1643_v14 = vmul.f32 1.442695, %v1475_v58  ;;  %v1432_v20 = vmax.f32 %v8257_v55, %v6277_v32  ;;  %v6326_v6 = vpop.eup %4885  ;;  %4905 = vpow2.f32 %v1649_v34  ;;  %v1651_v58 = vmul.f32 1.442695, %v1479_v51 }
 0x323   : >> { %v1436_v45 = vmax.f32 %v8262_v28, %v6299_v52  ;;  %8263 = vst [vmem:[#allocation67_spill] sm:$0xff] %v6326_v6  ;;  %v6332_v55 = vpop.eup %4887  ;;  %v1653_v22 = vmul.f32 1.442695, %v1480_v62  ;;  %4907 = vpow2.f32 %v1641_v30  ;;  %v1477_v4 = vsub.f32 %v8266_v19, %v6256_v50  ;;  %v8270_v62 = vld [vmem:[#allocation26_spill] sm:$0xff]  ;;  %v8272_v19 = vld [vmem:[#allocation29_spill] sm:$0xff] }
 0x324   : >> { %1433 = vmax.xlane.f32.xlu1 %v1432_v20  ;;  %8265 = vst [vmem:[#allocation30_spill] sm:$0xff] %v6332_v55  ;;  %v8267_v51 = vmax.f32 %v6044_v21, %v6048_v18  ;;  %v6342_v28 = vpop.eup %4889  ;;  %v6347_v20 = vsel %vm267_vm0, %v6080_v9, -1e+30  ;;  %4909 = vpow2.f32 %v1643_v14  ;;  %v1487_v30 = vsub.f32 %v8270_v62, %v6288_v36  ;;  %v8276_v62 = vld [vmem:[#allocation35_spill] sm:$0xff] }
 0x325   : >> { %8268 = vst [vmem:[#allocation24_spill] sm:$0xff] %v6342_v28  ;;  %8269 = vst [vmem:[#allocation13_spill] sm:$0xff] %v6347_v20  ;;  %v6351_v50 = vpop.eup %4891  ;;  %v1491_v0 = vsub.f32 %v8272_v19, %v6310_v11  ;;  %v1657_v26 = vmul.f32 1.442695, %v1482_v33  ;;  %4911 = vpow2.f32 %v1645_v59  ;;  %v1907_v14 = vadd.f32 %v6332_v55, %v6326_v6  ;;  %v6366_v59 = vpop.xlane.xlu1 %1321 }
 0x326   : >> { %1373 = vmax.xlane.f32.xlu0 %v1372_v8  ;;  %v8264_v8 = vld [vmem:[#allocation28_spill] sm:$0xff]  ;;  %v6336_v27 = vpop.xlane.xlu0 %1317  ;;  %v1376_v34 = vmax.f32 %v8267_v51, %v6307_v60  ;;  %8271 = vst [vmem:[#allocation14_spill] sm:$0xff] %v6351_v50  ;;  %v8273_v51 = vld [vmem:[#allocation27_spill] sm:$0xff]  ;;  %v6357_v12 = vpop.eup %4893  ;;  %4913 = vpow2.f32 %v1651_v58  ;;  %v1483_v33 = vsub.f32 %v8276_v62, %v6228_v17  ;;  %v1647_v19 = vmul.f32 1.442695, %v1477_v4 }
 0x327   : >> { %v1490_v53 = vsub.f32 %v8264_v8, %v6310_v11  ;;  %v1655_v8 = vmul.f32 1.442695, %v1481_v48  ;;  %v1488_v46 = vsub.f32 %v8273_v51, %v6288_v36  ;;  %8274 = vst [vmem:[#allocation25_spill] sm:$0xff] %v6357_v12  ;;  %v1900_v48 = vadd.f32 %v6302_v54, %v1899_v42  ;;  %v8277_v51 = vld [vmem:[#allocation31_spill] sm:$0xff]  ;;  %v8279_v42 = vld [vmem:[#allocation17_spill] sm:$0xff]  ;;  %v8283_v62 = vld [vmem:[#allocation60_spill] sm:$0xff] }
 0x328   : >> { %1377 = vmax.xlane.f32.xlu1 %v1376_v34  ;;  %4915 = vpow2.f32 %v1653_v22  ;;  %v1493_v1 = vsub.f32 %v8277_v51, %v6336_v27  ;;  %v8280_v34 = vld [vmem:[#allocation18_spill] sm:$0xff]  ;;  %v1903_v22 = vadd.f32 %v6342_v28, %v6318_v5  ;;  %v6383_v4 = vsel %vm267_vm0, %v8283_v62, -1e+30  ;;  %v8287_v5 = vld [vmem:[#allocation33_spill] sm:$0xff] }
 0x329   : >> { %v1673_v9 = vmul.f32 1.442695, %v1490_v53  ;;  %4917 = vpow2.f32 %v1655_v8  ;;  %v1667_v53 = vmul.f32 1.442695, %v1487_v30  ;;  %v8281_v6 = vmax.f32 %v8279_v42, %v8280_v34  ;;  %8284 = vst [vmem:[#allocation37_spill] sm:$0xff] %v6383_v4  ;;  %v8285_v8 = vld [vmem:[#allocation32_spill] sm:$0xff] }
 0x32a   : >> { %1437 = vmax.xlane.f32.xlu0 %v1436_v45  ;;  %v6362_v45 = vpop.eup %4895  ;;  %4919 = vpow2.f32 %v1657_v26  ;;  %v1669_v51 = vmul.f32 1.442695, %v1488_v46  ;;  %v1494_v30 = vsub.f32 %v8285_v8, %v6336_v27  ;;  %v1496_v28 = vsub.f32 %v8287_v5, %v6366_v59  ;;  %v8289_v46 = vld [vmem:[#allocation43_spill] sm:$0xff] }
 0x32b   : >> { %8275 = vst [vmem:[#allocation15_spill] sm:$0xff] %v6362_v45  ;;  %v6370_v58 = vpop.eup %4897  ;;  %v1440_v55 = vmax.f32 %v8281_v6, %v6347_v20  ;;  %4921 = vpow2.f32 %v1673_v9  ;;  %v1675_v6 = vmul.f32 1.442695, %v1491_v0  ;;  %v1908_v10 = vadd.f32 %v6362_v45, %v1907_v14  ;;  %v8291_v9 = vld [vmem:[#allocation39_spill] sm:$0xff] }
 0x32c   : >> { %8278 = vst [vmem:[#allocation16_spill] sm:$0xff] %v6370_v58  ;;  %v6378_v17 = vpop.eup %4899  ;;  %v1659_v62 = vmul.f32 1.442695, %v1483_v33  ;;  %4923 = vpow2.f32 %v1647_v19  ;;  %v1489_v26 = vsub.f32 %v8289_v46, %v6288_v36  ;;  %v1679_v8 = vmul.f32 1.442695, %v1493_v1  ;;  %v8294_v36 = vld [vmem:[#allocation40_spill] sm:$0xff] }
 0x32d   : >> { %8282 = vst [vmem:[#allocation28_spill] sm:$0xff] %v6378_v17  ;;  %v6389_v54 = vpop.eup %4901  ;;  %1441 = vmax.xlane.f32.xlu1 %v1440_v55  ;;  %4925 = vpow2.f32 %v1667_v53  ;;  %v1904_v5 = vadd.f32 %v6351_v50, %v1903_v22  ;;  %v1911_v55 = vadd.f32 %v6378_v17, %v6370_v58  ;;  %v6410_v33 = vsel %vm267_vm0, %v6066_v43, -1e+30  ;;  %v8297_v58 = vld [vmem:[#allocation83_spill] sm:$0xff] }
 0x32e   : >> { %1901 = vadd.xlane.f32.xlu0 %v1900_v48  ;;  %v6387_v48 = vpop.xlane.xlu0 %1325  ;;  %8286 = vst [vmem:[#allocation26_spill] sm:$0xff] %v6389_v54  ;;  %v6394_v20 = vpop.eup %4903  ;;  %8293 = vst [vmem:[#allocation31_spill] sm:$0xff] %v6410_v33  ;;  %4927 = vpow2.f32 %v1669_v51  ;;  %v1681_v1 = vmul.f32 1.442695, %v1494_v30  ;;  %v1685_v46 = vmul.f32 1.442695, %v1496_v28  ;;  %v8298_v43 = vmax.f32 %v6064_v23, %v8297_v58 }
 0x32f   : >> { %8288 = vst [vmem:[#allocation29_spill] sm:$0xff] %v6394_v20  ;;  %v6398_v34 = vpop.eup %4905  ;;  %v1499_v0 = vsub.f32 %v8291_v9, %v6387_v48  ;;  %v1500_v19 = vsub.f32 %v8294_v36, %v6387_v48  ;;  %4929 = vpow2.f32 %v1675_v6  ;;  %v6418_v9 = vpop.xlane.xlu1 %1329  ;;  %v8300_v30 = vld [vmem:[#allocation64_spill] sm:$0xff]  ;;  %v1671_v6 = vmul.f32 1.442695, %v1489_v26  ;;  %v8307_v26 = vld [vmem:[#allocation19_spill] sm:$0xff] }
 0x330   : >> { %8290 = vst [vmem:[#allocation27_spill] sm:$0xff] %v6398_v34  ;;  %v6405_v14 = vpop.eup %4907  ;;  %v1380_v45 = vmax.f32 %v8298_v43, %v6383_v4  ;;  %v6429_v36 = vsel %vm267_vm0, %v8300_v30, -1e+30  ;;  %4931 = vpow2.f32 %v1659_v62  ;;  %v8306_v30 = vld [vmem:[#allocation41_spill] sm:$0xff] }
 0x331   : >> { %8292 = vst [vmem:[#allocation35_spill] sm:$0xff] %v6405_v14  ;;  %v6414_v53 = vpop.eup %4909  ;;  %1905 = vadd.xlane.f32.xlu1 %v1904_v5  ;;  %8301 = vst [vmem:[#allocation33_spill] sm:$0xff] %v6429_v36  ;;  %v8304_v5 = vld [vmem:[#allocation36_spill] sm:$0xff]  ;;  %4933 = vpow2.f32 %v1679_v8  ;;  %v1691_v58 = vmul.f32 1.442695, %v1499_v0  ;;  %v1912_v43 = vadd.f32 %v6405_v14, %v1911_v55  ;;  %v1502_v23 = vsub.f32 %v8306_v30, %v6418_v9 }
 0x332   : >> { %1909 = vadd.xlane.f32.xlu0 %v1908_v10  ;;  %8295 = vst [vmem:[#allocation60_spill] sm:$0xff] %v6414_v53  ;;  %v8296_v10 = vld [vmem:[#allocation34_spill] sm:$0xff]  ;;  %v6424_v51 = vpop.eup %4911  ;;  %v1492_v50 = vsub.f32 %v8304_v5, %v6310_v11  ;;  %4935 = vpow2.f32 %v1681_v1  ;;  %v1693_v62 = vmul.f32 1.442695, %v1500_v19  ;;  %v8313_v19 = vld [vmem:[#allocation48_spill] sm:$0xff] }
 0x333   : >> { %v1497_v22 = vsub.f32 %v8296_v10, %v6366_v59  ;;  %8299 = vst [vmem:[#allocation32_spill] sm:$0xff] %v6424_v51  ;;  %v8302_v10 = vld [vmem:[#allocation47_spill] sm:$0xff]  ;;  %v6433_v17 = vpop.eup %4913  ;;  %4937 = vpow2.f32 %v1685_v46  ;;  %v1915_v0 = vadd.f32 %v6424_v51, %v6414_v53  ;;  %v1501_v5 = vsub.f32 %v8313_v19, %v6387_v48  ;;  %v8316_v46 = vld [vmem:[#allocation86_spill] sm:$0xff]  ;;  %v8319_v53 = vld [vmem:[#allocation85_spill] sm:$0xff] }
 0x334   : >> { %v1495_v28 = vsub.f32 %v8302_v10, %v6336_v27  ;;  %8303 = vst [vmem:[#allocation43_spill] sm:$0xff] %v6433_v17  ;;  %v6438_v4 = vpop.eup %4915  ;;  %v8308_v27 = vld [vmem:[#allocation20_spill] sm:$0xff]  ;;  %4939 = vpow2.f32 %v1671_v6  ;;  %v6467_v6 = vsel %vm267_vm0, %v8319_v53, -1e+30  ;;  %v1697_v19 = vmul.f32 1.442695, %v1502_v23 }
 0x335   : >> { %8305 = vst [vmem:[#allocation39_spill] sm:$0xff] %v6438_v4  ;;  %v8309_v10 = vmax.f32 %v8307_v26, %v8308_v27  ;;  %v6446_v56 = vpop.eup %4917  ;;  %v1687_v11 = vmul.f32 1.442695, %v1497_v22  ;;  %1913 = vadd.xlane.f32.xlu1 %v1912_v43  ;;  %4941 = vpow2.f32 %v1691_v58  ;;  %v8315_v22 = vld [vmem:[#allocation84_spill] sm:$0xff]  ;;  %8320 = vst [vmem:[#allocation36_spill] sm:$0xff] %v6467_v6  ;;  %v8325_v23 = vld [vmem:[#allocation21_spill] sm:$0xff] }
 0x336   : >> { %1381 = vmax.xlane.f32.xlu0 %v1380_v45  ;;  %8310 = vst [vmem:[#allocation40_spill] sm:$0xff] %v6446_v56  ;;  %v8311_v45 = vld [vmem:[#allocation42_spill] sm:$0xff]  ;;  %v6452_v55 = vpop.eup %4919  ;;  %v1683_v1 = vmul.f32 1.442695, %v1495_v28  ;;  %4943 = vpow2.f32 %v1693_v62  ;;  %v1695_v53 = vmul.f32 1.442695, %v1501_v5 }
 0x337   : >> { %v1444_v42 = vmax.f32 %v8309_v10, %v6410_v33  ;;  %v1503_v8 = vsub.f32 %v8311_v45, %v6418_v9  ;;  %8312 = vst [vmem:[#allocation34_spill] sm:$0xff] %v6452_v55  ;;  %v6456_v30 = vpop.eup %4921  ;;  %v1677_v10 = vmul.f32 1.442695, %v1492_v50  ;;  %v8317_v45 = vmax.f32 %v8315_v22, %v8316_v46  ;;  %v8321_v28 = vld [vmem:[#allocation38_spill] sm:$0xff]  ;;  %v8383_v33 = vld [vmem:[#allocation95_spill] sm:$0xff] }
 0x338   : >> { %8314 = vst [vmem:[#allocation64_spill] sm:$0xff] %v6456_v30  ;;  %v6462_v14 = vpop.eup %4923  ;;  %v1498_v48 = vsub.f32 %v8321_v28, %v6366_v59  ;;  %4945 = vpow2.f32 %v1687_v11  ;;  %v8326_v59 = vld [vmem:[#allocation22_spill] sm:$0xff]  ;;  %v8329_v28 = vld [vmem:[#allocation44_spill] sm:$0xff] }
 0x339   : >> { %v1384_v43 = vmax.f32 %v8317_v45, %v6429_v36  ;;  %8318 = vst [vmem:[#allocation47_spill] sm:$0xff] %v6462_v14  ;;  %v6471_v50 = vpop.eup %4925  ;;  %v1699_v58 = vmul.f32 1.442695, %v1503_v8  ;;  %v1923_v45 = vadd.f32 %v6452_v55, %v6446_v56  ;;  %4947 = vpow2.f32 %v1683_v1  ;;  %v8348_v55 = vld [vmem:[#allocation52_spill] sm:$0xff] }
 0x33a   : >> { %1445 = vmax.xlane.f32.xlu0 %v1444_v42  ;;  %8322 = vst [vmem:[#allocation41_spill] sm:$0xff] %v6471_v50  ;;  %v1916_v42 = vadd.f32 %v6462_v14, %v1915_v0  ;;  %v6476_v51 = vpop.eup %4927  ;;  %4949 = vpow2.f32 %v1677_v10  ;;  %v8327_v62 = vmax.f32 %v8325_v23, %v8326_v59  ;;  %v1919_v8 = vadd.f32 %v6433_v17, %v6398_v34  ;;  %v8351_v14 = vld [vmem:[#allocation57_spill] sm:$0xff] }
 0x33b   : >> { %1385 = vmax.xlane.f32.xlu1 %v1384_v43  ;;  %8323 = vst [vmem:[#allocation42_spill] sm:$0xff] %v6476_v51  ;;  %v6478_v3 = vpop.eup %4929  ;;  %v1689_v43 = vmul.f32 1.442695, %v1498_v48  ;;  %v1504_v56 = vsub.f32 %v8329_v28, %v6418_v9  ;;  %4951 = vpow2.f32 %v1697_v19  ;;  %v1931_v10 = vadd.f32 %v6476_v51, %v6471_v50 }
 0x33c   : >> { %8324 = vst [vmem:[#allocation48_spill] sm:$0xff] %v6478_v3  ;;  %v1448_v11 = vmax.f32 %v8327_v62, %v6467_v6  ;;  %v6486_v0 = vpop.eup %4931  ;;  %4953 = vpow2.f32 %v1699_v58  ;;  %v1920_v48 = vadd.f32 %v6438_v4, %v1919_v8  ;;  %v1927_v9 = vadd.f32 %v6389_v54, %v6357_v12 }
 0x33d   : >> { %8328 = vst [vmem:[#allocation85_spill] sm:$0xff] %v6486_v0  ;;  %v6490_v1 = vpop.eup %4933  ;;  %v1924_v5 = vadd.f32 %v6486_v0, %v1923_v45  ;;  %4955 = vpow2.f32 %v1695_v53  ;;  %v1701_v58 = vmul.f32 1.442695, %v1504_v56  ;;  %v8346_v0 = vld [vmem:[#allocation45_spill] sm:$0xff] }
 0x33e   : >> { %1917 = vadd.xlane.f32.xlu0 %v1916_v42  ;;  %8330 = vst [vmem:[#allocation38_spill] sm:$0xff] %v6490_v1  ;;  %v6495_v42 = vpop.eup %4935  ;;  %4957 = vpow2.f32 %v1689_v43  ;;  %v1928_v8 = vadd.f32 %v6394_v20, %v1927_v9  ;;  %v1935_v43 = vadd.f32 %v6478_v3, %v6456_v30  ;;  %v8341_v9 = vld [vmem:[#allocation49_spill] sm:$0xff] }
 0x33f   : >> { %1449 = vmax.xlane.f32.xlu1 %v1448_v11  ;;  %8331 = vst [vmem:[#allocation44_spill] sm:$0xff] %v6495_v42  ;;  %v6497_v62 = vpop.eup %4937  ;;  %v1939_v53 = vadd.f32 %v6495_v42, %v6490_v1  ;;  %4959 = vpow2.f32 %v1701_v58 }
 0x340   : >> { %8332 = vst [vmem:[#allocation117_spill] sm:$0xff] %v6497_v62  ;;  %v6502_v19 = vpop.eup %4939 }
 0x341   : >> { %8333 = vst [vmem:[#allocation118_spill] sm:$0xff] %v6502_v19  ;;  %v6504_v11 = vpop.eup %4941  ;;  %v1932_v45 = vadd.f32 %v6502_v19, %v1931_v10 }
 0x342   : >> { %1925 = vadd.xlane.f32.xlu0 %v1924_v5  ;;  %8334 = vst [vmem:[#allocation119_spill] sm:$0xff] %v6504_v11  ;;  %v6509_v28 = vpop.eup %4943  ;;  %v1334_v5 = vpop.xlane.xlu0 %1333 }
 0x343   : >> { %1921 = vadd.xlane.f32.xlu1 %v1920_v48  ;;  %8335 = vst [vmem:[#allocation120_spill] sm:$0xff] %v6509_v28  ;;  %v6511_v50 = vpop.eup %4945  ;;  %v1338_v48 = vpop.xlane.xlu1 %1337  ;;  %v1947_v1 = vadd.f32 %v6509_v28, %v6504_v11 }
 0x344   : >> { %8336 = vst [vmem:[#allocation121_spill] sm:$0xff] %v6511_v50  ;;  %v6516_v56 = vpop.eup %4947  ;;  %v1508_v19 = vsub.f32 %v8341_v9, %v1338_v48  ;;  %v1943_v58 = vadd.f32 %v6511_v50, %v6497_v62  ;;  %v1505_v9 = vsub.f32 %v8346_v0, %v1334_v5 }
 0x345   : >> { %8337 = vst [vmem:[#allocation122_spill] sm:$0xff] %v6516_v56  ;;  %v6518_v51 = vpop.eup %4949  ;;  %v1940_v10 = vadd.f32 %v6516_v56, %v1939_v53  ;;  %v8344_v56 = vld [vmem:[#allocation50_spill] sm:$0xff] }
 0x346   : >> { %1933 = vadd.xlane.f32.xlu0 %v1932_v45  ;;  %8338 = vst [vmem:[#allocation123_spill] sm:$0xff] %v6518_v51  ;;  %v6523_v42 = vpop.eup %4951  ;;  %v1936_v30 = vadd.f32 %v6518_v51, %v1935_v43  ;;  %v1342_v53 = vpop.xlane.xlu0 %1341  ;;  %v1510_v20 = vsub.f32 %v8344_v56, %v1338_v48  ;;  %v1709_v54 = vmul.f32 1.442695, %v1508_v19  ;;  %v8347_v43 = vld [vmem:[#allocation46_spill] sm:$0xff]  ;;  %v1507_v56 = vsub.f32 %v8348_v55, %v1334_v5 }
 0x347   : >> { %1929 = vadd.xlane.f32.xlu1 %v1928_v8  ;;  %8339 = vst [vmem:[#allocation124_spill] sm:$0xff] %v6523_v42  ;;  %v6525_v45 = vpop.eup %4953  ;;  %v8343_v8 = vld [vmem:[#allocation51_spill] sm:$0xff]  ;;  %v1506_v51 = vsub.f32 %v8347_v43, %v1334_v5  ;;  %v1703_v0 = vmul.f32 1.442695, %v1505_v9  ;;  %v8352_v43 = vld [vmem:[#allocation58_spill] sm:$0xff]  ;;  %v8355_v9 = vld [vmem:[#allocation56_spill] sm:$0xff] }
 0x348   : >> { %8340 = vst [vmem:[#allocation125_spill] sm:$0xff] %v6525_v45  ;;  %v6531_v3 = vpop.eup %4955  ;;  %v1509_v12 = vsub.f32 %v8343_v8, %v1338_v48  ;;  %v1951_v8 = vadd.f32 %v6525_v45, %v6523_v42  ;;  %v8349_v48 = vld [vmem:[#allocation55_spill] sm:$0xff]  ;;  %4961 = vpow2.f32 %v1709_v54  ;;  %v8353_v42 = vld [vmem:[#allocation53_spill] sm:$0xff]  ;;  %v8354_v5 = vld [vmem:[#allocation54_spill] sm:$0xff]  ;;  %v1513_v54 = vsub.f32 %v8355_v9, %v1342_v53 }
 0x349   : >> { %8342 = vst [vmem:[#allocation49_spill] sm:$0xff] %v6531_v3  ;;  %v1948_v11 = vadd.f32 %v6531_v3, %v1947_v1  ;;  %v6536_v28 = vpop.eup %4957  ;;  %v1511_v55 = vsub.f32 %v8353_v42, %v1342_v53  ;;  %v8357_v42 = vld [vmem:[#allocation62_spill] sm:$0xff] }
 0x34a   : >> { %1941 = vadd.xlane.f32.xlu0 %v1940_v10  ;;  %8345 = vst [vmem:[#allocation51_spill] sm:$0xff] %v6536_v28  ;;  %v1346_v10 = vpop.xlane.xlu1 %1345  ;;  %v1944_v62 = vadd.f32 %v6536_v28, %v1943_v58  ;;  %v1711_v50 = vmul.f32 1.442695, %v1509_v12  ;;  %v6545_v3 = vpop.eup %4959  ;;  %v1707_v12 = vmul.f32 1.442695, %v1507_v56 }
 0x34b   : >> { %1937 = vadd.xlane.f32.xlu1 %v1936_v30  ;;  %v1713_v30 = vmul.f32 1.442695, %v1510_v20  ;;  %v1514_v1 = vsub.f32 %v8349_v48, %v1346_v10  ;;  %8350 = vst [vmem:[#allocation50_spill] sm:$0xff] %v6545_v3  ;;  %v1515_v19 = vsub.f32 %v8351_v14, %v1346_v10  ;;  %v1350_v4 = vpop.xlane.xlu0 %1349  ;;  %v1516_v58 = vsub.f32 %v8352_v43, %v1346_v10 }
 0x34c   : >> { %v1952_v28 = vadd.f32 %v6545_v3, %v1951_v8  ;;  %4963 = vpow2.f32 %v1711_v50  ;;  %v1512_v48 = vsub.f32 %v8354_v5, %v1342_v53  ;;  %v8356_v8 = vld [vmem:[#allocation59_spill] sm:$0xff]  ;;  %v1715_v56 = vmul.f32 1.442695, %v1511_v55 }
 0x34d   : >> { %4965 = vpow2.f32 %v1713_v30  ;;  %v1723_v14 = vmul.f32 1.442695, %v1515_v19  ;;  %v1725_v10 = vmul.f32 1.442695, %v1516_v58  ;;  %v1517_v50 = vsub.f32 %v8356_v8, %v1350_v4  ;;  %v8359_v53 = vld [vmem:[#allocation63_spill] sm:$0xff] }
 0x34e   : >> { %1949 = vadd.xlane.f32.xlu0 %v1948_v11  ;;  %v1705_v11 = vmul.f32 1.442695, %v1506_v51  ;;  %v6551_v20 = vpop.xlane.xlu1 %1353  ;;  %4967 = vpow2.f32 %v1703_v0  ;;  %v1518_v43 = vsub.f32 %v8357_v42, %v1350_v4  ;;  %v1717_v30 = vmul.f32 1.442695, %v1512_v48 }
 0x34f   : >> { %1945 = vadd.xlane.f32.xlu1 %v1944_v62  ;;  %v1721_v62 = vmul.f32 1.442695, %v1514_v1  ;;  %v6555_v51 = vpop.xlane.xlu0 %1357  ;;  %v8358_v1 = vld [vmem:[#allocation61_spill] sm:$0xff]  ;;  %v1719_v0 = vmul.f32 1.442695, %v1513_v54  ;;  %v1520_v19 = vsub.f32 %v8359_v53, %v6551_v20 }
 0x350   : >> { %4969 = vpow2.f32 %v1705_v11  ;;  %v1727_v11 = vmul.f32 1.442695, %v1517_v50  ;;  %v1729_v58 = vmul.f32 1.442695, %v1518_v43 }
 0x351   : >> { %4971 = vpow2.f32 %v1707_v12  ;;  %v8360_v12 = vld [vmem:[#allocation66_spill] sm:$0xff] }
 0x352   : >> { %v6559_v45 = vpop.xlane.xlu1 %1361  ;;  %4973 = vpow2.f32 %v1721_v62  ;;  %v1521_v55 = vsub.f32 %v8360_v12, %v6551_v20  ;;  %v6570_v62 = vpop.eup %4961 }
 0x353   : >> { %1953 = vadd.xlane.f32.xlu1 %v1952_v28  ;;  %v1519_v28 = vsub.f32 %v8358_v1, %v1350_v4  ;;  %4975 = vpow2.f32 %v1723_v14  ;;  %v6564_v5 = vpop.xlane.xlu0 %1421  ;;  %8361 = vst [vmem:[#allocation45_spill] sm:$0xff] %v6570_v62  ;;  %v1733_v14 = vmul.f32 1.442695, %v1520_v19  ;;  %v8367_v1 = vld [vmem:[#allocation65_spill] sm:$0xff] }
 0x354   : >> { %4977 = vpow2.f32 %v1725_v10  ;;  %v8364_v10 = vld [vmem:[#allocation87_spill] sm:$0xff]  ;;  %v1522_v53 = vsub.f32 %v8367_v1, %v6551_v20 }
 0x355   : >> { %4979 = vpow2.f32 %v1715_v56  ;;  %v1731_v4 = vmul.f32 1.442695, %v1519_v28  ;;  %v8365_v56 = vld [vmem:[#allocation88_spill] sm:$0xff] }
 0x356   : >> { %v6568_v9 = vpop.xlane.xlu1 %1425  ;;  %4981 = vpow2.f32 %v1717_v30  ;;  %v6572_v48 = vpop.eup %4963  ;;  %v1735_v30 = vmul.f32 1.442695, %v1521_v55 }
 0x357   : >> { %8362 = vst [vmem:[#allocation46_spill] sm:$0xff] %v6572_v48  ;;  %4983 = vpow2.f32 %v1719_v0  ;;  %v6574_v8 = vpop.eup %4965 }
 0x358   : >> { %8363 = vst [vmem:[#allocation52_spill] sm:$0xff] %v6574_v8  ;;  %4985 = vpow2.f32 %v1727_v11  ;;  %v6578_v43 = vpop.eup %4967  ;;  %v8369_v11 = vld [vmem:[#allocation89_spill] sm:$0xff] }
 0x359   : >> { %8366 = vst [vmem:[#allocation55_spill] sm:$0xff] %v6578_v43  ;;  %4987 = vpow2.f32 %v1729_v58 }
 0x35a   : >> { %v6583_v0 = vpop.eup %4969  ;;  %4989 = vpow2.f32 %v1731_v4 }
 0x35b   : >> { %8368 = vst [vmem:[#allocation57_spill] sm:$0xff] %v6583_v0  ;;  %4991 = vpow2.f32 %v1733_v14 }
 0x35f   : >> { %v1390_v54 = vpop.xlane.xlu0 %1389 }
 0x360   : >> { %v1547_v50 = vsub.f32 %v8364_v10, %v1390_v54  ;;  %v1548_v42 = vsub.f32 %v8365_v56, %v1390_v54  ;;  %v1549_v28 = vsub.f32 %v6099_v37, %v1390_v54  ;;  %v6586_v10 = vpop.eup %4971  ;;  %v8371_v56 = vld [vmem:[#allocation91_spill] sm:$0xff]  ;;  %v8373_v37 = vld [vmem:[#allocation68_spill] sm:$0xff] }
 0x361   : >> { %v1394_v12 = vpop.xlane.xlu1 %1393  ;;  %8370 = vst [vmem:[#allocation58_spill] sm:$0xff] %v6586_v10  ;;  %v6592_v20 = vpop.eup %4973  ;;  %v1523_v55 = vsub.f32 %v8373_v37, %v6555_v51 }
 0x362   : >> { %v1787_v19 = vmul.f32 1.442695, %v1547_v50  ;;  %v1789_v3 = vmul.f32 1.442695, %v1548_v42  ;;  %v1550_v34 = vsub.f32 %v8369_v11, %v1394_v12  ;;  %v1551_v17 = vsub.f32 %v8371_v56, %v1394_v12  ;;  %8372 = vst [vmem:[#allocation53_spill] sm:$0xff] %v6592_v20  ;;  %v6596_v54 = vpop.eup %4975  ;;  %v8375_v50 = vld [vmem:[#allocation70_spill] sm:$0xff] }
 0x363   : >> { %v1552_v58 = vsub.f32 %v6113_v39, %v1394_v12  ;;  %v6590_v6 = vpop.xlane.xlu0 %1365  ;;  %8374 = vst [vmem:[#allocation54_spill] sm:$0xff] %v6596_v54  ;;  %v1524_v42 = vsub.f32 %v8375_v50, %v6555_v51  ;;  %v1791_v14 = vmul.f32 1.442695, %v1549_v28  ;;  %v6602_v39 = vpop.eup %4977  ;;  %v1737_v12 = vmul.f32 1.442695, %v1522_v53  ;;  %v8376_v56 = vld [vmem:[#allocation69_spill] sm:$0xff] }
 0x364   : >> { %4993 = vpow2.f32 %v1787_v19  ;;  %v1793_v4 = vmul.f32 1.442695, %v1550_v34  ;;  %v1795_v1 = vmul.f32 1.442695, %v1551_v17  ;;  %v1525_v59 = vsub.f32 %v8376_v56, %v6555_v51  ;;  %v6606_v37 = vpop.eup %4979  ;;  %v8378_v34 = vld [vmem:[#allocation71_spill] sm:$0xff] }
 0x365   : >> { %4995 = vpow2.f32 %v1789_v3  ;;  %v6600_v11 = vpop.xlane.xlu1 %1369  ;;  %8377 = vst [vmem:[#allocation56_spill] sm:$0xff] %v6606_v37  ;;  %v1526_v19 = vsub.f32 %v8378_v34, %v6559_v45  ;;  %v1797_v23 = vmul.f32 1.442695, %v1552_v58  ;;  %v6610_v3 = vpop.eup %4981  ;;  %v1739_v17 = vmul.f32 1.442695, %v1523_v55 }
 0x366   : >> { %4997 = vpow2.f32 %v1735_v30  ;;  %8379 = vst [vmem:[#allocation59_spill] sm:$0xff] %v6610_v3  ;;  %v6613_v36 = vpop.eup %4983  ;;  %v1741_v53 = vmul.f32 1.442695, %v1524_v42  ;;  %v1743_v34 = vmul.f32 1.442695, %v1525_v59 }
 0x367   : >> { %4999 = vpow2.f32 %v1793_v4  ;;  %v1398_v50 = vpop.xlane.xlu0 %1397  ;;  %v6616_v56 = vpop.eup %4985  ;;  %v1745_v46 = vmul.f32 1.442695, %v1526_v19 }
 0x368   : >> { %5001 = vpow2.f32 %v1795_v1  ;;  %v1553_v28 = vsub.f32 %v6117_v44, %v1398_v50  ;;  %v1554_v51 = vsub.f32 %v6120_v7, %v1398_v50  ;;  %v1555_v58 = vsub.f32 %v6129_v25, %v1398_v50  ;;  %v6619_v4 = vpop.eup %4987 }
 0x369   : >> { %5003 = vpow2.f32 %v1791_v14  ;;  %v1402_v30 = vpop.xlane.xlu1 %1401  ;;  %v6623_v1 = vpop.eup %4989 }
 0x36a   : >> { %5005 = vpow2.f32 %v1737_v12  ;;  %v1556_v55 = vsub.f32 %v6124_v61, %v1402_v30  ;;  %v1557_v44 = vsub.f32 %v6131_v16, %v1402_v30  ;;  %v1799_v42 = vmul.f32 1.442695, %v1553_v28  ;;  %v6625_v7 = vpop.eup %4991  ;;  %v8380_v12 = vld [vmem:[#allocation93_spill] sm:$0xff] }
 0x36b   : >> { %5007 = vpow2.f32 %v1797_v23  ;;  %v1801_v14 = vmul.f32 1.442695, %v1554_v51  ;;  %v1558_v59 = vsub.f32 %v8380_v12, %v1402_v30  ;;  %v1803_v25 = vmul.f32 1.442695, %v1555_v58  ;;  %v8384_v51 = vld [vmem:[#allocation97_spill] sm:$0xff] }
 0x36c   : >> { %5009 = vpow2.f32 %v1739_v17  ;;  %v1805_v61 = vmul.f32 1.442695, %v1556_v55  ;;  %v1807_v23 = vmul.f32 1.442695, %v1557_v44  ;;  %v8382_v17 = vld [vmem:[#allocation94_spill] sm:$0xff] }
 0x36d   : >> { %5011 = vpow2.f32 %v1741_v53  ;;  %v1809_v12 = vmul.f32 1.442695, %v1558_v59  ;;  %v8390_v59 = vld [vmem:[#allocation99_spill] sm:$0xff] }
 0x36e   : >> { %v6628_v22 = vpop.eup %4993  ;;  %5013 = vpow2.f32 %v1743_v34  ;;  %v8386_v34 = vld [vmem:[#allocation73_spill] sm:$0xff] }
 0x36f   : >> { %8381 = vst [vmem:[#allocation62_spill] sm:$0xff] %v6628_v22  ;;  %v6630_v19 = vpop.eup %4995  ;;  %5015 = vpow2.f32 %v1745_v46  ;;  %v1406_v16 = vpop.xlane.xlu0 %1405  ;;  %v1527_v58 = vsub.f32 %v8386_v34, %v6559_v45  ;;  %v8389_v34 = vld [vmem:[#allocation98_spill] sm:$0xff] }
 0x370   : >> { %v6632_v50 = vpop.eup %4997  ;;  %5017 = vpow2.f32 %v1799_v42  ;;  %v1559_v28 = vsub.f32 %v8382_v17, %v1406_v16  ;;  %v1560_v53 = vsub.f32 %v8383_v33, %v1406_v16  ;;  %v1561_v27 = vsub.f32 %v8384_v51, %v1406_v16  ;;  %v8388_v51 = vld [vmem:[#allocation96_spill] sm:$0xff] }
 0x371   : >> { %v6637_v30 = vpop.eup %4999  ;;  %5019 = vpow2.f32 %v1801_v14  ;;  %v1410_v46 = vpop.xlane.xlu1 %1409  ;;  %v2011_v55 = vadd.f32 %v6630_v19, %v6628_v22  ;;  %v1955_v33 = vadd.f32 %v6583_v0, %v6578_v43  ;;  %v8391_v43 = vld [vmem:[#allocation72_spill] sm:$0xff] }
 0x372   : >> { %8385 = vst [vmem:[#allocation61_spill] sm:$0xff] %v6637_v30  ;;  %v6643_v44 = vpop.eup %5001  ;;  %5021 = vpow2.f32 %v1803_v25  ;;  %v1811_v42 = vmul.f32 1.442695, %v1559_v28  ;;  %v1813_v17 = vmul.f32 1.442695, %v1560_v53  ;;  %v1562_v26 = vsub.f32 %v8388_v51, %v1410_v46 }
 0x373   : >> { %v6647_v16 = vpop.eup %5003  ;;  %5023 = vpow2.f32 %v1805_v61  ;;  %v1563_v14 = vsub.f32 %v8389_v34, %v1410_v46  ;;  %v1564_v31 = vsub.f32 %v8390_v59, %v1410_v46  ;;  %v1815_v22 = vmul.f32 1.442695, %v1561_v27 }
 0x374   : >> { %8387 = vst [vmem:[#allocation63_spill] sm:$0xff] %v6647_v16  ;;  %v6652_v35 = vpop.eup %5005  ;;  %5025 = vpow2.f32 %v1807_v23  ;;  %v2012_v25 = vadd.f32 %v6647_v16, %v2011_v55  ;;  %v2015_v28 = vadd.f32 %v6643_v44, %v6637_v30  ;;  %v1528_v61 = vsub.f32 %v8391_v43, %v6559_v45  ;;  %v8392_v45 = vld [vmem:[#allocation100_spill] sm:$0xff] }
 0x375   : >> { %v6657_v53 = vpop.eup %5007  ;;  %5027 = vpow2.f32 %v1809_v12  ;;  %v1817_v51 = vmul.f32 1.442695, %v1562_v26  ;;  %v1959_v34 = vadd.f32 %v6572_v48, %v6570_v62  ;;  %v1819_v23 = vmul.f32 1.442695, %v1563_v14  ;;  %v8393_v12 = vld [vmem:[#allocation101_spill] sm:$0xff] }
 0x376   : >> { %v6663_v46 = vpop.eup %5009  ;;  %5029 = vpow2.f32 %v1811_v42  ;;  %2013 = vadd.xlane.f32.xlu0 %v2012_v25  ;;  %v2016_v27 = vadd.f32 %v6657_v53, %v2015_v28  ;;  %v1747_v59 = vmul.f32 1.442695, %v1527_v58  ;;  %v1821_v0 = vmul.f32 1.442695, %v1564_v31  ;;  %v8395_v28 = vld [vmem:[#allocation103_spill] sm:$0xff] }
 0x377   : >> { %v6666_v55 = vpop.eup %5011  ;;  %5031 = vpow2.f32 %v1813_v17  ;;  %v1414_v16 = vpop.xlane.xlu0 %1413  ;;  %v1956_v26 = vadd.f32 %v6586_v10, %v1955_v33  ;;  %v1749_v25 = vmul.f32 1.442695, %v1528_v61  ;;  %v1960_v58 = vadd.f32 %v6574_v8, %v1959_v34 }
 0x378   : >> { %v6668_v30 = vpop.eup %5013  ;;  %5033 = vpow2.f32 %v1815_v22  ;;  %2017 = vadd.xlane.f32.xlu1 %v2016_v27  ;;  %v1565_v43 = vsub.f32 %v8392_v45, %v1414_v16  ;;  %v1566_v42 = vsub.f32 %v8393_v12, %v1414_v16  ;;  %v1567_v62 = vsub.f32 %v8395_v28, %v1414_v16  ;;  %v8396_v12 = vld [vmem:[#allocation9_spill] sm:$0xff]  ;;  %v8398_v28 = vld [vmem:[#allocation104_spill] sm:$0xff] }
 0x379   : >> { %v6673_v14 = vpop.eup %5015  ;;  %5035 = vpow2.f32 %v1817_v51  ;;  %v1418_v31 = vpop.xlane.xlu1 %1417  ;;  %v1967_v33 = vadd.f32 %v6596_v54, %v6592_v20  ;;  %v1571_v61 = vsub.f32 %v8396_v12, %v6564_v5  ;;  %v8397_v51 = vld [vmem:[#allocation102_spill] sm:$0xff] }
 0x37a   : >> { %8394 = vst [vmem:[#allocation66_spill] sm:$0xff] %v6673_v14  ;;  %v6677_v17 = vpop.eup %5017  ;;  %5037 = vpow2.f32 %v1819_v23  ;;  %1957 = vadd.xlane.f32.xlu0 %v1956_v26  ;;  %v1823_v22 = vmul.f32 1.442695, %v1565_v43  ;;  %v1825_v27 = vmul.f32 1.442695, %v1566_v42  ;;  %v1568_v16 = vsub.f32 %v8397_v51, %v1418_v31  ;;  %v8400_v23 = vld [vmem:[#allocation10_spill] sm:$0xff] }
 0x37b   : >> { %v6681_v45 = vpop.eup %5019  ;;  %5039 = vpow2.f32 %v1821_v0  ;;  %v1569_v34 = vsub.f32 %v8398_v28, %v1418_v31  ;;  %v1572_v26 = vsub.f32 %v8400_v23, %v6564_v5  ;;  %v8401_v43 = vld [vmem:[#allocation105_spill] sm:$0xff]  ;;  %v1827_v0 = vmul.f32 1.442695, %v1567_v62  ;;  %v8404_v28 = vld [vmem:[#allocation11_spill] sm:$0xff] }
 0x37c   : >> { %v6687_v8 = vpop.eup %5021  ;;  %5041 = vpow2.f32 %v1823_v22  ;;  %1961 = vadd.xlane.f32.xlu1 %v1960_v58  ;;  %v1570_v42 = vsub.f32 %v8401_v43, %v1418_v31  ;;  %v2019_v20 = vadd.f32 %v6681_v45, %v6677_v17  ;;  %v1829_v12 = vmul.f32 1.442695, %v1568_v16  ;;  %v8405_v43 = vld [vmem:[#allocation12_spill] sm:$0xff] }
 0x37d   : >> { %8399 = vst [vmem:[#allocation87_spill] sm:$0xff] %v6687_v8  ;;  %v6694_v54 = vpop.eup %5023  ;;  %5043 = vpow2.f32 %v1825_v27  ;;  %v1831_v51 = vmul.f32 1.442695, %v1569_v34  ;;  %v1574_v10 = vsub.f32 %v8404_v28, %v6568_v9  ;;  %v1963_v58 = vadd.f32 %v6610_v3, %v6606_v37 }
 0x37e   : >> { %8402 = vst [vmem:[#allocation88_spill] sm:$0xff] %v6694_v54  ;;  %v6696_v48 = vpop.eup %5025  ;;  %5045 = vpow2.f32 %v1747_v59  ;;  %v2020_v22 = vadd.f32 %v6687_v8, %v2019_v20  ;;  %v1835_v23 = vmul.f32 1.442695, %v1571_v61  ;;  %v1575_v27 = vsub.f32 %v8405_v43, %v6568_v9  ;;  %v8407_v59 = vld [vmem:[#allocation80_spill] sm:$0xff]  ;;  %v8408_v20 = vld [vmem:[#allocation74_spill] sm:$0xff]  ;;  %v8409_v43 = vld [vmem:[#allocation75_spill] sm:$0xff] }
 0x37f   : >> { %8403 = vst [vmem:[#allocation65_spill] sm:$0xff] %v6696_v48  ;;  %v6703_v31 = vpop.eup %5027  ;;  %5047 = vpow2.f32 %v1829_v12  ;;  %v2023_v62 = vadd.f32 %v6696_v48, %v6694_v54  ;;  %v1573_v34 = vsub.f32 %v8407_v59, %v6564_v5  ;;  %v1529_v28 = vsub.f32 %v8408_v20, %v6590_v6  ;;  %v8411_v20 = vld [vmem:[#allocation77_spill] sm:$0xff] }
 0x380   : >> { %v6709_v16 = vpop.eup %5029  ;;  %5049 = vpow2.f32 %v1831_v51  ;;  %v1833_v37 = vmul.f32 1.442695, %v1570_v42  ;;  %2021 = vadd.xlane.f32.xlu0 %v2020_v22  ;;  %v1837_v61 = vmul.f32 1.442695, %v1572_v26  ;;  %v1530_v12 = vsub.f32 %v8409_v43, %v6590_v6  ;;  %v8410_v26 = vld [vmem:[#allocation76_spill] sm:$0xff] }
 0x381   : >> { %8406 = vst [vmem:[#allocation89_spill] sm:$0xff] %v6709_v16  ;;  %v6715_v3 = vpop.eup %5031  ;;  %5051 = vpow2.f32 %v1827_v0  ;;  %v2024_v8 = vadd.f32 %v6703_v31, %v2023_v62  ;;  %v1841_v48 = vmul.f32 1.442695, %v1574_v10  ;;  %v1964_v5 = vadd.f32 %v6613_v36, %v1963_v58 }
 0x382   : >> { %v6720_v54 = vpop.eup %5033  ;;  %5053 = vpow2.f32 %v1749_v25  ;;  %v2027_v51 = vadd.f32 %v6715_v3, %v6709_v16  ;;  %v1843_v22 = vmul.f32 1.442695, %v1575_v27  ;;  %v1532_v59 = vsub.f32 %v8410_v26, %v6600_v11 }
 0x383   : >> { %v6725_v42 = vpop.eup %5035  ;;  %5055 = vpow2.f32 %v1835_v23  ;;  %2025 = vadd.xlane.f32.xlu1 %v2024_v8  ;;  %v1751_v62 = vmul.f32 1.442695, %v1529_v28  ;;  %v1533_v25 = vsub.f32 %v8411_v20, %v6600_v11  ;;  %v1753_v43 = vmul.f32 1.442695, %v1530_v12  ;;  %v8412_v28 = vld [vmem:[#allocation81_spill] sm:$0xff] }
 0x384   : >> { %v6729_v0 = vpop.eup %5037  ;;  %5057 = vpow2.f32 %v1833_v37  ;;  %1965 = vadd.xlane.f32.xlu0 %v1964_v5  ;;  %v2028_v10 = vadd.f32 %v6720_v54, %v2027_v51  ;;  %v1968_v23 = vadd.f32 %v6602_v39, %v1967_v33  ;;  %v1839_v26 = vmul.f32 1.442695, %v1573_v34 }
 0x385   : >> { %v6734_v58 = vpop.eup %5039  ;;  %5059 = vpow2.f32 %v1837_v61  ;;  %v2031_v27 = vadd.f32 %v6729_v0, %v6725_v42  ;;  %v1576_v16 = vsub.f32 %v8412_v28, %v6568_v9  ;;  %v1971_v37 = vadd.f32 %v6619_v4, %v6616_v56  ;;  %v8413_v61 = vld [vmem:[#allocation90_spill] sm:$0xff] }
 0x386   : >> { %v6739_v8 = vpop.eup %5041  ;;  %5061 = vpow2.f32 %v1841_v48  ;;  %v1531_v12 = vsub.f32 %v8413_v61, %v6590_v6  ;;  %v1757_v33 = vmul.f32 1.442695, %v1532_v59  ;;  %v1759_v34 = vmul.f32 1.442695, %v1533_v25  ;;  %v8414_v59 = vld [vmem:[#allocation92_spill] sm:$0xff] }
 0x387   : >> { %v6745_v5 = vpop.eup %5043  ;;  %5063 = vpow2.f32 %v1843_v22  ;;  %1969 = vadd.xlane.f32.xlu1 %v1968_v23  ;;  %v2032_v51 = vadd.f32 %v6734_v58, %v2031_v27  ;;  %v1975_v22 = vadd.f32 %v6632_v50, %v6625_v7  ;;  %v1845_v6 = vmul.f32 1.442695, %v1576_v16 }
 0x388   : >> { %v6750_v20 = vpop.eup %5045  ;;  %5065 = vpow2.f32 %v1751_v62  ;;  %2029 = vadd.xlane.f32.xlu0 %v2028_v10  ;;  %v2035_v9 = vadd.f32 %v6745_v5, %v6739_v8  ;;  %v1534_v23 = vsub.f32 %v8414_v59, %v6600_v11  ;;  %v1972_v62 = vadd.f32 %v6623_v1, %v1971_v37 }
 0x389   : >> { %v6754_v48 = vpop.eup %5047  ;;  %5067 = vpow2.f32 %v1753_v43  ;;  %v1755_v10 = vmul.f32 1.442695, %v1531_v12  ;;  %v1976_v11 = vadd.f32 %v6652_v35, %v1975_v22  ;;  %v1979_v12 = vadd.f32 %v6666_v55, %v6663_v46 }
 0x38a   : >> { %v6758_v28 = vpop.eup %5049  ;;  %5069 = vpow2.f32 %v1839_v26  ;;  %v1761_v37 = vmul.f32 1.442695, %v1534_v23  ;;  %v1983_v22 = vadd.f32 %v6750_v20, %v6673_v14 }
 0x38b   : >> { %v6763_v25 = vpop.eup %5051  ;;  %5071 = vpow2.f32 %v1757_v33  ;;  %2033 = vadd.xlane.f32.xlu1 %v2032_v51  ;;  %v2039_v43 = vadd.f32 %v6758_v28, %v6754_v48 }
 0x38c   : >> { %v6767_v27 = vpop.eup %5053  ;;  %5073 = vpow2.f32 %v1759_v34  ;;  %1973 = vadd.xlane.f32.xlu0 %v1972_v62  ;;  %v2036_v26 = vadd.f32 %v6763_v25, %v2035_v9 }
 0x38d   : >> { %v6770_v16 = vpop.eup %5055  ;;  %5075 = vpow2.f32 %v1845_v6  ;;  %v1980_v6 = vadd.f32 %v6668_v30, %v1979_v12 }
 0x38e   : >> { %8415 = vst [vmem:[#allocation91_spill] sm:$0xff] %v6770_v16  ;;  %v6773_v61 = vpop.eup %5057  ;;  %5077 = vpow2.f32 %v1755_v10 }
 0x38f   : >> { %v6777_v33 = vpop.eup %5059  ;;  %1977 = vadd.xlane.f32.xlu1 %v1976_v11  ;;  %v2040_v51 = vadd.f32 %v6773_v61, %v2039_v43  ;;  %5079 = vpow2.f32 %v1761_v37 }
 0x390   : >> { %8416 = vst [vmem:[#allocation68_spill] sm:$0xff] %v6777_v33  ;;  %v6780_v34 = vpop.eup %5061  ;;  %2037 = vadd.xlane.f32.xlu0 %v2036_v26  ;;  %v2043_v23 = vadd.f32 %v6777_v33, %v6770_v16  ;;  %v1984_v26 = vadd.f32 %v6767_v27, %v1983_v22 }
 0x391   : >> { %8417 = vst [vmem:[#allocation70_spill] sm:$0xff] %v6780_v34  ;;  %v6782_v9 = vpop.eup %5063 }
 0x392   : >> { %8418 = vst [vmem:[#allocation69_spill] sm:$0xff] %v6782_v9  ;;  %v6786_v59 = vpop.eup %5065  ;;  %v2047_v11 = vadd.f32 %v6782_v9, %v6780_v34 }
 0x393   : >> { %8419 = vst [vmem:[#allocation71_spill] sm:$0xff] %v6786_v59  ;;  %v6791_v62 = vpop.eup %5067  ;;  %2041 = vadd.xlane.f32.xlu1 %v2040_v51 }
 0x394   : >> { %8420 = vst [vmem:[#allocation93_spill] sm:$0xff] %v6791_v62  ;;  %v6793_v10 = vpop.eup %5069  ;;  %1981 = vadd.xlane.f32.xlu0 %v1980_v6  ;;  %v1987_v12 = vadd.f32 %v6791_v62, %v6786_v59 }
 0x395   : >> { %8421 = vst [vmem:[#allocation94_spill] sm:$0xff] %v6793_v10  ;;  %v6795_v43 = vpop.eup %5071  ;;  %v2044_v37 = vadd.f32 %v6793_v10, %v2043_v23 }
 0x396   : >> { %8422 = vst [vmem:[#allocation95_spill] sm:$0xff] %v6795_v43  ;;  %v6800_v14 = vpop.eup %5073 }
 0x397   : >> { %8423 = vst [vmem:[#allocation97_spill] sm:$0xff] %v6800_v14  ;;  %1985 = vadd.xlane.f32.xlu1 %v1984_v26  ;;  %v6805_v16 = vpop.eup %5075  ;;  %v1991_v22 = vadd.f32 %v6800_v14, %v6795_v43 }
 0x398   : >> { %8424 = vst [vmem:[#allocation73_spill] sm:$0xff] %v6805_v16  ;;  %2045 = vadd.xlane.f32.xlu0 %v2044_v37  ;;  %v6807_v51 = vpop.eup %5077  ;;  %v2048_v6 = vadd.f32 %v6805_v16, %v2047_v11 }
 0x399   : >> { %8425 = vst [vmem:[#allocation96_spill] sm:$0xff] %v6807_v51  ;;  %v1988_v34 = vadd.f32 %v6807_v51, %v1987_v12  ;;  %v6813_v9 = vpop.eup %5079 }
 0x39a   : >> { %8426 = vst [vmem:[#allocation98_spill] sm:$0xff] %v6813_v9  ;;  %v1992_v23 = vadd.f32 %v6813_v9, %v1991_v22 }
 0x39b   : >> { %2049 = vadd.xlane.f32.xlu1 %v2048_v6 }
 0x39c   : >> { %1989 = vadd.xlane.f32.xlu0 %v1988_v34 }
 0x39f   : >> { %1993 = vadd.xlane.f32.xlu1 %v1992_v23 }
 0x3a7   : >> { %v1894_v26 = vpop.xlane.xlu0 %1893 }
 0x3a8   : >> { %5081 = vrcp.f32 %v1894_v26 }
 0x3a9   : >> { %v1898_v37 = vpop.xlane.xlu1 %1897 }
 0x3ab   : >> { %v1886_v59 = vpop.xlane.xlu0 %1885 }
 0x3ac   : >> { %5083 = vrcp.f32 %v1886_v59 }
 0x3ad   : >> { %5085 = vrcp.f32 %v1898_v37  ;;  %v1890_v6 = vpop.xlane.xlu1 %1889 }
 0x3ae   : >> { %5087 = vrcp.f32 %v1890_v6 }
 0x3af   : >> { %v1430_v62 = vpop.xlane.xlu0 %1429 }
 0x3b0   : >> { %v1577_v11 = vsub.f32 %v5682_v13, %v1430_v62  ;;  %v1578_v43 = vsub.f32 %v5686_v15, %v1430_v62  ;;  %v1579_v12 = vsub.f32 %v6243_v57, %v1430_v62 }
 0x3b1   : >> { %v1434_v13 = vpop.xlane.xlu1 %1433 }
 0x3b2   : >> { %v1847_v51 = vmul.f32 1.442695, %v1577_v11  ;;  %v1849_v14 = vmul.f32 1.442695, %v1578_v43  ;;  %v5082_v34 = vpop.eup %5081  ;;  %v1851_v22 = vmul.f32 1.442695, %v1579_v12  ;;  %v1580_v62 = vsub.f32 %v8255_v41, %v1434_v13 }
 0x3b3   : >> { %v1374_v23 = vpop.xlane.xlu0 %1373  ;;  %v6823_v57 = vmul.f32 %v5082_v34, %v6210_v63  ;;  %v1581_v43 = vsub.f32 %v8256_v47, %v1434_v13 }
 0x3b4   : >> { %5089 = vpow2.f32 %v1847_v51  ;;  %v1535_v26 = vsub.f32 %v8246_v38, %v1374_v23  ;;  %v1536_v59 = vsub.f32 %v8247_v29, %v1374_v23  ;;  %v1537_v37 = vsub.f32 %v6261_v24, %v1374_v23 }
 0x3b5   : >> { %5091 = vpow2.f32 %v1849_v14  ;;  %v1582_v51 = vsub.f32 %v6277_v32, %v1434_v13  ;;  %v1853_v63 = vmul.f32 1.442695, %v1580_v62  ;;  %v1855_v6 = vmul.f32 1.442695, %v1581_v43  ;;  %v1378_v41 = vpop.xlane.xlu1 %1377 }
 0x3b6   : >> { %v1763_v9 = vmul.f32 1.442695, %v1535_v26  ;;  %v1765_v15 = vmul.f32 1.442695, %v1536_v59  ;;  %v1767_v16 = vmul.f32 1.442695, %v1537_v37  ;;  %5093 = vpow2.f32 %v1851_v22  ;;  %v5084_v11 = vpop.eup %5083 }
 0x3b7   : >> { %v1438_v38 = vpop.xlane.xlu0 %1437  ;;  %v6831_v12 = vpop.eup %5085  ;;  %v1857_v22 = vmul.f32 1.442695, %v1582_v51  ;;  %v6834_v32 = vmul.f32 %v5082_v34, %v6207_v2  ;;  %v8427_v37 = vld [vmem:[#allocation107_spill] sm:$0xff]  ;;  %v8429_v51 = vld [vmem:[#allocation106_spill] sm:$0xff] }
 0x3b8   : >> { %5095 = vpow2.f32 %v1763_v9  ;;  %v1583_v24 = vsub.f32 %v8260_v49, %v1438_v38  ;;  %v1584_v29 = vsub.f32 %v8261_v40, %v1438_v38  ;;  %v1585_v14 = vsub.f32 %v6299_v52, %v1438_v38  ;;  %v5088_v26 = vpop.eup %5087 }
 0x3b9   : >> { %5097 = vpow2.f32 %v1765_v15  ;;  %v1538_v49 = vsub.f32 %v6044_v21, %v1378_v41  ;;  %v1539_v40 = vsub.f32 %v6048_v18, %v1378_v41  ;;  %v1540_v52 = vsub.f32 %v6307_v60, %v1378_v41  ;;  %v8428_v15 = vld [vmem:[#allocation109_spill] sm:$0xff] }
 0x3ba   : >> { %5099 = vpow2.f32 %v1767_v16  ;;  %v1859_v47 = vmul.f32 1.442695, %v1583_v24  ;;  %v1861_v23 = vmul.f32 1.442695, %v1584_v29  ;;  %v1863_v59 = vmul.f32 1.442695, %v1585_v14  ;;  %v1442_v43 = vpop.xlane.xlu1 %1441 }
 0x3bb   : >> { %5101 = vpow2.f32 %v1853_v63  ;;  %v1902_v9 = vpop.xlane.xlu0 %1901  ;;  %v2124_v13 = vmul.f32 %v5084_v11, %v8427_v37  ;;  %v2133_v16 = vmul.f32 %v6831_v12, %v8428_v15  ;;  %v1769_v62 = vmul.f32 1.442695, %v1538_v49  ;;  %v8430_v18 = vld [vmem:[#allocation17_spill] sm:$0xff]  ;;  %v8431_v24 = vld [vmem:[#allocation18_spill] sm:$0xff] }
 0x3bc   : >> { %5103 = vpow2.f32 %v1855_v6  ;;  %v1771_v2 = vmul.f32 1.442695, %v1539_v40  ;;  %v2123_v38 = vmul.f32 %v5084_v11, %v8429_v51  ;;  %v1586_v60 = vsub.f32 %v8430_v18, %v1442_v43  ;;  %v8432_v63 = vld [vmem:[#allocation13_spill] sm:$0xff] }
 0x3bd   : >> { %5105 = vpow2.f32 %v1857_v22  ;;  %v1587_v29 = vsub.f32 %v8431_v24, %v1442_v43  ;;  %v1588_v14 = vsub.f32 %v8432_v63, %v1442_v43  ;;  %v1773_v41 = vmul.f32 1.442695, %v1540_v52  ;;  %v8433_v22 = vld [vmem:[#allocation114_spill] sm:$0xff]  ;;  %v8434_v40 = vld [vmem:[#allocation113_spill] sm:$0xff] }
 0x3be   : >> { %v6843_v21 = vpop.eup %5089  ;;  %5107 = vpow2.f32 %v1859_v47  ;;  %v2127_v49 = vmul.f32 %v5088_v26, %v8433_v22  ;;  %v2126_v15 = vmul.f32 %v5088_v26, %v8434_v40  ;;  %v1865_v51 = vmul.f32 1.442695, %v1586_v60  ;;  %v8435_v47 = vld [vmem:[#allocation110_spill] sm:$0xff]  ;;  %v1906_v24 = vpop.xlane.xlu1 %1905  ;;  %v8438_v60 = vld [vmem:[#allocation115_spill] sm:$0xff] }
 0x3bf   : >> { %v6848_v6 = vpop.eup %5091  ;;  %5109 = vpow2.f32 %v1861_v23  ;;  %v1910_v37 = vpop.xlane.xlu0 %1909  ;;  %v2274_v10 = vpack.c.bf16 %v2133_v16, %v6823_v57  ;;  %v6854_v33 = vmul.f32 %v5082_v34, %v8435_v47  ;;  %v1867_v22 = vmul.f32 1.442695, %v1587_v29  ;;  %v8441_v16 = vld [vmem:[#allocation111_spill] sm:$0xff] }
 0x3c0   : >> { %5111 = vpow2.f32 %v1863_v59  ;;  %v6856_v18 = vpop.eup %5093  ;;  %v2271_v43 = vpack.c.bf16 %v2127_v49, %v2124_v13  ;;  %v2270_v63 = vpack.c.bf16 %v2126_v15, %v2123_v38  ;;  %v2051_v23 = vadd.f32 %v6848_v6, %v6843_v21  ;;  %v8443_v38 = vld [vmem:[#allocation112_spill] sm:$0xff] }
 0x3c1   : >> { %8436 = vst [vmem:[#allocation99_spill] sm:$0xff] %v6854_v33  ;;  %5113 = vpow2.f32 %v1769_v62  ;;  %v1869_v59 = vmul.f32 1.442695, %v1588_v14  ;;  %v6863_v40 = vmul.f32 %v5088_v26, %v8438_v60  ;;  %v6869_v62 = vmul.f32 %v5084_v11, %v8441_v16  ;;  %v8446_v26 = vld [vmem:[#allocation82_spill] sm:$0xff]  ;;  %v8447_v14 = vld [vmem:[#allocation83_spill] sm:$0xff] }
 0x3c2   : >> { %v6860_v52 = vpop.eup %5095  ;;  %5115 = vpow2.f32 %v1771_v2  ;;  %2351 = vmatprep.subr.bf16.mxu1 %v2271_v43  ;;  %v2052_v34 = vadd.f32 %v6856_v18, %v2051_v23  ;;  %v6873_v49 = vmul.f32 %v6831_v12, %v8443_v38  ;;  %v1914_v11 = vpop.xlane.xlu1 %1913  ;;  %v8449_v38 = vld [vmem:[#allocation108_spill] sm:$0xff]  ;;  %v8454_v33 = vld [vmem:[#allocation31_spill] sm:$0xff] }
 0x3c3   : >> { %8437 = vst [vmem:[#allocation72_spill] sm:$0xff] %v6860_v52  ;;  %8439 = vst [vmem:[#allocation100_spill] sm:$0xff] %v6863_v40  ;;  %v6865_v57 = vpop.eup %5097  ;;  %5117 = vpow2.f32 %v1773_v41  ;;  %v1382_v13 = vpop.xlane.xlu0 %1381  ;;  %2352 = vmatpush1.bf16.xpose.msra.mxu1 %v2270_v63  ;;  %v8448_v41 = vld [vmem:[#allocation37_spill] sm:$0xff] }
 0x3c4   : >> { %8440 = vst [vmem:[#allocation101_spill] sm:$0xff] %v6865_v57  ;;  %8442 = vst [vmem:[#allocation103_spill] sm:$0xff] %v6869_v62  ;;  %v6875_v2 = vpop.eup %5099  ;;  %5119 = vrcp.f32 %v1902_v9  ;;  %v1541_v29 = vsub.f32 %v8446_v26, %v1382_v13  ;;  %v1542_v15 = vsub.f32 %v8447_v14, %v1382_v13  ;;  %v1543_v47 = vsub.f32 %v8448_v41, %v1382_v13  ;;  %v8452_v9 = vld [vmem:[#allocation19_spill] sm:$0xff] }
 0x3c5   : >> { %8444 = vst [vmem:[#allocation9_spill] sm:$0xff] %v6873_v49  ;;  %8445 = vst [vmem:[#allocation102_spill] sm:$0xff] %v6875_v2  ;;  %v6880_v43 = vpop.eup %5101  ;;  %5121 = vpow2.f32 %v1865_v51  ;;  %2353 = vmatprep.subr.bf16.mxu1 %v2274_v10  ;;  %2053 = vadd.xlane.f32.xlu0 %v2052_v34  ;;  %v1995_v23 = vadd.f32 %v6865_v57, %v6860_v52  ;;  %v2132_v51 = vmul.f32 %v6831_v12, %v8449_v38 }
 0x3c6   : >> { %v6888_v63 = vpop.eup %5103  ;;  %5123 = vpow2.f32 %v1867_v22  ;;  %v1775_v16 = vmul.f32 1.442695, %v1541_v29  ;;  %v1777_v13 = vmul.f32 1.442695, %v1542_v15  ;;  %v1779_v34 = vmul.f32 1.442695, %v1543_v47 }
 0x3c7   : >> { %v6892_v10 = vpop.eup %5105  ;;  %5125 = vpow2.f32 %v1869_v59  ;;  %v1996_v26 = vadd.f32 %v6875_v2, %v1995_v23  ;;  %v1446_v14 = vpop.xlane.xlu0 %1445  ;;  %v2055_v41 = vadd.f32 %v6888_v63, %v6880_v43  ;;  %v8453_v29 = vld [vmem:[#allocation20_spill] sm:$0xff] }
 0x3c8   : >> { %8450 = vst [vmem:[#allocation104_spill] sm:$0xff] %v6892_v10  ;;  %v6897_v60 = vpop.eup %5107  ;;  %5127 = vrcp.f32 %v1910_v37  ;;  %v1589_v22 = vsub.f32 %v8452_v9, %v1446_v14  ;;  %v1590_v15 = vsub.f32 %v8453_v29, %v1446_v14  ;;  %v1591_v49 = vsub.f32 %v8454_v33, %v1446_v14  ;;  %v1386_v47 = vpop.xlane.xlu1 %1385  ;;  %v8458_v9 = vld [vmem:[#allocation84_spill] sm:$0xff]  ;;  %v8459_v14 = vld [vmem:[#allocation86_spill] sm:$0xff] }
 0x3c9   : >> { %8451 = vst [vmem:[#allocation10_spill] sm:$0xff] %v6897_v60  ;;  %v6902_v12 = vpop.eup %5109  ;;  %5129 = vrcp.f32 %v1906_v24  ;;  %1997 = vadd.xlane.f32.xlu0 %v1996_v26  ;;  %v2056_v59 = vadd.f32 %v6892_v10, %v2055_v41  ;;  %v2273_v37 = vpack.c.bf16 %v2132_v51, %v6834_v32  ;;  %v1544_v33 = vsub.f32 %v8458_v9, %v1386_v47  ;;  %v8460_v24 = vld [vmem:[#allocation33_spill] sm:$0xff]  ;;  %v8526_v10 = vld [vmem:[#allocation44_spill] sm:$0xff] }
 0x3ca   : >> { %8455 = vst [vmem:[#allocation105_spill] sm:$0xff] %v6902_v12  ;;  %v6905_v23 = vpop.eup %5111  ;;  %5131 = vpow2.f32 %v1775_v16  ;;  %v1871_v38 = vmul.f32 1.442695, %v1589_v22  ;;  %v1873_v62 = vmul.f32 1.442695, %v1590_v15  ;;  %v1545_v29 = vsub.f32 %v8459_v14, %v1386_v47  ;;  %v8463_v9 = vld [vmem:[#allocation21_spill] sm:$0xff] }
 0x3cb   : >> { %8456 = vst [vmem:[#allocation11_spill] sm:$0xff] %v6905_v23  ;;  %v6908_v40 = vpop.eup %5113  ;;  %5133 = vpow2.f32 %v1777_v13  ;;  %2057 = vadd.xlane.f32.xlu1 %v2056_v59  ;;  %v1546_v26 = vsub.f32 %v8460_v24, %v1386_v47  ;;  %v1918_v2 = vpop.xlane.xlu0 %1917  ;;  %v1875_v52 = vmul.f32 1.442695, %v1591_v49  ;;  %2354 = vmatpush1.bf16.xpose.msra.mxu1 %v2273_v37  ;;  %v2059_v16 = vadd.f32 %v6902_v12, %v6897_v60  ;;  %v8465_v14 = vld [vmem:[#allocation22_spill] sm:$0xff]  ;;  %v8466_v60 = vld [vmem:[#allocation36_spill] sm:$0xff] }
 0x3cc   : >> { %8457 = vst [vmem:[#allocation12_spill] sm:$0xff] %v6908_v40  ;;  %v6913_v41 = vpop.eup %5115  ;;  %5135 = vpow2.f32 %v1779_v34  ;;  %v1781_v13 = vmul.f32 1.442695, %v1544_v33  ;;  %v1783_v51 = vmul.f32 1.442695, %v1545_v29  ;;  %v1450_v22 = vpop.xlane.xlu1 %1449 }
 0x3cd   : >> { %8461 = vst [vmem:[#allocation80_spill] sm:$0xff] %v6913_v41  ;;  %v6917_v32 = vpop.eup %5117  ;;  %5137 = vrcp.f32 %v1914_v11  ;;  %v2060_v59 = vadd.f32 %v6905_v23, %v2059_v16  ;;  %v1999_v47 = vadd.f32 %v6913_v41, %v6908_v40  ;;  %v1592_v34 = vsub.f32 %v8463_v9, %v1450_v22 }
 0x3ce   : >> { %8462 = vst [vmem:[#allocation74_spill] sm:$0xff] %v6917_v32  ;;  %v5120_v15 = vpop.eup %5119  ;;  %5139 = vpow2.f32 %v1871_v38  ;;  %v1785_v37 = vmul.f32 1.442695, %v1546_v26  ;;  %v1593_v24 = vsub.f32 %v8465_v14, %v1450_v22  ;;  %v1594_v11 = vsub.f32 %v8466_v60, %v1450_v22  ;;  %v8469_v60 = vld [vmem:[#allocation78_spill] sm:$0xff] }
 0x3cf   : >> { %v6923_v49 = vpop.eup %5121  ;;  %5141 = vpow2.f32 %v1873_v62  ;;  %v1926_v33 = vpop.xlane.xlu0 %1925  ;;  %2061 = vadd.xlane.f32.xlu0 %v2060_v59  ;;  %v2000_v38 = vadd.f32 %v6917_v32, %v1999_v47  ;;  %v1877_v23 = vmul.f32 1.442695, %v1592_v34  ;;  %v2136_v22 = vmul.f32 %v5120_v15, %v8469_v60  ;;  %v8470_v47 = vld [vmem:[#allocation116_spill] sm:$0xff] }
 0x3d0   : >> { %8464 = vst [vmem:[#allocation75_spill] sm:$0xff] %v6923_v49  ;;  %v6927_v29 = vpop.eup %5123  ;;  %5143 = vpow2.f32 %v1875_v52  ;;  %v1922_v62 = vpop.xlane.xlu1 %1921  ;;  %v1879_v14 = vmul.f32 1.442695, %v1593_v24  ;;  %v1881_v52 = vmul.f32 1.442695, %v1594_v11  ;;  %v2135_v32 = vmul.f32 %v5120_v15, %v8470_v47  ;;  %v8472_v34 = vld [vmem:[#allocation24_spill] sm:$0xff] }
 0x3d1   : >> { %8467 = vst [vmem:[#allocation76_spill] sm:$0xff] %v6927_v29  ;;  %v6930_v16 = vpop.eup %5125  ;;  %5145 = vpow2.f32 %v1781_v13  ;;  %v2063_v9 = vadd.f32 %v6927_v29, %v6923_v49  ;;  %2001 = vadd.xlane.f32.xlu1 %v2000_v38  ;;  %v8473_v29 = vld [vmem:[#allocation23_spill] sm:$0xff] }
 0x3d2   : >> { %8468 = vst [vmem:[#allocation77_spill] sm:$0xff] %v6930_v16  ;;  %v5128_v26 = vpop.eup %5127  ;;  %5147 = vpow2.f32 %v1783_v51  ;;  %v8474_v51 = vld [vmem:[#allocation14_spill] sm:$0xff]  ;;  %v8477_v11 = vld [vmem:[#allocation79_spill] sm:$0xff] }
 0x3d3   : >> { %v5130_v12 = vpop.eup %5129  ;;  %5149 = vpow2.f32 %v1785_v37  ;;  %v2064_v59 = vadd.f32 %v6930_v16, %v2063_v9  ;;  %v1934_v40 = vpop.xlane.xlu0 %1933  ;;  %v6947_v60 = vmul.f32 %v5120_v15, %v8477_v11  ;;  %v8481_v15 = vld [vmem:[#allocation30_spill] sm:$0xff]  ;;  %v8482_v16 = vld [vmem:[#allocation28_spill] sm:$0xff] }
 0x3d4   : >> { %v6937_v13 = vpop.eup %5131  ;;  %5151 = vrcp.f32 %v1918_v2  ;;  %v2139_v49 = vmul.f32 %v5130_v12, %v8472_v34  ;;  %v2138_v41 = vmul.f32 %v5130_v12, %v8473_v29  ;;  %v6942_v38 = vmul.f32 %v5130_v12, %v8474_v51  ;;  %v1930_v37 = vpop.xlane.xlu1 %1929 }
 0x3d5   : >> { %8471 = vst [vmem:[#allocation81_spill] sm:$0xff] %v6937_v13  ;;  %v6944_v24 = vpop.eup %5133  ;;  %5153 = vpow2.f32 %v1877_v23  ;;  %8478 = vst [vmem:[#allocation107_spill] sm:$0xff] %v6947_v60  ;;  %2065 = vadd.xlane.f32.xlu1 %v2064_v59  ;;  %v2142_v11 = vmul.f32 %v5128_v26, %v8481_v15  ;;  %v8486_v59 = vld [vmem:[#allocation35_spill] sm:$0xff] }
 0x3d6   : >> { %8475 = vst [vmem:[#allocation90_spill] sm:$0xff] %v6942_v38  ;;  %8476 = vst [vmem:[#allocation92_spill] sm:$0xff] %v6944_v24  ;;  %v6949_v9 = vpop.eup %5135  ;;  %5155 = vpow2.f32 %v1879_v14  ;;  %v2277_v47 = vpack.c.bf16 %v2139_v49, %v2136_v22  ;;  %v2276_v2 = vpack.c.bf16 %v2138_v41, %v2135_v32  ;;  %v2003_v34 = vadd.f32 %v6944_v24, %v6937_v13  ;;  %v8484_v22 = vld [vmem:[#allocation15_spill] sm:$0xff]  ;;  %v8525_v24 = vld [vmem:[#allocation41_spill] sm:$0xff] }
 0x3d7   : >> { %8479 = vst [vmem:[#allocation109_spill] sm:$0xff] %v6949_v9  ;;  %v5138_v29 = vpop.eup %5137  ;;  %5157 = vpow2.f32 %v1881_v52  ;;  %v1942_v12 = vpop.xlane.xlu0 %1941  ;;  %v6963_v52 = vmul.f32 %v5128_v26, %v8484_v22 }
 0x3d8   : >> { %v6955_v23 = vpop.eup %5139  ;;  %5159 = vrcp.f32 %v1926_v33  ;;  %2355 = vmatprep.subr.bf16.mxu1 %v2277_v47  ;;  %v2145_v14 = vmul.f32 %v5138_v29, %v8482_v16  ;;  %v2004_v49 = vadd.f32 %v6949_v9, %v2003_v34  ;;  %v1938_v32 = vpop.xlane.xlu1 %1937  ;;  %v6966_v51 = vmul.f32 %v5138_v29, %v8486_v59  ;;  %v8490_v34 = vld [vmem:[#allocation16_spill] sm:$0xff] }
 0x3d9   : >> { %8480 = vst [vmem:[#allocation106_spill] sm:$0xff] %v6955_v23  ;;  %v6960_v41 = vpop.eup %5141  ;;  %5161 = vrcp.f32 %v1922_v62  ;;  %2356 = vmatpush1.bf16.xpose.msra.mxu1 %v2276_v2  ;;  %8485 = vst [vmem:[#allocation18_spill] sm:$0xff] %v6963_v52  ;;  %v2144_v62 = vmul.f32 %v5138_v29, %v8490_v34  ;;  %v8499_v52 = vld [vmem:[#allocation60_spill] sm:$0xff] }
 0x3da   : >> { %8483 = vst [vmem:[#allocation17_spill] sm:$0xff] %v6960_v41  ;;  %8487 = vst [vmem:[#allocation13_spill] sm:$0xff] %v6966_v51  ;;  %v6968_v60 = vpop.eup %5143  ;;  %v2280_v33 = vpack.c.bf16 %v2145_v14, %v2142_v11  ;;  %2005 = vadd.xlane.f32.xlu0 %v2004_v49  ;;  %v2067_v16 = vadd.f32 %v6960_v41, %v6955_v23  ;;  %5163 = vrcp.f32 %v1930_v37  ;;  %v8493_v11 = vld [vmem:[#allocation67_spill] sm:$0xff] }
 0x3db   : >> { %8488 = vst [vmem:[#allocation114_spill] sm:$0xff] %v6968_v60  ;;  %v6972_v47 = vpop.eup %5145  ;;  %5165 = vrcp.f32 %v1934_v40  ;;  %v2141_v14 = vmul.f32 %v5128_v26, %v8493_v11  ;;  %v1950_v49 = vpop.xlane.xlu0 %1949  ;;  %v8501_v23 = vld [vmem:[#allocation39_spill] sm:$0xff] }
 0x3dc   : >> { %8489 = vst [vmem:[#allocation113_spill] sm:$0xff] %v6972_v47  ;;  %v6977_v15 = vpop.eup %5147  ;;  %2357 = vmatprep.subr.bf16.mxu1 %v2280_v33  ;;  %v2068_v22 = vadd.f32 %v6968_v60, %v2067_v16  ;;  %5167 = vrcp.f32 %v1942_v12  ;;  %v1946_v38 = vpop.xlane.xlu1 %1945 }
 0x3dd   : >> { %8491 = vst [vmem:[#allocation110_spill] sm:$0xff] %v6977_v15  ;;  %v6980_v59 = vpop.eup %5149  ;;  %v2007_v37 = vadd.f32 %v6977_v15, %v6972_v47  ;;  %5169 = vrcp.f32 %v1938_v32  ;;  %v2279_v2 = vpack.c.bf16 %v2144_v62, %v2141_v14  ;;  %v8497_v62 = vld [vmem:[#allocation32_spill] sm:$0xff]  ;;  %v8527_v15 = vld [vmem:[#allocation117_spill] sm:$0xff] }
 0x3de   : >> { %8492 = vst [vmem:[#allocation115_spill] sm:$0xff] %v6980_v59  ;;  %v5152_v29 = vpop.eup %5151  ;;  %2069 = vadd.xlane.f32.xlu0 %v2068_v22  ;;  %5171 = vrcp.f32 %v1946_v38 }
 0x3df   : >> { %v6985_v34 = vpop.eup %5153  ;;  %v2008_v40 = vadd.f32 %v6980_v59, %v2007_v37  ;;  %5173 = vrcp.f32 %v1950_v49  ;;  %v2148_v14 = vmul.f32 %v5152_v29, %v8497_v62  ;;  %v8498_v37 = vld [vmem:[#allocation43_spill] sm:$0xff]  ;;  %v2147_v51 = vmul.f32 %v5152_v29, %v8499_v52  ;;  %v8506_v62 = vld [vmem:[#allocation26_spill] sm:$0xff] }
 0x3e0   : >> { %8494 = vst [vmem:[#allocation111_spill] sm:$0xff] %v6985_v34  ;;  %v6988_v33 = vpop.eup %5155  ;;  %v1954_v16 = vpop.xlane.xlu1 %1953  ;;  %v8500_v49 = vld [vmem:[#allocation27_spill] sm:$0xff] }
 0x3e1   : >> { %8495 = vst [vmem:[#allocation112_spill] sm:$0xff] %v6988_v33  ;;  %v6990_v12 = vpop.eup %5157  ;;  %2358 = vmatpush1.bf16.xpose.msra.mxu1 %v2279_v2  ;;  %2009 = vadd.xlane.f32.xlu1 %v2008_v40  ;;  %v2071_v26 = vadd.f32 %v6988_v33, %v6985_v34  ;;  %5175 = vrcp.f32 %v1954_v16  ;;  %v8503_v34 = vld [vmem:[#allocation47_spill] sm:$0xff] }
 0x3e2   : >> { %8496 = vst [vmem:[#allocation82_spill] sm:$0xff] %v6990_v12  ;;  %v5160_v11 = vpop.eup %5159  ;;  %v7003_v33 = vmul.f32 %v5152_v29, %v8503_v34 }
 0x3e3   : >> { %v5162_v32 = vpop.eup %5161  ;;  %v2072_v22 = vadd.f32 %v6990_v12, %v2071_v26  ;;  %v8505_v26 = vld [vmem:[#allocation34_spill] sm:$0xff] }
 0x3e4   : >> { %v2151_v38 = vmul.f32 %v5162_v32, %v8498_v37  ;;  %v2150_v60 = vmul.f32 %v5162_v32, %v8500_v49  ;;  %v7000_v2 = vmul.f32 %v5162_v32, %v8501_v23  ;;  %v5164_v40 = vpop.eup %5163  ;;  %8504 = vst [vmem:[#allocation37_spill] sm:$0xff] %v7003_v33  ;;  %v2154_v12 = vmul.f32 %v5160_v11, %v8505_v26  ;;  %v8507_v49 = vld [vmem:[#allocation85_spill] sm:$0xff]  ;;  %v8512_v26 = vld [vmem:[#allocation118_spill] sm:$0xff] }
 0x3e5   : >> { %2073 = vadd.xlane.f32.xlu1 %v2072_v22  ;;  %v5166_v16 = vpop.eup %5165  ;;  %v2157_v9 = vmul.f32 %v5164_v40, %v8506_v62  ;;  %v7010_v47 = vmul.f32 %v5160_v11, %v8507_v49  ;;  %v8509_v23 = vld [vmem:[#allocation29_spill] sm:$0xff]  ;;  %v8514_v49 = vld [vmem:[#allocation123_spill] sm:$0xff] }
 0x3e6   : >> { %8502 = vst [vmem:[#allocation83_spill] sm:$0xff] %v7000_v2  ;;  %v2283_v41 = vpack.c.bf16 %v2151_v38, %v2148_v14  ;;  %v2282_v59 = vpack.c.bf16 %v2150_v60, %v2147_v51  ;;  %v5168_v37 = vpop.eup %5167  ;;  %v7013_v32 = vmul.f32 %v5164_v40, %v8509_v23  ;;  %v8511_v14 = vld [vmem:[#allocation25_spill] sm:$0xff]  ;;  %v7019_v62 = vmul.f32 %v5166_v16, %v8512_v26  ;;  %v8515_v23 = vld [vmem:[#allocation51_spill] sm:$0xff]  ;;  %v8519_v60 = vld [vmem:[#allocation40_spill] sm:$0xff] }
 0x3e7   : >> { %8508 = vst [vmem:[#allocation108_spill] sm:$0xff] %v7010_v47  ;;  %v5170_v22 = vpop.eup %5169  ;;  %v2286_v29 = vpack.c.bf16 %v2157_v9, %v2154_v12  ;;  %v2156_v38 = vmul.f32 %v5164_v40, %v8511_v14  ;;  %v8516_v9 = vld [vmem:[#allocation48_spill] sm:$0xff]  ;;  %v2153_v47 = vmul.f32 %v5160_v11, %v8519_v60  ;;  %v8521_v40 = vld [vmem:[#allocation50_spill] sm:$0xff]  ;;  %v2159_v57 = vmul.f32 %v5166_v16, %v8525_v24 }
 0x3e8   : >> { %8510 = vst [vmem:[#allocation19_spill] sm:$0xff] %v7013_v32  ;;  %2359 = vmatprep.subr.bf16.mxu1 %v2283_v41  ;;  %v5172_v34 = vpop.eup %5171  ;;  %8513 = vst [vmem:[#allocation20_spill] sm:$0xff] %v7019_v62  ;;  %v7022_v52 = vmul.f32 %v5170_v22, %v8514_v49  ;;  %v2163_v12 = vmul.f32 %v5170_v22, %v8516_v9  ;;  %v8522_v49 = vld [vmem:[#allocation42_spill] sm:$0xff]  ;;  %v8523_v11 = vld [vmem:[#allocation64_spill] sm:$0xff]  ;;  %v2166_v26 = vmul.f32 %v5168_v37, %v8526_v10 }
 0x3e9   : >> { %2360 = vmatpush1.bf16.xpose.msra.mxu1 %v2282_v59  ;;  %v5174_v51 = vpop.eup %5173  ;;  %v7025_v33 = vmul.f32 %v5172_v34, %v8515_v23  ;;  %v8517_v59 = vld [vmem:[#allocation122_spill] sm:$0xff]  ;;  %v2160_v23 = vmul.f32 %v5166_v16, %v8522_v49  ;;  %v2285_v9 = vpack.c.bf16 %v2156_v38, %v2153_v47  ;;  %v2162_v60 = vmul.f32 %v5170_v22, %v8523_v11  ;;  %v8528_v38 = vld [vmem:[#allocation125_spill] sm:$0xff]  ;;  %v8531_v24 = vld [vmem:[#allocation124_spill] sm:$0xff] }
 0x3ea   : >> { %2361 = vmatprep.subr.bf16.mxu1 %v2286_v29  ;;  %v7029_v2 = vmul.f32 %v5168_v37, %v8517_v59  ;;  %v8520_v29 = vld [vmem:[#allocation49_spill] sm:$0xff]  ;;  %v2168_v47 = vmul.f32 %v5172_v34, %v8527_v15  ;;  %v8529_v59 = vld [vmem:[#allocation38_spill] sm:$0xff]  ;;  %v8532_v16 = vld [vmem:[#allocation119_spill] sm:$0xff] }
 0x3eb   : >> { %v5176_v41 = vpop.eup %5175  ;;  %v7033_v32 = vmul.f32 %v5174_v51, %v8520_v29  ;;  %v2289_v13 = vpack.c.bf16 %v2163_v12, %v2160_v23  ;;  %v8524_v29 = vld [vmem:[#allocation121_spill] sm:$0xff]  ;;  %v2288_v62 = vpack.c.bf16 %v2162_v60, %v2159_v57  ;;  %v2165_v12 = vmul.f32 %v5168_v37, %v8529_v59  ;;  %v8530_v23 = vld [vmem:[#allocation120_spill] sm:$0xff] }
 0x3ec   : >> { %8518 = vst [vmem:[#allocation31_spill] sm:$0xff] %v7029_v2  ;;  %v7036_v14 = vmul.f32 %v5176_v41, %v8521_v40  ;;  %v2169_v40 = vmul.f32 %v5172_v34, %v8524_v29  ;;  %v2175_v2 = vmul.f32 %v5176_v41, %v8528_v38  ;;  %v2174_v10 = vmul.f32 %v5176_v41, %v8531_v24 }
 0x3ee   : >> { %v2292_v49 = vpack.c.bf16 %v2169_v40, %v2166_v26  ;;  %v8533_v40 = vld [vmem:[#allocation62_spill] sm:$0xff] }
 0x3f1   : >> { %2362 = vmatpush1.bf16.xpose.msra.mxu1 %v2285_v9  ;;  %v2291_v9 = vpack.c.bf16 %v2168_v47, %v2165_v12 }
 0x3f2   : >> { %2363 = vmatprep.subr.bf16.mxu1 %v2289_v13  ;;  %v2172_v13 = vmul.f32 %v5174_v51, %v8530_v23 }
 0x3f4   : >> { %v2295_v22 = vpack.c.bf16 %v2175_v2, %v2172_v13  ;;  %v8535_v13 = vld [vmem:[#allocation63_spill] sm:$0xff] }
 0x3f9   : >> { %2364 = vmatpush1.bf16.xpose.msra.mxu1 %v2288_v62  ;;  %v2171_v62 = vmul.f32 %v5174_v51, %v8532_v16  ;;  %v8534_v51 = vld [vmem:[#allocation61_spill] sm:$0xff]  ;;  %v8537_v16 = vld [vmem:[#allocation55_spill] sm:$0xff] }
 0x3fa   : >> { %2365 = vmatprep.subr.bf16.mxu1 %v2292_v49 }
 0x3fb   : >> { %v2294_v15 = vpack.c.bf16 %v2174_v10, %v2171_v62  ;;  %v8536_v10 = vld [vmem:[#allocation57_spill] sm:$0xff] }
 0x401   : >> { %2366 = vmatpush1.bf16.xpose.msra.mxu1 %v2291_v9 }
 0x402   : >> { %2367 = vmatprep.subr.bf16.mxu1 %v2295_v22 }
 0x403   : >> { %v2014_v11 = vpop.xlane.xlu0 %2013 }
 0x404   : >> { %5177 = vrcp.f32 %v2014_v11 }
 0x405   : >> { %v2018_v57 = vpop.xlane.xlu1 %2017 }
 0x406   : >> { %5179 = vrcp.f32 %v2018_v57 }
 0x407   : >> { %v1958_v26 = vpop.xlane.xlu0 %1957 }
 0x408   : >> { %5181 = vrcp.f32 %v1958_v26  ;;  %v8538_v26 = vld [vmem:[#allocation58_spill] sm:$0xff] }
 0x409   : >> { %v1962_v34 = vpop.xlane.xlu1 %1961  ;;  %2368 = vmatpush1.bf16.xpose.msra.mxu1 %v2294_v15 }
 0x40a   : >> { %5183 = vrcp.f32 %v1962_v34  ;;  %v8539_v34 = vld [vmem:[#allocation46_spill] sm:$0xff] }
 0x40d   : >> { %v2022_v37 = vpop.xlane.xlu0 %2021 }
 0x40e   : >> { %v5178_v59 = vpop.eup %5177  ;;  %5185 = vrcp.f32 %v2022_v37 }
 0x40f   : >> { %v2220_v29 = vmul.f32 %v5178_v59, %v6630_v19  ;;  %v2219_v49 = vmul.f32 %v5178_v59, %v8533_v40  ;;  %v7063_v9 = vmul.f32 %v5178_v59, %v8535_v13  ;;  %v8540_v59 = vld [vmem:[#allocation45_spill] sm:$0xff] }
 0x410   : >> { %v5180_v2 = vpop.eup %5179  ;;  %v2026_v60 = vpop.xlane.xlu1 %2025 }
 0x411   : >> { %5187 = vrcp.f32 %v2026_v60  ;;  %v1966_v41 = vpop.xlane.xlu0 %1965  ;;  %v2223_v47 = vmul.f32 %v5180_v2, %v6643_v44  ;;  %v2222_v38 = vmul.f32 %v5180_v2, %v8534_v51  ;;  %v7060_v12 = vmul.f32 %v5180_v2, %v6657_v53  ;;  %v8541_v60 = vld [vmem:[#allocation52_spill] sm:$0xff] }
 0x412   : >> { %v5182_v23 = vpop.eup %5181  ;;  %5189 = vrcp.f32 %v1966_v41 }
 0x413   : >> { %v2319_v22 = vpack.c.bf16 %v2223_v47, %v2220_v29  ;;  %v2318_v11 = vpack.c.bf16 %v2222_v38, %v2219_v49  ;;  %v2178_v57 = vmul.f32 %v5182_v23, %v8536_v10  ;;  %v2177_v62 = vmul.f32 %v5182_v23, %v8537_v16 }
 0x414   : >> { %v5184_v24 = vpop.eup %5183  ;;  %v1970_v19 = vpop.xlane.xlu1 %1969  ;;  %v7068_v44 = vmul.f32 %v5182_v23, %v8538_v26  ;;  %v2320_v53 = vpack.c.bf16 %v7060_v12, %v7063_v9  ;;  %v8598_v12 = vld [vmem:[#allocation90_spill] sm:$0xff]  ;;  %v8599_v9 = vld [vmem:[#allocation107_spill] sm:$0xff] }
 0x415   : >> { %5191 = vrcp.f32 %v1970_v19  ;;  %v2030_v15 = vpop.xlane.xlu0 %2029  ;;  %2433 = vmatprep.subr.bf16.mxu0 %v2319_v22  ;;  %v2181_v37 = vmul.f32 %v5184_v24, %v8539_v34  ;;  %v2180_v2 = vmul.f32 %v5184_v24, %v8540_v59  ;;  %v7075_v29 = vmul.f32 %v5184_v24, %v8541_v60 }
 0x416   : >> { %5193 = vrcp.f32 %v2030_v15  ;;  %2434 = vmatpush1.bf16.xpose.msra.mxu0 %v2318_v11  ;;  %v8542_v11 = vld [vmem:[#allocation65_spill] sm:$0xff] }
 0x417   : >> { %v2298_v40 = vpack.c.bf16 %v2181_v37, %v2178_v57  ;;  %v2297_v49 = vpack.c.bf16 %v2180_v2, %v2177_v62  ;;  %v2299_v41 = vpack.c.bf16 %v7075_v29, %v7068_v44  ;;  %v8543_v57 = vld [vmem:[#allocation88_spill] sm:$0xff]  ;;  %v8544_v62 = vld [vmem:[#allocation87_spill] sm:$0xff]  ;;  %v8600_v44 = vpack.c.bf16 %v8598_v12, %v8599_v9  ;;  %v8602_v29 = vld [vmem:[#allocation18_spill] sm:$0xff] }
 0x418   : >> { %v5186_v47 = vpop.eup %5185  ;;  %v2034_v51 = vpop.xlane.xlu1 %2033  ;;  %v8545_v2 = vld [vmem:[#allocation59_spill] sm:$0xff]  ;;  %v5284_v12 = vld [vmem:[%s7873_s2 + $0x128] ss:$12 sps:$4 sm:$0xff] (%p271_p5)  }
 0x419   : >> { %5195 = vrcp.f32 %v2034_v51  ;;  %v1974_v38 = vpop.xlane.xlu0 %1973  ;;  %2369 = vmatprep.subr.bf16.mxu1 %v2298_v40  ;;  %v2226_v13 = vmul.f32 %v5186_v47, %v6681_v45  ;;  %v2225_v22 = vmul.f32 %v5186_v47, %v6677_v17  ;;  %v7084_v26 = vmul.f32 %v5186_v47, %v8544_v62  ;;  %v8546_v40 = vld [vmem:[#allocation56_spill] sm:$0xff]  ;;  %v5260_v9 = vld [vmem:[%s7873_s2 + $0xa8] ss:$12 sps:$4 sm:$0xff] (%p271_p5)  }
 0x41a   : >> { %5197 = vrcp.f32 %v1974_v38  ;;  %2370 = vmatpush1.bf16.xpose.msra.mxu1 %v2297_v49  ;;  %v8547_v38 = vld [vmem:[#allocation54_spill] sm:$0xff] }
 0x41b   : >> { %v5188_v23 = vpop.eup %5187 }
 0x41c   : >> { %v5190_v24 = vpop.eup %5189  ;;  %v1978_v19 = vpop.xlane.xlu1 %1977  ;;  %v2229_v10 = vmul.f32 %v5188_v23, %v8542_v11  ;;  %v2228_v16 = vmul.f32 %v5188_v23, %v8543_v57  ;;  %v7087_v15 = vmul.f32 %v5188_v23, %v6703_v31  ;;  %v8548_v31 = vld [vmem:[#allocation53_spill] sm:$0xff] }
 0x41d   : >> { %5199 = vrcp.f32 %v1978_v19  ;;  %v2038_v34 = vpop.xlane.xlu0 %2037  ;;  %v2184_v60 = vmul.f32 %v5190_v24, %v8545_v2  ;;  %v2183_v49 = vmul.f32 %v5190_v24, %v8546_v40  ;;  %v7096_v19 = vmul.f32 %v5190_v24, %v6613_v36 }
 0x41e   : >> { %5201 = vrcp.f32 %v2038_v34  ;;  %v2322_v37 = vpack.c.bf16 %v2229_v10, %v2226_v13  ;;  %v2321_v59 = vpack.c.bf16 %v2228_v16, %v2225_v22  ;;  %v2323_v17 = vpack.c.bf16 %v7087_v15, %v7084_v26  ;;  %v8605_v15 = vld [vmem:[#allocation83_spill] sm:$0xff] }
 0x41f   : >> { %v5192_v45 = vpop.eup %5191 }
 0x420   : >> { %v5194_v51 = vpop.eup %5193  ;;  %2435 = vmatprep.subr.bf16.mxu0 %v2322_v37  ;;  %v2042_v47 = vpop.xlane.xlu1 %2041  ;;  %v2187_v11 = vmul.f32 %v5192_v45, %v8547_v38  ;;  %v2186_v23 = vmul.f32 %v5192_v45, %v8548_v31  ;;  %v7099_v13 = vmul.f32 %v5192_v45, %v6602_v39  ;;  %v8549_v37 = vld [vmem:[#allocation89_spill] sm:$0xff] }
 0x421   : >> { %5203 = vrcp.f32 %v2042_v47  ;;  %2436 = vmatpush1.bf16.xpose.msra.mxu0 %v2321_v59  ;;  %v1982_v22 = vpop.xlane.xlu0 %1981  ;;  %v2232_v34 = vmul.f32 %v5194_v51, %v6715_v3  ;;  %v2231_v2 = vmul.f32 %v5194_v51, %v8549_v37  ;;  %v7108_v59 = vmul.f32 %v5194_v51, %v6720_v54 }
 0x422   : >> { %5205 = vrcp.f32 %v1982_v22  ;;  %v2301_v10 = vpack.c.bf16 %v2187_v11, %v2184_v60  ;;  %v2300_v57 = vpack.c.bf16 %v2186_v23, %v2183_v49  ;;  %v2302_v16 = vpack.c.bf16 %v7099_v13, %v7096_v19 }
 0x423   : >> { %v5196_v62 = vpop.eup %5195 }
 0x424   : >> { %v5198_v40 = vpop.eup %5197  ;;  %2371 = vmatprep.subr.bf16.mxu1 %v2301_v10  ;;  %v1986_v36 = vpop.xlane.xlu1 %1985  ;;  %v2235_v39 = vmul.f32 %v5196_v62, %v6729_v0  ;;  %v2234_v24 = vmul.f32 %v5196_v62, %v6725_v42  ;;  %v7111_v45 = vmul.f32 %v5196_v62, %v6734_v58 }
 0x425   : >> { %5207 = vrcp.f32 %v1986_v36  ;;  %2372 = vmatpush1.bf16.xpose.msra.mxu1 %v2300_v57  ;;  %v2046_v60 = vpop.xlane.xlu0 %2045  ;;  %v2190_v0 = vmul.f32 %v5198_v40, %v6619_v4  ;;  %v2189_v42 = vmul.f32 %v5198_v40, %v6616_v56  ;;  %v7120_v31 = vmul.f32 %v5198_v40, %v6623_v1 }
 0x426   : >> { %5209 = vrcp.f32 %v2046_v60  ;;  %v2325_v3 = vpack.c.bf16 %v2235_v39, %v2232_v34  ;;  %v2324_v49 = vpack.c.bf16 %v2234_v24, %v2231_v2  ;;  %v2326_v47 = vpack.c.bf16 %v7111_v45, %v7108_v59  ;;  %v8610_v59 = vld [vmem:[#allocation19_spill] sm:$0xff]  ;;  %v8611_v45 = vld [vmem:[#allocation108_spill] sm:$0xff] }
 0x427   : >> { %v5200_v38 = vpop.eup %5199 }
 0x428   : >> { %v5202_v11 = vpop.eup %5201  ;;  %2437 = vmatprep.subr.bf16.mxu0 %v2325_v3  ;;  %v2050_v54 = vpop.xlane.xlu1 %2049  ;;  %v2193_v58 = vmul.f32 %v5200_v38, %v6632_v50  ;;  %v2192_v51 = vmul.f32 %v5200_v38, %v6625_v7  ;;  %v7123_v23 = vmul.f32 %v5200_v38, %v6652_v35 }
 0x429   : >> { %5211 = vrcp.f32 %v2050_v54  ;;  %2438 = vmatpush1.bf16.xpose.msra.mxu0 %v2324_v49  ;;  %v1990_v22 = vpop.xlane.xlu0 %1989  ;;  %v2238_v50 = vmul.f32 %v5202_v11, %v6745_v5  ;;  %v2237_v7 = vmul.f32 %v5202_v11, %v6739_v8  ;;  %v7132_v37 = vmul.f32 %v5202_v11, %v6763_v25  ;;  %v8550_v25 = vld [vmem:[#allocation66_spill] sm:$0xff]  ;;  %v8552_v11 = vld [vmem:[#allocation91_spill] sm:$0xff] }
 0x42a   : >> { %5213 = vrcp.f32 %v1990_v22  ;;  %v2304_v4 = vpack.c.bf16 %v2193_v58, %v2190_v0  ;;  %v2303_v10 = vpack.c.bf16 %v2192_v51, %v2189_v42  ;;  %v2305_v56 = vpack.c.bf16 %v7123_v23, %v7120_v31  ;;  %v8553_v58 = vld [vmem:[#allocation69_spill] sm:$0xff] }
 0x42b   : >> { %v5204_v57 = vpop.eup %5203 }
 0x42c   : >> { %v5206_v62 = vpop.eup %5205  ;;  %2373 = vmatprep.subr.bf16.mxu1 %v2304_v4  ;;  %v1994_v1 = vpop.xlane.xlu1 %1993  ;;  %v2241_v35 = vmul.f32 %v5204_v57, %v6758_v28  ;;  %v2240_v34 = vmul.f32 %v5204_v57, %v6754_v48  ;;  %v7135_v2 = vmul.f32 %v5204_v57, %v6773_v61  ;;  %v8555_v4 = vld [vmem:[#allocation94_spill] sm:$0xff] }
 0x42d   : >> { %5215 = vrcp.f32 %v1994_v1  ;;  %2374 = vmatpush1.bf16.xpose.msra.mxu1 %v2303_v10  ;;  %v2196_v39 = vmul.f32 %v5206_v62, %v6666_v55  ;;  %v2195_v28 = vmul.f32 %v5206_v62, %v6663_v46  ;;  %v7144_v61 = vmul.f32 %v5206_v62, %v6668_v30  ;;  %v8551_v46 = vld [vmem:[#allocation68_spill] sm:$0xff]  ;;  %v8554_v30 = vld [vmem:[#allocation70_spill] sm:$0xff]  ;;  %v8556_v10 = vld [vmem:[#allocation73_spill] sm:$0xff] }
 0x42e   : >> { %v2328_v40 = vpack.c.bf16 %v2241_v35, %v2238_v50  ;;  %v2327_v36 = vpack.c.bf16 %v2240_v34, %v2237_v7  ;;  %v8557_v35 = vld [vmem:[#allocation93_spill] sm:$0xff]  ;;  %v8604_v26 = vpack.c.bf16 %v7135_v2, %v7132_v37 }
 0x42f   : >> { %v5208_v5 = vpop.eup %5207 }
 0x430   : >> { %v5210_v24 = vpop.eup %5209  ;;  %2439 = vmatprep.subr.bf16.mxu0 %v2328_v40  ;;  %v2199_v48 = vmul.f32 %v5208_v5, %v6750_v20  ;;  %v2198_v60 = vmul.f32 %v5208_v5, %v8550_v25  ;;  %v7147_v3 = vmul.f32 %v5208_v5, %v6767_v27  ;;  %v8558_v40 = vld [vmem:[#allocation71_spill] sm:$0xff]  ;;  %v8559_v5 = vld [vmem:[#allocation97_spill] sm:$0xff] }
 0x431   : >> { %2440 = vmatpush1.bf16.xpose.msra.mxu0 %v2327_v36  ;;  %v2244_v42 = vmul.f32 %v5210_v24, %v8551_v46  ;;  %v2243_v54 = vmul.f32 %v5210_v24, %v8552_v11  ;;  %v7156_v27 = vmul.f32 %v5210_v24, %v8555_v4 }
 0x432   : >> { %v2307_v49 = vpack.c.bf16 %v2199_v48, %v2196_v39  ;;  %v2306_v38 = vpack.c.bf16 %v2198_v60, %v2195_v28  ;;  %v2308_v55 = vpack.c.bf16 %v7147_v3, %v7144_v61  ;;  %v8560_v28 = vld [vmem:[#allocation95_spill] sm:$0xff]  ;;  %v8561_v48 = vld [vmem:[#allocation96_spill] sm:$0xff]  ;;  %v8562_v60 = vld [vmem:[#allocation98_spill] sm:$0xff] }
 0x433   : >> { %v5212_v0 = vpop.eup %5211  ;;  %v8618_v61 = vld [vmem:[#allocation31_spill] sm:$0xff] }
 0x434   : >> { %v5214_v20 = vpop.eup %5213  ;;  %2375 = vmatprep.subr.bf16.mxu1 %v2307_v49  ;;  %v2247_v51 = vmul.f32 %v5212_v0, %v8553_v58  ;;  %v2246_v22 = vmul.f32 %v5212_v0, %v8554_v30  ;;  %v7159_v57 = vmul.f32 %v5212_v0, %v8556_v10  ;;  %v8619_v3 = vpack.c.bf16 %v7025_v33, %v8618_v61  ;;  %v5278_v61 = vld [vmem:[%s7873_s2 + $0x108] ss:$12 sps:$4 sm:$0xff] (%p271_p5)  }
 0x435   : >> { %2376 = vmatpush1.bf16.xpose.msra.mxu1 %v2306_v38  ;;  %v2202_v34 = vmul.f32 %v5214_v20, %v8557_v35  ;;  %v2201_v36 = vmul.f32 %v5214_v20, %v8558_v40  ;;  %v7168_v25 = vmul.f32 %v5214_v20, %v8561_v48  ;;  %v8563_v35 = vld [vmem:[#allocation104_spill] sm:$0xff] }
 0x436   : >> { %v2331_v50 = vpack.c.bf16 %v2247_v51, %v2244_v42  ;;  %v2330_v7 = vpack.c.bf16 %v2246_v22, %v2243_v54 }
 0x437   : >> { %v5216_v1 = vpop.eup %5215 }
 0x438   : >> { %2441 = vmatprep.subr.bf16.mxu0 %v2331_v50  ;;  %v2205_v39 = vmul.f32 %v5216_v1, %v8559_v5  ;;  %v2204_v24 = vmul.f32 %v5216_v1, %v8560_v28  ;;  %v7171_v49 = vmul.f32 %v5216_v1, %v8562_v60  ;;  %v8566_v60 = vld [vmem:[#allocation80_spill] sm:$0xff] }
 0x439   : >> { %2442 = vmatpush1.bf16.xpose.msra.mxu0 %v2330_v7 }
 0x43a   : >> { %v2310_v38 = vpack.c.bf16 %v2205_v39, %v2202_v34  ;;  %v2309_v0 = vpack.c.bf16 %v2204_v24, %v2201_v36  ;;  %v8565_v24 = vld [vmem:[#allocation72_spill] sm:$0xff]  ;;  %v8608_v13 = vpack.c.bf16 %v7171_v49, %v7168_v25 }
 0x43c   : >> { %2377 = vmatprep.subr.bf16.mxu1 %v2310_v38  ;;  %v8567_v38 = vld [vmem:[#allocation12_spill] sm:$0xff] }
 0x43d   : >> { %2378 = vmatpush1.bf16.xpose.msra.mxu1 %v2309_v0 }
 0x452   : >> { %v2054_v42 = vpop.xlane.xlu0 %2053 }
 0x453   : >> { %5217 = vrcp.f32 %v2054_v42  ;;  %v8568_v42 = vld [vmem:[#allocation102_spill] sm:$0xff] }
 0x456   : >> { %v1998_v11 = vpop.xlane.xlu0 %1997 }
 0x458   : >> { %v2058_v54 = vpop.xlane.xlu1 %2057 }
 0x459   : >> { %5219 = vrcp.f32 %v2058_v54  ;;  %v8569_v54 = vld [vmem:[#allocation74_spill] sm:$0xff] }
 0x45a   : >> { %5221 = vrcp.f32 %v1998_v11 }
 0x45c   : >> { %v2062_v58 = vpop.xlane.xlu0 %2061 }
 0x45d   : >> { %v5218_v51 = vpop.eup %5217 }
 0x45e   : >> { %v2002_v20 = vpop.xlane.xlu1 %2001  ;;  %v2250_v4 = vmul.f32 %v5218_v51, %v6848_v6  ;;  %v2249_v10 = vmul.f32 %v5218_v51, %v6843_v21  ;;  %v7178_v50 = vmul.f32 %v5218_v51, %v6856_v18  ;;  %v8564_v18 = vld [vmem:[#allocation101_spill] sm:$0xff] }
 0x45f   : >> { %5223 = vrcp.f32 %v2002_v20 }
 0x460   : >> { %5225 = vrcp.f32 %v2062_v58 }
 0x462   : >> { %v2066_v22 = vpop.xlane.xlu1 %2065 }
 0x463   : >> { %v5220_v30 = vpop.eup %5219  ;;  %5227 = vrcp.f32 %v2066_v22  ;;  %v8585_v22 = vld [vmem:[#allocation111_spill] sm:$0xff] }
 0x464   : >> { %v2253_v7 = vmul.f32 %v5220_v30, %v6888_v63  ;;  %v2252_v1 = vmul.f32 %v5220_v30, %v6880_v43  ;;  %v7183_v34 = vmul.f32 %v5220_v30, %v8563_v35  ;;  %v5222_v39 = vpop.eup %5221  ;;  %v8571_v35 = vld [vmem:[#allocation10_spill] sm:$0xff] }
 0x465   : >> { %v2208_v28 = vmul.f32 %v5222_v39, %v8564_v18  ;;  %v2207_v48 = vmul.f32 %v5222_v39, %v8565_v24  ;;  %v7192_v11 = vmul.f32 %v5222_v39, %v8568_v42  ;;  %v8573_v39 = vld [vmem:[#allocation76_spill] sm:$0xff] }
 0x466   : >> { %v2334_v40 = vpack.c.bf16 %v2253_v7, %v2250_v4  ;;  %v2333_v36 = vpack.c.bf16 %v2252_v1, %v2249_v10  ;;  %v8570_v7 = vld [vmem:[#allocation105_spill] sm:$0xff]  ;;  %v8614_v23 = vpack.c.bf16 %v7183_v34, %v7178_v50 }
 0x467   : >> { %v2006_v6 = vpop.xlane.xlu0 %2005 }
 0x468   : >> { %2443 = vmatprep.subr.bf16.mxu0 %v2334_v40  ;;  %5229 = vrcp.f32 %v2006_v6  ;;  %v8574_v6 = vld [vmem:[#allocation75_spill] sm:$0xff] }
 0x469   : >> { %2444 = vmatpush1.bf16.xpose.msra.mxu0 %v2333_v36  ;;  %v5224_v21 = vpop.eup %5223  ;;  %v8572_v36 = vld [vmem:[#allocation11_spill] sm:$0xff] }
 0x46a   : >> { %v5226_v63 = vpop.eup %5225  ;;  %v2211_v43 = vmul.f32 %v5224_v21, %v8566_v60  ;;  %v2210_v0 = vmul.f32 %v5224_v21, %v8567_v38  ;;  %v7195_v58 = vmul.f32 %v5224_v21, %v8569_v54  ;;  %v8576_v54 = vld [vmem:[#allocation92_spill] sm:$0xff]  ;;  %v8583_v38 = vld [vmem:[#allocation106_spill] sm:$0xff] }
 0x46b   : >> { %v2070_v20 = vpop.xlane.xlu0 %2069  ;;  %v2256_v1 = vmul.f32 %v5226_v63, %v8570_v7  ;;  %v2255_v40 = vmul.f32 %v5226_v63, %v8571_v35  ;;  %v7202_v18 = vmul.f32 %v5226_v63, %v8572_v36 }
 0x46c   : >> { %v2313_v51 = vpack.c.bf16 %v2211_v43, %v2208_v28  ;;  %v2312_v30 = vpack.c.bf16 %v2210_v0, %v2207_v48  ;;  %v8575_v28 = vld [vmem:[#allocation77_spill] sm:$0xff]  ;;  %v8613_v31 = vpack.c.bf16 %v7195_v58, %v7192_v11 }
 0x46d   : >> { %v5228_v4 = vpop.eup %5227 }
 0x46e   : >> { %v2010_v10 = vpop.xlane.xlu1 %2009  ;;  %2379 = vmatprep.subr.bf16.mxu1 %v2313_v51  ;;  %v2259_v21 = vmul.f32 %v5228_v4, %v8573_v39  ;;  %v2258_v24 = vmul.f32 %v5228_v4, %v8574_v6  ;;  %v7207_v48 = vmul.f32 %v5228_v4, %v8575_v28  ;;  %v8578_v4 = vld [vmem:[#allocation110_spill] sm:$0xff]  ;;  %v8581_v39 = vld [vmem:[#allocation115_spill] sm:$0xff] }
 0x46f   : >> { %5231 = vrcp.f32 %v2010_v10  ;;  %2380 = vmatpush1.bf16.xpose.msra.mxu1 %v2312_v30  ;;  %v8577_v10 = vld [vmem:[#allocation81_spill] sm:$0xff] }
 0x470   : >> { %5233 = vrcp.f32 %v2070_v20  ;;  %v2337_v60 = vpack.c.bf16 %v2259_v21, %v2256_v1  ;;  %v2336_v43 = vpack.c.bf16 %v2258_v24, %v2255_v40  ;;  %v8579_v20 = vld [vmem:[#allocation113_spill] sm:$0xff]  ;;  %v8617_v2 = vpack.c.bf16 %v7207_v48, %v7202_v18 }
 0x471   : >> { %v8580_v1 = vld [vmem:[#allocation109_spill] sm:$0xff] }
 0x472   : >> { %v2074_v0 = vpop.xlane.xlu1 %2073  ;;  %2445 = vmatprep.subr.bf16.mxu0 %v2337_v60  ;;  %v5230_v63 = vpop.eup %5229 }
 0x473   : >> { %5235 = vrcp.f32 %v2074_v0  ;;  %2446 = vmatpush1.bf16.xpose.msra.mxu0 %v2336_v43  ;;  %v2214_v51 = vmul.f32 %v5230_v63, %v8576_v54  ;;  %v2213_v7 = vmul.f32 %v5230_v63, %v8577_v10  ;;  %v2215_v40 = vmul.f32 %v5230_v63, %v8580_v1  ;;  %v8582_v43 = vld [vmem:[#allocation17_spill] sm:$0xff]  ;;  %v8584_v54 = vld [vmem:[#allocation112_spill] sm:$0xff]  ;;  %v8588_v63 = vld [vmem:[#allocation7_spill] sm:$0xff] }
 0x479   : >> { %v5232_v42 = vpop.eup %5231 }
 0x47a   : >> { %v5234_v35 = vpop.eup %5233  ;;  %v2217_v36 = vmul.f32 %v5232_v42, %v8578_v4  ;;  %v2216_v30 = vmul.f32 %v5232_v42, %v8579_v20  ;;  %v2218_v21 = vmul.f32 %v5232_v42, %v8581_v39  ;;  %v8586_v4 = vld [vmem:[#allocation114_spill] sm:$0xff]  ;;  %v2267_v42 = vpack.c.bf16 %v8588_v63, %v8588_v63  ;;  %v8592_v39 = vld [vmem:[#allocation100_spill] sm:$0xff]  ;;  %v5246_v63 = vld [vmem:[%s7873_s2 + $0x4c] ss:$12 sps:$4 sm:$0xff] (%p271_p5)  }
 0x47b   : >> { %v2262_v0 = vmul.f32 %v5234_v35, %v8582_v43  ;;  %v2261_v5 = vmul.f32 %v5234_v35, %v8583_v38  ;;  %v2263_v46 = vmul.f32 %v5234_v35, %v8586_v4  ;;  %v8587_v20 = vld [vmem:[#allocation82_spill] sm:$0xff]  ;;  %v8591_v35 = vmov 0.0  }
 0x47c   : >> { %v2316_v6 = vpack.c.bf16 %v2217_v36, %v2214_v51  ;;  %v2315_v24 = vpack.c.bf16 %v2216_v30, %v2213_v7  ;;  %v2317_v28 = vpack.c.bf16 %v2218_v21, %v2215_v40  ;;  %v8589_v51 = vpack.c.bf16 %v7036_v14, %v7033_v32  ;;  %v8590_v30 = vld [vmem:[#allocation8_spill] sm:$0xff]  ;;  %v8593_v21 = vld [vmem:[#allocation103_spill] sm:$0xff]  ;;  %v8595_v32 = vld [vmem:[#allocation9_spill] sm:$0xff] }
 0x47d   : >> { %v5236_v60 = vpop.eup %5235  ;;  %v2269_v1 = vpack.c.bf16 %v8590_v30, %v8590_v30  ;;  %v8596_v14 = vld [vmem:[#allocation99_spill] sm:$0xff]  ;;  %v5237_v43 = vld [vmem:[%s7873_s2 + $0x4] ss:$12 sps:$4 sm:$0xff] (%p271_p5)   ;;  %v5243_v4 = vld [vmem:[%s7873_s2 + $0x34] ss:$12 sps:$4 sm:$0xff] (%p271_p5)  }
 0x47e   : >> { %2381 = vmatprep.subr.bf16.mxu1 %v2316_v6  ;;  %v2265_v10 = vmul.f32 %v5236_v60, %v8584_v54  ;;  %v2264_v62 = vmul.f32 %v5236_v60, %v8585_v22  ;;  %v2266_v8 = vmul.f32 %v5236_v60, %v8587_v20  ;;  %v2345_v22 = vrot.slane %v2267_v42, 1  ;;  %v5240_v54 = vld [vmem:[%s7873_s2 + $0x1c] ss:$12 sps:$4 sm:$0xff] (%p271_p5)  }
 0x47f   : >> { %2382 = vmatpush1.bf16.xpose.msra.mxu1 %v2315_v24  ;;  %v2347_v40 = vrot.slane %v2269_v1, 1  ;;  %v8594_v6 = vpack.c.bf16 %v8592_v39, %v8593_v21  ;;  %v5245_v20 = vld [vmem:[%s7873_s2 + $0x30] ss:$12 sps:$4 sm:$0xff] (%p271_p5)   ;;  %v5248_v42 = vld [vmem:[%s7873_s2 + $0x48] ss:$12 sps:$4 sm:$0xff] (%p271_p5)  }
 0x480   : >> { %4500 = vmatprep.subr.bf16.mxu1 %v8589_v51  ;;  %v2340_v7 = vpack.c.bf16 %v2265_v10, %v2262_v0  ;;  %v2339_v36 = vpack.c.bf16 %v2264_v62, %v2261_v5  ;;  %v2341_v38 = vpack.c.bf16 %v2266_v8, %v2263_v46  ;;  %v8597_v8 = vpack.c.bf16 %v8595_v32, %v8596_v14  ;;  %v8620_v62 = vld [vmem:[#allocation5_spill] sm:$0xff]  ;;  %v5242_v10 = vld [vmem:[%s7873_s2 + $0x18] ss:$12 sps:$4 sm:$0xff] (%p271_p5)   ;;  %v5255_v39 = vld [vmem:[%s7873_s2 + $0x94] ss:$12 sps:$4 sm:$0xff] (%p271_p5)  }
 0x481   : > { %v5239_v0 = vld [vmem:[%s7873_s2] ss:$12 sps:$4 sm:$0xff] (%p271_p5)   ;;  %v5249_v51 = vld [vmem:[%s7873_s2 + $0x64] ss:$12 sps:$4 sm:$0xff] (%p271_p5)   ;;  %v5252_v30 = vld [vmem:[%s7873_s2 + $0x7c] ss:$12 sps:$4 sm:$0xff] (%p271_p5)  }
 0x482   : >> { %2447 = vmatprep.subr.bf16.mxu0 %v2340_v7  ;;  %v5264_v7 = vld [vmem:[%s7873_s2 + $0xc8] ss:$12 sps:$4 sm:$0xff] (%p271_p5)   ;;  %v5269_v1 = vld [vmem:[%s7873_s2 + $0xe0] ss:$12 sps:$4 sm:$0xff] (%p271_p5)   ;;  %v5257_v21 = vld [vmem:[%s7873_s2 + $0x90] ss:$12 sps:$4 sm:$0xff] (%p271_p5)  }
 0x483   : >> { %2448 = vmatpush1.bf16.xpose.msra.mxu0 %v2339_v36  ;;  %v5251_v36 = vld [vmem:[%s7873_s2 + $0x60] ss:$12 sps:$4 sm:$0xff] (%p271_p5)   ;;  %v5279_v32 = vld [vmem:[%s7873_s2 + $0x110] ss:$12 sps:$4 sm:$0xff] (%p271_p5)  }
 0x484   : >> { %4686 = vmatprep.subr.bf16.mxu0 %v8591_v35  ;;  %v5258_v14 = vld [vmem:[%s7873_s2 + $0xac] ss:$12 sps:$4 sm:$0xff] (%p271_p5)  }
 0x486   : >> { %2384 = vmatmul.mubr.bf16.vlgmr.msra.gmra.mrb[68].mxu1 %v2345_v22 }
 0x487   : >> { %4501 = vmatpush3.bf16.xpose.msra.mxu1 %v8594_v6  ;;  %4516 = vmatprep.mubr.bf16.mxu1 %v2347_v40  ;;  %v5277_v6 = vld [vmem:[%s7873_s2 + $0x38] ss:$12 sps:$4 sm:$0xff] (%p271_p5)  }
 0x488   : >> { %4502 = vmatprep.subr.bf16.mxu1 %v2299_v41 }
 0x48a   : >> { %2466 = vmatmul.mubr.bf16.vlgmr.msra.gmra.mrb[84].mxu0 %v2345_v22  ;;  %v5254_v22 = vld [vmem:[%s7873_s2 + $0x78] ss:$12 sps:$4 sm:$0xff] (%p271_p5)  }
 0x48b   : >> { %4687 = vmatpush3.bf16.xpose.msra.mxu0 %v2320_v53  ;;  %4702 = vmatprep.mubr.msk.bf16.mxu0 %vm5446_vm1, %v8591_v35  ;;  %v8601_v53 = vld [vmem:[#allocation13_spill] sm:$0xff] }
 0x48c   : >> { %4688 = vmatprep.subr.bf16.mxu0 %v8591_v35  ;;  %v8603_v41 = vpack.c.bf16 %v8601_v53, %v8602_v29  ;;  %v5287_v53 = vld [vmem:[%s7873_s2 + $0x68] ss:$12 sps:$4 sm:$0xff] (%p271_p5)   ;;  %v5289_v29 = vld [vmem:[%s7873_s2 + $0x140] ss:$12 sps:$4 sm:$0xff] (%p271_p5)  }
 0x48f   : >> { %4503 = vmatpush3.bf16.xpose.msra.mxu1 %v8597_v8  ;;  %v5282_v8 = vld [vmem:[%s7873_s2 + $0x50] ss:$12 sps:$4 sm:$0xff] (%p271_p5)  }
 0x490   : >> { %4504 = vmatprep.subr.bf16.mxu1 %v2302_v16  ;;  %v8609_v16 = vpack.c.bf16 %v7159_v57, %v7156_v27 }
 0x493   : >> { %4689 = vmatpush3.bf16.xpose.msra.mxu0 %v2323_v17  ;;  %v8606_v17 = vld [vmem:[#allocation37_spill] sm:$0xff] }
 0x494   : >> { %4690 = vmatprep.subr.bf16.mxu0 %v8591_v35  ;;  %v8607_v19 = vpack.c.bf16 %v8605_v15, %v8606_v17  ;;  %v5292_v15 = vld [vmem:[%s7873_s2 + $0x80] ss:$12 sps:$4 sm:$0xff] (%p271_p5)   ;;  %v5294_v17 = vld [vmem:[%s7873_s2 + $0x158] ss:$12 sps:$4 sm:$0xff] (%p271_p5)  }
 0x497   : >> { %4505 = vmatpush3.bf16.xpose.msra.mxu1 %v8600_v44  ;;  %v5261_v44 = vld [vmem:[%s7873_s2 + $0xc4] ss:$12 sps:$4 sm:$0xff] (%p271_p5)  }
 0x498   : >> { %4506 = vmatprep.subr.bf16.mxu1 %v2305_v56  ;;  %v8615_v56 = vld [vmem:[#allocation20_spill] sm:$0xff] }
 0x499   : >> { %v8616_v37 = vpack.c.bf16 %v7022_v52, %v8615_v56  ;;  %v5275_v56 = vld [vmem:[%s7873_s2 + $0x10c] ss:$12 sps:$4 sm:$0xff] (%p271_p5)  }
 0x49b   : >> { %4691 = vmatpush3.bf16.xpose.msra.mxu0 %v2326_v47  ;;  %v8612_v47 = vpack.c.bf16 %v8610_v59, %v8611_v45  ;;  %v5297_v45 = vld [vmem:[%s7873_s2 + $0x98] ss:$12 sps:$4 sm:$0xff] (%p271_p5)  }
 0x49c   : >> { %4692 = vmatprep.subr.bf16.mxu0 %v8591_v35 }
 0x49f   : >> { %4507 = vmatpush3.bf16.xpose.msra.mxu1 %v8603_v41  ;;  %v5263_v41 = vld [vmem:[%s7873_s2 + $0xc0] ss:$12 sps:$4 sm:$0xff] (%p271_p5)  }
 0x4a0   : >> { %4508 = vmatprep.subr.bf16.mxu1 %v2308_v55  ;;  %v5448_v55 = vmov 1966171168  }
 0x4a1   : >> { %v2518_v27 = vunpack.c.l.s4 %v5448_v55 }
 0x4a3   : >> { %4693 = vmatpush3.bf16.xpose.msra.mxu0 %v8604_v26  ;;  %v2519_v57 = vunpack.c.0.s8 %v2518_v27  ;;  %v5265_v26 = vld [vmem:[%s7873_s2 + $0xdc] ss:$12 sps:$4 sm:$0xff] (%p271_p5)   ;;  %v5280_v27 = vld [vmem:[%s7873_s2 + $0x124] ss:$12 sps:$4 sm:$0xff] (%p271_p5)  }
 0x4a4   : >> { %4694 = vmatprep.subr.bf16.mxu0 %v8591_v35 }
 0x4a5   : >> { %v2522_v25 = vsub.s32 %v2519_v57, %v8620_v62 }
 0x4a7   : >> { %4509 = vmatpush3.bf16.xpose.msra.mxu1 %v8607_v19  ;;  %v5268_v19 = vld [vmem:[%s7873_s2 + $0xd8] ss:$12 sps:$4 sm:$0xff] (%p271_p5)  }
 0x4a8   : >> { %4510 = vmatprep.subr.bf16.mxu1 %v8608_v13  ;;  %v5270_v13 = vld [vmem:[%s7873_s2 + $0xf4] ss:$12 sps:$4 sm:$0xff] (%p271_p5)  }
 0x4ab   : >> { %4695 = vmatpush3.bf16.xpose.msra.mxu0 %v8609_v16 }
 0x4ac   : >> { %4696 = vmatprep.subr.bf16.mxu0 %v8591_v35 }
 0x4af   : >> { %4511 = vmatpush3.bf16.xpose.msra.mxu1 %v8612_v47 }
 0x4b0   : >> { %4512 = vmatprep.subr.bf16.mxu1 %v8613_v31  ;;  %v5299_v31 = vld [vmem:[%s7873_s2 + $0x170] ss:$12 sps:$4 sm:$0xff] (%p271_p5)  }
 0x4b3   : >> { %4697 = vmatpush3.bf16.xpose.msra.mxu0 %v8614_v23  ;;  %v5273_v23 = vld [vmem:[%s7873_s2 + $0xf0] ss:$12 sps:$4 sm:$0xff] (%p271_p5)  }
 0x4b4   : >> { %4698 = vmatprep.subr.bf16.mxu0 %v8591_v35 }
 0x4b7   : >> { %4513 = vmatpush3.bf16.xpose.msra.mxu1 %v8616_v37  ;;  %v5303_v37 = vld [vmem:[%s7873_s2 + $0xb0] ss:$12 sps:$4 sm:$0xff] (%p271_p5)  }
 0x4b8   : >> { %4514 = vmatprep.subr.bf16.mxu1 %v2317_v28  ;;  %v8621_v28 = vlaneseq }
 0x4ba   : >> { %vm2542_vm4 = vcmp.lt.s32.totalorder %v8621_v28, 384  ;;  %v5316_v28 = vld [vmem:[%s7873_s2 + $0x1d0] ss:$12 sps:$4 sm:$0xff] (%p271_p5)  }
 0x4bb   : >> { %4699 = vmatpush3.bf16.xpose.msra.mxu0 %v8617_v2  ;;  %v5304_v2 = vld [vmem:[%s7873_s2 + $0x188] ss:$12 sps:$4 sm:$0xff] (%p271_p5)  }
 0x4bc   : >> { %4700 = vmatprep.subr.bf16.mxu0 %v8591_v35  ;;  %v5272_v35 = vld [vmem:[%s7873_s2 + $0x20] ss:$12 sps:$4 sm:$0xff] (%p271_p5)  }
 0x4bf   : >> { %4515 = vmatpush3.bf16.xpose.msra.mxu1 %v8619_v3 }
 0x4c0   : > { %4527 = vmatprep.subr.bf16.mxu1 (%p271_p5), %v5264_v7 }
 0x4c3   : >> { %4701 = vmatpush3.bf16.xpose.msra.mxu0 %v2341_v38  ;;  %v5267_v38 = vld [vmem:[%s7873_s2 + $0x8] ss:$12 sps:$4 sm:$0xff] (%p271_p5)  }
 0x4c4   : > { %3087 = vmatprep.subr.bf16.mxu0 (%p271_p5), %v5237_v43 }
 0x4c6   : >> { %4517 = vmatmul.mubr.bf16.vlgmr.msra.gmra.mrb[68].mxu1 %v2347_v40 }
 0x4c7   : > { %4528 = vmatpush3.bf16.msra.mxu1 (%p271_p5), %v5267_v38  ;;  %v5300_v38 = vld [vmem:[%s7873_s2 + $0x180] ss:$12 sps:$4 sm:$0xff] (%p271_p5)  }
 0x4c8   : > { %4529 = vmatprep.subr.bf16.mxu1 (%p271_p5), %v5269_v1 }
 0x4ca   : >> { %4703 = vmatmul.mubr.bf16.vlgmr.msra.gmra.mrb[84].mxu0 %v2347_v40  ;;  %v5274_v40 = vld [vmem:[%s7873_s2 + $0xf8] ss:$12 sps:$4 sm:$0xff] (%p271_p5)  }
 0x4cb   : > { %3088 = vmatpush1.bf16.msra.mxu0 (%p271_p5), %v5239_v0  ;;  %4530 = vmatpush3.bf16.msra.mxu1 (%p271_p5), %v5272_v35  ;;  %v5295_v0 = vld [vmem:[%s7873_s2 + $0x16c] ss:$12 sps:$4 sm:$0xff] (%p271_p5)  }
 0x4cc   : > { %3089 = vmatprep.subr.bf16.mxu0 (%p271_p5), %v5240_v54  ;;  %4531 = vmatprep.subr.bf16.mxu1 (%p271_p5), %v5274_v40  ;;  %v5298_v54 = vld [vmem:[%s7873_s2 + $0x168] ss:$12 sps:$4 sm:$0xff] (%p271_p5)   ;;  %v5328_v40 = vld [vmem:[%s7873_s2 + $0x218] ss:$12 sps:$4 sm:$0xff] (%p271_p5)  }
 0x4cf   : > { %3090 = vmatpush1.bf16.msra.mxu0 (%p271_p5), %v5242_v10  ;;  %4532 = vmatpush3.bf16.msra.mxu1 (%p271_p5), %v5277_v6  ;;  %v5305_v6 = vld [vmem:[%s7873_s2 + $0x198] ss:$12 sps:$4 sm:$0xff] (%p271_p5)  }
 0x4d0   : > { %3091 = vmatprep.subr.bf16.mxu0 (%p271_p5), %v5243_v4  ;;  %4533 = vmatprep.subr.bf16.mxu1 (%p271_p5), %v5279_v32  ;;  %v5320_v4 = vld [vmem:[%s7873_s2 + $0x1e8] ss:$12 sps:$4 sm:$0xff] (%p271_p5)  }
 0x4d1   : > { %v5311_v32 = vld [vmem:[%s7873_s2 + $0x1b4] ss:$12 sps:$4 sm:$0xff] (%p271_p5)  }
 0x4d3   : > { %3092 = vmatpush1.bf16.msra.mxu0 (%p271_p5), %v5245_v20  ;;  %4534 = vmatpush3.bf16.msra.mxu1 (%p271_p5), %v5282_v8  ;;  %v5302_v20 = vld [vmem:[%s7873_s2 + $0x184] ss:$12 sps:$4 sm:$0xff] (%p271_p5)  }
 0x4d4   : > { %3093 = vmatprep.subr.bf16.mxu0 (%p271_p5), %v5246_v63  ;;  %4535 = vmatprep.subr.bf16.mxu1 (%p271_p5), %v5284_v12  ;;  %v5332_v12 = vld [vmem:[%s7873_s2 + $0x230] ss:$12 sps:$4 sm:$0xff] (%p271_p5)  }
 0x4d7   : > { %3094 = vmatpush1.bf16.msra.mxu0 (%p271_p5), %v5248_v42  ;;  %4536 = vmatpush3.bf16.msra.mxu1 (%p271_p5), %v5287_v53 }
 0x4d8   : > { %3095 = vmatprep.subr.bf16.mxu0 (%p271_p5), %v5249_v51  ;;  %4537 = vmatprep.subr.bf16.mxu1 (%p271_p5), %v5289_v29 }
 0x4db   : > { %3096 = vmatpush1.bf16.msra.mxu0 (%p271_p5), %v5251_v36  ;;  %4538 = vmatpush3.bf16.msra.mxu1 (%p271_p5), %v5292_v15  ;;  %v5324_v36 = vld [vmem:[%s7873_s2 + $0x200] ss:$12 sps:$4 sm:$0xff] (%p271_p5)   ;;  %v5335_v15 = vld [vmem:[%s7875_s4 + $0x4] ss:$12 sps:$4 sm:$0xff] (%p271_p5)  }
 0x4dc   : > { %3097 = vmatprep.subr.bf16.mxu0 (%p271_p5), %v5252_v30  ;;  %4539 = vmatprep.subr.bf16.mxu1 (%p271_p5), %v5294_v17  ;;  %v5307_v30 = vld [vmem:[%s7873_s2 + $0x19c] ss:$12 sps:$4 sm:$0xff] (%p271_p5)  }
 0x4dd   : > { %v5313_v17 = vld [vmem:[%s7873_s2 + $0x1c8] ss:$12 sps:$4 sm:$0xff] (%p271_p5)  }
 0x4df   : > { %3098 = vmatpush1.bf16.msra.mxu0 (%p271_p5), %v5254_v22  ;;  %4540 = vmatpush3.bf16.msra.mxu1 (%p271_p5), %v5297_v45  ;;  %v5333_v45 = vld [vmem:[%s7875_s4] ss:$12 sps:$4 sm:$0xff] (%p271_p5)  }
 0x4e0   : > { %3099 = vmatprep.subr.bf16.mxu0 (%p271_p5), %v5255_v39  ;;  %4541 = vmatprep.subr.bf16.mxu1 (%p271_p5), %v5299_v31 }
 0x4e3   : > { %3100 = vmatpush1.bf16.msra.mxu0 (%p271_p5), %v5257_v21  ;;  %4542 = vmatpush3.bf16.msra.mxu1 (%p271_p5), %v5303_v37  ;;  %v5336_v37 = vld [vmem:[%s7875_s4 + $0x18] ss:$12 sps:$4 sm:$0xff] (%p271_p5)  }
 0x4e4   : > { %3101 = vmatprep.subr.bf16.mxu0 (%p271_p5), %v5258_v14  ;;  %4706 = vmatprep.subr.bf16.mxu1 (%p271_p5), %v5304_v2  ;;  %v5309_v14 = vld [vmem:[%s7873_s2 + $0x1b0] ss:$12 sps:$4 sm:$0xff] (%p271_p5)  }
 0x4e7   : > { %3102 = vmatpush1.bf16.msra.mxu0 (%p271_p5), %v5260_v9 }
 0x4e8   : > { %3103 = vmatprep.subr.bf16.mxu0 (%p271_p5), %v5261_v44  ;;  %v5315_v44 = vld [vmem:[%s7873_s2 + $0x1cc] ss:$12 sps:$4 sm:$0xff] (%p271_p5)  }
 0x4eb   : > { %3104 = vmatpush1.bf16.msra.mxu0 (%p271_p5), %v5263_v41 }
 0x4ec   : > { %3105 = vmatprep.subr.bf16.mxu0 (%p271_p5), %v5265_v26 }
 0x4ef   : > { %3106 = vmatpush1.bf16.msra.mxu0 (%p271_p5), %v5268_v19 }
 0x4f0   : > { %3107 = vmatprep.subr.bf16.mxu0 (%p271_p5), %v5270_v13  ;;  %v5319_v13 = vld [vmem:[%s7873_s2 + $0x1e4] ss:$12 sps:$4 sm:$0xff] (%p271_p5)  }
 0x4f3   : > { %3108 = vmatpush1.bf16.msra.mxu0 (%p271_p5), %v5273_v23  ;;  %v5338_v23 = vld [vmem:[%s7875_s4 + $0x1c] ss:$12 sps:$4 sm:$0xff] (%p271_p5)  }
 0x4f4   : > { %3109 = vmatprep.subr.bf16.mxu0 (%p271_p5), %v5275_v56 }
 0x4f7   : > { %3110 = vmatpush1.bf16.msra.mxu0 (%p271_p5), %v5278_v61  ;;  %v5341_v61 = vld [vmem:[%s7875_s4 + $0x34] ss:$12 sps:$4 sm:$0xff] (%p271_p5)  }
 0x4f8   : > { %3111 = vmatprep.subr.bf16.mxu0 (%p271_p5), %v5280_v27  ;;  %v5339_v27 = vld [vmem:[%s7875_s4 + $0x30] ss:$12 sps:$4 sm:$0xff] (%p271_p5)  }
 0x599   : >> { %v2426_v52 = vpop.f32.mrb[68].mxu1 }
 0x59a   : >> { %v2428_v49 = vpop.f32.mrb[69].mxu1 }
 0x59b   : >> { %v2516_v46 = vcombine.low %v2426_v52, %v2428_v49  ;;  %v2430_v50 = vpop.f32.mrb[70].mxu1  ;;  %v5283_v49 = vld [vmem:[%s7873_s2 + $0x120] ss:$12 sps:$4 sm:$0xff] (%p271_p5)  }
 0x59c   : >> { %v2431_v34 = vpop.f32.mrb[71].mxu1  ;;  %v5285_v50 = vld [vmem:[%s7873_s2 + $0x13c] ss:$12 sps:$4 sm:$0xff] (%p271_p5)   ;;  %3112 = vmatpush1.bf16.msra.mxu0 (%p271_p5), %v5283_v49  ;;  %v5347_v49 = vld [vmem:[%s7875_s4 + $0x64] ss:$12 sps:$4 sm:$0xff] (%p271_p5)  }
 0x59d   : >> { %v2523_v5 = vrot.slane %v2516_v46, %v2522_v25  ;;  %v2507_v11 = vpop.f32.mrb[84].mxu0  ;;  %v5288_v34 = vld [vmem:[%s7873_s2 + $0x138] ss:$12 sps:$4 sm:$0xff] (%p271_p5)   ;;  %3113 = vmatprep.subr.bf16.mxu0 (%p271_p5), %v5285_v50  ;;  %v5360_v50 = vld [vmem:[%s7875_s4 + $0xc8] ss:$12 sps:$4 sm:$0xff] (%p271_p5)  }
 0x59e   : >> { %v2530_v33 = vrot.slane %v2507_v11, %v2522_v25  ;;  %v4704_v58 = vpop.f32.mrb[85].mxu0  ;;  %273 = sbr.rel (!%p271_p5) target bundleno = 21 (0x15), region = 83 }
 0x59f   : >> { %v2510_v18 = vpop.f32.mrb[86].mxu0  ;;  %v5290_v58 = vld [vmem:[%s7873_s2 + $0x154] ss:$12 sps:$4 sm:$0xff] (%p271_p5)  }
 0x5a0   : >> { %v2531_v48 = vcombine.low %v2523_v5, %v2530_v33  ;;  %v4705_v24 = vpop.f32.mrb[87].mxu0  ;;  %v5312_v5 = vld [vmem:[%s7873_s2 + $0x1b8] ss:$12 sps:$4 sm:$0xff] (%p271_p5)   ;;  %3114 = vmatpush1.bf16.msra.mxu0 (%p271_p5), %v5288_v34  ;;  %v5449_v34 = vmov (%p271_p5), 0  }
 0x5a1   : > { %3115 = vmatprep.subr.bf16.mxu0 (%p271_p5), %v5290_v58  ;;  %v5365_v58 = vld [vmem:[%s7875_s4 + $0xe0] ss:$12 sps:$4 sm:$0xff] (%p271_p5)  }
 0x5a2   : >> { %v2538_v60 = vrot.slane %v2531_v48, %v2522_v25  ;;  %v5308_v25 = vld [vmem:[%s7873_s2 + $0x1a0] ss:$12 sps:$4 sm:$0xff] (%p271_p5)  }
 0x5a4   : >> { %2552 = vst.msk [vmem:[%s2551_s18] ss:$8 sm:$0x7] %vm2542_vm4, %v2538_v60  ;;  %v5293_v60 = vld [vmem:[%s7873_s2 + $0x150] ss:$12 sps:$4 sm:$0xff] (%p271_p5)  }
 0x5a5   : > { %3116 = vmatpush1.bf16.msra.mxu0 %v5293_v60  ;;  %v5356_v60 = vld [vmem:[%s7875_s4 + $0xac] ss:$12 sps:$4 sm:$0xff]  }
 0x5a6   : > { %3117 = vmatprep.subr.bf16.mxu0 %v5295_v0  ;;  %v5359_v0 = vld [vmem:[%s7875_s4 + $0xc4] ss:$12 sps:$4 sm:$0xff]  }
 0x5a9   : > { %3118 = vmatpush1.bf16.msra.mxu0 %v5298_v54  ;;  %v5357_v54 = vld [vmem:[%s7875_s4 + $0xc0] ss:$12 sps:$4 sm:$0xff]  }
 0x5aa   : > { %3160 = vmatprep.subr.bf16.mxu0 %v5302_v20  ;;  %v5367_v20 = vld [vmem:[%s7875_s4 + $0xf0] ss:$12 sps:$4 sm:$0xff]  }
 0x5ab   : > { %v2555_v16 = vld [vmem:[#allocation2 + $0x8] sm:$0xff]  ;;  %v2558_v59 = vld [vmem:[#allocation2 + $0x20] sm:$0xff]  ;;  %v2557_v55 = vld [vmem:[#allocation2 + $0x18] sm:$0xff] }
 0x5ac   : > { %v2579_v47 = vpack.c.bf16 %v2558_v59, %v2555_v16  ;;  %v2554_v3 = vld [vmem:[#allocation2] sm:$0xff]  ;;  %v2561_v57 = vld [vmem:[#allocation2 + $0x38] sm:$0xff]  ;;  %v2564_v52 = vld [vmem:[#allocation2 + $0x50] sm:$0xff] }
 0x5ad   : > { %v2578_v62 = vpack.c.bf16 %v2557_v55, %v2554_v3  ;;  %v2582_v46 = vpack.c.bf16 %v2564_v52, %v2561_v57  ;;  %v2560_v11 = vld [vmem:[#allocation2 + $0x30] sm:$0xff]  ;;  %v2563_v33 = vld [vmem:[#allocation2 + $0x48] sm:$0xff]  ;;  %v2570_v48 = vld [vmem:[#allocation2 + $0x80] sm:$0xff] }
 0x5ae   : > { %3119 = vmatprep.mubr.bf16.mxu0 %v2579_v47  ;;  %3265 = vmatprep.mubr.bf16.mxu1 %v2579_v47  ;;  %v2567_v18 = vld [vmem:[#allocation2 + $0x68] sm:$0xff]  ;;  %v2581_v24 = vpack.c.bf16 %v2563_v33, %v2560_v11  ;;  %v2566_v10 = vld [vmem:[#allocation2 + $0x60] sm:$0xff]  ;;  %v2569_v63 = vld [vmem:[#allocation2 + $0x78] sm:$0xff] }
 0x5af   : > { %3266 = vmatmul.mubr.bf16.vlgmr.msra.gmra.mrb[0].mxu1 %v2578_v62  ;;  %v2585_v43 = vpack.c.bf16 %v2570_v48, %v2567_v18  ;;  %v2573_v42 = vld [vmem:[#allocation2 + $0x98] sm:$0xff]  ;;  %v2576_v51 = vld [vmem:[#allocation2 + $0xb0] sm:$0xff]  ;;  %v7472_v7 = vpack.c.bf16 %v2569_v63, %v2566_v10  ;;  %v2575_v35 = vld [vmem:[#allocation2 + $0xa8] sm:$0xff]  ;;  %3120 = vmatmul.mubr.bf16.vlgmr.msra.gmra.mrb[0].mxu0 %v2578_v62 }
 0x5b0   : > { %4707 = vmatpush3.bf16.msra.mxu1 %v5304_v2  ;;  %3273 = vmatprep.mubr.bf16.mxu1 %v2582_v46  ;;  %v2588_v1 = vpack.c.bf16 %v2576_v51, %v2573_v42  ;;  %v2572_v22 = vld [vmem:[#allocation2 + $0x90] sm:$0xff]  ;;  %v2559_v21 = vld [vmem:[#allocation2 + $0x28] sm:$0xff]  ;;  %v2562_v53 = vld [vmem:[#allocation2 + $0x40] sm:$0xff] }
 0x5b1   : > { %4708 = vmatprep.subr.bf16.mxu1 %v5308_v25  ;;  %v2556_v39 = vld [vmem:[#allocation2 + $0x10] sm:$0xff]  ;;  %3161 = vmatpush1.bf16.msra.mxu0 %v5300_v38  ;;  %v2587_v8 = vpack.c.bf16 %v2575_v35, %v2572_v22  ;;  %v2565_v29 = vld [vmem:[#allocation2 + $0x58] sm:$0xff]  ;;  %v2571_v26 = vld [vmem:[#allocation2 + $0x88] sm:$0xff] }
 0x5b2   : > { %3129 = vmatprep.mubr.bf16.mxu0 %v2582_v46  ;;  %3162 = vmatprep.subr.bf16.mxu0 %v5307_v30  ;;  %v7499_v9 = vpack.c.bf16 %v2559_v21, %v2556_v39  ;;  %v2568_v41 = vld [vmem:[#allocation2 + $0x70] sm:$0xff]  ;;  %v7511_v19 = vpack.c.bf16 %v2565_v29, %v2562_v53  ;;  %v2574_v31 = vld [vmem:[#allocation2 + $0xa0] sm:$0xff]  ;;  %v2577_v56 = vld [vmem:[#allocation2 + $0xb8] sm:$0xff] }
 0x5b3   : > { %v7516_v16 = vpack.c.bf16 %v2571_v26, %v2568_v41  ;;  %v5317_v59 = vld [vmem:[%s7873_s2 + $0x1e0] ss:$12 sps:$4 sm:$0xff]   ;;  %v5323_v47 = vld [vmem:[%s7873_s2 + $0x1fc] ss:$12 sps:$4 sm:$0xff]   ;;  %v5321_v2 = vld [vmem:[%s7873_s2 + $0x1f8] ss:$12 sps:$4 sm:$0xff]   ;;  %v2589_v55 = vpack.c.bf16 %v2577_v56, %v2574_v31 }
 0x5b4   : > { %4709 = vmatpush3.bf16.msra.mxu1 %v5308_v25  ;;  %v5327_v3 = vld [vmem:[%s7873_s2 + $0x214] ss:$12 sps:$4 sm:$0xff]   ;;  %v5344_v57 = vld [vmem:[%s7875_s4 + $0x4c] ss:$12 sps:$4 sm:$0xff]   ;;  %v5325_v52 = vld [vmem:[%s7873_s2 + $0x210] ss:$12 sps:$4 sm:$0xff]  }
 0x5b5   : > { %4710 = vmatprep.subr.bf16.mxu1 %v5312_v5  ;;  %3163 = vmatpush1.bf16.msra.mxu0 %v5305_v6  ;;  %v5331_v62 = vld [vmem:[%s7873_s2 + $0x22c] ss:$12 sps:$4 sm:$0xff]   ;;  %v5342_v25 = vld [vmem:[%s7875_s4 + $0x48] ss:$12 sps:$4 sm:$0xff]   ;;  %v5375_v38 = vld [vmem:[%s7875_s4 + $0x110] ss:$12 sps:$4 sm:$0xff]  }
 0x5b6   : > { %3164 = vmatprep.subr.bf16.mxu0 %v5311_v32  ;;  %v5329_v46 = vld [vmem:[%s7873_s2 + $0x228] ss:$12 sps:$4 sm:$0xff]   ;;  %v5348_v18 = vld [vmem:[%s7875_s4 + $0x78] ss:$12 sps:$4 sm:$0xff]   ;;  %v5376_v30 = vld [vmem:[%s7875_s4 + $0x50] ss:$12 sps:$4 sm:$0xff]  }
 0x5b7   : > { %3274 = vmatmul.mubr.bf16.gmra.mrb[4].mxu1 %v2581_v24  ;;  %3130 = vmatmul.mubr.bf16.gmra.mrb[4].mxu0 %v2581_v24  ;;  %v5350_v11 = vld [vmem:[%s7875_s4 + $0x7c] ss:$12 sps:$4 sm:$0xff]   ;;  %v5353_v48 = vld [vmem:[%s7875_s4 + $0x94] ss:$12 sps:$4 sm:$0xff]   ;;  %v5370_v42 = vld [vmem:[%s7875_s4 + $0xf8] ss:$12 sps:$4 sm:$0xff]  }
 0x5b8   : > { %4711 = vmatpush3.bf16.msra.mxu1 %v5312_v5  ;;  %3281 = vmatprep.mubr.bf16.mxu1 %v2585_v43  ;;  %v5345_v5 = vld [vmem:[%s7875_s4 + $0x60] ss:$12 sps:$4 sm:$0xff]   ;;  %v5361_v33 = vld [vmem:[%s7875_s4 + $0x8] ss:$12 sps:$4 sm:$0xff]   ;;  %v5371_v51 = vld [vmem:[%s7875_s4 + $0x38] ss:$12 sps:$4 sm:$0xff]  }
 0x5b9   : > { %4712 = vmatprep.subr.bf16.mxu1 %v5316_v28  ;;  %3165 = vmatpush1.bf16.msra.mxu0 %v5309_v14  ;;  %v5366_v24 = vld [vmem:[%s7875_s4 + $0x20] ss:$12 sps:$4 sm:$0xff]   ;;  %v5364_v10 = vld [vmem:[%s7875_s4 + $0xdc] ss:$12 sps:$4 sm:$0xff]   ;;  %v5379_v22 = vld [vmem:[%s7875_s4 + $0x124] ss:$12 sps:$4 sm:$0xff]  }
 0x5ba   : > { %3139 = vmatprep.mubr.bf16.mxu0 %v2585_v43  ;;  %3166 = vmatprep.subr.bf16.mxu0 %v5315_v44  ;;  %v5354_v43 = vld [vmem:[%s7875_s4 + $0xa8] ss:$12 sps:$4 sm:$0xff]   ;;  %v5382_v39 = vld [vmem:[%s7875_s4 + $0x138] ss:$12 sps:$4 sm:$0xff]   ;;  %v5385_v6 = vld [vmem:[%s7875_s4 + $0x140] ss:$12 sps:$4 sm:$0xff]  }
 0x5bb   : > { %v5369_v63 = vld [vmem:[%s7875_s4 + $0xf4] ss:$12 sps:$4 sm:$0xff]   ;;  %v5384_v21 = vld [vmem:[%s7875_s4 + $0x13c] ss:$12 sps:$4 sm:$0xff]   ;;  %v5394_v44 = vld [vmem:[%s7875_s4 + $0x16c] ss:$12 sps:$4 sm:$0xff]  }
 0x5bc   : > { %4713 = vmatpush3.bf16.msra.mxu1 %v5316_v28  ;;  %v5351_v28 = vld [vmem:[%s7875_s4 + $0x90] ss:$12 sps:$4 sm:$0xff]   ;;  %v5380_v35 = vld [vmem:[%s7875_s4 + $0x128] ss:$12 sps:$4 sm:$0xff]   ;;  %v5386_v32 = vld [vmem:[%s7875_s4 + $0x80] ss:$12 sps:$4 sm:$0xff]  }
 0x5bd   : > { %4714 = vmatprep.subr.bf16.mxu1 %v5320_v4  ;;  %3167 = vmatpush1.bf16.msra.mxu0 %v5313_v17  ;;  %v5389_v14 = vld [vmem:[%s7875_s4 + $0x154] ss:$12 sps:$4 sm:$0xff]   ;;  %v5395_v53 = vld [vmem:[%s7875_s4 + $0x170] ss:$12 sps:$4 sm:$0xff]  }
 0x5be   : > { %3168 = vmatprep.subr.bf16.mxu0 %v5319_v13  ;;  %v5392_v29 = vld [vmem:[%s7875_s4 + $0x168] ss:$12 sps:$4 sm:$0xff]   ;;  %v5396_v41 = vld [vmem:[%s7875_s4 + $0xb0] ss:$12 sps:$4 sm:$0xff]  }
 0x5bf   : > { %3282 = vmatmul.mubr.bf16.gmra.mrb[8].mxu1 %v7472_v7  ;;  %3140 = vmatmul.mubr.bf16.gmra.mrb[8].mxu0 %v7472_v7  ;;  %v5372_v7 = vld [vmem:[%s7875_s4 + $0x108] ss:$12 sps:$4 sm:$0xff]   ;;  %v5399_v26 = vld [vmem:[%s7875_s4 + $0x184] ss:$12 sps:$4 sm:$0xff]  }
 0x5c0   : > { %4715 = vmatpush3.bf16.msra.mxu1 %v5320_v4  ;;  %3289 = vmatprep.mubr.bf16.mxu1 %v2588_v1  ;;  %v5362_v4 = vld [vmem:[%s7875_s4 + $0xd8] ss:$12 sps:$4 sm:$0xff]  }
 0x5c1   : > { %4716 = vmatprep.subr.bf16.mxu1 %v5324_v36  ;;  %3169 = vmatpush1.bf16.msra.mxu0 %v5317_v59 }
 0x5c2   : > { %3149 = vmatprep.mubr.bf16.mxu0 %v2588_v1  ;;  %3170 = vmatprep.subr.bf16.mxu0 %v5323_v47  ;;  %v5377_v1 = vld [vmem:[%s7875_s4 + $0x120] ss:$12 sps:$4 sm:$0xff]  }
 0x5c4   : > { %4717 = vmatpush3.bf16.msra.mxu1 %v5324_v36  ;;  %v5374_v36 = vld [vmem:[%s7875_s4 + $0x10c] ss:$12 sps:$4 sm:$0xff]  }
 0x5c5   : > { %4718 = vmatprep.subr.bf16.mxu1 %v5328_v40  ;;  %3171 = vmatpush1.bf16.msra.mxu0 %v5321_v2 }
 0x5c6   : > { %3172 = vmatprep.subr.bf16.mxu0 %v5327_v3 }
 0x5c7   : > { %3290 = vmatmul.mubr.bf16.gmra.mrb[12].mxu1 %v2587_v8  ;;  %3150 = vmatmul.mubr.bf16.gmra.mrb[12].mxu0 %v2587_v8  ;;  %v5390_v8 = vld [vmem:[%s7875_s4 + $0x158] ss:$12 sps:$4 sm:$0xff]  }
 0x5c8   : > { %4719 = vmatpush3.bf16.msra.mxu1 %v5328_v40  ;;  %4722 = vmatprep.mubr.bf16.mxu1 %v7499_v9  ;;  %v5381_v40 = vld [vmem:[%s7875_s4 + $0x68] ss:$12 sps:$4 sm:$0xff]  }
 0x5c9   : > { %4720 = vmatprep.subr.bf16.mxu1 %v5332_v12  ;;  %3173 = vmatpush1.bf16.msra.mxu0 %v5325_v52 }
 0x5ca   : > { %3192 = vmatprep.mubr.bf16.mxu0 %v5449_v34  ;;  %3174 = vmatprep.subr.bf16.mxu0 %v5331_v62  ;;  %v8622_v62 = vld [vmem:[#allocation5_spill] sm:$0xff] }
 0x5cc   : > { %4721 = vmatpush3.bf16.msra.mxu1 %v5332_v12  ;;  %v5387_v12 = vld [vmem:[%s7875_s4 + $0x150] ss:$12 sps:$4 sm:$0xff]  }
 0x5cd   : > { %3896 = vmatprep.subr.bf16.mxu1 %v5335_v15  ;;  %3175 = vmatpush1.bf16.msra.mxu0 %v5329_v46  ;;  %v7696_v15 = vld [vmem:[%s7875_s4 + $0x188] ss:$12 sps:$4 sm:$0xff]   ;;  %v2686_v46 = vld [vmem:[%s7874_s3] sm:$0x7] }
 0x5ce   : > { %4579 = vmatprep.subr.bf16.mxu0 %v5360_v50 }
 0x5cf   : > { %4723 = vmatmul.mubr.bf16.vlgmr.msra.gmra.mrb[16].mxu1 %v7511_v19 }
 0x5d0   : > { %4726 = vmatprep.mubr.bf16.mxu1 %v7516_v16  ;;  %3897 = vmatpush1.bf16.msra.mxu1 %v5333_v45 }
 0x5d1   : > { %3898 = vmatprep.subr.bf16.mxu1 %v5338_v23  ;;  %3193 = vmatmul.mubr.bf16.vlgmr.msra.gmra.mrb[0].mxu0 %v7499_v9  ;;  %v5391_v9 = vld [vmem:[%s7875_s4 + $0x98] ss:$12 sps:$4 sm:$0xff]  }
 0x5d2   : > { %3202 = vmatprep.mubr.bf16.mxu0 %v5449_v34  ;;  %4580 = vmatpush3.bf16.msra.mxu0 %v5361_v33 }
 0x5d3   : > { %4581 = vmatprep.subr.bf16.mxu0 %v5365_v58 }
 0x5d4   : > { %3899 = vmatpush1.bf16.msra.mxu1 %v5336_v37 }
 0x5d5   : > { %3900 = vmatprep.subr.bf16.mxu1 %v5341_v61 }
 0x5d6   : > { %4582 = vmatpush3.bf16.msra.mxu0 %v5366_v24 }
 0x5d7   : > { %4727 = vmatmul.mubr.bf16.gmra.mrb[20].mxu1 %v2589_v55  ;;  %4583 = vmatprep.subr.bf16.mxu0 %v5370_v42 }
 0x5d8   : > { %3901 = vmatpush1.bf16.msra.mxu1 %v5339_v27 }
 0x5d9   : > { %3902 = vmatprep.subr.bf16.mxu1 %v5344_v57  ;;  %3203 = vmatmul.mubr.bf16.gmra.mrb[4].mxu0 %v7511_v19 }
 0x5da   : > { %3212 = vmatprep.mubr.bf16.mxu0 %v5449_v34  ;;  %4584 = vmatpush3.bf16.msra.mxu0 %v5371_v51 }
 0x5db   : > { %4585 = vmatprep.subr.bf16.mxu0 %v5375_v38 }
 0x5dc   : > { %3903 = vmatpush1.bf16.msra.mxu1 %v5342_v25  ;;  %v2698_v25 = vsub.s32 2, %v8622_v62 }
 0x5dd   : > { %3904 = vmatprep.subr.bf16.mxu1 %v5347_v49 }
 0x5de   : > { %4586 = vmatpush3.bf16.msra.mxu0 %v5376_v30  ;;  %v2699_v33 = vrot.slane %v2686_v46, %v2698_v25 }
 0x5df   : > { %4587 = vmatprep.subr.bf16.mxu0 %v5380_v35 }
 0x5e0   : > { %3905 = vmatpush1.bf16.msra.mxu1 %v5345_v5 }
 0x5e1   : > { %3906 = vmatprep.subr.bf16.mxu1 %v5350_v11  ;;  %3213 = vmatmul.mubr.bf16.gmra.mrb[8].mxu0 %v7516_v16 }
 0x5e2   : > { %3222 = vmatprep.mubr.bf16.mxu0 %v5449_v34  ;;  %4588 = vmatpush3.bf16.msra.mxu0 %v5381_v40 }
 0x5e3   : > { %4589 = vmatprep.subr.bf16.mxu0 %v5385_v6 }
 0x5e4   : > { %3907 = vmatpush1.bf16.msra.mxu1 %v5348_v18 }
 0x5e5   : > { %3908 = vmatprep.subr.bf16.mxu1 %v5353_v48 }
 0x5e6   : > { %4590 = vmatpush3.bf16.msra.mxu0 %v5386_v32 }
 0x5e7   : > { %4591 = vmatprep.subr.bf16.mxu0 %v5390_v8 }
 0x5e8   : > { %3909 = vmatpush1.bf16.msra.mxu1 %v5351_v28 }
 0x5e9   : > { %3910 = vmatprep.subr.bf16.mxu1 %v5356_v60  ;;  %3223 = vmatmul.mubr.bf16.gmra.mrb[12].mxu0 %v2589_v55 }
 0x5ea   : > { %4592 = vmatpush3.bf16.msra.mxu0 %v5391_v9 }
 0x5eb   : > { %4593 = vmatprep.subr.bf16.mxu0 %v5395_v53  ;;  %v2690_v53 = vsub.s32 0, %v8622_v62 }
 0x5ec   : > { %3911 = vmatpush1.bf16.msra.mxu1 %v5354_v43 }
 0x5ed   : > { %3912 = vmatprep.subr.bf16.mxu1 %v5359_v0 }
 0x5ee   : > { %4594 = vmatpush3.bf16.msra.mxu0 %v5396_v41 }
 0x5ef   : > { %4730 = vmatprep.subr.bf16.mxu0 %v7696_v15 }
 0x5f0   : > { %3913 = vmatpush1.bf16.msra.mxu1 %v5357_v54 }
 0x5f1   : > { %3914 = vmatprep.subr.bf16.mxu1 %v5364_v10 }
 0x5f4   : > { %3915 = vmatpush1.bf16.msra.mxu1 %v5362_v4 }
 0x5f5   : > { %3916 = vmatprep.subr.bf16.mxu1 %v5369_v63 }
 0x5f8   : > { %3917 = vmatpush1.bf16.msra.mxu1 %v5367_v20 }
 0x5f9   : > { %3918 = vmatprep.subr.bf16.mxu1 %v5374_v36 }
 0x5fc   : > { %3919 = vmatpush1.bf16.msra.mxu1 %v5372_v7 }
 0x5fd   : > { %3920 = vmatprep.subr.bf16.mxu1 %v5379_v22 }
 0x600   : > { %3921 = vmatpush1.bf16.msra.mxu1 %v5377_v1 }
 0x601   : > { %3922 = vmatprep.subr.bf16.mxu1 %v5384_v21 }
 0x604   : > { %3923 = vmatpush1.bf16.msra.mxu1 %v5382_v39 }
 0x605   : > { %3924 = vmatprep.subr.bf16.mxu1 %v5389_v14 }
 0x608   : > { %3925 = vmatpush1.bf16.msra.mxu1 %v5387_v12 }
 0x609   : > { %3926 = vmatprep.subr.bf16.mxu1 %v5394_v44 }
 0x60c   : > { %3927 = vmatpush1.bf16.msra.mxu1 %v5392_v29 }
 0x60d   : > { %3969 = vmatprep.subr.bf16.mxu1 %v5399_v26 }
 0x682   : > { %v4543_v17 = vpop.f32.mrb[0].mxu1 }
 0x683   : > { %v4544_v19 = vpop.f32.mrb[1].mxu1 }
 0x684   : > { %v4545_v13 = vadd.f32 %v4544_v19, %v4543_v17  ;;  %v4546_v16 = vpop.f32.mrb[2].mxu1 }
 0x685   : > { %v4547_v59 = vpop.f32.mrb[3].mxu1 }
 0x686   : > { %v4548_v45 = vadd.f32 %v4547_v59, %v4546_v16  ;;  %v3268_v24 = vadd.f32 %v4545_v13, %v2699_v33  ;;  %v7714_v13 = vrot.slane %v2686_v46, %v2690_v53  ;;  %v8623_v59 = vld [vmem:[#allocation6_spill] sm:$0xff] }
 0x688   : > { %v3271_v43 = vadd.f32 %v4548_v45, %v2699_v33  ;;  %v7719_v45 = vrot.slane %v2686_v46, %v8623_v59 }
 0x68a   : > { %v4549_v47 = vpop.f32.mrb[4].mxu1 }
 0x68b   : > { %v4550_v31 = vpop.f32.mrb[5].mxu1 }
 0x68c   : > { %v4551_v23 = vadd.f32 %v4550_v31, %v4549_v47  ;;  %v4552_v56 = vpop.f32.mrb[6].mxu1 }
 0x68d   : > { %v4553_v37 = vpop.f32.mrb[7].mxu1 }
 0x68e   : > { %v4554_v2 = vadd.f32 %v4553_v37, %v4552_v56  ;;  %v3276_v48 = vadd.f32 %v4551_v23, %v2699_v33 }
 0x690   : > { %v3279_v28 = vadd.f32 %v4554_v2, %v2699_v33 }
 0x692   : > { %v4555_v61 = vpop.f32.mrb[8].mxu1 }
 0x693   : > { %v4556_v3 = vpop.f32.mrb[9].mxu1 }
 0x694   : > { %v4557_v55 = vadd.f32 %v4556_v3, %v4555_v61  ;;  %v4558_v27 = vpop.f32.mrb[10].mxu1 }
 0x695   : > { %v4559_v57 = vpop.f32.mrb[11].mxu1 }
 0x696   : > { %v4560_v52 = vadd.f32 %v4559_v57, %v4558_v27  ;;  %v3284_v1 = vadd.f32 %v4557_v55, %v2699_v33 }
 0x698   : > { %v3287_v21 = vadd.f32 %v4560_v52, %v2699_v33 }
 0x69a   : > { %v4561_v49 = vpop.f32.mrb[12].mxu1 }
 0x69b   : > { %v4562_v50 = vpop.f32.mrb[13].mxu1 }
 0x69c   : > { %v4563_v5 = vadd.f32 %v4562_v50, %v4561_v49  ;;  %v4564_v11 = vpop.f32.mrb[14].mxu1 }
 0x69d   : > { %v4565_v58 = vpop.f32.mrb[15].mxu1 }
 0x69e   : > { %v4566_v18 = vadd.f32 %v4565_v58, %v4564_v11  ;;  %v3292_v38 = vadd.f32 %v4563_v5, %v2699_v33  ;;  %v5397_v5 = vld [vmem:[%s7875_s4 + $0x180] ss:$12 sps:$4 sm:$0xff]   ;;  %v5403_v58 = vld [vmem:[%s7875_s4 + $0x19c] ss:$12 sps:$4 sm:$0xff]  }
 0x6a0   : > { %v3295_v35 = vadd.f32 %v4566_v18, %v2699_v33  ;;  %v5404_v18 = vld [vmem:[%s7875_s4 + $0x1a0] ss:$12 sps:$4 sm:$0xff]  }
 0x6a2   : > { %v4724_v60 = vpop.f32.mrb[16].mxu1 }
 0x6a3   : > { %v3341_v0 = vadd.f32 %v4724_v60, %v3276_v48  ;;  %v3332_v54 = vpop.f32.mrb[17].mxu1 }
 0x6a4   : > { %v3333_v10 = vadd.f32 %v3332_v54, %v3268_v24  ;;  %v4725_v4 = vpop.f32.mrb[18].mxu1  ;;  %v3194_v47 = vpop.f32.mrb[0].mxu0 }
 0x6a5   : > { %v3371_v20 = vmax.f32 %v3341_v0, 0.0  ;;  %v3344_v63 = vadd.f32 %v4725_v4, %v3279_v28  ;;  %v3335_v42 = vpop.f32.mrb[19].mxu1  ;;  %v4764_v31 = vadd.f32 %v3194_v47, %v7714_v13  ;;  %v3196_v23 = vpop.f32.mrb[1].mxu0  ;;  %v5401_v0 = vld [vmem:[%s7875_s4 + $0x198] ss:$12 sps:$4 sm:$0xff]  }
 0x6a6   : > { %v3365_v51 = vmax.f32 %v3333_v10, 0.0  ;;  %v3336_v7 = vadd.f32 %v3335_v42, %v3271_v43  ;;  %v4765_v56 = vadd.f32 %v3196_v23, %v7719_v45  ;;  %v3198_v37 = vpop.f32.mrb[2].mxu0  ;;  %v5407_v4 = vld [vmem:[%s7875_s4 + $0x1b4] ss:$12 sps:$4 sm:$0xff]  }
 0x6a7   : > { %v3374_v36 = vmax.f32 %v3344_v63, 0.0  ;;  %v4766_v2 = vadd.f32 %v3198_v37, %v7714_v13  ;;  %v3200_v61 = vpop.f32.mrb[3].mxu0  ;;  %v3363_v55 = vmax.f32 %v4764_v31, 0.0  ;;  %v5413_v23 = vld [vmem:[%s7875_s4 + $0x1e0] ss:$12 sps:$4 sm:$0xff]  }
 0x6a8   : > { %v3368_v30 = vmax.f32 %v3336_v7, 0.0  ;;  %v4767_v3 = vadd.f32 %v3200_v61, %v7719_v45  ;;  %v3364_v57 = vmax.f32 %v4765_v56, 0.0  ;;  %v5420_v61 = vld [vmem:[%s7875_s4 + $0x200] ss:$12 sps:$4 sm:$0xff]  }
 0x6a9   : > { %v7705_v22 = vpack.c.bf16 %v3374_v36, %v3371_v20  ;;  %v3366_v27 = vmax.f32 %v4766_v2, 0.0  ;;  %v5408_v20 = vld [vmem:[%s7875_s4 + $0x1b8] ss:$12 sps:$4 sm:$0xff]   ;;  %v5405_v36 = vld [vmem:[%s7875_s4 + $0x1b0] ss:$12 sps:$4 sm:$0xff]  }
 0x6aa   : > { %v7707_v40 = vpack.c.bf16 %v3368_v30, %v3365_v51  ;;  %v4728_v39 = vpop.f32.mrb[20].mxu1  ;;  %v3367_v52 = vmax.f32 %v4767_v3, 0.0  ;;  %v5419_v2 = vld [vmem:[%s7875_s4 + $0x1fc] ss:$12 sps:$4 sm:$0xff]  }
 0x6ab   : > { %v3357_v6 = vadd.f32 %v4728_v39, %v3292_v38  ;;  %v3348_v32 = vpop.f32.mrb[21].mxu1  ;;  %v3387_v49 = vpack.c.bf16 %v3366_v27, %v3363_v55 }
 0x6ac   : > { %v3349_v14 = vadd.f32 %v3348_v32, %v3284_v1  ;;  %v4729_v8 = vpop.f32.mrb[22].mxu1  ;;  %v3388_v50 = vpack.c.bf16 %v3367_v52, %v3364_v57  ;;  %v3204_v46 = vpop.f32.mrb[4].mxu0  ;;  %v5411_v1 = vld [vmem:[%s7875_s4 + $0x1cc] ss:$12 sps:$4 sm:$0xff]  }
 0x6ad   : > { %v3383_v12 = vmax.f32 %v3357_v6, 0.0  ;;  %v3360_v9 = vadd.f32 %v4729_v8, %v3295_v35  ;;  %v3351_v44 = vpop.f32.mrb[23].mxu1  ;;  %v4768_v11 = vadd.f32 %v3204_v46, %v7714_v13  ;;  %v3206_v33 = vpop.f32.mrb[5].mxu0  ;;  %v5412_v35 = vld [vmem:[%s7875_s4 + $0x1d0] ss:$12 sps:$4 sm:$0xff]  }
 0x6ae   : > { %v3377_v29 = vmax.f32 %v3349_v14, 0.0  ;;  %v3352_v41 = vadd.f32 %v3351_v44, %v3287_v21  ;;  %v4769_v48 = vadd.f32 %v3206_v33, %v7719_v45  ;;  %v3208_v24 = vpop.f32.mrb[6].mxu0  ;;  %3928 = vmatprep.mubr.bf16.mxu1 %v3388_v50  ;;  %4074 = vmatprep.mubr.bf16.mxu0 %v3388_v50  ;;  %v5409_v8 = vld [vmem:[%s7875_s4 + $0x1c8] ss:$12 sps:$4 sm:$0xff]   ;;  %v5415_v44 = vld [vmem:[%s7875_s4 + $0x1e4] ss:$12 sps:$4 sm:$0xff]  }
 0x6af   : > { %v3386_v26 = vmax.f32 %v3360_v9, 0.0  ;;  %v4770_v28 = vadd.f32 %v3208_v24, %v7714_v13  ;;  %v3210_v60 = vpop.f32.mrb[7].mxu0  ;;  %3929 = vmatmul.mubr.bf16.vlgmr.msra.gmra.mrb[24].mxu1 %v3387_v49  ;;  %4075 = vmatmul.mubr.bf16.vlgmr.msra.gmra.mrb[16].mxu0 %v3387_v49  ;;  %v3369_v54 = vmax.f32 %v4768_v11, 0.0  ;;  %v5417_v49 = vld [vmem:[%s7875_s4 + $0x1f8] ss:$12 sps:$4 sm:$0xff]  }
 0x6b0   : > { %v3380_v17 = vmax.f32 %v3352_v41, 0.0  ;;  %v4771_v43 = vadd.f32 %v3210_v60, %v7719_v45  ;;  %3970 = vmatpush1.bf16.msra.mxu1 %v5397_v5  ;;  %4731 = vmatpush3.bf16.msra.mxu0 %v7696_v15  ;;  %v3370_v63 = vmax.f32 %v4769_v48, 0.0  ;;  %v5423_v5 = vld [vmem:[%s7875_s4 + $0x214] ss:$12 sps:$4 sm:$0xff]   ;;  %v5427_v48 = vld [vmem:[%s7875_s4 + $0x22c] ss:$12 sps:$4 sm:$0xff]  }
 0x6b1   : > { %v7710_v19 = vpack.c.bf16 %v3386_v26, %v3383_v12  ;;  %v3372_v10 = vmax.f32 %v4770_v28, 0.0  ;;  %3971 = vmatprep.subr.bf16.mxu1 %v5403_v58  ;;  %4732 = vmatprep.subr.bf16.mxu0 %v5404_v18  ;;  %v5428_v24 = vld [vmem:[%s7875_s4 + $0x230] ss:$12 sps:$4 sm:$0xff]   ;;  %v5425_v28 = vld [vmem:[%s7875_s4 + $0x228] ss:$12 sps:$4 sm:$0xff]  }
 0x6b2   : > { %v7716_v16 = vpack.c.bf16 %v3380_v17, %v3377_v29  ;;  %v3373_v42 = vmax.f32 %v4771_v43, 0.0  ;;  %v5416_v29 = vld [vmem:[%s7875_s4 + $0x1e8] ss:$12 sps:$4 sm:$0xff]  }
 0x6b3   : > { %v3390_v51 = vpack.c.bf16 %v3372_v10, %v3369_v54 }
 0x6b4   : > { %v3391_v15 = vpack.c.bf16 %v3373_v42, %v3370_v63  ;;  %v3214_v7 = vpop.f32.mrb[8].mxu0  ;;  %3972 = vmatpush1.bf16.msra.mxu1 %v5401_v0  ;;  %4733 = vmatpush3.bf16.msra.mxu0 %v5404_v18  ;;  %v5421_v18 = vld [vmem:[%s7875_s4 + $0x210] ss:$12 sps:$4 sm:$0xff]  }
 0x6b5   : > { %v4772_v38 = vadd.f32 %v3214_v7, %v7714_v13  ;;  %v3216_v30 = vpop.f32.mrb[9].mxu0  ;;  %3973 = vmatprep.subr.bf16.mxu1 %v5407_v4  ;;  %4734 = vmatprep.subr.bf16.mxu0 %v5408_v20 }
 0x6b6   : > { %v4773_v39 = vadd.f32 %v3216_v30, %v7719_v45  ;;  %v3218_v21 = vpop.f32.mrb[10].mxu0  ;;  %3938 = vmatprep.mubr.bf16.mxu1 %v3391_v15  ;;  %4082 = vmatprep.mubr.bf16.mxu0 %v3391_v15 }
 0x6b7   : > { %v4774_v6 = vadd.f32 %v3218_v21, %v7714_v13  ;;  %v3220_v32 = vpop.f32.mrb[11].mxu0  ;;  %3939 = vmatmul.mubr.bf16.gmra.mrb[28].mxu1 %v3390_v51  ;;  %4083 = vmatmul.mubr.bf16.gmra.mrb[20].mxu0 %v3390_v51  ;;  %v3375_v12 = vmax.f32 %v4772_v38, 0.0 }
 0x6b8   : > { %v4775_v14 = vadd.f32 %v3220_v32, %v7719_v45  ;;  %3974 = vmatpush1.bf16.msra.mxu1 %v5405_v36  ;;  %4735 = vmatpush3.bf16.msra.mxu0 %v5408_v20  ;;  %v3376_v41 = vmax.f32 %v4773_v39, 0.0 }
 0x6b9   : > { %v3378_v9 = vmax.f32 %v4774_v6, 0.0  ;;  %3975 = vmatprep.subr.bf16.mxu1 %v5411_v1  ;;  %4736 = vmatprep.subr.bf16.mxu0 %v5412_v35  ;;  %v3495_v1 = vld [vmem:[%s7876_s5] sm:$0x7] }
 0x6ba   : > { %v3379_v26 = vmax.f32 %v4775_v14, 0.0  ;;  %v3508_v32 = vrot.slane %v3495_v1, %v2698_v25  ;;  %v7823_v14 = vrot.slane %v3495_v1, %v2690_v53 }
 0x6bb   : > { %v3393_v17 = vpack.c.bf16 %v3378_v9, %v3375_v12 }
 0x6bc   : > { %v3394_v47 = vpack.c.bf16 %v3379_v26, %v3376_v41  ;;  %v3224_v31 = vpop.f32.mrb[12].mxu0  ;;  %3976 = vmatpush1.bf16.msra.mxu1 %v5409_v8  ;;  %4737 = vmatpush3.bf16.msra.mxu0 %v5412_v35  ;;  %v7826_v8 = vrot.slane %v3495_v1, %v8623_v59 }
 0x6bd   : > { %v4776_v56 = vadd.f32 %v3224_v31, %v7714_v13  ;;  %v3226_v37 = vpop.f32.mrb[13].mxu0  ;;  %3977 = vmatprep.subr.bf16.mxu1 %v5415_v44  ;;  %4738 = vmatprep.subr.bf16.mxu0 %v5416_v29 }
 0x6be   : > { %v4777_v3 = vadd.f32 %v3226_v37, %v7719_v45  ;;  %v3228_v55 = vpop.f32.mrb[14].mxu0  ;;  %3948 = vmatprep.mubr.bf16.mxu1 %v3394_v47  ;;  %4090 = vmatprep.mubr.bf16.mxu0 %v3394_v47 }
 0x6bf   : > { %v4778_v27 = vadd.f32 %v3228_v55, %v7714_v13  ;;  %v3230_v57 = vpop.f32.mrb[15].mxu0  ;;  %3949 = vmatmul.mubr.bf16.gmra.mrb[32].mxu1 %v3393_v17  ;;  %4091 = vmatmul.mubr.bf16.gmra.mrb[24].mxu0 %v3393_v17  ;;  %v3381_v50 = vmax.f32 %v4776_v56, 0.0  ;;  %v5424_v13 = vld [vmem:[%s7875_s4 + $0x218] ss:$12 sps:$4 sm:$0xff]  }
 0x6c0   : > { %v4779_v52 = vadd.f32 %v3230_v57, %v7719_v45  ;;  %3978 = vmatpush1.bf16.msra.mxu1 %v5413_v23  ;;  %4739 = vmatpush3.bf16.msra.mxu0 %v5416_v29  ;;  %v3382_v11 = vmax.f32 %v4777_v3, 0.0 }
 0x6c1   : > { %v3384_v46 = vmax.f32 %v4778_v27, 0.0  ;;  %3979 = vmatprep.subr.bf16.mxu1 %v5419_v2  ;;  %4740 = vmatprep.subr.bf16.mxu0 %v5420_v61 }
 0x6c2   : > { %v3385_v45 = vmax.f32 %v4779_v52, 0.0 }
 0x6c3   : > { %v3396_v33 = vpack.c.bf16 %v3384_v46, %v3381_v50 }
 0x6c4   : > { %v3397_v58 = vpack.c.bf16 %v3385_v45, %v3382_v11  ;;  %3980 = vmatpush1.bf16.msra.mxu1 %v5417_v49  ;;  %4741 = vmatpush3.bf16.msra.mxu0 %v5420_v61 }
 0x6c5   : > { %3981 = vmatprep.subr.bf16.mxu1 %v5423_v5  ;;  %4742 = vmatprep.subr.bf16.mxu0 %v5424_v13 }
 0x6c6   : > { %3958 = vmatprep.mubr.bf16.mxu1 %v3397_v58  ;;  %4098 = vmatprep.mubr.bf16.mxu0 %v3397_v58 }
 0x6c7   : > { %3959 = vmatmul.mubr.bf16.gmra.mrb[36].mxu1 %v3396_v33  ;;  %4099 = vmatmul.mubr.bf16.gmra.mrb[28].mxu0 %v3396_v33 }
 0x6c8   : > { %3982 = vmatpush1.bf16.msra.mxu1 %v5421_v18  ;;  %4743 = vmatpush3.bf16.msra.mxu0 %v5424_v13 }
 0x6c9   : > { %4746 = vmatprep.mubr.bf16.mxu0 %v7707_v40  ;;  %3983 = vmatprep.subr.bf16.mxu1 %v5427_v48 }
 0x6ca   : > { %4744 = vmatprep.subr.bf16.mxu0 %v5428_v24  ;;  %4001 = vmatprep.mubr.bf16.mxu1 %v5449_v34 }
 0x6cc   : > { %3984 = vmatpush1.bf16.msra.mxu1 %v5425_v28  ;;  %4745 = vmatpush3.bf16.msra.mxu0 %v5428_v24 }
 0x6cf   : > { %4002 = vmatmul.mubr.bf16.vlgmr.msra.gmra.mrb[24].mxu1 %v7707_v40  ;;  %4747 = vmatmul.mubr.bf16.vlgmr.msra.gmra.mrb[32].mxu0 %v7705_v22 }
 0x6d0   : > { %4750 = vmatprep.mubr.bf16.mxu0 %v7716_v16  ;;  %4011 = vmatprep.mubr.bf16.mxu1 %v5449_v34 }
 0x6d7   : > { %4012 = vmatmul.mubr.bf16.gmra.mrb[28].mxu1 %v7705_v22  ;;  %4751 = vmatmul.mubr.bf16.gmra.mrb[36].mxu0 %v7710_v19 }
 0x6d8   : > { %4021 = vmatprep.mubr.bf16.mxu1 %v5449_v34 }
 0x6df   : > { %4022 = vmatmul.mubr.bf16.gmra.mrb[32].mxu1 %v7716_v16 }
 0x6e0   : > { %4031 = vmatprep.mubr.bf16.mxu1 %v5449_v34 }
 0x6e7   : > { %4032 = vmatmul.mubr.bf16.gmra.mrb[36].mxu1 %v7710_v19 }
 0x782   : > { %v4595_v60 = vpop.f32.mrb[16].mxu0 }
 0x783   : > { %v4596_v40 = vpop.f32.mrb[17].mxu0 }
 0x784   : > { %v4597_v43 = vadd.f32 %v4596_v40, %v4595_v60  ;;  %v4598_v0 = vpop.f32.mrb[18].mxu0 }
 0x785   : > { %v4599_v54 = vpop.f32.mrb[19].mxu0 }
 0x786   : > { %v4600_v10 = vadd.f32 %v4599_v54, %v4598_v0  ;;  %v4077_v29 = vadd.f32 %v4597_v43, %v3508_v32 }
 0x788   : > { %v4080_v23 = vadd.f32 %v4600_v10, %v3508_v32 }
 0x78a   : > { %v4601_v4 = vpop.f32.mrb[20].mxu0 }
 0x78b   : > { %v4602_v20 = vpop.f32.mrb[21].mxu0 }
 0x78c   : > { %v4603_v63 = vadd.f32 %v4602_v20, %v4601_v4  ;;  %v4604_v22 = vpop.f32.mrb[22].mxu0 }
 0x78d   : > { %v4605_v42 = vpop.f32.mrb[23].mxu0 }
 0x78e   : > { %v4606_v51 = vadd.f32 %v4605_v42, %v4604_v22  ;;  %v4085_v12 = vadd.f32 %v4603_v63, %v3508_v32 }
 0x790   : > { %v4088_v47 = vadd.f32 %v4606_v51, %v3508_v32 }
 0x792   : > { %v4607_v15 = vpop.f32.mrb[24].mxu0 }
 0x793   : > { %v4608_v7 = vpop.f32.mrb[25].mxu0 }
 0x794   : > { %v4609_v36 = vadd.f32 %v4608_v7, %v4607_v15  ;;  %v4610_v16 = vpop.f32.mrb[26].mxu0 }
 0x795   : > { %v4611_v38 = vpop.f32.mrb[27].mxu0 }
 0x796   : > { %v4612_v34 = vadd.f32 %v4611_v38, %v4610_v16  ;;  %v4093_v49 = vadd.f32 %v4609_v36, %v3508_v32 }
 0x798   : > { %v4096_v48 = vadd.f32 %v4612_v34, %v3508_v32 }
 0x79a   : > { %v4613_v30 = vpop.f32.mrb[28].mxu0 }
 0x79b   : > { %v4614_v19 = vpop.f32.mrb[29].mxu0 }
 0x79c   : > { %v4615_v35 = vadd.f32 %v4614_v19, %v4613_v30  ;;  %v4616_v39 = vpop.f32.mrb[30].mxu0 }
 0x79d   : > { %v4617_v21 = vpop.f32.mrb[31].mxu0 }
 0x79e   : > { %v4618_v6 = vadd.f32 %v4617_v21, %v4616_v39  ;;  %v4101_v27 = vadd.f32 %v4615_v35, %v3508_v32 }
 0x7a0   : > { %v4104_v11 = vadd.f32 %v4618_v6, %v3508_v32 }
 0x7a2   : > { %v4003_v9 = vpop.f32.mrb[24].mxu1  ;;  %v4748_v44 = vpop.f32.mrb[32].mxu0 }
 0x7a3   : > { %v4780_v41 = vadd.f32 %v4003_v9, %v7823_v14  ;;  %v4150_v26 = vadd.f32 %v4748_v44, %v4085_v12  ;;  %v4005_v17 = vpop.f32.mrb[25].mxu1  ;;  %v4141_v25 = vpop.f32.mrb[33].mxu0 }
 0x7a4   : > { %v4781_v62 = vadd.f32 %v4005_v17, %v7826_v8  ;;  %v4142_v53 = vadd.f32 %v4141_v25, %v4077_v29  ;;  %v4007_v59 = vpop.f32.mrb[26].mxu1  ;;  %v4749_v31 = vpop.f32.mrb[34].mxu0 }
 0x7a5   : > { %4172 = vst [vmem:[%s5510_s10] sm:$0xff] %v4780_v41  ;;  %4180 = vst [vmem:[%s5510_s10 + $0x40] sm:$0xff] %v4150_v26  ;;  %v4782_v56 = vadd.f32 %v4007_v59, %v7823_v14  ;;  %v4153_v37 = vadd.f32 %v4749_v31, %v4088_v47  ;;  %v4009_v2 = vpop.f32.mrb[27].mxu1  ;;  %v4144_v61 = vpop.f32.mrb[35].mxu0 }
 0x7a6   : > { %4173 = vst [vmem:[%s5510_s10 + $0x8] sm:$0xff] %v4781_v62  ;;  %4174 = vst [vmem:[%s5510_s10 + $0x10] sm:$0xff] %v4142_v53  ;;  %v4783_v3 = vadd.f32 %v4009_v2, %v7826_v8  ;;  %v4145_v55 = vadd.f32 %v4144_v61, %v4080_v23 }
 0x7a7   : > { %4175 = vst [vmem:[%s5510_s10 + $0x18] sm:$0xff] %v4782_v56  ;;  %4183 = vst [vmem:[%s5510_s10 + $0x58] sm:$0xff] %v4153_v37 }
 0x7a8   : > { %4176 = vst [vmem:[%s5510_s10 + $0x20] sm:$0xff] %v4783_v3  ;;  %4177 = vst [vmem:[%s5510_s10 + $0x28] sm:$0xff] %v4145_v55 }
 0x7aa   : > { %v4013_v57 = vpop.f32.mrb[28].mxu1  ;;  %v4752_v52 = vpop.f32.mrb[36].mxu0 }
 0x7ab   : > { %v4784_v50 = vadd.f32 %v4013_v57, %v7823_v14  ;;  %v4166_v46 = vadd.f32 %v4752_v52, %v4101_v27  ;;  %v4015_v5 = vpop.f32.mrb[29].mxu1  ;;  %v4157_v13 = vpop.f32.mrb[37].mxu0 }
 0x7ac   : > { %v4785_v45 = vadd.f32 %v4015_v5, %v7826_v8  ;;  %v4158_v33 = vadd.f32 %v4157_v13, %v4093_v49  ;;  %v4017_v58 = vpop.f32.mrb[30].mxu1  ;;  %v4753_v18 = vpop.f32.mrb[38].mxu0 }
 0x7ad   : > { %4178 = vst [vmem:[%s5510_s10 + $0x30] sm:$0xff] %v4784_v50  ;;  %4192 = vst [vmem:[%s5510_s10 + $0xa0] sm:$0xff] %v4166_v46  ;;  %v4786_v24 = vadd.f32 %v4017_v58, %v7823_v14  ;;  %v4169_v28 = vadd.f32 %v4753_v18, %v4104_v11  ;;  %v4019_v60 = vpop.f32.mrb[31].mxu1  ;;  %v4160_v40 = vpop.f32.mrb[39].mxu0 }
 0x7ae   : > { %4179 = vst [vmem:[%s5510_s10 + $0x38] sm:$0xff] %v4785_v45  ;;  %4186 = vst [vmem:[%s5510_s10 + $0x70] sm:$0xff] %v4158_v33  ;;  %v4787_v43 = vadd.f32 %v4019_v60, %v7826_v8  ;;  %v4161_v0 = vadd.f32 %v4160_v40, %v4096_v48 }
 0x7af   : > { %4181 = vst [vmem:[%s5510_s10 + $0x48] sm:$0xff] %v4786_v24  ;;  %4195 = vst [vmem:[%s5510_s10 + $0xb8] sm:$0xff] %v4169_v28 }
 0x7b0   : > { %4182 = vst [vmem:[%s5510_s10 + $0x50] sm:$0xff] %v4787_v43  ;;  %4189 = vst [vmem:[%s5510_s10 + $0x88] sm:$0xff] %v4161_v0 }
 0x7b2   : > { %v4023_v54 = vpop.f32.mrb[32].mxu1 }
 0x7b3   : > { %v4788_v10 = vadd.f32 %v4023_v54, %v7823_v14  ;;  %v4025_v4 = vpop.f32.mrb[33].mxu1 }
 0x7b4   : > { %v4789_v20 = vadd.f32 %v4025_v4, %v7826_v8  ;;  %v4027_v63 = vpop.f32.mrb[34].mxu1 }
 0x7b5   : > { %4184 = vst [vmem:[%s5510_s10 + $0x60] sm:$0xff] %v4788_v10  ;;  %v4790_v22 = vadd.f32 %v4027_v63, %v7823_v14  ;;  %v4029_v42 = vpop.f32.mrb[35].mxu1 }
 0x7b6   : > { %4185 = vst [vmem:[%s5510_s10 + $0x68] sm:$0xff] %v4789_v20  ;;  %v4791_v51 = vadd.f32 %v4029_v42, %v7826_v8 }
 0x7b7   : > { %4187 = vst [vmem:[%s5510_s10 + $0x78] sm:$0xff] %v4790_v22 }
 0x7b8   : > { %4188 = vst [vmem:[%s5510_s10 + $0x80] sm:$0xff] %v4791_v51 }
 0x7ba   : > { %v4033_v15 = vpop.f32.mrb[36].mxu1 }
 0x7bb   : > { %v4792_v7 = vadd.f32 %v4033_v15, %v7823_v14  ;;  %v4035_v36 = vpop.f32.mrb[37].mxu1 }
 0x7bc   : > { %v4793_v16 = vadd.f32 %v4035_v36, %v7826_v8  ;;  %v4037_v38 = vpop.f32.mrb[38].mxu1 }
 0x7bd   : > { %4190 = vst [vmem:[%s5510_s10 + $0x90] sm:$0xff] %v4792_v7  ;;  %v4794_v34 = vadd.f32 %v4037_v38, %v7823_v14  ;;  %v4039_v30 = vpop.f32.mrb[39].mxu1 }
 0x7be   : > { %4191 = vst [vmem:[%s5510_s10 + $0x98] sm:$0xff] %v4793_v16  ;;  %v4795_v19 = vadd.f32 %v4039_v30, %v7826_v8 }
 0x7bf   : > { %4193 = vst [vmem:[%s5510_s10 + $0xa8] sm:$0xff] %v4794_v34 }
 0x7c0   : > { %4194 = vst [vmem:[%s5510_s10 + $0xb0] sm:$0xff] %v4795_v19 }
 0x7c1 PF: > { %s16_s21 = sadd.s32 1, %s5439_s21  }
 0x7c2   : > { %p13_p6 = scmp.ge.s32.totalorder %s16_s21, 4  }
 0x7c4   :  { %15 = sbr.rel (!%p13_p6) target bundleno = 1 (0x1), region = 94 }

// kernel: my_pretrainnn_forward.2
= control target key start
LH: loop header
LB: loop body
LE: loop exit
PB: predicated region body
PF: predicated region fallthrough
CT: control target
= control target key end

     0   :  { %s6143_s27 = smov 0   ;;  %s7201_s0 = inlined_call_operand.vmem [shape: bf16[128,128], index: 0, kind: input, shape index: {}]   ;;  %s7202_s1 = inlined_call_operand.vmem [shape: bf16[8,128], index: 1, kind: input, shape index: {}]   ;;  %s7203_s2 = inlined_call_operand.vmem [shape: bf16[128,384], index: 2, kind: input, shape index: {}]   ;;  %s7204_s3 = inlined_call_operand.vmem [shape: bf16[5,128,384], index: 3, kind: input, shape index: {}]   ;;  %s7205_s4 = inlined_call_operand.vmem [shape: bf16[5,384,768], index: 4, kind: input, shape index: {}]   ;;  %s7206_s5 = inlined_call_operand.vmem [shape: f32[5,1,768], index: 5, kind: input, shape index: {}]   ;;  %s7207_s6 = inlined_call_operand.vmem [shape: bf16[5,768,384], index: 6, kind: input, shape index: {}]   ;;  %s7208_s7 = inlined_call_operand.vmem [shape: f32[5,1,384], index: 7, kind: input, shape index: {}]   ;;  %s7209_s8 = inlined_call_operand.vmem [shape: f32[6,8,384], index: 8, kind: output, shape index: {}]  }
   0x1 LB: > { %s6149_s28 = sadd.s32 4294967295, %s6092_s27   ;;  %p4730_p0 = scmp.ge.s32.totalorder %s6092_s27, 1  ;;  %s6092_s27 = sphi %s6143_s27, %s18_s27  }
   0x2   : > { %p360_p1 = scmp.lt.s32.totalorder %s6092_s27, 7 }
   0x4   : > { %p361_p2 = pnand %p4730_p0, %p360_p1 }
   0x5   : > { %p427_p3 = scmp.gt.s32.totalorder (!%p361_p2), %s6149_s28, 1  ;;  %p480_p4 = scmp.lt.s32.totalorder (!%p361_p2), %s6149_s28, 5 }
   0x6   : > { %364 = sbr.rel (%p361_p2) target bundleno = 1291 (0x50b), region = 52  ;;  %p4740_p6 = scmp.ne.s32.totalorder (!%p361_p2), %s6149_s28, 0 }
   0xd   : > { %s428_s29 = scalar_select %p427_p3, %s6149_s28, 1 }
   0xe   : > { %s481_s30 = scalar_select %p480_p4, %s6149_s28, 5 }
   0xf   : > { %s4731_s9 = sadd.s32 4294967295, %s428_s29  ;;  %v5638_v0 = vld [vmem:[%s7203_s2] ss:$12 sps:$4 sm:$0xff] (!%p4740_p6)   ;;  %v5640_v1 = vld [vmem:[%s7203_s2 + $0x4] ss:$12 sps:$4 sm:$0xff] (!%p4740_p6)  }
  0x10   : > { %p430_p5 = scmp.lt.s32.totalorder %s4731_s9, 4  ;;  %s5625_s10 = smul.u32 24, %s481_s30  ;;  %650 = vst [vmem:[#allocation2] sm:$0xff] (!%p4740_p6), %v5638_v0  ;;  %v5641_v2 = vld [vmem:[%s7203_s2 + $0x8] ss:$12 sps:$4 sm:$0xff] (!%p4740_p6)   ;;  %651 = vst [vmem:[#allocation2 + $0x8] sm:$0xff] (!%p4740_p6), %v5640_v1 }
  0x11   : > { %v5642_v3 = vld [vmem:[%s7203_s2 + $0x18] ss:$12 sps:$4 sm:$0xff] (!%p4740_p6)   ;;  %v5644_v4 = vld [vmem:[%s7203_s2 + $0x1c] ss:$12 sps:$4 sm:$0xff] (!%p4740_p6)   ;;  %652 = vst [vmem:[#allocation2 + $0x10] sm:$0xff] (!%p4740_p6), %v5641_v2 }
  0x12   : > { %s7211_s9 = smov (!%p430_p5, %s4731_s9), 4  ;;  %s6162_s13 = scalar_lea.vmem %s7209_s8, %s5625_s10  ;;  %v5645_v5 = vld [vmem:[%s7203_s2 + $0x20] ss:$12 sps:$4 sm:$0xff] (!%p4740_p6)   ;;  %653 = vst [vmem:[#allocation2 + $0x18] sm:$0xff] (!%p4740_p6), %v5642_v3  ;;  %654 = vst [vmem:[#allocation2 + $0x20] sm:$0xff] (!%p4740_p6), %v5644_v4 }
  0x13   : > { %s5621_s14 = smul.u32 192, %s7211_s9  ;;  %v5646_v6 = vld [vmem:[%s7203_s2 + $0x30] ss:$12 sps:$4 sm:$0xff] (!%p4740_p6)   ;;  %v5648_v7 = vld [vmem:[%s7203_s2 + $0x34] ss:$12 sps:$4 sm:$0xff] (!%p4740_p6)   ;;  %655 = vst [vmem:[#allocation2 + $0x28] sm:$0xff] (!%p4740_p6), %v5645_v5 }
  0x14   : > { %s5622_s15 = smul.u32 1152, %s7211_s9  ;;  %v5649_v8 = vld [vmem:[%s7203_s2 + $0x38] ss:$12 sps:$4 sm:$0xff] (!%p4740_p6)   ;;  %656 = vst [vmem:[#allocation2 + $0x30] sm:$0xff] (!%p4740_p6), %v5646_v6  ;;  %657 = vst [vmem:[#allocation2 + $0x38] sm:$0xff] (!%p4740_p6), %v5648_v7 }
  0x15   : > { %s6167_s18 = scalar_lea.vmem %s7204_s3, %s5621_s14  ;;  %s5623_s19 = smul.u32 6, %s7211_s9  ;;  %v5650_v9 = vld [vmem:[%s7203_s2 + $0x48] ss:$12 sps:$4 sm:$0xff] (!%p4740_p6)   ;;  %658 = vst [vmem:[#allocation2 + $0x40] sm:$0xff] (!%p4740_p6), %v5649_v8  ;;  %v5652_v10 = vld [vmem:[%s7203_s2 + $0x4c] ss:$12 sps:$4 sm:$0xff] (!%p4740_p6)  }
  0x16   : > { %s6172_s22 = scalar_lea.vmem %s7205_s4, %s5622_s15  ;;  %s6177_s25 = scalar_lea.vmem %s7207_s6, %s5622_s15  ;;  %659 = vst [vmem:[#allocation2 + $0x48] sm:$0xff] (!%p4740_p6), %v5650_v9  ;;  %v5653_v11 = vld [vmem:[%s7203_s2 + $0x50] ss:$12 sps:$4 sm:$0xff] (!%p4740_p6)   ;;  %660 = vst [vmem:[#allocation2 + $0x50] sm:$0xff] (!%p4740_p6), %v5652_v10  ;;  %v5654_v12 = vld [vmem:[%s7203_s2 + $0x60] ss:$12 sps:$4 sm:$0xff] (!%p4740_p6)  }
  0x17   : > { %s6182_s30 = scalar_lea.vmem %s7206_s5, %s5623_s19  ;;  %s5624_s10 = smul.u32 3, %s7211_s9  ;;  %v5656_v13 = vld [vmem:[%s7203_s2 + $0x64] ss:$12 sps:$4 sm:$0xff] (!%p4740_p6)   ;;  %661 = vst [vmem:[#allocation2 + $0x58] sm:$0xff] (!%p4740_p6), %v5653_v11  ;;  %v5657_v14 = vld [vmem:[%s7203_s2 + $0x68] ss:$12 sps:$4 sm:$0xff] (!%p4740_p6)  }
  0x18   : > { %489 = sbr.rel (%p4740_p6) target bundleno = 31 (0x1f), region = 56  ;;  %662 = vst [vmem:[#allocation2 + $0x60] sm:$0xff] (!%p4740_p6), %v5654_v12  ;;  %663 = vst [vmem:[#allocation2 + $0x68] sm:$0xff] (!%p4740_p6), %v5656_v13  ;;  %v5658_v15 = vld [vmem:[%s7203_s2 + $0x78] ss:$12 sps:$4 sm:$0xff] (!%p4740_p6)  }
  0x19   : > { %s6187_s14 = scalar_lea.vmem %s7208_s7, %s5624_s10  ;;  %v5660_v16 = vld [vmem:[%s7203_s2 + $0x7c] ss:$12 sps:$4 sm:$0xff] (!%p4740_p6)   ;;  %664 = vst [vmem:[#allocation2 + $0x70] sm:$0xff] (!%p4740_p6), %v5657_v14  ;;  %v5661_v17 = vld [vmem:[%s7203_s2 + $0x80] ss:$12 sps:$4 sm:$0xff] (!%p4740_p6)   ;;  %665 = vst [vmem:[#allocation2 + $0x78] sm:$0xff] (!%p4740_p6), %v5658_v15 }
  0x1a   : > { %666 = vst [vmem:[#allocation2 + $0x80] sm:$0xff] (!%p4740_p6), %v5660_v16  ;;  %v5662_v18 = vld [vmem:[%s7203_s2 + $0x90] ss:$12 sps:$4 sm:$0xff] (!%p4740_p6)   ;;  %667 = vst [vmem:[#allocation2 + $0x88] sm:$0xff] (!%p4740_p6), %v5661_v17  ;;  %v5664_v19 = vld [vmem:[%s7203_s2 + $0x94] ss:$12 sps:$4 sm:$0xff] (!%p4740_p6)  }
  0x1b   : > { %668 = vst [vmem:[#allocation2 + $0x90] sm:$0xff] (!%p4740_p6), %v5662_v18  ;;  %v5665_v20 = vld [vmem:[%s7203_s2 + $0x98] ss:$12 sps:$4 sm:$0xff] (!%p4740_p6)   ;;  %669 = vst [vmem:[#allocation2 + $0x98] sm:$0xff] (!%p4740_p6), %v5664_v19  ;;  %v5666_v21 = vld [vmem:[%s7203_s2 + $0xa8] ss:$12 sps:$4 sm:$0xff] (!%p4740_p6)  }
  0x1c   : > { %v5668_v22 = vld [vmem:[%s7203_s2 + $0xac] ss:$12 sps:$4 sm:$0xff] (!%p4740_p6)   ;;  %670 = vst [vmem:[#allocation2 + $0xa0] sm:$0xff] (!%p4740_p6), %v5665_v20  ;;  %v5669_v23 = vld [vmem:[%s7203_s2 + $0xb0] ss:$12 sps:$4 sm:$0xff] (!%p4740_p6)   ;;  %671 = vst [vmem:[#allocation2 + $0xa8] sm:$0xff] (!%p4740_p6), %v5666_v21 }
  0x1d   : > { %672 = vst [vmem:[#allocation2 + $0xb0] sm:$0xff] (!%p4740_p6), %v5668_v22  ;;  %673 = vst [vmem:[#allocation2 + $0xb8] sm:$0xff] (!%p4740_p6), %v5669_v23 }
  0x1f PF: > { %p4765_p7 = scmp.le.s32.totalorder %s6149_s28, 0 }
  0x20   : > { %v695_v24 = vld [vmem:[#allocation2 + $0x8] sm:$0xff] (!%p4765_p7)  ;;  %v694_v25 = vld [vmem:[#allocation2] sm:$0xff] (!%p4765_p7)  ;;  %v6094_v27 = vmov (!%p4765_p7), 0   ;;  %v697_v28 = vld [vmem:[#allocation2 + $0x18] sm:$0xff] (!%p4765_p7) }
  0x21   : > { %677 = sbr.rel (%p4765_p7) target bundleno = 1043 (0x413), region = 60  ;;  %v698_v26 = vld [vmem:[#allocation2 + $0x20] sm:$0xff] (!%p4765_p7)  ;;  %846 = vmatprep.subr.bf16.mxu0 (!%p4765_p7), %v695_v24  ;;  %878 = vmatprep.mubr.bf16.mxu0 (!%p4765_p7), %v6094_v27  ;;  %v701_v29 = vld [vmem:[#allocation2 + $0x38] sm:$0xff] (!%p4765_p7)  ;;  %v5670_v30 = vld [vmem:[%s7201_s0] sm:$0xff] (!%p4765_p7)  }
  0x22   : > { %847 = vmatpush1.bf16.msra.mxu0 (!%p4765_p7), %v694_v25  ;;  %v700_v31 = vld [vmem:[#allocation2 + $0x30] sm:$0xff] (!%p4765_p7)  ;;  %5297 = vmatprep.mubr.bf16.mxu1 (!%p4765_p7), %v5670_v30  ;;  %v699_v34 = vld [vmem:[#allocation2 + $0x28] sm:$0xff] (!%p4765_p7)  ;;  %v702_v37 = vld [vmem:[#allocation2 + $0x40] sm:$0xff] (!%p4765_p7) }
  0x23   : > { %848 = vmatprep.subr.bf16.mxu0 (!%p4765_p7), %v698_v26  ;;  %v704_v32 = vld [vmem:[#allocation2 + $0x50] sm:$0xff] (!%p4765_p7)  ;;  %v703_v35 = vld [vmem:[#allocation2 + $0x48] sm:$0xff] (!%p4765_p7)  ;;  %v706_v38 = vld [vmem:[#allocation2 + $0x60] sm:$0xff] (!%p4765_p7) }
  0x24   : > { %v696_v33 = vld [vmem:[#allocation2 + $0x10] sm:$0xff] (!%p4765_p7)  ;;  %v707_v36 = vld [vmem:[#allocation2 + $0x68] sm:$0xff] (!%p4765_p7)  ;;  %v710_v39 = vld [vmem:[#allocation2 + $0x80] sm:$0xff] (!%p4765_p7) }
  0x25   : > { %5281 = vmatprep.subr.bf16.mxu1 (!%p4765_p7), %v696_v33  ;;  %v705_v40 = vld [vmem:[#allocation2 + $0x58] sm:$0xff] (!%p4765_p7)  ;;  %v708_v43 = vld [vmem:[#allocation2 + $0x70] sm:$0xff] (!%p4765_p7)  ;;  %v711_v46 = vld [vmem:[#allocation2 + $0x88] sm:$0xff] (!%p4765_p7) }
  0x26   : > { %849 = vmatpush1.bf16.msra.mxu0 (!%p4765_p7), %v697_v28  ;;  %5282 = vmatpush3.bf16.msra.mxu1 (!%p4765_p7), %v696_v33  ;;  %v709_v41 = vld [vmem:[#allocation2 + $0x78] sm:$0xff] (!%p4765_p7)  ;;  %v712_v44 = vld [vmem:[#allocation2 + $0x90] sm:$0xff] (!%p4765_p7)  ;;  %v715_v47 = vld [vmem:[#allocation2 + $0xa8] sm:$0xff] (!%p4765_p7) }
  0x27   : > { %850 = vmatprep.subr.bf16.mxu0 (!%p4765_p7), %v701_v29  ;;  %5283 = vmatprep.subr.bf16.mxu1 (!%p4765_p7), %v699_v34  ;;  %v713_v42 = vld [vmem:[#allocation2 + $0x98] sm:$0xff] (!%p4765_p7)  ;;  %v716_v45 = vld [vmem:[#allocation2 + $0xb0] sm:$0xff] (!%p4765_p7)  ;;  %v5680_v48 = vld [vmem:[%s6172_s22 + $0x4] ss:$24 sps:$4 sm:$0xff] (!%p4765_p7)  }
  0x28   : > { %v714_v49 = vld [vmem:[#allocation2 + $0xa0] sm:$0xff]  ;;  %v5686_v51 = vld [vmem:[%s6172_s22 + $0x34] ss:$24 sps:$4 sm:$0xff]   ;;  %v5684_v53 = vld [vmem:[%s6172_s22 + $0x30] ss:$24 sps:$4 sm:$0xff]  }
  0x29   : > { %v5678_v50 = vld [vmem:[%s6172_s22] ss:$24 sps:$4 sm:$0xff]   ;;  %v717_v52 = vld [vmem:[#allocation2 + $0xb8] sm:$0xff]  ;;  %v5692_v54 = vld [vmem:[%s6172_s22 + $0x64] ss:$24 sps:$4 sm:$0xff]  }
  0x2a   : > { %851 = vmatpush1.bf16.msra.mxu0 %v700_v31  ;;  %5284 = vmatpush3.bf16.msra.mxu1 %v699_v34  ;;  %v5683_v55 = vld [vmem:[%s6172_s22 + $0xc] ss:$24 sps:$4 sm:$0xff]   ;;  %v5672_v57 = vld [vmem:[%s7201_s0 + $0x10] sm:$0xff]   ;;  %v5681_v58 = vld [vmem:[%s6172_s22 + $0x8] ss:$24 sps:$4 sm:$0xff]  }
  0x2b   : > { %852 = vmatprep.subr.bf16.mxu0 %v704_v32  ;;  %5285 = vmatprep.subr.bf16.mxu1 %v702_v37  ;;  %v5671_v56 = vld [vmem:[%s7201_s0 + $0x8] sm:$0xff]   ;;  %v5689_v59 = vld [vmem:[%s6172_s22 + $0x3c] ss:$24 sps:$4 sm:$0xff]   ;;  %v5690_v60 = vld [vmem:[%s6172_s22 + $0x60] ss:$24 sps:$4 sm:$0xff]  }
  0x2c   : > { %v5698_v61 = vld [vmem:[%s6172_s22 + $0x94] ss:$24 sps:$4 sm:$0xff]   ;;  %v5687_v62 = vld [vmem:[%s6172_s22 + $0x38] ss:$24 sps:$4 sm:$0xff]   ;;  %v5704_v1 = vld [vmem:[%s6172_s22 + $0xc4] ss:$24 sps:$4 sm:$0xff]  }
  0x2d   : > { %v5695_v63 = vld [vmem:[%s6172_s22 + $0x6c] ss:$24 sps:$4 sm:$0xff]   ;;  %v5696_v0 = vld [vmem:[%s6172_s22 + $0x90] ss:$24 sps:$4 sm:$0xff]   ;;  %v5673_v2 = vld [vmem:[%s7201_s0 + $0x18] sm:$0xff]  }
  0x2e   : > { %853 = vmatpush1.bf16.msra.mxu0 %v703_v35  ;;  %5286 = vmatpush3.bf16.msra.mxu1 %v702_v37  ;;  %v5674_v3 = vld [vmem:[%s7201_s0 + $0x20] sm:$0xff]   ;;  %v5701_v5 = vld [vmem:[%s6172_s22 + $0x9c] ss:$24 sps:$4 sm:$0xff]   ;;  %v5699_v8 = vld [vmem:[%s6172_s22 + $0x98] ss:$24 sps:$4 sm:$0xff]  }
  0x2f   : > { %854 = vmatprep.subr.bf16.mxu0 %v707_v36  ;;  %5287 = vmatprep.subr.bf16.mxu1 %v705_v40  ;;  %v5693_v4 = vld [vmem:[%s6172_s22 + $0x68] ss:$24 sps:$4 sm:$0xff]   ;;  %v5710_v7 = vld [vmem:[%s6172_s22 + $0xf4] ss:$24 sps:$4 sm:$0xff]   ;;  %v5716_v12 = vld [vmem:[%s6172_s22 + $0x124] ss:$24 sps:$4 sm:$0xff]  }
  0x30   : > { %v5702_v6 = vld [vmem:[%s6172_s22 + $0xc0] ss:$24 sps:$4 sm:$0xff]   ;;  %v5707_v9 = vld [vmem:[%s6172_s22 + $0xcc] ss:$24 sps:$4 sm:$0xff]   ;;  %v5708_v10 = vld [vmem:[%s6172_s22 + $0xf0] ss:$24 sps:$4 sm:$0xff]  }
  0x31   : > { %v5705_v11 = vld [vmem:[%s6172_s22 + $0xc8] ss:$24 sps:$4 sm:$0xff]   ;;  %v5713_v14 = vld [vmem:[%s6172_s22 + $0xfc] ss:$24 sps:$4 sm:$0xff]   ;;  %v5711_v18 = vld [vmem:[%s6172_s22 + $0xf8] ss:$24 sps:$4 sm:$0xff]  }
  0x32   : > { %855 = vmatpush1.bf16.msra.mxu0 %v706_v38  ;;  %5288 = vmatpush3.bf16.msra.mxu1 %v705_v40  ;;  %v5675_v13 = vld [vmem:[%s7201_s0 + $0x28] sm:$0xff]   ;;  %v5714_v15 = vld [vmem:[%s6172_s22 + $0x120] ss:$24 sps:$4 sm:$0xff]   ;;  %v5676_v16 = vld [vmem:[%s7201_s0 + $0x30] sm:$0xff]  }
  0x33   : > { %856 = vmatprep.subr.bf16.mxu0 %v710_v39  ;;  %5289 = vmatprep.subr.bf16.mxu1 %v708_v43  ;;  %v5722_v17 = vld [vmem:[%s6172_s22 + $0x154] ss:$24 sps:$4 sm:$0xff]   ;;  %v5720_v20 = vld [vmem:[%s6172_s22 + $0x150] ss:$24 sps:$4 sm:$0xff]   ;;  %v5728_v21 = vld [vmem:[%s6172_s22 + $0x184] ss:$24 sps:$4 sm:$0xff]  }
  0x34   : > { %v5719_v19 = vld [vmem:[%s6172_s22 + $0x12c] ss:$24 sps:$4 sm:$0xff]   ;;  %v5717_v22 = vld [vmem:[%s6172_s22 + $0x128] ss:$24 sps:$4 sm:$0xff]   ;;  %v5677_v23 = vld [vmem:[%s7201_s0 + $0x38] sm:$0xff]  }
  0x35   : > { %v5725_v24 = vld [vmem:[%s6172_s22 + $0x15c] ss:$24 sps:$4 sm:$0xff]   ;;  %v5726_v25 = vld [vmem:[%s6172_s22 + $0x180] ss:$24 sps:$4 sm:$0xff]   ;;  %v5731_v29 = vld [vmem:[%s6172_s22 + $0x18c] ss:$24 sps:$4 sm:$0xff]  }
  0x36   : > { %857 = vmatpush1.bf16.msra.mxu0 %v709_v41  ;;  %5290 = vmatpush3.bf16.msra.mxu1 %v708_v43  ;;  %v5734_v26 = vld [vmem:[%s6172_s22 + $0x1b4] ss:$24 sps:$4 sm:$0xff]   ;;  %v5723_v28 = vld [vmem:[%s6172_s22 + $0x158] ss:$24 sps:$4 sm:$0xff]   ;;  %v5740_v31 = vld [vmem:[%s6172_s22 + $0x1e4] ss:$24 sps:$4 sm:$0xff]  }
  0x37   : > { %858 = vmatprep.subr.bf16.mxu0 %v713_v42  ;;  %5291 = vmatprep.subr.bf16.mxu1 %v711_v46  ;;  %v5729_v32 = vld [vmem:[%s6172_s22 + $0x188] ss:$24 sps:$4 sm:$0xff]   ;;  %v5737_v33 = vld [vmem:[%s6172_s22 + $0x1bc] ss:$24 sps:$4 sm:$0xff]   ;;  %v5735_v36 = vld [vmem:[%s6172_s22 + $0x1b8] ss:$24 sps:$4 sm:$0xff]  }
  0x38   : > { %v5738_v34 = vld [vmem:[%s6172_s22 + $0x1e0] ss:$24 sps:$4 sm:$0xff]   ;;  %v5746_v35 = vld [vmem:[%s6172_s22 + $0x214] ss:$24 sps:$4 sm:$0xff]   ;;  %v5744_v38 = vld [vmem:[%s6172_s22 + $0x210] ss:$24 sps:$4 sm:$0xff]  }
  0x39   : > { %v5743_v37 = vld [vmem:[%s6172_s22 + $0x1ec] ss:$24 sps:$4 sm:$0xff]   ;;  %v5741_v40 = vld [vmem:[%s6172_s22 + $0x1e8] ss:$24 sps:$4 sm:$0xff]   ;;  %v5749_v41 = vld [vmem:[%s6172_s22 + $0x21c] ss:$24 sps:$4 sm:$0xff]  }
  0x3a   : > { %859 = vmatpush1.bf16.msra.mxu0 %v712_v44  ;;  %5292 = vmatpush3.bf16.msra.mxu1 %v711_v46  ;;  %v5752_v39 = vld [vmem:[%s6172_s22 + $0x244] ss:$24 sps:$4 sm:$0xff]   ;;  %v5750_v42 = vld [vmem:[%s6172_s22 + $0x240] ss:$24 sps:$4 sm:$0xff]   ;;  %v5758_v43 = vld [vmem:[%s6172_s22 + $0x274] ss:$24 sps:$4 sm:$0xff]  }
  0x3b   : > { %860 = vmatprep.subr.bf16.mxu0 %v716_v45  ;;  %5293 = vmatprep.subr.bf16.mxu1 %v714_v49  ;;  %v5747_v44 = vld [vmem:[%s6172_s22 + $0x218] ss:$24 sps:$4 sm:$0xff]   ;;  %v5755_v45 = vld [vmem:[%s6172_s22 + $0x24c] ss:$24 sps:$4 sm:$0xff]  }
  0x3c   : > { %v5756_v46 = vld [vmem:[%s6172_s22 + $0x270] ss:$24 sps:$4 sm:$0xff]  }
  0x3e   : > { %861 = vmatpush1.bf16.msra.mxu0 %v715_v47  ;;  %5294 = vmatpush3.bf16.msra.mxu1 %v714_v49  ;;  %v5753_v47 = vld [vmem:[%s6172_s22 + $0x248] ss:$24 sps:$4 sm:$0xff]   ;;  %v5759_v49 = vld [vmem:[%s6172_s22 + $0x278] ss:$24 sps:$4 sm:$0xff]  }
  0x3f   : > { %1976 = vmatprep.subr.bf16.mxu0 %v5680_v48  ;;  %5295 = vmatprep.subr.bf16.mxu1 %v717_v52  ;;  %v5761_v48 = vld [vmem:[%s6172_s22 + $0x27c] ss:$24 sps:$4 sm:$0xff]  }
  0x41   : > { %879 = vmatmul.mubr.bf16.vlgmr.msra.gmra.mrb[0].mxu0 %v5670_v30  ;;  %v5732_v30 = vld [vmem:[%s6172_s22 + $0x1b0] ss:$24 sps:$4 sm:$0xff]  }
  0x42   : > { %888 = vmatprep.mubr.bf16.mxu0 %v6094_v27  ;;  %1977 = vmatpush1.bf16.msra.mxu0 %v5678_v50  ;;  %v5764_v50 = vld [vmem:[%s6172_s22 + $0x2a4] ss:$24 sps:$4 sm:$0xff]  }
  0x43   : > { %1978 = vmatprep.subr.bf16.mxu0 %v5686_v51  ;;  %5296 = vmatpush3.bf16.msra.mxu1 %v717_v52  ;;  %v5767_v51 = vld [vmem:[%s6172_s22 + $0x2ac] ss:$24 sps:$4 sm:$0xff]   ;;  %v5762_v52 = vld [vmem:[%s6172_s22 + $0x2a0] ss:$24 sps:$4 sm:$0xff]  }
  0x44   : > { %2202 = vmatprep.subr.bf16.mxu1 %v5683_v55  ;;  %v5773_v55 = vld [vmem:[%s6172_s22 + $0x2dc] ss:$24 sps:$4 sm:$0xff]  }
  0x46   : > { %1979 = vmatpush1.bf16.msra.mxu0 %v5684_v53  ;;  %5298 = vmatmul.mubr.bf16.vlgmr.msra.gmra.mrb[0].mxu1 %v5671_v56  ;;  %v5765_v53 = vld [vmem:[%s6172_s22 + $0x2a8] ss:$24 sps:$4 sm:$0xff]  }
  0x47   : > { %1980 = vmatprep.subr.bf16.mxu0 %v5692_v54  ;;  %5301 = vmatprep.mubr.bf16.mxu1 %v5672_v57  ;;  %v5770_v54 = vld [vmem:[%s6172_s22 + $0x2d4] ss:$24 sps:$4 sm:$0xff]  }
  0x48   : > { %2203 = vmatpush1.bf16.msra.mxu1 %v5681_v58  ;;  %v5776_v58 = vld [vmem:[%s6172_s22 + $0x304] ss:$24 sps:$4 sm:$0xff]  }
  0x49   : > { %889 = vmatmul.mubr.bf16.gmra.mrb[4].mxu0 %v5671_v56  ;;  %2204 = vmatprep.subr.bf16.mxu1 %v5689_v59  ;;  %v5768_v56 = vld [vmem:[%s6172_s22 + $0x2d0] ss:$24 sps:$4 sm:$0xff]   ;;  %v5791_v59 = vld [vmem:[%s6172_s22 + $0x30c] ss:$24 sps:$4 sm:$0xff]  }
  0x4a   : > { %898 = vmatprep.mubr.bf16.mxu0 %v6094_v27  ;;  %1981 = vmatpush1.bf16.msra.mxu0 %v5690_v60  ;;  %v718_v60 = vld [vmem:[%s6167_s18] sm:$0xff] }
  0x4b   : > { %1982 = vmatprep.subr.bf16.mxu0 %v5698_v61  ;;  %v720_v61 = vld [vmem:[%s6167_s18 + $0xc] sm:$0xff] }
  0x4c   : > { %2205 = vmatpush1.bf16.msra.mxu1 %v5687_v62  ;;  %v750_v62 = vunpack.c.l.bf16 %v718_v60 }
  0x4d   : > { %2206 = vmatprep.subr.bf16.mxu1 %v5695_v63  ;;  %v753_v63 = vunpack.c.l.bf16 %v720_v61 }
  0x4e   : > { %1983 = vmatpush1.bf16.msra.mxu0 %v5696_v0  ;;  %5302 = vmatmul.mubr.bf16.gmra.mrb[4].mxu1 %v5673_v2 }
  0x4f   : > { %1984 = vmatprep.subr.bf16.mxu0 %v5704_v1  ;;  %5305 = vmatprep.mubr.bf16.mxu1 %v5674_v3  ;;  %v751_v1 = vunpack.c.h.bf16 %v718_v60 }
  0x50   : > { %2207 = vmatpush1.bf16.msra.mxu1 %v5693_v4 }
  0x51   : > { %899 = vmatmul.mubr.bf16.gmra.mrb[8].mxu0 %v5672_v57  ;;  %2208 = vmatprep.subr.bf16.mxu1 %v5701_v5  ;;  %v5771_v57 = vld [vmem:[%s6172_s22 + $0x2d8] ss:$24 sps:$4 sm:$0xff]  }
  0x52   : > { %908 = vmatprep.mubr.bf16.mxu0 %v6094_v27  ;;  %1985 = vmatpush1.bf16.msra.mxu0 %v5702_v6 }
  0x53   : > { %1986 = vmatprep.subr.bf16.mxu0 %v5710_v7 }
  0x54   : > { %2209 = vmatpush1.bf16.msra.mxu1 %v5699_v8  ;;  %v723_v8 = vld [vmem:[%s6167_s18 + $0x8] ss:$24 sps:$4 sm:$0xff]  }
  0x55   : > { %2210 = vmatprep.subr.bf16.mxu1 %v5707_v9 }
  0x56   : > { %1987 = vmatpush1.bf16.msra.mxu0 %v5708_v10  ;;  %5306 = vmatmul.mubr.bf16.gmra.mrb[8].mxu1 %v5675_v13 }
  0x57   : > { %1988 = vmatprep.subr.bf16.mxu0 %v5716_v12  ;;  %5309 = vmatprep.mubr.bf16.mxu1 %v5676_v16  ;;  %v724_v12 = vld [vmem:[%s6167_s18 + $0x24] sm:$0xff] }
  0x58   : > { %2211 = vmatpush1.bf16.msra.mxu1 %v5705_v11  ;;  %v722_v11 = vld [vmem:[%s6167_s18 + $0x18] sm:$0xff] }
  0x59   : > { %909 = vmatmul.mubr.bf16.gmra.mrb[12].mxu0 %v5673_v2  ;;  %2212 = vmatprep.subr.bf16.mxu1 %v5713_v14  ;;  %v754_v2 = vunpack.c.h.bf16 %v720_v61  ;;  %v725_v14 = vld [vmem:[%s6167_s18 + $0x14] ss:$24 sps:$4 sm:$0xff]  }
  0x5a   : > { %918 = vmatprep.mubr.bf16.mxu0 %v6094_v27  ;;  %1989 = vmatpush1.bf16.msra.mxu0 %v5714_v15  ;;  %v5785_v61 = vld [vmem:[%s6172_s22 + $0x394] ss:$24 sps:$4 sm:$0xff]  }
  0x5b   : > { %1990 = vmatprep.subr.bf16.mxu0 %v5722_v17  ;;  %v5789_v17 = vld [vmem:[%s6172_s22 + $0x308] ss:$24 sps:$4 sm:$0xff]  }
  0x5c   : > { %2213 = vmatpush1.bf16.msra.mxu1 %v5711_v18  ;;  %v758_v18 = vunpack.c.h.bf16 %v723_v8 }
  0x5d   : > { %2214 = vmatprep.subr.bf16.mxu1 %v5719_v19  ;;  %v756_v19 = vunpack.c.l.bf16 %v722_v11 }
  0x5e   : > { %1991 = vmatpush1.bf16.msra.mxu0 %v5720_v20  ;;  %5310 = vmatmul.mubr.bf16.gmra.mrb[12].mxu1 %v5677_v23  ;;  %v759_v20 = vunpack.c.l.bf16 %v724_v12 }
  0x5f   : > { %1992 = vmatprep.subr.bf16.mxu0 %v5728_v21  ;;  %v5779_v21 = vld [vmem:[%s6172_s22 + $0x334] ss:$24 sps:$4 sm:$0xff]  }
  0x60   : > { %2215 = vmatpush1.bf16.msra.mxu1 %v5717_v22  ;;  %v5794_v22 = vld [vmem:[%s6172_s22 + $0x33c] ss:$24 sps:$4 sm:$0xff]  }
  0x61   : > { %919 = vmatmul.mubr.bf16.gmra.mrb[16].mxu0 %v5674_v3  ;;  %2216 = vmatprep.subr.bf16.mxu1 %v5725_v24 }
  0x62   : > { %928 = vmatprep.mubr.bf16.mxu0 %v6094_v27  ;;  %1993 = vmatpush1.bf16.msra.mxu0 %v5726_v25  ;;  %v757_v25 = vunpack.c.h.bf16 %v722_v11  ;;  %v5801_v11 = vld [vmem:[%s6172_s22 + $0x398] ss:$24 sps:$4 sm:$0xff]  }
  0x63   : > { %1994 = vmatprep.subr.bf16.mxu0 %v5734_v26  ;;  %v760_v26 = vunpack.c.h.bf16 %v724_v12 }
  0x64   : > { %2217 = vmatpush1.bf16.msra.mxu1 %v5723_v28  ;;  %v761_v28 = vunpack.c.h.bf16 %v725_v14 }
  0x65   : > { %2218 = vmatprep.subr.bf16.mxu1 %v5731_v29 }
  0x66   : > { %1995 = vmatpush1.bf16.msra.mxu0 %v5732_v30  ;;  %v5777_v30 = vld [vmem:[%s6172_s22 + $0x330] ss:$24 sps:$4 sm:$0xff]  }
  0x67   : > { %1996 = vmatprep.subr.bf16.mxu0 %v5740_v31 }
  0x68   : > { %2219 = vmatpush1.bf16.msra.mxu1 %v5729_v32  ;;  %v755_v32 = vunpack.c.l.bf16 %v725_v14 }
  0x69   : > { %929 = vmatmul.mubr.bf16.gmra.mrb[20].mxu0 %v5675_v13  ;;  %2220 = vmatprep.subr.bf16.mxu1 %v5737_v33 }
  0x6a   : > { %938 = vmatprep.mubr.bf16.mxu0 %v6094_v27  ;;  %1997 = vmatpush1.bf16.msra.mxu0 %v5738_v34  ;;  %v5782_v34 = vld [vmem:[%s6172_s22 + $0x364] ss:$24 sps:$4 sm:$0xff]  }
  0x6b   : > { %1998 = vmatprep.subr.bf16.mxu0 %v5746_v35  ;;  %v5792_v35 = vld [vmem:[%s6172_s22 + $0x338] ss:$24 sps:$4 sm:$0xff]  }
  0x6c   : > { %2221 = vmatpush1.bf16.msra.mxu1 %v5735_v36 }
  0x6d   : > { %2222 = vmatprep.subr.bf16.mxu1 %v5743_v37 }
  0x6e   : > { %1999 = vmatpush1.bf16.msra.mxu0 %v5744_v38 }
  0x6f   : > { %2000 = vmatprep.subr.bf16.mxu0 %v5752_v39 }
  0x70   : > { %2223 = vmatpush1.bf16.msra.mxu1 %v5741_v40 }
  0x71   : > { %939 = vmatmul.mubr.bf16.gmra.mrb[24].mxu0 %v5676_v16  ;;  %2224 = vmatprep.subr.bf16.mxu1 %v5749_v41  ;;  %v5774_v16 = vld [vmem:[%s6172_s22 + $0x300] ss:$24 sps:$4 sm:$0xff]   ;;  %v5800_v41 = vld [vmem:[%s6172_s22 + $0x36c] ss:$24 sps:$4 sm:$0xff]  }
  0x72   : > { %948 = vmatprep.mubr.bf16.mxu0 %v6094_v27  ;;  %2001 = vmatpush1.bf16.msra.mxu0 %v5750_v42 }
  0x73   : > { %2002 = vmatprep.subr.bf16.mxu0 %v5758_v43 }
  0x74   : > { %2225 = vmatpush1.bf16.msra.mxu1 %v5747_v44  ;;  %v731_v44 = vld [vmem:[%s6167_s18 + $0x38] ss:$24 sps:$4 sm:$0xff]  }
  0x75   : > { %2226 = vmatprep.subr.bf16.mxu1 %v5755_v45 }
  0x76   : > { %2003 = vmatpush1.bf16.msra.mxu0 %v5756_v46 }
  0x77   : > { %2004 = vmatprep.subr.bf16.mxu0 %v5764_v50 }
  0x78   : > { %2227 = vmatpush1.bf16.msra.mxu1 %v5753_v47  ;;  %v726_v47 = vld [vmem:[%s6167_s18 + $0x30] sm:$0xff] }
  0x79   : > { %949 = vmatmul.mubr.bf16.gmra.mrb[28].mxu0 %v5677_v23  ;;  %2228 = vmatprep.subr.bf16.mxu1 %v5761_v48  ;;  %v752_v23 = vunpack.c.l.bf16 %v723_v8  ;;  %v728_v48 = vld [vmem:[%s6167_s18 + $0x3c] sm:$0xff] }
  0x7a   : > { %2005 = vmatpush1.bf16.msra.mxu0 %v5762_v52  ;;  %v765_v60 = vunpack.c.l.bf16 %v728_v48 }
  0x7b   : > { %2006 = vmatprep.subr.bf16.mxu0 %v5770_v54 }
  0x7c   : > { %2229 = vmatpush1.bf16.msra.mxu1 %v5759_v49 }
  0x7d   : > { %2230 = vmatprep.subr.bf16.mxu1 %v5767_v51 }
  0x7e   : > { %2007 = vmatpush1.bf16.msra.mxu0 %v5768_v56  ;;  %v5798_v56 = vld [vmem:[%s6172_s22 + $0x368] ss:$24 sps:$4 sm:$0xff]  }
  0x7f   : > { %2089 = vmatprep.subr.bf16.mxu0 %v5776_v58  ;;  %v770_v58 = vunpack.c.h.bf16 %v731_v44 }
  0x80   : > { %2231 = vmatpush1.bf16.msra.mxu1 %v5765_v53  ;;  %v733_v53 = vld [vmem:[%s6167_s18 + $0x44] ss:$24 sps:$4 sm:$0xff]  }
  0x81   : > { %2232 = vmatprep.subr.bf16.mxu1 %v5773_v55  ;;  %v5780_v55 = vld [vmem:[%s6172_s22 + $0x360] ss:$24 sps:$4 sm:$0xff]   ;;  %v767_v8 = vunpack.c.l.bf16 %v733_v53 }
  0x84   : > { %2233 = vmatpush1.bf16.msra.mxu1 %v5771_v57 }
  0x85   : > { %2315 = vmatprep.subr.bf16.mxu1 %v5791_v59  ;;  %v762_v59 = vunpack.c.l.bf16 %v726_v47 }
 0x114   : > { %v880_v0 = vpop.f32.mrb[0].mxu0 }
 0x115   : > { %v882_v3 = vpop.f32.mrb[1].mxu0  ;;  %v881_v5 = vadd.f32 %v880_v0, %v750_v62  ;;  %v5803_v62 = vld [vmem:[%s6172_s22 + $0x39c] ss:$24 sps:$4 sm:$0xff]   ;;  %v764_v0 = vunpack.c.l.bf16 %v731_v44 }
 0x116   : > { %v884_v4 = vpop.f32.mrb[2].mxu0  ;;  %v883_v9 = vadd.f32 %v882_v3, %v751_v1  ;;  %v766_v3 = vunpack.c.h.bf16 %v728_v48 }
 0x117   : > { %v885_v6 = vadd.f32 %v884_v4, %v753_v63  ;;  %v886_v7 = vpop.f32.mrb[3].mxu0  ;;  %v773_v4 = vunpack.c.h.bf16 %v733_v53 }
 0x118   : > { %v887_v10 = vadd.f32 %v886_v7, %v754_v2  ;;  %v763_v2 = vunpack.c.h.bf16 %v726_v47 }
 0x119   : > { %v6366_v13 = vpack.c.bf16 %v885_v6, %v881_v5  ;;  %v5299_v31 = vpop.f32.mrb[0].mxu1  ;;  %v5783_v6 = vld [vmem:[%s6172_s22 + $0x390] ss:$24 sps:$4 sm:$0xff]  }
 0x11a   : > { %v6369_v15 = vpack.c.bf16 %v887_v10, %v883_v9  ;;  %v1002_v36 = vadd.f32 %v5299_v31, %v758_v18  ;;  %v993_v37 = vpop.f32.mrb[1].mxu1  ;;  %v5788_v10 = vld [vmem:[%s6172_s22 + $0x3c4] ss:$24 sps:$4 sm:$0xff]  }
 0x11b   : > { %v994_v42 = vadd.f32 %v993_v37, %v752_v23  ;;  %v5300_v43 = vpop.f32.mrb[2].mxu1 }
 0x11c   : > { %v890_v24 = vpop.f32.mrb[4].mxu0  ;;  %2008 = vmatprep.mubr.bf16.mxu0 %v6369_v15  ;;  %2234 = vmatprep.mubr.bf16.mxu1 %v6369_v15  ;;  %v1005_v49 = vadd.f32 %v5300_v43, %v761_v28  ;;  %v996_v50 = vpop.f32.mrb[3].mxu1 }
 0x11d   : > { %v892_v29 = vpop.f32.mrb[5].mxu0  ;;  %2009 = vmatmul.mubr.bf16.vlgmr.msra.gmra.mrb[32].mxu0 %v6366_v13  ;;  %2235 = vmatmul.mubr.bf16.vlgmr.msra.gmra.mrb[16].mxu1 %v6366_v13  ;;  %v891_v38 = vadd.f32 %v890_v24, %v756_v19  ;;  %v997_v52 = vadd.f32 %v996_v50, %v755_v32  ;;  %v5809_v19 = vld [vmem:[%s6172_s22 + $0x3cc] ss:$24 sps:$4 sm:$0xff]  }
 0x11e   : > { %2090 = vmatpush1.bf16.msra.mxu0 %v5774_v16  ;;  %v894_v33 = vpop.f32.mrb[6].mxu0  ;;  %2316 = vmatpush1.bf16.msra.mxu1 %v5789_v17  ;;  %v893_v45 = vadd.f32 %v892_v29, %v757_v25  ;;  %v6393_v57 = vpack.c.bf16 %v1005_v49, %v1002_v36  ;;  %v730_v25 = vld [vmem:[%s6167_s18 + $0x48] sm:$0xff] }
 0x11f   : > { %v895_v39 = vadd.f32 %v894_v33, %v759_v20  ;;  %v896_v40 = vpop.f32.mrb[7].mxu0  ;;  %2091 = vmatprep.subr.bf16.mxu0 %v5779_v21  ;;  %2317 = vmatprep.subr.bf16.mxu1 %v5794_v22  ;;  %v6397_v63 = vpack.c.bf16 %v997_v52, %v994_v42  ;;  %v739_v22 = vld [vmem:[%s6167_s18 + $0x68] ss:$24 sps:$4 sm:$0xff]   ;;  %v741_v32 = vld [vmem:[%s6167_s18 + $0x74] ss:$24 sps:$4 sm:$0xff]  }
 0x120   : > { %v897_v46 = vadd.f32 %v896_v40, %v760_v26  ;;  %v732_v26 = vld [vmem:[%s6167_s18 + $0x54] sm:$0xff]  ;;  %v782_v37 = vunpack.c.h.bf16 %v739_v22  ;;  %v776_v43 = vunpack.c.l.bf16 %v739_v22  ;;  %v785_v47 = vunpack.c.h.bf16 %v741_v32  ;;  %v5795_v49 = vld [vmem:[%s6172_s22 + $0x3f0] ss:$24 sps:$4 sm:$0xff]  }
 0x121   : > { %v6386_v51 = vpack.c.bf16 %v895_v39, %v891_v38  ;;  %v5303_v7 = vpop.f32.mrb[4].mxu1  ;;  %v768_v38 = vunpack.c.l.bf16 %v730_v25  ;;  %v771_v39 = vunpack.c.l.bf16 %v732_v26  ;;  %v5797_v40 = vld [vmem:[%s6172_s22 + $0x3f4] ss:$24 sps:$4 sm:$0xff]   ;;  %v779_v52 = vunpack.c.l.bf16 %v741_v32 }
 0x122   : > { %v6389_v54 = vpack.c.bf16 %v897_v46, %v893_v45  ;;  %2092 = vmatpush1.bf16.msra.mxu0 %v5777_v30  ;;  %2318 = vmatpush1.bf16.msra.mxu1 %v5792_v35  ;;  %v1018_v12 = vadd.f32 %v5303_v7, %v770_v58  ;;  %v1009_v14 = vpop.f32.mrb[5].mxu1  ;;  %v5807_v35 = vld [vmem:[%s6172_s22 + $0x3c8] ss:$24 sps:$4 sm:$0xff]   ;;  %v769_v45 = vunpack.c.h.bf16 %v730_v25  ;;  %v772_v46 = vunpack.c.h.bf16 %v732_v26  ;;  %v736_v7 = vld [vmem:[%s6167_s18 + $0x6c] sm:$0xff] }
 0x123   : > { %2093 = vmatprep.subr.bf16.mxu0 %v5782_v34  ;;  %2319 = vmatprep.subr.bf16.mxu1 %v5800_v41  ;;  %v1010_v20 = vadd.f32 %v1009_v14, %v764_v0  ;;  %v5304_v21 = vpop.f32.mrb[6].mxu1  ;;  %v5786_v34 = vld [vmem:[%s6172_s22 + $0x3c0] ss:$24 sps:$4 sm:$0xff]   ;;  %v5812_v41 = vld [vmem:[%s6172_s22 + $0x3fc] ss:$24 sps:$4 sm:$0xff]  }
 0x124   : > { %v900_v1 = vpop.f32.mrb[8].mxu0  ;;  %2018 = vmatprep.mubr.bf16.mxu0 %v6389_v54  ;;  %2244 = vmatprep.mubr.bf16.mxu1 %v6389_v54  ;;  %v1021_v28 = vadd.f32 %v5304_v21, %v773_v4  ;;  %v1012_v29 = vpop.f32.mrb[7].mxu1  ;;  %v5818_v0 = vld [vmem:[%s6172_s22 + $0x42c] ss:$24 sps:$4 sm:$0xff]   ;;  %v777_v21 = vunpack.c.l.bf16 %v736_v7 }
 0x125   : > { %v902_v5 = vpop.f32.mrb[9].mxu0  ;;  %2019 = vmatmul.mubr.bf16.gmra.mrb[36].mxu0 %v6386_v51  ;;  %2245 = vmatmul.mubr.bf16.gmra.mrb[20].mxu1 %v6386_v51  ;;  %v901_v16 = vadd.f32 %v900_v1, %v762_v59  ;;  %v1013_v31 = vadd.f32 %v1012_v29, %v767_v8  ;;  %v5815_v22 = vld [vmem:[%s6172_s22 + $0x454] ss:$24 sps:$4 sm:$0xff]   ;;  %v778_v29 = vunpack.c.h.bf16 %v736_v7 }
 0x126   : > { %v904_v9 = vpop.f32.mrb[10].mxu0  ;;  %2094 = vmatpush1.bf16.msra.mxu0 %v5780_v55  ;;  %2320 = vmatpush1.bf16.msra.mxu1 %v5798_v56  ;;  %v903_v23 = vadd.f32 %v902_v5, %v763_v2  ;;  %v6417_v36 = vpack.c.bf16 %v1021_v28, %v1018_v12  ;;  %v5806_v55 = vld [vmem:[%s6172_s22 + $0x424] ss:$24 sps:$4 sm:$0xff]   ;;  %v5810_v56 = vld [vmem:[%s6172_s22 + $0x3f8] ss:$24 sps:$4 sm:$0xff]  }
 0x127   : > { %v905_v17 = vadd.f32 %v904_v9, %v765_v60  ;;  %v906_v18 = vpop.f32.mrb[11].mxu0  ;;  %2095 = vmatprep.subr.bf16.mxu0 %v5785_v61  ;;  %2321 = vmatprep.subr.bf16.mxu1 %v5803_v62  ;;  %v6421_v42 = vpack.c.bf16 %v1013_v31, %v1010_v20  ;;  %v749_v12 = vld [vmem:[%s6167_s18 + $0xa4] ss:$24 sps:$4 sm:$0xff]  }
 0x128   : > { %v907_v24 = vadd.f32 %v906_v18, %v766_v3  ;;  %v747_v3 = vld [vmem:[%s6167_s18 + $0x98] ss:$24 sps:$4 sm:$0xff]   ;;  %v797_v31 = vunpack.c.h.bf16 %v749_v12 }
 0x129   : > { %v6410_v30 = vpack.c.bf16 %v905_v17, %v901_v16  ;;  %v5307_v50 = vpop.f32.mrb[8].mxu1  ;;  %v5804_v16 = vld [vmem:[%s6172_s22 + $0x420] ss:$24 sps:$4 sm:$0xff]   ;;  %v788_v25 = vunpack.c.l.bf16 %v747_v3 }
 0x12a   : > { %v6413_v33 = vpack.c.bf16 %v907_v24, %v903_v23  ;;  %2096 = vmatpush1.bf16.msra.mxu0 %v5783_v6  ;;  %2322 = vmatpush1.bf16.msra.mxu1 %v5801_v11  ;;  %v1034_v58 = vadd.f32 %v5307_v50, %v782_v37  ;;  %v1025_v59 = vpop.f32.mrb[9].mxu1  ;;  %v734_v6 = vld [vmem:[%s6167_s18 + $0x60] sm:$0xff]  ;;  %v5821_v23 = vld [vmem:[%s6172_s22 + $0x45c] ss:$24 sps:$4 sm:$0xff]  }
 0x12b   : > { %2097 = vmatprep.subr.bf16.mxu0 %v5788_v10  ;;  %2323 = vmatprep.subr.bf16.mxu1 %v5809_v19  ;;  %v1026_v1 = vadd.f32 %v1025_v59, %v776_v43  ;;  %v5308_v2 = vpop.f32.mrb[10].mxu1  ;;  %v5816_v17 = vld [vmem:[%s6172_s22 + $0x428] ss:$24 sps:$4 sm:$0xff]   ;;  %v794_v19 = vunpack.c.h.bf16 %v747_v3  ;;  %v774_v20 = vunpack.c.l.bf16 %v734_v6  ;;  %v775_v28 = vunpack.c.h.bf16 %v734_v6 }
 0x12c   : > { %v910_v44 = vpop.f32.mrb[12].mxu0  ;;  %2028 = vmatprep.mubr.bf16.mxu0 %v6413_v33  ;;  %2254 = vmatprep.mubr.bf16.mxu1 %v6413_v33  ;;  %v1037_v8 = vadd.f32 %v5308_v2, %v785_v47  ;;  %v1028_v9 = vpop.f32.mrb[11].mxu1 }
 0x12d   : > { %v912_v48 = vpop.f32.mrb[13].mxu0  ;;  %2029 = vmatmul.mubr.bf16.gmra.mrb[40].mxu0 %v6410_v30  ;;  %2255 = vmatmul.mubr.bf16.gmra.mrb[24].mxu1 %v6410_v30  ;;  %v911_v60 = vadd.f32 %v910_v44, %v768_v38  ;;  %v1029_v11 = vadd.f32 %v1028_v9, %v779_v52  ;;  %v5813_v38 = vld [vmem:[%s6172_s22 + $0x450] ss:$24 sps:$4 sm:$0xff]   ;;  %v738_v52 = vld [vmem:[%s6167_s18 + $0x78] sm:$0xff] }
 0x12e   : > { %v914_v53 = vpop.f32.mrb[14].mxu0  ;;  %2098 = vmatpush1.bf16.msra.mxu0 %v5786_v34  ;;  %2324 = vmatpush1.bf16.msra.mxu1 %v5807_v35  ;;  %v913_v4 = vadd.f32 %v912_v48, %v769_v45  ;;  %v6441_v18 = vpack.c.bf16 %v1037_v8, %v1034_v58  ;;  %v791_v35 = vunpack.c.l.bf16 %v749_v12  ;;  %v781_v3 = vunpack.c.h.bf16 %v738_v52 }
 0x12f   : > { %v915_v61 = vadd.f32 %v914_v53, %v771_v39  ;;  %v916_v62 = vpop.f32.mrb[15].mxu0  ;;  %2099 = vmatprep.subr.bf16.mxu0 %v5797_v40  ;;  %2325 = vmatprep.subr.bf16.mxu1 %v5812_v41  ;;  %v6445_v24 = vpack.c.bf16 %v1029_v11, %v1026_v1  ;;  %v5819_v39 = vld [vmem:[%s6172_s22 + $0x458] ss:$24 sps:$4 sm:$0xff]   ;;  %v740_v53 = vld [vmem:[%s6167_s18 + $0x84] sm:$0xff] }
 0x130   : > { %v917_v5 = vadd.f32 %v916_v62, %v772_v46  ;;  %v5824_v46 = vld [vmem:[%s6172_s22 + $0x14] ss:$24 sps:$4 sm:$0xff]   ;;  %v780_v62 = vunpack.c.l.bf16 %v738_v52 }
 0x131   : > { %v6434_v10 = vpack.c.bf16 %v915_v61, %v911_v60  ;;  %v5311_v34 = vpop.f32.mrb[12].mxu1 }
 0x132   : > { %v6437_v14 = vpack.c.bf16 %v917_v5, %v913_v4  ;;  %2100 = vmatpush1.bf16.msra.mxu0 %v5795_v49  ;;  %2326 = vmatpush1.bf16.msra.mxu1 %v5810_v56  ;;  %v1050_v40 = vadd.f32 %v5311_v34, %v794_v19  ;;  %v1041_v41 = vpop.f32.mrb[13].mxu1  ;;  %v784_v4 = vunpack.c.h.bf16 %v740_v53 }
 0x133   : > { %2101 = vmatprep.subr.bf16.mxu0 %v5806_v55  ;;  %2327 = vmatprep.subr.bf16.mxu1 %v5818_v0  ;;  %v1042_v47 = vadd.f32 %v1041_v41, %v788_v25  ;;  %v5312_v48 = vpop.f32.mrb[14].mxu1  ;;  %v783_v0 = vunpack.c.l.bf16 %v740_v53 }
 0x134   : > { %v920_v26 = vpop.f32.mrb[16].mxu0  ;;  %2038 = vmatprep.mubr.bf16.mxu0 %v6437_v14  ;;  %2264 = vmatprep.mubr.bf16.mxu1 %v6437_v14  ;;  %v1053_v55 = vadd.f32 %v5312_v48, %v797_v31  ;;  %v1044_v56 = vpop.f32.mrb[15].mxu1 }
 0x135   : > { %v922_v32 = vpop.f32.mrb[17].mxu0  ;;  %2039 = vmatmul.mubr.bf16.gmra.mrb[44].mxu0 %v6434_v10  ;;  %2265 = vmatmul.mubr.bf16.gmra.mrb[28].mxu1 %v6434_v10  ;;  %v921_v43 = vadd.f32 %v920_v26, %v774_v20  ;;  %v1045_v59 = vadd.f32 %v1044_v56, %v791_v35 }
 0x136   : > { %v924_v37 = vpop.f32.mrb[18].mxu0  ;;  %2102 = vmatpush1.bf16.msra.mxu0 %v5804_v16  ;;  %2328 = vmatpush1.bf16.msra.mxu1 %v5816_v17  ;;  %v923_v49 = vadd.f32 %v922_v32, %v775_v28  ;;  %v6460_v61 = vpack.c.bf16 %v1053_v55, %v1050_v40  ;;  %v742_v16 = vld [vmem:[%s6167_s18 + $0x90] sm:$0xff]  ;;  %v744_v17 = vld [vmem:[%s6167_s18 + $0x9c] sm:$0xff] }
 0x137   : > { %v925_v44 = vadd.f32 %v924_v37, %v777_v21  ;;  %v926_v45 = vpop.f32.mrb[19].mxu0  ;;  %2103 = vmatprep.subr.bf16.mxu0 %v5815_v22  ;;  %2329 = vmatprep.subr.bf16.mxu1 %v5821_v23  ;;  %v6462_v1 = vpack.c.bf16 %v1045_v59, %v1042_v47  ;;  %v786_v21 = vunpack.c.l.bf16 %v742_v16  ;;  %v789_v22 = vunpack.c.l.bf16 %v744_v17 }
 0x138   : > { %v927_v50 = vadd.f32 %v926_v45, %v778_v29  ;;  %v787_v25 = vunpack.c.h.bf16 %v742_v16  ;;  %v790_v26 = vunpack.c.h.bf16 %v744_v17  ;;  %v5842_v16 = vld [vmem:[%s6172_s22 + $0x134] ss:$24 sps:$4 sm:$0xff]   ;;  %v5840_v17 = vld [vmem:[%s6172_s22 + $0x130] ss:$24 sps:$4 sm:$0xff]  }
 0x139   : > { %v6456_v58 = vpack.c.bf16 %v925_v44, %v921_v43 }
 0x13a   : > { %v6458_v60 = vpack.c.bf16 %v927_v50, %v923_v49  ;;  %2104 = vmatpush1.bf16.msra.mxu0 %v5813_v38  ;;  %2330 = vmatpush1.bf16.msra.mxu1 %v5819_v39  ;;  %v746_v38 = vld [vmem:[%s6167_s18 + $0xa8] sm:$0xff]  ;;  %v748_v39 = vld [vmem:[%s6167_s18 + $0xb4] sm:$0xff]  ;;  %s4406_s18 = scalar_select %p480_p4, 0.0, -inf }
 0x13b   : > { %2428 = vmatprep.subr.bf16.mxu0 %v5824_v46  ;;  %v792_v43 = vunpack.c.l.bf16 %v746_v38  ;;  %v795_v44 = vunpack.c.l.bf16 %v748_v39  ;;  %v793_v46 = vunpack.c.h.bf16 %v746_v38  ;;  %v796_v47 = vunpack.c.h.bf16 %v748_v39  ;;  %v5852_v38 = vld [vmem:[%s6172_s22 + $0x1f0] ss:$24 sps:$4 sm:$0xff]   ;;  %v5857_v39 = vld [vmem:[%s6172_s22 + $0x224] ss:$24 sps:$4 sm:$0xff]  }
 0x13c   : > { %v930_v2 = vpop.f32.mrb[20].mxu0  ;;  %2048 = vmatprep.mubr.bf16.mxu0 %v6458_v60  ;;  %2274 = vmatprep.mubr.bf16.mxu1 %v6458_v60 }
 0x13d   : > { %v932_v5 = vpop.f32.mrb[21].mxu0  ;;  %2049 = vmatmul.mubr.bf16.gmra.mrb[48].mxu0 %v6456_v58  ;;  %2275 = vmatmul.mubr.bf16.gmra.mrb[32].mxu1 %v6456_v58  ;;  %v931_v7 = vadd.f32 %v930_v2, %v780_v62  ;;  %v5827_v2 = vld [vmem:[%s6172_s22 + $0x44] ss:$24 sps:$4 sm:$0xff]  }
 0x13e   : > { %v934_v6 = vpop.f32.mrb[22].mxu0  ;;  %v933_v11 = vadd.f32 %v932_v5, %v781_v3  ;;  %v5825_v3 = vld [vmem:[%s6172_s22 + $0x40] ss:$24 sps:$4 sm:$0xff]   ;;  %v5828_v5 = vld [vmem:[%s6172_s22 + $0x70] ss:$24 sps:$4 sm:$0xff]  }
 0x13f   : > { %v935_v8 = vadd.f32 %v934_v6, %v783_v0  ;;  %v936_v9 = vpop.f32.mrb[23].mxu0  ;;  %v5822_v0 = vld [vmem:[%s6172_s22 + $0x10] ss:$24 sps:$4 sm:$0xff]   ;;  %v5833_v6 = vld [vmem:[%s6172_s22 + $0xa4] ss:$24 sps:$4 sm:$0xff]  }
 0x140   : > { %v937_v12 = vadd.f32 %v936_v9, %v784_v4  ;;  %v5830_v4 = vld [vmem:[%s6172_s22 + $0x74] ss:$24 sps:$4 sm:$0xff]   ;;  %v5834_v9 = vld [vmem:[%s6172_s22 + $0xd0] ss:$24 sps:$4 sm:$0xff]  }
 0x141   : > { %v6470_v19 = vpack.c.bf16 %v935_v8, %v931_v7  ;;  %v5831_v7 = vld [vmem:[%s6172_s22 + $0xa0] ss:$24 sps:$4 sm:$0xff]   ;;  %v5836_v8 = vld [vmem:[%s6172_s22 + $0xd4] ss:$24 sps:$4 sm:$0xff]  }
 0x142   : > { %v6472_v20 = vpack.c.bf16 %v937_v12, %v933_v11  ;;  %v5839_v11 = vld [vmem:[%s6172_s22 + $0x104] ss:$24 sps:$4 sm:$0xff]   ;;  %v5837_v12 = vld [vmem:[%s6172_s22 + $0x100] ss:$24 sps:$4 sm:$0xff]  }
 0x144   : > { %v940_v23 = vpop.f32.mrb[24].mxu0  ;;  %2058 = vmatprep.mubr.bf16.mxu0 %v6472_v20  ;;  %2284 = vmatprep.mubr.bf16.mxu1 %v6472_v20 }
 0x145   : > { %v942_v28 = vpop.f32.mrb[25].mxu0  ;;  %2059 = vmatmul.mubr.bf16.gmra.mrb[52].mxu0 %v6470_v19  ;;  %2285 = vmatmul.mubr.bf16.gmra.mrb[36].mxu1 %v6470_v19  ;;  %v941_v31 = vadd.f32 %v940_v23, %v786_v21  ;;  %v5845_v21 = vld [vmem:[%s6172_s22 + $0x164] ss:$24 sps:$4 sm:$0xff]  }
 0x146   : > { %v944_v29 = vpop.f32.mrb[26].mxu0  ;;  %v943_v35 = vadd.f32 %v942_v28, %v787_v25  ;;  %v5896_v23 = vld [vmem:[%s6177_s25 + $0x4] ss:$12 sps:$4 sm:$0xff]   ;;  %v5843_v25 = vld [vmem:[%s6172_s22 + $0x160] ss:$24 sps:$4 sm:$0xff]  }
 0x147   : > { %v945_v32 = vadd.f32 %v944_v29, %v789_v22  ;;  %v946_v34 = vpop.f32.mrb[27].mxu0  ;;  %v5894_v22 = vld [vmem:[%s6177_s25] ss:$12 sps:$4 sm:$0xff]   ;;  %3775 = vmatprep.subr.bf16.mxu1 %v5896_v23  ;;  %v5846_v28 = vld [vmem:[%s6172_s22 + $0x190] ss:$24 sps:$4 sm:$0xff]  }
 0x148   : > { %v947_v37 = vadd.f32 %v946_v34, %v790_v26  ;;  %v5848_v26 = vld [vmem:[%s6172_s22 + $0x194] ss:$24 sps:$4 sm:$0xff]   ;;  %v5851_v29 = vld [vmem:[%s6172_s22 + $0x1c4] ss:$24 sps:$4 sm:$0xff]   ;;  %v5849_v34 = vld [vmem:[%s6172_s22 + $0x1c0] ss:$24 sps:$4 sm:$0xff]  }
 0x149   : > { %v6480_v40 = vpack.c.bf16 %v945_v32, %v941_v31  ;;  %v5897_v31 = vld [vmem:[%s6177_s25 + $0x18] ss:$12 sps:$4 sm:$0xff]   ;;  %v5899_v32 = vld [vmem:[%s6177_s25 + $0x1c] ss:$12 sps:$4 sm:$0xff]  }
 0x14a   : > { %v6482_v41 = vpack.c.bf16 %v947_v37, %v943_v35  ;;  %v5902_v35 = vld [vmem:[%s6177_s25 + $0x34] ss:$12 sps:$4 sm:$0xff]   ;;  %v5876_v23 = vld [vmem:[%s6172_s22 + $0x370] ss:$24 sps:$4 sm:$0xff]  }
 0x14b   : > { %v5854_v37 = vld [vmem:[%s6172_s22 + $0x1f4] ss:$24 sps:$4 sm:$0xff]  }
 0x14c   : > { %v950_v45 = vpop.f32.mrb[28].mxu0  ;;  %2068 = vmatprep.mubr.bf16.mxu0 %v6482_v41  ;;  %2294 = vmatprep.mubr.bf16.mxu1 %v6482_v41 }
 0x14d   : > { %v952_v48 = vpop.f32.mrb[29].mxu0  ;;  %2069 = vmatmul.mubr.bf16.gmra.mrb[56].mxu0 %v6480_v40  ;;  %2295 = vmatmul.mubr.bf16.gmra.mrb[40].mxu1 %v6480_v40  ;;  %v951_v50 = vadd.f32 %v950_v45, %v792_v43  ;;  %v5900_v43 = vld [vmem:[%s6177_s25 + $0x30] ss:$12 sps:$4 sm:$0xff]   ;;  %v5855_v45 = vld [vmem:[%s6172_s22 + $0x220] ss:$24 sps:$4 sm:$0xff]  }
 0x14e   : > { %v954_v49 = vpop.f32.mrb[30].mxu0  ;;  %v953_v55 = vadd.f32 %v952_v48, %v793_v46  ;;  %v5860_v46 = vld [vmem:[%s6172_s22 + $0x254] ss:$24 sps:$4 sm:$0xff]   ;;  %v5858_v48 = vld [vmem:[%s6172_s22 + $0x250] ss:$24 sps:$4 sm:$0xff]  }
 0x14f   : > { %v955_v52 = vadd.f32 %v954_v49, %v795_v44  ;;  %v956_v53 = vpop.f32.mrb[31].mxu0  ;;  %v5905_v44 = vld [vmem:[%s6177_s25 + $0x4c] ss:$12 sps:$4 sm:$0xff]   ;;  %v5863_v49 = vld [vmem:[%s6172_s22 + $0x284] ss:$24 sps:$4 sm:$0xff]  }
 0x150   : > { %v957_v56 = vadd.f32 %v956_v53, %v796_v47  ;;  %v5903_v47 = vld [vmem:[%s6177_s25 + $0x48] ss:$12 sps:$4 sm:$0xff]   ;;  %v5861_v53 = vld [vmem:[%s6172_s22 + $0x280] ss:$24 sps:$4 sm:$0xff]  }
 0x151   : > { %v6488_v59 = vpack.c.bf16 %v955_v52, %v951_v50  ;;  %v5908_v50 = vld [vmem:[%s6177_s25 + $0x64] ss:$12 sps:$4 sm:$0xff]   ;;  %v5906_v52 = vld [vmem:[%s6177_s25 + $0x60] ss:$12 sps:$4 sm:$0xff]  }
 0x152   : > { %v6490_v62 = vpack.c.bf16 %v957_v56, %v953_v55  ;;  %v5911_v55 = vld [vmem:[%s6177_s25 + $0x7c] ss:$12 sps:$4 sm:$0xff]   ;;  %v5866_v56 = vld [vmem:[%s6172_s22 + $0x2b4] ss:$24 sps:$4 sm:$0xff]  }
 0x154   : > { %2078 = vmatprep.mubr.bf16.mxu0 %v6490_v62  ;;  %2304 = vmatprep.mubr.bf16.mxu1 %v6490_v62 }
 0x155   : > { %2079 = vmatmul.mubr.bf16.gmra.mrb[60].mxu0 %v6488_v59  ;;  %2305 = vmatmul.mubr.bf16.gmra.mrb[44].mxu1 %v6488_v59 }
 0x156   : > { %2121 = vmatprep.mubr.bf16.mxu0 %v6094_v27  ;;  %2347 = vmatprep.mubr.bf16.mxu1 %v6094_v27 }
 0x15d   : > { %2122 = vmatmul.mubr.bf16.vlgmr.msra.gmra.mrb[32].mxu0 %v6397_v63  ;;  %2348 = vmatmul.mubr.bf16.vlgmr.msra.gmra.mrb[16].mxu1 %v6397_v63 }
 0x15e   : > { %2429 = vmatpush1.bf16.msra.mxu0 %v5822_v0  ;;  %2131 = vmatprep.mubr.bf16.mxu0 %v6094_v27  ;;  %v5864_v0 = vld [vmem:[%s6172_s22 + $0x2b0] ss:$24 sps:$4 sm:$0xff]  }
 0x15f   : > { %2430 = vmatprep.subr.bf16.mxu0 %v5827_v2  ;;  %2357 = vmatprep.mubr.bf16.mxu1 %v6094_v27  ;;  %v5869_v2 = vld [vmem:[%s6172_s22 + $0x2e4] ss:$24 sps:$4 sm:$0xff]  }
 0x160   : > { %3776 = vmatpush1.bf16.msra.mxu1 %v5894_v22  ;;  %v5925_v22 = vld [vmem:[%s6177_s25 + $0xdc] ss:$12 sps:$4 sm:$0xff]  }
 0x161   : > { %3777 = vmatprep.subr.bf16.mxu1 %v5899_v32  ;;  %v5882_v32 = vld [vmem:[%s6172_s22 + $0x3d0] ss:$24 sps:$4 sm:$0xff]  }
 0x162   : > { %2431 = vmatpush1.bf16.msra.mxu0 %v5825_v3  ;;  %v5909_v3 = vld [vmem:[%s6177_s25 + $0x78] ss:$12 sps:$4 sm:$0xff]  }
 0x163   : > { %2432 = vmatprep.subr.bf16.mxu0 %v5830_v4  ;;  %v5914_v4 = vld [vmem:[%s6177_s25 + $0x94] ss:$12 sps:$4 sm:$0xff]  }
 0x164   : > { %3778 = vmatpush1.bf16.msra.mxu1 %v5897_v31  ;;  %v5935_v31 = vld [vmem:[%s6177_s25 + $0x10c] ss:$12 sps:$4 sm:$0xff]  }
 0x165   : > { %2132 = vmatmul.mubr.bf16.gmra.mrb[36].mxu0 %v6393_v57  ;;  %2358 = vmatmul.mubr.bf16.gmra.mrb[20].mxu1 %v6393_v57 }
 0x166   : > { %2433 = vmatpush1.bf16.msra.mxu0 %v5828_v5  ;;  %2141 = vmatprep.mubr.bf16.mxu0 %v6094_v27  ;;  %v5867_v5 = vld [vmem:[%s6172_s22 + $0x2e0] ss:$24 sps:$4 sm:$0xff]  }
 0x167   : > { %2434 = vmatprep.subr.bf16.mxu0 %v5833_v6  ;;  %2367 = vmatprep.mubr.bf16.mxu1 %v6094_v27  ;;  %v5872_v6 = vld [vmem:[%s6172_s22 + $0x314] ss:$24 sps:$4 sm:$0xff]  }
 0x168   : > { %3779 = vmatprep.subr.bf16.mxu1 %v5902_v35  ;;  %v5885_v35 = vld [vmem:[%s6172_s22 + $0x400] ss:$24 sps:$4 sm:$0xff]  }
 0x169   : > { %3780 = vmatpush1.bf16.msra.mxu1 %v5900_v43  ;;  %v5888_v43 = vld [vmem:[%s6172_s22 + $0x430] ss:$24 sps:$4 sm:$0xff]  }
 0x16a   : > { %2435 = vmatpush1.bf16.msra.mxu0 %v5831_v7  ;;  %3781 = vmatprep.subr.bf16.mxu1 %v5905_v44  ;;  %v5912_v7 = vld [vmem:[%s6177_s25 + $0x90] ss:$12 sps:$4 sm:$0xff]  }
 0x16b   : > { %2436 = vmatprep.subr.bf16.mxu0 %v5836_v8  ;;  %v5917_v8 = vld [vmem:[%s6177_s25 + $0xac] ss:$12 sps:$4 sm:$0xff]   ;;  %v5893_v44 = vld [vmem:[%s6172_s22 + $0x464] ss:$24 sps:$4 sm:$0xff]  }
 0x16d   : > { %2142 = vmatmul.mubr.bf16.gmra.mrb[40].mxu0 %v6421_v42  ;;  %2368 = vmatmul.mubr.bf16.gmra.mrb[24].mxu1 %v6421_v42 }
 0x16e   : > { %2437 = vmatpush1.bf16.msra.mxu0 %v5834_v9  ;;  %2151 = vmatprep.mubr.bf16.mxu0 %v6094_v27  ;;  %v5870_v9 = vld [vmem:[%s6172_s22 + $0x310] ss:$24 sps:$4 sm:$0xff]  }
 0x16f   : > { %2438 = vmatprep.subr.bf16.mxu0 %v5839_v11  ;;  %2377 = vmatprep.mubr.bf16.mxu1 %v6094_v27  ;;  %v5875_v11 = vld [vmem:[%s6172_s22 + $0x344] ss:$24 sps:$4 sm:$0xff]  }
 0x170   : > { %3782 = vmatpush1.bf16.msra.mxu1 %v5903_v47  ;;  %v5948_v47 = vld [vmem:[%s6177_s25 + $0x150] ss:$12 sps:$4 sm:$0xff]  }
 0x171   : > { %3783 = vmatprep.subr.bf16.mxu1 %v5908_v50  ;;  %v5960_v50 = vld [vmem:[%s6177_s25 + $0x184] ss:$12 sps:$4 sm:$0xff]  }
 0x172   : > { %2439 = vmatpush1.bf16.msra.mxu0 %v5837_v12  ;;  %v5915_v12 = vld [vmem:[%s6177_s25 + $0xa8] ss:$12 sps:$4 sm:$0xff]  }
 0x173   : > { %2440 = vmatprep.subr.bf16.mxu0 %v5842_v16  ;;  %v5873_v16 = vld [vmem:[%s6172_s22 + $0x340] ss:$24 sps:$4 sm:$0xff]  }
 0x174   : > { %3784 = vmatpush1.bf16.msra.mxu1 %v5906_v52  ;;  %v5951_v52 = vld [vmem:[%s6177_s25 + $0x158] ss:$12 sps:$4 sm:$0xff]  }
 0x175   : > { %2152 = vmatmul.mubr.bf16.gmra.mrb[44].mxu0 %v6417_v36  ;;  %2378 = vmatmul.mubr.bf16.gmra.mrb[28].mxu1 %v6417_v36 }
 0x176   : > { %2441 = vmatpush1.bf16.msra.mxu0 %v5840_v17  ;;  %2161 = vmatprep.mubr.bf16.mxu0 %v6094_v27  ;;  %v5878_v17 = vld [vmem:[%s6172_s22 + $0x374] ss:$24 sps:$4 sm:$0xff]  }
 0x177   : > { %2442 = vmatprep.subr.bf16.mxu0 %v5845_v21  ;;  %2387 = vmatprep.mubr.bf16.mxu1 %v6094_v27  ;;  %v5918_v21 = vld [vmem:[%s6177_s25 + $0xc0] ss:$12 sps:$4 sm:$0xff]  }
 0x178   : > { %3785 = vmatprep.subr.bf16.mxu1 %v5911_v55  ;;  %v5956_v55 = vld [vmem:[%s6177_s25 + $0x170] ss:$12 sps:$4 sm:$0xff]  }
 0x179   : > { %3786 = vmatpush1.bf16.msra.mxu1 %v5909_v3 }
 0x17a   : > { %2443 = vmatpush1.bf16.msra.mxu0 %v5843_v25  ;;  %3787 = vmatprep.subr.bf16.mxu1 %v5914_v4  ;;  %v5881_v25 = vld [vmem:[%s6172_s22 + $0x3a4] ss:$24 sps:$4 sm:$0xff]  }
 0x17b   : > { %2444 = vmatprep.subr.bf16.mxu0 %v5848_v26  ;;  %v5879_v26 = vld [vmem:[%s6172_s22 + $0x3a0] ss:$24 sps:$4 sm:$0xff]  }
 0x17d   : > { %2162 = vmatmul.mubr.bf16.gmra.mrb[48].mxu0 %v6445_v24  ;;  %2388 = vmatmul.mubr.bf16.gmra.mrb[32].mxu1 %v6445_v24 }
 0x17e   : > { %2445 = vmatpush1.bf16.msra.mxu0 %v5846_v28  ;;  %2171 = vmatprep.mubr.bf16.mxu0 %v6094_v27  ;;  %v5884_v28 = vld [vmem:[%s6172_s22 + $0x3d4] ss:$24 sps:$4 sm:$0xff]  }
 0x17f   : > { %2446 = vmatprep.subr.bf16.mxu0 %v5851_v29  ;;  %2397 = vmatprep.mubr.bf16.mxu1 %v6094_v27  ;;  %v5928_v29 = vld [vmem:[%s6177_s25 + $0xf0] ss:$12 sps:$4 sm:$0xff]  }
 0x180   : > { %3788 = vmatpush1.bf16.msra.mxu1 %v5912_v7 }
 0x181   : > { %3789 = vmatprep.subr.bf16.mxu1 %v5917_v8 }
 0x182   : > { %2447 = vmatpush1.bf16.msra.mxu0 %v5849_v34  ;;  %v5887_v34 = vld [vmem:[%s6172_s22 + $0x404] ss:$24 sps:$4 sm:$0xff]  }
 0x183   : > { %2448 = vmatprep.subr.bf16.mxu0 %v5854_v37  ;;  %v5890_v37 = vld [vmem:[%s6172_s22 + $0x434] ss:$24 sps:$4 sm:$0xff]  }
 0x184   : > { %3790 = vmatpush1.bf16.msra.mxu1 %v5915_v12 }
 0x185   : > { %2172 = vmatmul.mubr.bf16.gmra.mrb[52].mxu0 %v6441_v18  ;;  %2398 = vmatmul.mubr.bf16.gmra.mrb[36].mxu1 %v6441_v18 }
 0x186   : > { %2449 = vmatpush1.bf16.msra.mxu0 %v5852_v38  ;;  %2181 = vmatprep.mubr.bf16.mxu0 %v6094_v27  ;;  %v5938_v38 = vld [vmem:[%s6177_s25 + $0x120] ss:$12 sps:$4 sm:$0xff]  }
 0x187   : > { %2450 = vmatprep.subr.bf16.mxu0 %v5857_v39  ;;  %2407 = vmatprep.mubr.bf16.mxu1 %v6094_v27  ;;  %v5945_v39 = vld [vmem:[%s6177_s25 + $0x13c] ss:$12 sps:$4 sm:$0xff]  }
 0x18a   : > { %2451 = vmatpush1.bf16.msra.mxu0 %v5855_v45  ;;  %v5891_v45 = vld [vmem:[%s6172_s22 + $0x460] ss:$24 sps:$4 sm:$0xff]  }
 0x18b   : > { %2452 = vmatprep.subr.bf16.mxu0 %v5860_v46  ;;  %v5921_v46 = vld [vmem:[%s6177_s25 + $0xc8] ss:$12 sps:$4 sm:$0xff]  }
 0x18d   : > { %2182 = vmatmul.mubr.bf16.gmra.mrb[56].mxu0 %v6462_v1  ;;  %2408 = vmatmul.mubr.bf16.gmra.mrb[40].mxu1 %v6462_v1 }
 0x18e   : > { %2453 = vmatpush1.bf16.msra.mxu0 %v5858_v48  ;;  %2191 = vmatprep.mubr.bf16.mxu0 %v6094_v27  ;;  %v5955_v48 = vld [vmem:[%s6177_s25 + $0x16c] ss:$12 sps:$4 sm:$0xff]  }
 0x18f   : > { %2454 = vmatprep.subr.bf16.mxu0 %v5863_v49  ;;  %2417 = vmatprep.mubr.bf16.mxu1 %v6094_v27  ;;  %v5953_v49 = vld [vmem:[%s6177_s25 + $0x168] ss:$12 sps:$4 sm:$0xff]  }
 0x192   : > { %2455 = vmatpush1.bf16.msra.mxu0 %v5861_v53  ;;  %v5952_v53 = vld [vmem:[%s6177_s25 + $0x98] ss:$12 sps:$4 sm:$0xff]  }
 0x193   : > { %2456 = vmatprep.subr.bf16.mxu0 %v5866_v56  ;;  %v5957_v56 = vld [vmem:[%s6177_s25 + $0xb0] ss:$12 sps:$4 sm:$0xff]  }
 0x195   : > { %2192 = vmatmul.mubr.bf16.gmra.mrb[60].mxu0 %v6460_v61  ;;  %2418 = vmatmul.mubr.bf16.gmra.mrb[44].mxu1 %v6460_v61 }
 0x196   : > { %2457 = vmatpush1.bf16.msra.mxu0 %v5864_v0  ;;  %2460 = vmatprep.mubr.bf16.mxu0 %v6369_v15  ;;  %v5920_v15 = vld [vmem:[%s6177_s25 + $0xc4] ss:$12 sps:$4 sm:$0xff]   ;;  %v5985_v0 = vld [vmem:[%s6177_s25 + $0x248] ss:$12 sps:$4 sm:$0xff]  }
 0x197   : > { %2458 = vmatprep.subr.bf16.mxu0 %v5869_v2  ;;  %3791 = vmatprep.subr.bf16.mxu1 %v5920_v15 }
 0x198   : > { %3792 = vmatpush1.bf16.msra.mxu1 %v5918_v21 }
 0x199   : > { %3793 = vmatprep.subr.bf16.mxu1 %v5925_v22 }
 0x19a   : > { %2459 = vmatpush1.bf16.msra.mxu0 %v5867_v5 }
 0x19b   : > { %2541 = vmatprep.subr.bf16.mxu0 %v5872_v6 }
 0x19d   : > { %2461 = vmatmul.mubr.bf16.vlgmr.msra.gmra.mrb[64].mxu0 %v6366_v13  ;;  %v5923_v13 = vld [vmem:[%s6177_s25 + $0xd8] ss:$12 sps:$4 sm:$0xff]  }
 0x19e   : > { %2542 = vmatpush1.bf16.msra.mxu0 %v5870_v9  ;;  %2470 = vmatprep.mubr.bf16.mxu0 %v6389_v54  ;;  %v5930_v54 = vld [vmem:[%s6177_s25 + $0xf4] ss:$12 sps:$4 sm:$0xff]  }
 0x19f   : > { %2543 = vmatprep.subr.bf16.mxu0 %v5875_v11  ;;  %3794 = vmatpush1.bf16.msra.mxu1 %v5923_v13 }
 0x1a0   : > { %3795 = vmatprep.subr.bf16.mxu1 %v5930_v54 }
 0x1a2   : > { %2544 = vmatpush1.bf16.msra.mxu0 %v5873_v16 }
 0x1a3   : > { %2545 = vmatprep.subr.bf16.mxu0 %v5878_v17  ;;  %3796 = vmatpush1.bf16.msra.mxu1 %v5928_v29 }
 0x1a4   : > { %3797 = vmatprep.subr.bf16.mxu1 %v5935_v31 }
 0x1a5   : > { %2471 = vmatmul.mubr.bf16.gmra.mrb[68].mxu0 %v6386_v51  ;;  %v5933_v51 = vld [vmem:[%s6177_s25 + $0x108] ss:$12 sps:$4 sm:$0xff]  }
 0x1a6   : > { %2480 = vmatprep.mubr.bf16.mxu0 %v6413_v33  ;;  %2546 = vmatpush1.bf16.msra.mxu0 %v5876_v23  ;;  %v5940_v33 = vld [vmem:[%s6177_s25 + $0x124] ss:$12 sps:$4 sm:$0xff]  }
 0x1a7   : > { %2547 = vmatprep.subr.bf16.mxu0 %v5881_v25  ;;  %3798 = vmatpush1.bf16.msra.mxu1 %v5933_v51 }
 0x1a8   : > { %3799 = vmatprep.subr.bf16.mxu1 %v5940_v33 }
 0x1aa   : > { %2548 = vmatpush1.bf16.msra.mxu0 %v5879_v26 }
 0x1ab   : > { %2549 = vmatprep.subr.bf16.mxu0 %v5884_v28  ;;  %3800 = vmatpush1.bf16.msra.mxu1 %v5938_v38 }
 0x1ac   : > { %3801 = vmatprep.subr.bf16.mxu1 %v5945_v39 }
 0x1ad   : > { %2481 = vmatmul.mubr.bf16.gmra.mrb[72].mxu0 %v6410_v30  ;;  %v5943_v30 = vld [vmem:[%s6177_s25 + $0x138] ss:$12 sps:$4 sm:$0xff]  }
 0x1ae   : > { %2490 = vmatprep.mubr.bf16.mxu0 %v6437_v14  ;;  %2550 = vmatpush1.bf16.msra.mxu0 %v5882_v32  ;;  %v5950_v14 = vld [vmem:[%s6177_s25 + $0x154] ss:$12 sps:$4 sm:$0xff]  }
 0x1af   : > { %2551 = vmatprep.subr.bf16.mxu0 %v5887_v34  ;;  %3802 = vmatpush1.bf16.msra.mxu1 %v5943_v30 }
 0x1b0   : > { %3803 = vmatprep.subr.bf16.mxu1 %v5950_v14  ;;  %v5958_v14 = vld [vmem:[%s6177_s25 + $0x180] ss:$12 sps:$4 sm:$0xff]  }
 0x1b2   : > { %2552 = vmatpush1.bf16.msra.mxu0 %v5885_v35 }
 0x1b3   : > { %2553 = vmatprep.subr.bf16.mxu0 %v5890_v37  ;;  %3804 = vmatpush1.bf16.msra.mxu1 %v5948_v47 }
 0x1b4   : > { %3805 = vmatprep.subr.bf16.mxu1 %v5955_v48 }
 0x1b5   : > { %2491 = vmatmul.mubr.bf16.gmra.mrb[76].mxu0 %v6434_v10  ;;  %v5922_v10 = vld [vmem:[%s6177_s25 + $0x8] ss:$12 sps:$4 sm:$0xff]  }
 0x1b6   : > { %2500 = vmatprep.mubr.bf16.mxu0 %v6458_v60  ;;  %2554 = vmatpush1.bf16.msra.mxu0 %v5888_v43  ;;  %v5927_v60 = vld [vmem:[%s6177_s25 + $0x20] ss:$12 sps:$4 sm:$0xff]  }
 0x1b7   : > { %2555 = vmatprep.subr.bf16.mxu0 %v5893_v44  ;;  %3806 = vmatpush1.bf16.msra.mxu1 %v5953_v49 }
 0x1b8   : > { %3888 = vmatprep.subr.bf16.mxu1 %v5960_v50  ;;  %v5963_v50 = vld [vmem:[%s6177_s25 + $0x19c] ss:$12 sps:$4 sm:$0xff]  }
 0x1ba   : > { %2556 = vmatpush1.bf16.msra.mxu0 %v5891_v45  ;;  %v5986_v45 = vld [vmem:[%s6177_s25 + $0x188] ss:$12 sps:$4 sm:$0xff]  }
 0x1bb   : > { %5080 = vmatprep.subr.bf16.mxu0 %v5921_v46 }
 0x1bd   : > { %2501 = vmatmul.mubr.bf16.gmra.mrb[80].mxu0 %v6456_v58  ;;  %v5926_v58 = vld [vmem:[%s6177_s25 + $0xe0] ss:$12 sps:$4 sm:$0xff]  }
 0x1be   : > { %2510 = vmatprep.mubr.bf16.mxu0 %v6472_v20  ;;  %v5932_v20 = vld [vmem:[%s6177_s25 + $0x38] ss:$12 sps:$4 sm:$0xff]  }
 0x1c5   : > { %2511 = vmatmul.mubr.bf16.gmra.mrb[84].mxu0 %v6470_v19  ;;  %v5931_v19 = vld [vmem:[%s6177_s25 + $0xf8] ss:$12 sps:$4 sm:$0xff]  }
 0x1c6   : > { %2520 = vmatprep.mubr.bf16.mxu0 %v6482_v41  ;;  %v5941_v41 = vld [vmem:[%s6177_s25 + $0x128] ss:$12 sps:$4 sm:$0xff]  }
 0x1cd   : > { %2521 = vmatmul.mubr.bf16.gmra.mrb[88].mxu0 %v6480_v40  ;;  %v5936_v40 = vld [vmem:[%s6177_s25 + $0x110] ss:$12 sps:$4 sm:$0xff]  }
 0x1ce   : > { %2530 = vmatprep.mubr.bf16.mxu0 %v6490_v62  ;;  %v5946_v62 = vld [vmem:[%s6177_s25 + $0x140] ss:$12 sps:$4 sm:$0xff]  }
 0x1d5   : > { %2531 = vmatmul.mubr.bf16.gmra.mrb[92].mxu0 %v6488_v59  ;;  %v5942_v59 = vld [vmem:[%s6177_s25 + $0x68] ss:$12 sps:$4 sm:$0xff]  }
 0x1d6   : > { %2573 = vmatprep.mubr.bf16.mxu0 %v6094_v27 }
 0x1dd   : > { %2574 = vmatmul.mubr.bf16.vlgmr.msra.gmra.mrb[64].mxu0 %v6397_v63  ;;  %v5937_v63 = vld [vmem:[%s6177_s25 + $0x50] ss:$12 sps:$4 sm:$0xff]  }
 0x1de   : > { %2583 = vmatprep.mubr.bf16.mxu0 %v6094_v27  ;;  %5081 = vmatpush3.bf16.msra.mxu0 %v5922_v10  ;;  %v5990_v10 = vld [vmem:[%s6177_s25 + $0x260] ss:$12 sps:$4 sm:$0xff]  }
 0x1df   : > { %5082 = vmatprep.subr.bf16.mxu0 %v5926_v58 }
 0x1e2   : > { %5083 = vmatpush3.bf16.msra.mxu0 %v5927_v60 }
 0x1e3   : > { %5084 = vmatprep.subr.bf16.mxu0 %v5931_v19 }
 0x1e5   : > { %2584 = vmatmul.mubr.bf16.gmra.mrb[68].mxu0 %v6393_v57  ;;  %v5947_v57 = vld [vmem:[%s6177_s25 + $0x80] ss:$12 sps:$4 sm:$0xff]  }
 0x1e6   : > { %2593 = vmatprep.mubr.bf16.mxu0 %v6094_v27  ;;  %5085 = vmatpush3.bf16.msra.mxu0 %v5932_v20 }
 0x1e7   : > { %5086 = vmatprep.subr.bf16.mxu0 %v5936_v40 }
 0x1ea   : > { %5087 = vmatpush3.bf16.msra.mxu0 %v5937_v63 }
 0x1eb   : > { %5088 = vmatprep.subr.bf16.mxu0 %v5941_v41 }
 0x1ed   : > { %2594 = vmatmul.mubr.bf16.gmra.mrb[72].mxu0 %v6421_v42 }
 0x1ee   : > { %2603 = vmatprep.mubr.bf16.mxu0 %v6094_v27  ;;  %5089 = vmatpush3.bf16.msra.mxu0 %v5942_v59 }
 0x1ef   : > { %5090 = vmatprep.subr.bf16.mxu0 %v5946_v62 }
 0x1f2   : > { %5091 = vmatpush3.bf16.msra.mxu0 %v5947_v57 }
 0x1f3   : > { %5092 = vmatprep.subr.bf16.mxu0 %v5951_v52  ;;  %v5961_v52 = vld [vmem:[%s6177_s25 + $0x198] ss:$12 sps:$4 sm:$0xff]  }
 0x1f5   : > { %2604 = vmatmul.mubr.bf16.gmra.mrb[76].mxu0 %v6417_v36  ;;  %v1226_v36 = vlaneseq }
 0x1f6   : > { %2613 = vmatprep.mubr.bf16.mxu0 %v6094_v27  ;;  %5093 = vmatpush3.bf16.msra.mxu0 %v5952_v53  ;;  %v5966_v53 = vld [vmem:[%s6177_s25 + $0x1b4] ss:$12 sps:$4 sm:$0xff]  }
 0x1f7   : > { %5094 = vmatprep.subr.bf16.mxu0 %v5956_v55  ;;  %v6657_v42 = vshrl.u32 %v1226_v36, 7  ;;  %v5991_v55 = vld [vmem:[%s6177_s25 + $0x1a0] ss:$12 sps:$4 sm:$0xff]  }
 0x1f9   : > { %v1228_v2 = vsub.s32 0, %v6657_v42  ;;  %v1236_v3 = vsub.s32 2, %v6657_v42  ;;  %v1232_v4 = vsub.s32 1, %v6657_v42 }
 0x1fa   : > { %5095 = vmatpush3.bf16.msra.mxu0 %v5957_v56 }
 0x1fb   : > { %5144 = vmatprep.subr.bf16.mxu0 %v5985_v0 }
 0x1fd   : > { %2614 = vmatmul.mubr.bf16.gmra.mrb[80].mxu0 %v6445_v24  ;;  %v6662_v24 = vld [vmem:[%s6182_s30] sm:$0x3f] }
 0x1fe   : > { %2623 = vmatprep.mubr.bf16.mxu0 %v6094_v27 }
 0x205   : > { %2624 = vmatmul.mubr.bf16.gmra.mrb[84].mxu0 %v6441_v18  ;;  %v1240_v18 = vsub.s32 3, %v6657_v42 }
 0x206   : > { %2633 = vmatprep.mubr.bf16.mxu0 %v6094_v27 }
 0x207   : > { %v6682_v5 = vrot.slane %v6662_v24, %v1240_v18 }
 0x20d   : > { %2634 = vmatmul.mubr.bf16.gmra.mrb[88].mxu0 %v6462_v1  ;;  %v6669_v1 = vrot.slane %v6662_v24, %v1228_v2 }
 0x20e   : > { %2643 = vmatprep.mubr.bf16.mxu0 %v6094_v27  ;;  %v6674_v27 = vrot.slane %v6662_v24, %v1236_v3 }
 0x215   : > { %2644 = vmatmul.mubr.bf16.gmra.mrb[92].mxu0 %v6460_v61  ;;  %v6679_v61 = vrot.slane %v6662_v24, %v1232_v4 }
 0x230   : > { %v2123_v6 = vpop.f32.mrb[32].mxu0  ;;  %v2349_v7 = vpop.f32.mrb[16].mxu1 }
 0x231   : > { %v5333_v8 = vadd.f32 %v2123_v6, %v6669_v1  ;;  %v5365_v9 = vadd.f32 %v2349_v7, %v6674_v27  ;;  %v2125_v11 = vpop.f32.mrb[33].mxu0  ;;  %v2351_v12 = vpop.f32.mrb[17].mxu1  ;;  %v5995_v6 = vld [vmem:[%s6177_s25 + $0x278] ss:$12 sps:$4 sm:$0xff]  }
 0x232   : > { %v5334_v15 = vadd.f32 %v2125_v11, %v6679_v61  ;;  %v5366_v16 = vadd.f32 %v2351_v12, %v6682_v5  ;;  %v2127_v17 = vpop.f32.mrb[34].mxu0  ;;  %v2353_v21 = vpop.f32.mrb[18].mxu1 }
 0x233   : > { %v5335_v22 = vadd.f32 %v2127_v17, %v6669_v1  ;;  %v5367_v23 = vadd.f32 %v2353_v21, %v6674_v27  ;;  %v2129_v25 = vpop.f32.mrb[35].mxu0  ;;  %v2355_v13 = vpop.f32.mrb[19].mxu1  ;;  %v2654_v28 = vmax.f32 %v5333_v8, 0.0  ;;  %v2656_v29 = vmax.f32 %v5365_v9, 0.0 }
 0x234   : > { %v5336_v54 = vadd.f32 %v2129_v25, %v6679_v61  ;;  %v5368_v26 = vadd.f32 %v2355_v13, %v6682_v5  ;;  %v2655_v34 = vmax.f32 %v5334_v15, 0.0  ;;  %v2657_v51 = vmax.f32 %v5366_v16, 0.0  ;;  %v5996_v25 = vld [vmem:[%s6177_s25 + $0x1b8] ss:$12 sps:$4 sm:$0xff]  }
 0x235   : > { %v2660_v31 = vmax.f32 %v5335_v22, 0.0  ;;  %v2662_v32 = vmax.f32 %v5367_v23, 0.0  ;;  %v5964_v23 = vld [vmem:[%s6177_s25 + $0x1b0] ss:$12 sps:$4 sm:$0xff]  }
 0x236   : > { %v2661_v33 = vmax.f32 %v5336_v54, 0.0  ;;  %v2663_v35 = vmax.f32 %v5368_v26, 0.0 }
 0x237   : > { %v2750_v37 = vpack.c.bf16 %v2660_v31, %v2654_v28  ;;  %v6692_v38 = vpack.c.bf16 %v2662_v32, %v2656_v29  ;;  %v5969_v29 = vld [vmem:[%s6177_s25 + $0x1cc] ss:$12 sps:$4 sm:$0xff]   ;;  %v6000_v31 = vld [vmem:[%s6177_s25 + $0x290] ss:$12 sps:$4 sm:$0xff]  }
 0x238   : > { %v2751_v39 = vpack.c.bf16 %v2661_v33, %v2655_v34  ;;  %v6694_v43 = vpack.c.bf16 %v2663_v35, %v2657_v51  ;;  %v2133_v44 = vpop.f32.mrb[36].mxu0  ;;  %v2359_v30 = vpop.f32.mrb[20].mxu1 }
 0x239   : > { %v5337_v46 = vadd.f32 %v2133_v44, %v6669_v1  ;;  %v5369_v47 = vadd.f32 %v2359_v30, %v6674_v27  ;;  %v2135_v48 = vpop.f32.mrb[37].mxu0  ;;  %v2361_v49 = vpop.f32.mrb[21].mxu1 }
 0x23a   : > { %v5338_v58 = vadd.f32 %v2135_v48, %v6679_v61  ;;  %v5370_v60 = vadd.f32 %v2361_v49, %v6682_v5  ;;  %v2137_v19 = vpop.f32.mrb[38].mxu0  ;;  %v2363_v20 = vpop.f32.mrb[22].mxu1  ;;  %3807 = vmatprep.mubr.bf16.mxu1 %v2751_v39  ;;  %4146 = vmatprep.mubr.bf16.mxu0 %v2751_v39 }
 0x23b   : > { %v5339_v40 = vadd.f32 %v2137_v19, %v6669_v1  ;;  %v5371_v63 = vadd.f32 %v2363_v20, %v6674_v27  ;;  %v2139_v41 = vpop.f32.mrb[39].mxu0  ;;  %v2365_v59 = vpop.f32.mrb[23].mxu1  ;;  %3808 = vmatmul.mubr.bf16.vlgmr.msra.gmra.mrb[48].mxu1 %v2750_v37  ;;  %4147 = vmatmul.mubr.bf16.vlgmr.msra.gmra.mrb[96].mxu0 %v2750_v37  ;;  %v2666_v56 = vmax.f32 %v5337_v46, 0.0  ;;  %v2668_v0 = vmax.f32 %v5369_v47, 0.0  ;;  %v5972_v46 = vld [vmem:[%s6177_s25 + $0x1e4] ss:$12 sps:$4 sm:$0xff]  }
 0x23c   : > { %v5340_v62 = vadd.f32 %v2139_v41, %v6679_v61  ;;  %v5372_v57 = vadd.f32 %v2365_v59, %v6682_v5  ;;  %3889 = vmatpush1.bf16.msra.mxu1 %v5958_v14  ;;  %5145 = vmatpush3.bf16.msra.mxu0 %v5986_v45  ;;  %v2667_v7 = vmax.f32 %v5338_v58, 0.0  ;;  %v2669_v8 = vmax.f32 %v5370_v60, 0.0  ;;  %v5967_v45 = vld [vmem:[%s6177_s25 + $0x1c8] ss:$12 sps:$4 sm:$0xff]   ;;  %v6001_v47 = vld [vmem:[%s6177_s25 + $0x1d0] ss:$12 sps:$4 sm:$0xff]  }
 0x23d   : > { %v2672_v36 = vmax.f32 %v5339_v40, 0.0  ;;  %v2674_v18 = vmax.f32 %v5371_v63, 0.0  ;;  %3890 = vmatprep.subr.bf16.mxu1 %v5963_v50  ;;  %5146 = vmatprep.subr.bf16.mxu0 %v5990_v10  ;;  %v6005_v58 = vld [vmem:[%s6177_s25 + $0x2a8] ss:$12 sps:$4 sm:$0xff]  }
 0x23e   : > { %v2673_v9 = vmax.f32 %v5340_v62, 0.0  ;;  %v2675_v11 = vmax.f32 %v5372_v57, 0.0 }
 0x23f   : > { %v2756_v12 = vpack.c.bf16 %v2672_v36, %v2666_v56  ;;  %v6712_v15 = vpack.c.bf16 %v2674_v18, %v2668_v0 }
 0x240   : > { %v2757_v16 = vpack.c.bf16 %v2673_v9, %v2667_v7  ;;  %v6714_v17 = vpack.c.bf16 %v2675_v11, %v2669_v8  ;;  %3891 = vmatpush1.bf16.msra.mxu1 %v5961_v52  ;;  %v2143_v21 = vpop.f32.mrb[40].mxu0  ;;  %v2369_v22 = vpop.f32.mrb[24].mxu1  ;;  %5147 = vmatpush3.bf16.msra.mxu0 %v5991_v55  ;;  %v6006_v55 = vld [vmem:[%s6177_s25 + $0x1e8] ss:$12 sps:$4 sm:$0xff]   ;;  %v6010_v7 = vld [vmem:[%s6177_s25 + $0x2c0] ss:$12 sps:$4 sm:$0xff]  }
 0x241   : > { %v5341_v13 = vadd.f32 %v2143_v21, %v6669_v1  ;;  %v5373_v54 = vadd.f32 %v2369_v22, %v6674_v27  ;;  %v2145_v26 = vpop.f32.mrb[41].mxu0  ;;  %v2371_v28 = vpop.f32.mrb[25].mxu1  ;;  %3892 = vmatprep.subr.bf16.mxu1 %v5966_v53  ;;  %5148 = vmatprep.subr.bf16.mxu0 %v5995_v6  ;;  %v5970_v53 = vld [vmem:[%s6177_s25 + $0x1e0] ss:$12 sps:$4 sm:$0xff]   ;;  %v5975_v6 = vld [vmem:[%s6177_s25 + $0x1fc] ss:$12 sps:$4 sm:$0xff]  }
 0x242   : > { %v5342_v32 = vadd.f32 %v2145_v26, %v6679_v61  ;;  %v5374_v34 = vadd.f32 %v2371_v28, %v6682_v5  ;;  %v2147_v51 = vpop.f32.mrb[42].mxu0  ;;  %v2373_v33 = vpop.f32.mrb[26].mxu1  ;;  %3817 = vmatprep.mubr.bf16.mxu1 %v2757_v16  ;;  %4154 = vmatprep.mubr.bf16.mxu0 %v2757_v16  ;;  %v5978_v26 = vld [vmem:[%s6177_s25 + $0x214] ss:$12 sps:$4 sm:$0xff]  }
 0x243   : > { %v5343_v35 = vadd.f32 %v2147_v51, %v6669_v1  ;;  %v5375_v37 = vadd.f32 %v2373_v33, %v6674_v27  ;;  %v2149_v39 = vpop.f32.mrb[43].mxu0  ;;  %v2375_v44 = vpop.f32.mrb[27].mxu1  ;;  %3818 = vmatmul.mubr.bf16.gmra.mrb[52].mxu1 %v2756_v12  ;;  %4155 = vmatmul.mubr.bf16.gmra.mrb[100].mxu0 %v2756_v12  ;;  %v2678_v48 = vmax.f32 %v5341_v13, 0.0  ;;  %v2680_v49 = vmax.f32 %v5373_v54, 0.0  ;;  %v5973_v54 = vld [vmem:[%s6177_s25 + $0x1f8] ss:$12 sps:$4 sm:$0xff]  }
 0x244   : > { %v5344_v30 = vadd.f32 %v2149_v39, %v6679_v61  ;;  %v5376_v14 = vadd.f32 %v2375_v44, %v6682_v5  ;;  %3893 = vmatpush1.bf16.msra.mxu1 %v5964_v23  ;;  %5149 = vmatpush3.bf16.msra.mxu0 %v5996_v25  ;;  %v2679_v60 = vmax.f32 %v5342_v32, 0.0  ;;  %v2681_v19 = vmax.f32 %v5374_v34, 0.0  ;;  %v6011_v28 = vld [vmem:[%s6177_s25 + $0x200] ss:$12 sps:$4 sm:$0xff]   ;;  %v6015_v51 = vld [vmem:[%s6177_s25 + $0x2d8] ss:$12 sps:$4 sm:$0xff]  }
 0x245   : > { %v2684_v50 = vmax.f32 %v5343_v35, 0.0  ;;  %v2686_v10 = vmax.f32 %v5375_v37, 0.0  ;;  %3894 = vmatprep.subr.bf16.mxu1 %v5969_v29  ;;  %5150 = vmatprep.subr.bf16.mxu0 %v6000_v31 }
 0x246   : > { %v2685_v20 = vmax.f32 %v5344_v30, 0.0  ;;  %v2687_v40 = vmax.f32 %v5376_v14, 0.0 }
 0x247   : > { %v2762_v63 = vpack.c.bf16 %v2684_v50, %v2678_v48  ;;  %v6732_v41 = vpack.c.bf16 %v2686_v10, %v2680_v49  ;;  %v5976_v48 = vld [vmem:[%s6177_s25 + $0x210] ss:$12 sps:$4 sm:$0xff]   ;;  %v6016_v49 = vld [vmem:[%s6177_s25 + $0x218] ss:$12 sps:$4 sm:$0xff]  }
 0x248   : > { %v2763_v59 = vpack.c.bf16 %v2685_v20, %v2679_v60  ;;  %v6734_v62 = vpack.c.bf16 %v2687_v40, %v2681_v19  ;;  %3895 = vmatpush1.bf16.msra.mxu1 %v5967_v45  ;;  %v2153_v57 = vpop.f32.mrb[44].mxu0  ;;  %v2379_v52 = vpop.f32.mrb[28].mxu1  ;;  %5151 = vmatpush3.bf16.msra.mxu0 %v6001_v47  ;;  %v5981_v19 = vld [vmem:[%s6177_s25 + $0x22c] ss:$12 sps:$4 sm:$0xff]   ;;  %v6020_v20 = vld [vmem:[%s6177_s25 + $0x2f0] ss:$12 sps:$4 sm:$0xff]  }
 0x249   : > { %v5345_v56 = vadd.f32 %v2153_v57, %v6669_v1  ;;  %v5377_v0 = vadd.f32 %v2379_v52, %v6674_v27  ;;  %v2155_v36 = vpop.f32.mrb[45].mxu0  ;;  %v2381_v18 = vpop.f32.mrb[29].mxu1  ;;  %3896 = vmatprep.subr.bf16.mxu1 %v5972_v46  ;;  %5152 = vmatprep.subr.bf16.mxu0 %v6005_v58 }
 0x24a   : > { %v5346_v8 = vadd.f32 %v2155_v36, %v6679_v61  ;;  %v5378_v9 = vadd.f32 %v2381_v18, %v6682_v5  ;;  %v2157_v11 = vpop.f32.mrb[46].mxu0  ;;  %v2383_v12 = vpop.f32.mrb[30].mxu1  ;;  %3827 = vmatprep.mubr.bf16.mxu1 %v2763_v59  ;;  %4162 = vmatprep.mubr.bf16.mxu0 %v2763_v59  ;;  %v5979_v18 = vld [vmem:[%s6177_s25 + $0x228] ss:$12 sps:$4 sm:$0xff]  }
 0x24b   : > { %v5347_v16 = vadd.f32 %v2157_v11, %v6669_v1  ;;  %v5379_v21 = vadd.f32 %v2383_v12, %v6674_v27  ;;  %v2159_v22 = vpop.f32.mrb[47].mxu0  ;;  %v2385_v23 = vpop.f32.mrb[31].mxu1  ;;  %3828 = vmatmul.mubr.bf16.gmra.mrb[56].mxu1 %v2762_v63  ;;  %4163 = vmatmul.mubr.bf16.gmra.mrb[104].mxu0 %v2762_v63  ;;  %v2690_v29 = vmax.f32 %v5345_v56, 0.0  ;;  %v2692_v31 = vmax.f32 %v5377_v0, 0.0  ;;  %v5984_v12 = vld [vmem:[%s6177_s25 + $0x244] ss:$12 sps:$4 sm:$0xff]  }
 0x24c   : > { %v5348_v25 = vadd.f32 %v2159_v22, %v6679_v61  ;;  %v5380_v13 = vadd.f32 %v2385_v23, %v6682_v5  ;;  %3897 = vmatpush1.bf16.msra.mxu1 %v5970_v53  ;;  %5153 = vmatpush3.bf16.msra.mxu0 %v6006_v55  ;;  %v2691_v33 = vmax.f32 %v5346_v8, 0.0  ;;  %v2693_v35 = vmax.f32 %v5378_v9, 0.0 }
 0x24d   : > { %v2696_v32 = vmax.f32 %v5347_v16, 0.0  ;;  %v2698_v34 = vmax.f32 %v5379_v21, 0.0  ;;  %3898 = vmatprep.subr.bf16.mxu1 %v5975_v6  ;;  %5154 = vmatprep.subr.bf16.mxu0 %v6010_v7  ;;  %v6021_v6 = vld [vmem:[%s6177_s25 + $0x230] ss:$12 sps:$4 sm:$0xff]  }
 0x24e   : > { %v2697_v37 = vmax.f32 %v5348_v25, 0.0  ;;  %v2699_v39 = vmax.f32 %v5380_v13, 0.0 }
 0x24f   : > { %v2768_v44 = vpack.c.bf16 %v2696_v32, %v2690_v29  ;;  %v6752_v30 = vpack.c.bf16 %v2698_v34, %v2692_v31  ;;  %v5982_v31 = vld [vmem:[%s6177_s25 + $0x240] ss:$12 sps:$4 sm:$0xff]  }
 0x250   : > { %v2769_v14 = vpack.c.bf16 %v2697_v37, %v2691_v33  ;;  %v6754_v45 = vpack.c.bf16 %v2699_v39, %v2693_v35  ;;  %3899 = vmatpush1.bf16.msra.mxu1 %v5973_v54  ;;  %v2163_v46 = vpop.f32.mrb[48].mxu0  ;;  %v2389_v47 = vpop.f32.mrb[32].mxu1  ;;  %5155 = vmatpush3.bf16.msra.mxu0 %v6011_v28  ;;  %v5989_v35 = vld [vmem:[%s6177_s25 + $0x25c] ss:$12 sps:$4 sm:$0xff]  }
 0x251   : > { %v5349_v50 = vadd.f32 %v2163_v46, %v6669_v1  ;;  %v5381_v10 = vadd.f32 %v2389_v47, %v6674_v27  ;;  %v2165_v58 = vpop.f32.mrb[49].mxu0  ;;  %v2391_v60 = vpop.f32.mrb[33].mxu1  ;;  %3900 = vmatprep.subr.bf16.mxu1 %v5978_v26  ;;  %5156 = vmatprep.subr.bf16.mxu0 %v6015_v51 }
 0x252   : > { %v5350_v40 = vadd.f32 %v2165_v58, %v6679_v61  ;;  %v5382_v63 = vadd.f32 %v2391_v60, %v6682_v5  ;;  %v2167_v59 = vpop.f32.mrb[50].mxu0  ;;  %v2393_v57 = vpop.f32.mrb[34].mxu1  ;;  %3837 = vmatprep.mubr.bf16.mxu1 %v2769_v14  ;;  %4170 = vmatprep.mubr.bf16.mxu0 %v2769_v14  ;;  %v5987_v58 = vld [vmem:[%s6177_s25 + $0x258] ss:$12 sps:$4 sm:$0xff]  }
 0x253   : > { %v5351_v52 = vadd.f32 %v2167_v59, %v6669_v1  ;;  %v5383_v53 = vadd.f32 %v2393_v57, %v6674_v27  ;;  %v2169_v55 = vpop.f32.mrb[51].mxu0  ;;  %v2395_v56 = vpop.f32.mrb[35].mxu1  ;;  %3838 = vmatmul.mubr.bf16.gmra.mrb[60].mxu1 %v2768_v44  ;;  %4171 = vmatmul.mubr.bf16.gmra.mrb[108].mxu0 %v2768_v44  ;;  %v2702_v7 = vmax.f32 %v5349_v50, 0.0  ;;  %v2704_v8 = vmax.f32 %v5381_v10, 0.0 }
 0x254   : > { %v5352_v0 = vadd.f32 %v2169_v55, %v6679_v61  ;;  %v5384_v36 = vadd.f32 %v2395_v56, %v6682_v5  ;;  %3901 = vmatpush1.bf16.msra.mxu1 %v5976_v48  ;;  %5157 = vmatpush3.bf16.msra.mxu0 %v6016_v49  ;;  %v2703_v16 = vmax.f32 %v5350_v40, 0.0  ;;  %v2705_v21 = vmax.f32 %v5382_v63, 0.0  ;;  %v5994_v63 = vld [vmem:[%s6177_s25 + $0x274] ss:$12 sps:$4 sm:$0xff]  }
 0x255   : > { %v2708_v9 = vmax.f32 %v5351_v52, 0.0  ;;  %v2710_v11 = vmax.f32 %v5383_v53, 0.0  ;;  %3902 = vmatprep.subr.bf16.mxu1 %v5981_v19  ;;  %5158 = vmatprep.subr.bf16.mxu0 %v6020_v20 }
 0x256   : > { %v2709_v22 = vmax.f32 %v5352_v0, 0.0  ;;  %v2711_v23 = vmax.f32 %v5384_v36, 0.0 }
 0x257   : > { %v2774_v25 = vpack.c.bf16 %v2708_v9, %v2702_v7  ;;  %v6771_v13 = vpack.c.bf16 %v2710_v11, %v2704_v8  ;;  %v5992_v7 = vld [vmem:[%s6177_s25 + $0x270] ss:$12 sps:$4 sm:$0xff]  }
 0x258   : > { %v2775_v54 = vpack.c.bf16 %v2709_v22, %v2703_v16  ;;  %v6773_v26 = vpack.c.bf16 %v2711_v23, %v2705_v21  ;;  %3903 = vmatpush1.bf16.msra.mxu1 %v5979_v18  ;;  %v2173_v28 = vpop.f32.mrb[52].mxu0  ;;  %v2399_v29 = vpop.f32.mrb[36].mxu1  ;;  %5159 = vmatpush3.bf16.msra.mxu0 %v6021_v6  ;;  %v5999_v16 = vld [vmem:[%s6177_s25 + $0x28c] ss:$12 sps:$4 sm:$0xff]  }
 0x259   : > { %v5353_v32 = vadd.f32 %v2173_v28, %v6669_v1  ;;  %v5385_v34 = vadd.f32 %v2399_v29, %v6674_v27  ;;  %v2175_v51 = vpop.f32.mrb[53].mxu0  ;;  %v2401_v33 = vpop.f32.mrb[37].mxu1  ;;  %3904 = vmatprep.subr.bf16.mxu1 %v5984_v12 }
 0x25a   : > { %v5354_v37 = vadd.f32 %v2175_v51, %v6679_v61  ;;  %v5386_v39 = vadd.f32 %v2401_v33, %v6682_v5  ;;  %v2177_v44 = vpop.f32.mrb[54].mxu0  ;;  %v2403_v14 = vpop.f32.mrb[38].mxu1  ;;  %3847 = vmatprep.mubr.bf16.mxu1 %v2775_v54  ;;  %4178 = vmatprep.mubr.bf16.mxu0 %v2775_v54  ;;  %v5997_v51 = vld [vmem:[%s6177_s25 + $0x288] ss:$12 sps:$4 sm:$0xff]  }
 0x25b   : > { %v5355_v46 = vadd.f32 %v2177_v44, %v6669_v1  ;;  %v5387_v47 = vadd.f32 %v2403_v14, %v6674_v27  ;;  %v2179_v48 = vpop.f32.mrb[55].mxu0  ;;  %v2405_v49 = vpop.f32.mrb[39].mxu1  ;;  %3848 = vmatmul.mubr.bf16.gmra.mrb[64].mxu1 %v2774_v25  ;;  %4179 = vmatmul.mubr.bf16.gmra.mrb[112].mxu0 %v2774_v25  ;;  %v2714_v60 = vmax.f32 %v5353_v32, 0.0  ;;  %v2716_v19 = vmax.f32 %v5385_v34, 0.0  ;;  %v6004_v44 = vld [vmem:[%s6177_s25 + $0x2a4] ss:$12 sps:$4 sm:$0xff]  }
 0x25c   : > { %v5356_v50 = vadd.f32 %v2179_v48, %v6679_v61  ;;  %v5388_v10 = vadd.f32 %v2405_v49, %v6682_v5  ;;  %3905 = vmatpush1.bf16.msra.mxu1 %v5982_v31  ;;  %v2715_v59 = vmax.f32 %v5354_v37, 0.0  ;;  %v2717_v57 = vmax.f32 %v5386_v39, 0.0 }
 0x25d   : > { %v2720_v20 = vmax.f32 %v5355_v46, 0.0  ;;  %v2722_v40 = vmax.f32 %v5387_v47, 0.0  ;;  %3906 = vmatprep.subr.bf16.mxu1 %v5989_v35 }
 0x25e   : > { %v2721_v52 = vmax.f32 %v5356_v50, 0.0  ;;  %v2723_v53 = vmax.f32 %v5388_v10, 0.0 }
 0x25f   : > { %v2780_v55 = vpack.c.bf16 %v2720_v20, %v2714_v60  ;;  %v6787_v56 = vpack.c.bf16 %v2722_v40, %v2716_v19  ;;  %v6002_v20 = vld [vmem:[%s6177_s25 + $0x2a0] ss:$12 sps:$4 sm:$0xff]  }
 0x260   : > { %v2781_v0 = vpack.c.bf16 %v2721_v52, %v2715_v59  ;;  %v6789_v36 = vpack.c.bf16 %v2723_v53, %v2717_v57  ;;  %3907 = vmatpush1.bf16.msra.mxu1 %v5987_v58  ;;  %v2183_v18 = vpop.f32.mrb[56].mxu0  ;;  %v2409_v6 = vpop.f32.mrb[40].mxu1  ;;  %v6009_v52 = vld [vmem:[%s6177_s25 + $0x2bc] ss:$12 sps:$4 sm:$0xff]  }
 0x261   : > { %v5357_v8 = vadd.f32 %v2183_v18, %v6669_v1  ;;  %v5389_v9 = vadd.f32 %v2409_v6, %v6674_v27  ;;  %v2185_v11 = vpop.f32.mrb[57].mxu0  ;;  %v2411_v12 = vpop.f32.mrb[41].mxu1  ;;  %3908 = vmatprep.subr.bf16.mxu1 %v5994_v63 }
 0x262   : > { %v5358_v21 = vadd.f32 %v2185_v11, %v6679_v61  ;;  %v5390_v22 = vadd.f32 %v2411_v12, %v6682_v5  ;;  %v2187_v23 = vpop.f32.mrb[58].mxu0  ;;  %v2413_v25 = vpop.f32.mrb[42].mxu1  ;;  %3857 = vmatprep.mubr.bf16.mxu1 %v2781_v0  ;;  %4186 = vmatprep.mubr.bf16.mxu0 %v2781_v0 }
 0x263   : > { %v5359_v54 = vadd.f32 %v2187_v23, %v6669_v1  ;;  %v5391_v28 = vadd.f32 %v2413_v25, %v6674_v27  ;;  %v2189_v29 = vpop.f32.mrb[59].mxu0  ;;  %v2415_v31 = vpop.f32.mrb[43].mxu1  ;;  %3858 = vmatmul.mubr.bf16.gmra.mrb[68].mxu1 %v2780_v55  ;;  %4187 = vmatmul.mubr.bf16.gmra.mrb[116].mxu0 %v2780_v55  ;;  %v2726_v33 = vmax.f32 %v5357_v8, 0.0  ;;  %v2728_v35 = vmax.f32 %v5389_v9, 0.0 }
 0x264   : > { %v5360_v32 = vadd.f32 %v2189_v29, %v6679_v61  ;;  %v5392_v34 = vadd.f32 %v2415_v31, %v6682_v5  ;;  %3909 = vmatpush1.bf16.msra.mxu1 %v5992_v7  ;;  %v2727_v14 = vmax.f32 %v5358_v21, 0.0  ;;  %v2729_v46 = vmax.f32 %v5390_v22, 0.0 }
 0x265   : > { %v2732_v37 = vmax.f32 %v5359_v54, 0.0  ;;  %v2734_v39 = vmax.f32 %v5391_v28, 0.0  ;;  %3910 = vmatprep.subr.bf16.mxu1 %v5999_v16  ;;  %v6007_v16 = vld [vmem:[%s6177_s25 + $0x2b8] ss:$12 sps:$4 sm:$0xff]  }
 0x266   : > { %v2733_v47 = vmax.f32 %v5360_v32, 0.0  ;;  %v2735_v48 = vmax.f32 %v5392_v34, 0.0  ;;  %v6012_v34 = vld [vmem:[%s6177_s25 + $0x2d0] ss:$12 sps:$4 sm:$0xff]  }
 0x267   : > { %v2786_v49 = vpack.c.bf16 %v2732_v37, %v2726_v33  ;;  %v6803_v50 = vpack.c.bf16 %v2734_v39, %v2728_v35  ;;  %v6017_v33 = vld [vmem:[%s6177_s25 + $0x2e8] ss:$12 sps:$4 sm:$0xff]   ;;  %v6024_v35 = vld [vmem:[%s6177_s25 + $0x304] ss:$12 sps:$4 sm:$0xff]   ;;  %v6022_v37 = vld [vmem:[%s6177_s25 + $0x300] ss:$12 sps:$4 sm:$0xff]  }
 0x268   : > { %v2787_v10 = vpack.c.bf16 %v2733_v47, %v2727_v14  ;;  %v6805_v58 = vpack.c.bf16 %v2735_v48, %v2729_v46  ;;  %3911 = vmatpush1.bf16.msra.mxu1 %v5997_v51  ;;  %v2193_v60 = vpop.f32.mrb[60].mxu0  ;;  %v2419_v19 = vpop.f32.mrb[44].mxu1  ;;  %v6019_v51 = vld [vmem:[%s6177_s25 + $0x2ec] ss:$12 sps:$4 sm:$0xff]   ;;  %v6027_v39 = vld [vmem:[%s6177_s25 + $0x31c] ss:$12 sps:$4 sm:$0xff]  }
 0x269   : > { %v5361_v40 = vadd.f32 %v2193_v60, %v6669_v1  ;;  %v5393_v63 = vadd.f32 %v2419_v19, %v6674_v27  ;;  %v2195_v59 = vpop.f32.mrb[61].mxu0  ;;  %v2421_v57 = vpop.f32.mrb[45].mxu1  ;;  %3912 = vmatprep.subr.bf16.mxu1 %v6004_v44  ;;  %v6025_v44 = vld [vmem:[%s6177_s25 + $0x318] ss:$12 sps:$4 sm:$0xff]   ;;  %v6028_v14 = vld [vmem:[%s6177_s25 + $0x330] ss:$12 sps:$4 sm:$0xff]  }
 0x26a   : > { %v5362_v53 = vadd.f32 %v2195_v59, %v6679_v61  ;;  %v5394_v55 = vadd.f32 %v2421_v57, %v6682_v5  ;;  %v2197_v0 = vpop.f32.mrb[62].mxu0  ;;  %v2423_v18 = vpop.f32.mrb[46].mxu1  ;;  %3867 = vmatprep.mubr.bf16.mxu1 %v2787_v10  ;;  %4194 = vmatprep.mubr.bf16.mxu0 %v2787_v10  ;;  %v6033_v46 = vld [vmem:[%s6177_s25 + $0x34c] ss:$12 sps:$4 sm:$0xff]   ;;  %v6039_v48 = vld [vmem:[%s6177_s25 + $0x37c] ss:$12 sps:$4 sm:$0xff]  }
 0x26b   : > { %v5363_v6 = vadd.f32 %v2197_v0, %v6669_v1  ;;  %v5395_v7 = vadd.f32 %v2423_v18, %v6674_v27  ;;  %v2199_v8 = vpop.f32.mrb[63].mxu0  ;;  %v2425_v9 = vpop.f32.mrb[47].mxu1  ;;  %3868 = vmatmul.mubr.bf16.gmra.mrb[72].mxu1 %v2786_v49  ;;  %4195 = vmatmul.mubr.bf16.gmra.mrb[120].mxu0 %v2786_v49  ;;  %v2738_v21 = vmax.f32 %v5361_v40, 0.0  ;;  %v2740_v22 = vmax.f32 %v5393_v63, 0.0  ;;  %v6014_v1 = vld [vmem:[%s6177_s25 + $0x2d4] ss:$12 sps:$4 sm:$0xff]  }
 0x26c   : > { %v5364_v11 = vadd.f32 %v2199_v8, %v6679_v61  ;;  %v5396_v12 = vadd.f32 %v2425_v9, %v6682_v5  ;;  %3913 = vmatpush1.bf16.msra.mxu1 %v6002_v20  ;;  %v2739_v54 = vmax.f32 %v5362_v53, 0.0  ;;  %v2741_v27 = vmax.f32 %v5394_v55, 0.0  ;;  %v6034_v47 = vld [vmem:[%s6177_s25 + $0x360] ss:$12 sps:$4 sm:$0xff]   ;;  %v6040_v49 = vld [vmem:[%s6177_s25 + $0x390] ss:$12 sps:$4 sm:$0xff]  }
 0x26d   : > { %v2744_v23 = vmax.f32 %v5363_v6, 0.0  ;;  %v2746_v25 = vmax.f32 %v5395_v7, 0.0  ;;  %3914 = vmatprep.subr.bf16.mxu1 %v6009_v52  ;;  %v6045_v10 = vld [vmem:[%s6177_s25 + $0x3ac] ss:$12 sps:$4 sm:$0xff]   ;;  %v6051_v19 = vld [vmem:[%s6177_s25 + $0x3dc] ss:$12 sps:$4 sm:$0xff]  }
 0x26e   : > { %v2745_v28 = vmax.f32 %v5364_v11, 0.0  ;;  %v2747_v29 = vmax.f32 %v5396_v12, 0.0  ;;  %v6046_v60 = vld [vmem:[%s6177_s25 + $0x3c0] ss:$12 sps:$4 sm:$0xff]   ;;  %v6052_v20 = vld [vmem:[%s6177_s25 + $0x3f0] ss:$12 sps:$4 sm:$0xff]  }
 0x26f   : > { %v2792_v31 = vpack.c.bf16 %v2744_v23, %v2738_v21  ;;  %v6819_v32 = vpack.c.bf16 %v2746_v25, %v2740_v22  ;;  %v6057_v40 = vld [vmem:[%s6177_s25 + $0x40c] ss:$12 sps:$4 sm:$0xff]   ;;  %v6063_v59 = vld [vmem:[%s6177_s25 + $0x43c] ss:$12 sps:$4 sm:$0xff]   ;;  %v1244_v57 = vsub.s32 4, %v6657_v42  ;;  %v1248_v52 = vsub.s32 5, %v6657_v42 }
 0x270   : > { %v2793_v61 = vpack.c.bf16 %v2745_v28, %v2739_v54  ;;  %v6821_v5 = vpack.c.bf16 %v2747_v29, %v2741_v27  ;;  %3915 = vmatpush1.bf16.msra.mxu1 %v6007_v16  ;;  %v6058_v63 = vld [vmem:[%s6177_s25 + $0x420] ss:$12 sps:$4 sm:$0xff]   ;;  %v6064_v18 = vld [vmem:[%s6177_s25 + $0x450] ss:$12 sps:$4 sm:$0xff]   ;;  %v6067_v16 = vld [vmem:[%s6177_s25 + $0x468] ss:$12 sps:$4 sm:$0xff]  }
 0x271   : > { %3916 = vmatprep.subr.bf16.mxu1 %v6014_v1  ;;  %v6066_v53 = vld [vmem:[%s6177_s25 + $0x454] ss:$12 sps:$4 sm:$0xff]   ;;  %v6891_v55 = vrot.slane %v6662_v24, %v1248_v52  ;;  %v6069_v7 = vld [vmem:[%s6177_s25 + $0x46c] ss:$12 sps:$4 sm:$0xff]  }
 0x272   : > { %3877 = vmatprep.mubr.bf16.mxu1 %v2793_v61  ;;  %4202 = vmatprep.mubr.bf16.mxu0 %v2793_v61  ;;  %v6070_v23 = vld [vmem:[%s6177_s25 + $0x3c8] ss:$12 sps:$4 sm:$0xff]   ;;  %v6072_v61 = vld [vmem:[%s6177_s25 + $0x3e0] ss:$12 sps:$4 sm:$0xff]  }
 0x273   : > { %3878 = vmatmul.mubr.bf16.gmra.mrb[76].mxu1 %v2792_v31  ;;  %4203 = vmatmul.mubr.bf16.gmra.mrb[124].mxu0 %v2792_v31  ;;  %v6071_v29 = vld [vmem:[%s6177_s25 + $0x308] ss:$12 sps:$4 sm:$0xff]  }
 0x274   : > { %3917 = vmatpush1.bf16.msra.mxu1 %v6012_v34  ;;  %3920 = vmatprep.mubr.bf16.mxu1 %v6694_v43  ;;  %v6079_v52 = vld [vmem:[%s6177_s25 + $0x368] ss:$12 sps:$4 sm:$0xff]  }
 0x275   : > { %4243 = vmatprep.mubr.bf16.mxu0 %v6694_v43  ;;  %3918 = vmatprep.subr.bf16.mxu1 %v6019_v51  ;;  %v6030_v43 = vld [vmem:[%s6177_s25 + $0x334] ss:$12 sps:$4 sm:$0xff]  }
 0x278   : > { %3919 = vmatpush1.bf16.msra.mxu1 %v6017_v33 }
 0x279   : > { %4001 = vmatprep.subr.bf16.mxu1 %v6024_v35 }
 0x27b   : > { %3921 = vmatmul.mubr.bf16.vlgmr.msra.gmra.mrb[48].mxu1 %v6692_v38  ;;  %4244 = vmatmul.mubr.bf16.vlgmr.msra.gmra.mrb[128].mxu0 %v6692_v38  ;;  %v6031_v38 = vld [vmem:[%s6177_s25 + $0x348] ss:$12 sps:$4 sm:$0xff]  }
 0x27c   : > { %4002 = vmatpush1.bf16.msra.mxu1 %v6022_v37  ;;  %3930 = vmatprep.mubr.bf16.mxu1 %v6714_v17  ;;  %v6073_v37 = vld [vmem:[%s6177_s25 + $0x320] ss:$12 sps:$4 sm:$0xff]  }
 0x27d   : > { %4251 = vmatprep.mubr.bf16.mxu0 %v6714_v17  ;;  %4003 = vmatprep.subr.bf16.mxu1 %v6027_v39  ;;  %v6036_v17 = vld [vmem:[%s6177_s25 + $0x364] ss:$12 sps:$4 sm:$0xff]  }
 0x280   : > { %4004 = vmatpush1.bf16.msra.mxu1 %v6025_v44 }
 0x281   : > { %4005 = vmatprep.subr.bf16.mxu1 %v6030_v43  ;;  %v6074_v43 = vld [vmem:[%s6177_s25 + $0x3f8] ss:$12 sps:$4 sm:$0xff]  }
 0x283   : > { %3931 = vmatmul.mubr.bf16.gmra.mrb[52].mxu1 %v6712_v15  ;;  %4252 = vmatmul.mubr.bf16.gmra.mrb[132].mxu0 %v6712_v15  ;;  %v6037_v15 = vld [vmem:[%s6177_s25 + $0x378] ss:$12 sps:$4 sm:$0xff]  }
 0x284   : > { %4006 = vmatpush1.bf16.msra.mxu1 %v6028_v14  ;;  %3940 = vmatprep.mubr.bf16.mxu1 %v6734_v62 }
 0x285   : > { %4259 = vmatprep.mubr.bf16.mxu0 %v6734_v62  ;;  %4007 = vmatprep.subr.bf16.mxu1 %v6033_v46  ;;  %v6042_v62 = vld [vmem:[%s6177_s25 + $0x394] ss:$12 sps:$4 sm:$0xff]  }
 0x288   : > { %4008 = vmatpush1.bf16.msra.mxu1 %v6031_v38 }
 0x289   : > { %4009 = vmatprep.subr.bf16.mxu1 %v6036_v17 }
 0x28b   : > { %3941 = vmatmul.mubr.bf16.gmra.mrb[56].mxu1 %v6732_v41  ;;  %4260 = vmatmul.mubr.bf16.gmra.mrb[136].mxu0 %v6732_v41  ;;  %v6043_v41 = vld [vmem:[%s6177_s25 + $0x3a8] ss:$12 sps:$4 sm:$0xff]  }
 0x28c   : > { %4010 = vmatpush1.bf16.msra.mxu1 %v6034_v47  ;;  %3950 = vmatprep.mubr.bf16.mxu1 %v6754_v45 }
 0x28d   : > { %4267 = vmatprep.mubr.bf16.mxu0 %v6754_v45  ;;  %4011 = vmatprep.subr.bf16.mxu1 %v6039_v48  ;;  %v6048_v45 = vld [vmem:[%s6177_s25 + $0x3c4] ss:$12 sps:$4 sm:$0xff]  }
 0x28e   : > { %v6075_v48 = vld [vmem:[%s6177_s25 + $0x338] ss:$12 sps:$4 sm:$0xff]  }
 0x290   : > { %4012 = vmatpush1.bf16.msra.mxu1 %v6037_v15 }
 0x291   : > { %4013 = vmatprep.subr.bf16.mxu1 %v6042_v62 }
 0x293   : > { %3951 = vmatmul.mubr.bf16.gmra.mrb[60].mxu1 %v6752_v30  ;;  %4268 = vmatmul.mubr.bf16.gmra.mrb[140].mxu0 %v6752_v30  ;;  %v6049_v30 = vld [vmem:[%s6177_s25 + $0x3d8] ss:$12 sps:$4 sm:$0xff]  }
 0x294   : > { %4014 = vmatpush1.bf16.msra.mxu1 %v6040_v49  ;;  %3960 = vmatprep.mubr.bf16.mxu1 %v6773_v26  ;;  %v6076_v49 = vld [vmem:[%s6177_s25 + $0x410] ss:$12 sps:$4 sm:$0xff]  }
 0x295   : > { %4275 = vmatprep.mubr.bf16.mxu0 %v6773_v26  ;;  %4015 = vmatprep.subr.bf16.mxu1 %v6045_v10  ;;  %v6054_v26 = vld [vmem:[%s6177_s25 + $0x3f4] ss:$12 sps:$4 sm:$0xff]  }
 0x298   : > { %4016 = vmatpush1.bf16.msra.mxu1 %v6043_v41 }
 0x299   : > { %4017 = vmatprep.subr.bf16.mxu1 %v6048_v45 }
 0x29b   : > { %3961 = vmatmul.mubr.bf16.gmra.mrb[64].mxu1 %v6771_v13  ;;  %4276 = vmatmul.mubr.bf16.gmra.mrb[144].mxu0 %v6771_v13  ;;  %v6055_v13 = vld [vmem:[%s6177_s25 + $0x408] ss:$12 sps:$4 sm:$0xff]  }
 0x29c   : > { %4018 = vmatpush1.bf16.msra.mxu1 %v6046_v60  ;;  %3970 = vmatprep.mubr.bf16.mxu1 %v6789_v36 }
 0x29d   : > { %4283 = vmatprep.mubr.bf16.mxu0 %v6789_v36  ;;  %4019 = vmatprep.subr.bf16.mxu1 %v6051_v19  ;;  %v6060_v36 = vld [vmem:[%s6177_s25 + $0x424] ss:$12 sps:$4 sm:$0xff]  }
 0x2a0   : > { %4020 = vmatpush1.bf16.msra.mxu1 %v6049_v30  ;;  %v6077_v30 = vld [vmem:[%s6177_s25 + $0x350] ss:$12 sps:$4 sm:$0xff]  }
 0x2a1   : > { %4021 = vmatprep.subr.bf16.mxu1 %v6054_v26 }
 0x2a3   : > { %3971 = vmatmul.mubr.bf16.gmra.mrb[68].mxu1 %v6787_v56  ;;  %4284 = vmatmul.mubr.bf16.gmra.mrb[148].mxu0 %v6787_v56  ;;  %v6061_v56 = vld [vmem:[%s6177_s25 + $0x438] ss:$12 sps:$4 sm:$0xff]  }
 0x2a4   : > { %4022 = vmatpush1.bf16.msra.mxu1 %v6052_v20  ;;  %3980 = vmatprep.mubr.bf16.mxu1 %v6805_v58 }
 0x2a5   : > { %4291 = vmatprep.mubr.bf16.mxu0 %v6805_v58  ;;  %4023 = vmatprep.subr.bf16.mxu1 %v6057_v40  ;;  %v6887_v58 = vrot.slane %v6662_v24, %v1244_v57  ;;  %v6078_v40 = vld [vmem:[%s6177_s25 + $0x428] ss:$12 sps:$4 sm:$0xff]  }
 0x2a8   : > { %4024 = vmatpush1.bf16.msra.mxu1 %v6055_v13 }
 0x2a9   : > { %4025 = vmatprep.subr.bf16.mxu1 %v6060_v36 }
 0x2ab   : > { %3981 = vmatmul.mubr.bf16.gmra.mrb[72].mxu1 %v6803_v50  ;;  %4292 = vmatmul.mubr.bf16.gmra.mrb[152].mxu0 %v6803_v50 }
 0x2ac   : > { %4026 = vmatpush1.bf16.msra.mxu1 %v6058_v63  ;;  %3990 = vmatprep.mubr.bf16.mxu1 %v6821_v5 }
 0x2ad   : > { %4299 = vmatprep.mubr.bf16.mxu0 %v6821_v5  ;;  %4027 = vmatprep.subr.bf16.mxu1 %v6063_v59 }
 0x2b0   : > { %4028 = vmatpush1.bf16.msra.mxu1 %v6061_v56  ;;  %v2575_v0 = vpop.f32.mrb[64].mxu0 }
 0x2b1   : > { %v5397_v50 = vadd.f32 %v2575_v0, %v6887_v58  ;;  %v2577_v6 = vpop.f32.mrb[65].mxu0  ;;  %4029 = vmatprep.subr.bf16.mxu1 %v6066_v53  ;;  %v6080_v0 = vld [vmem:[%s6177_s25 + $0x440] ss:$12 sps:$4 sm:$0xff]  }
 0x2b2   : > { %v5398_v8 = vadd.f32 %v2577_v6, %v6891_v55  ;;  %v2579_v9 = vpop.f32.mrb[66].mxu0 }
 0x2b3   : > { %v5399_v11 = vadd.f32 %v2579_v9, %v6887_v58  ;;  %v2581_v12 = vpop.f32.mrb[67].mxu0  ;;  %3991 = vmatmul.mubr.bf16.gmra.mrb[76].mxu1 %v6819_v32  ;;  %4300 = vmatmul.mubr.bf16.gmra.mrb[156].mxu0 %v6819_v32  ;;  %v2658_v21 = vmax.f32 %v5397_v50, 0.0  ;;  %v6081_v9 = vld [vmem:[%s6177_s25 + $0x380] ss:$12 sps:$4 sm:$0xff]  }
 0x2b4   : > { %v5400_v24 = vadd.f32 %v2581_v12, %v6891_v55  ;;  %4030 = vmatpush1.bf16.msra.mxu1 %v6064_v18  ;;  %v2659_v25 = vmax.f32 %v5398_v8, 0.0 }
 0x2b5   : > { %v2664_v22 = vmax.f32 %v5399_v11, 0.0  ;;  %4031 = vmatprep.subr.bf16.mxu1 %v6069_v7 }
 0x2b6   : > { %v2665_v1 = vmax.f32 %v5400_v24, 0.0  ;;  %v6082_v24 = vld [vmem:[%s6177_s25 + $0x458] ss:$12 sps:$4 sm:$0xff]  }
 0x2b7   : > { %v6903_v54 = vpack.c.bf16 %v2664_v22, %v2658_v21 }
 0x2b8   : > { %v6905_v27 = vpack.c.bf16 %v2665_v1, %v2659_v25  ;;  %4032 = vmatpush1.bf16.msra.mxu1 %v6067_v16  ;;  %v2585_v28 = vpop.f32.mrb[68].mxu0  ;;  %v6083_v1 = vld [vmem:[%s6177_s25 + $0x398] ss:$12 sps:$4 sm:$0xff]  }
 0x2b9   : > { %v5401_v31 = vadd.f32 %v2585_v28, %v6887_v58  ;;  %v2587_v32 = vpop.f32.mrb[69].mxu0  ;;  %5208 = vmatprep.subr.bf16.mxu1 %v6070_v23 }
 0x2ba   : > { %v5402_v5 = vadd.f32 %v2587_v32, %v6891_v55  ;;  %v2589_v34 = vpop.f32.mrb[70].mxu0  ;;  %4033 = vmatprep.mubr.bf16.mxu1 %v6905_v27 }
 0x2bb   : > { %v5403_v51 = vadd.f32 %v2589_v34, %v6887_v58  ;;  %v2591_v33 = vpop.f32.mrb[71].mxu0  ;;  %4034 = vmatmul.mubr.bf16.vlgmr.msra.gmra.mrb[48].mxu1 %v6903_v54  ;;  %v2670_v39 = vmax.f32 %v5401_v31, 0.0  ;;  %v6084_v31 = vld [vmem:[%s6177_s25 + $0x470] ss:$12 sps:$4 sm:$0xff]  }
 0x2bc   : > { %v5404_v35 = vadd.f32 %v2591_v33, %v6891_v55  ;;  %5209 = vmatpush3.bf16.msra.mxu1 %v6071_v29  ;;  %v2671_v14 = vmax.f32 %v5402_v5, 0.0  ;;  %v6085_v33 = vld [vmem:[%s6177_s25 + $0x3b0] ss:$12 sps:$4 sm:$0xff]  }
 0x2bd   : > { %v2676_v44 = vmax.f32 %v5403_v51, 0.0  ;;  %5210 = vmatprep.subr.bf16.mxu1 %v6072_v61 }
 0x2be   : > { %v2677_v46 = vmax.f32 %v5404_v35, 0.0 }
 0x2bf   : > { %v6917_v38 = vpack.c.bf16 %v2676_v44, %v2670_v39 }
 0x2c0   : > { %v6919_v17 = vpack.c.bf16 %v2677_v46, %v2671_v14  ;;  %v2595_v47 = vpop.f32.mrb[72].mxu0  ;;  %5211 = vmatpush3.bf16.msra.mxu1 %v6073_v37 }
 0x2c1   : > { %v5405_v15 = vadd.f32 %v2595_v47, %v6887_v58  ;;  %v2597_v62 = vpop.f32.mrb[73].mxu0  ;;  %5212 = vmatprep.subr.bf16.mxu1 %v6074_v43 }
 0x2c2   : > { %v5406_v10 = vadd.f32 %v2597_v62, %v6891_v55  ;;  %v2599_v41 = vpop.f32.mrb[74].mxu0  ;;  %4043 = vmatprep.mubr.bf16.mxu1 %v6919_v17 }
 0x2c3   : > { %v5407_v45 = vadd.f32 %v2599_v41, %v6887_v58  ;;  %v2601_v60 = vpop.f32.mrb[75].mxu0  ;;  %4044 = vmatmul.mubr.bf16.gmra.mrb[52].mxu1 %v6917_v38  ;;  %v2682_v26 = vmax.f32 %v5405_v15, 0.0 }
 0x2c4   : > { %v5408_v19 = vadd.f32 %v2601_v60, %v6891_v55  ;;  %5213 = vmatpush3.bf16.msra.mxu1 %v6075_v48  ;;  %v2683_v13 = vmax.f32 %v5406_v10, 0.0 }
 0x2c5   : > { %v2688_v20 = vmax.f32 %v5407_v45, 0.0  ;;  %5214 = vmatprep.subr.bf16.mxu1 %v6076_v49 }
 0x2c6   : > { %v2689_v36 = vmax.f32 %v5408_v19, 0.0 }
 0x2c7   : > { %v6931_v63 = vpack.c.bf16 %v2688_v20, %v2682_v26 }
 0x2c8   : > { %v6933_v59 = vpack.c.bf16 %v2689_v36, %v2683_v13  ;;  %v2605_v57 = vpop.f32.mrb[76].mxu0  ;;  %5215 = vmatpush3.bf16.msra.mxu1 %v6077_v30 }
 0x2c9   : > { %v5409_v56 = vadd.f32 %v2605_v57, %v6887_v58  ;;  %v2607_v53 = vpop.f32.mrb[77].mxu0  ;;  %5216 = vmatprep.subr.bf16.mxu1 %v6078_v40 }
 0x2ca   : > { %v5410_v18 = vadd.f32 %v2607_v53, %v6891_v55  ;;  %v2609_v50 = vpop.f32.mrb[78].mxu0  ;;  %4053 = vmatprep.mubr.bf16.mxu1 %v6933_v59 }
 0x2cb   : > { %v5411_v6 = vadd.f32 %v2609_v50, %v6887_v58  ;;  %v2611_v7 = vpop.f32.mrb[79].mxu0  ;;  %4054 = vmatmul.mubr.bf16.gmra.mrb[56].mxu1 %v6931_v63  ;;  %v2694_v11 = vmax.f32 %v5409_v56, 0.0 }
 0x2cc   : > { %v5412_v8 = vadd.f32 %v2611_v7, %v6891_v55  ;;  %5217 = vmatpush3.bf16.msra.mxu1 %v6079_v52  ;;  %v2695_v16 = vmax.f32 %v5410_v18, 0.0 }
 0x2cd   : > { %v2700_v12 = vmax.f32 %v5411_v6, 0.0  ;;  %5218 = vmatprep.subr.bf16.mxu1 %v6080_v0 }
 0x2ce   : > { %v2701_v21 = vmax.f32 %v5412_v8, 0.0 }
 0x2cf   : > { %v6945_v22 = vpack.c.bf16 %v2700_v12, %v2694_v11 }
 0x2d0   : > { %v6947_v23 = vpack.c.bf16 %v2701_v21, %v2695_v16  ;;  %v2615_v25 = vpop.f32.mrb[80].mxu0  ;;  %5219 = vmatpush3.bf16.msra.mxu1 %v6081_v9 }
 0x2d1   : > { %v5413_v28 = vadd.f32 %v2615_v25, %v6887_v58  ;;  %v2617_v29 = vpop.f32.mrb[81].mxu0  ;;  %5220 = vmatprep.subr.bf16.mxu1 %v6082_v24 }
 0x2d2   : > { %v5414_v32 = vadd.f32 %v2617_v29, %v6891_v55  ;;  %v2619_v61 = vpop.f32.mrb[82].mxu0  ;;  %4063 = vmatprep.mubr.bf16.mxu1 %v6947_v23 }
 0x2d3   : > { %v5415_v5 = vadd.f32 %v2619_v61, %v6887_v58  ;;  %v2621_v34 = vpop.f32.mrb[83].mxu0  ;;  %4064 = vmatmul.mubr.bf16.gmra.mrb[60].mxu1 %v6945_v22  ;;  %v2706_v35 = vmax.f32 %v5413_v28, 0.0 }
 0x2d4   : > { %v5416_v51 = vadd.f32 %v2621_v34, %v6891_v55  ;;  %5221 = vmatpush3.bf16.msra.mxu1 %v6083_v1  ;;  %v2707_v39 = vmax.f32 %v5414_v32, 0.0 }
 0x2d5   : > { %v2712_v37 = vmax.f32 %v5415_v5, 0.0  ;;  %5222 = vmatprep.subr.bf16.mxu1 %v6084_v31 }
 0x2d6   : > { %v2713_v44 = vmax.f32 %v5416_v51, 0.0 }
 0x2d7   : > { %v6958_v43 = vpack.c.bf16 %v2712_v37, %v2706_v35 }
 0x2d8   : > { %v6960_v14 = vpack.c.bf16 %v2713_v44, %v2707_v39  ;;  %v2625_v46 = vpop.f32.mrb[84].mxu0  ;;  %5223 = vmatpush3.bf16.msra.mxu1 %v6085_v33 }
 0x2d9   : > { %v5417_v47 = vadd.f32 %v2625_v46, %v6887_v58  ;;  %v2627_v48 = vpop.f32.mrb[85].mxu0 }
 0x2da   : > { %v5418_v15 = vadd.f32 %v2627_v48, %v6891_v55  ;;  %v2629_v62 = vpop.f32.mrb[86].mxu0  ;;  %4073 = vmatprep.mubr.bf16.mxu1 %v6960_v14 }
 0x2db   : > { %v5419_v49 = vadd.f32 %v2629_v62, %v6887_v58  ;;  %v2631_v10 = vpop.f32.mrb[87].mxu0  ;;  %4074 = vmatmul.mubr.bf16.gmra.mrb[64].mxu1 %v6958_v43  ;;  %v2718_v45 = vmax.f32 %v5417_v47, 0.0 }
 0x2dc   : > { %v5420_v41 = vadd.f32 %v2631_v10, %v6891_v55  ;;  %v2719_v19 = vmax.f32 %v5418_v15, 0.0 }
 0x2dd   : > { %v2724_v60 = vmax.f32 %v5419_v49, 0.0 }
 0x2de   : > { %v2725_v30 = vmax.f32 %v5420_v41, 0.0 }
 0x2df   : > { %v6968_v26 = vpack.c.bf16 %v2724_v60, %v2718_v45 }
 0x2e0   : > { %v2785_v20 = vpack.c.bf16 %v2725_v30, %v2719_v19  ;;  %v2635_v40 = vpop.f32.mrb[88].mxu0 }
 0x2e1   : > { %v5421_v13 = vadd.f32 %v2635_v40, %v6887_v58  ;;  %v2637_v36 = vpop.f32.mrb[89].mxu0 }
 0x2e2   : > { %v5422_v57 = vadd.f32 %v2637_v36, %v6891_v55  ;;  %v2639_v52 = vpop.f32.mrb[90].mxu0  ;;  %4083 = vmatprep.mubr.bf16.mxu1 %v2785_v20 }
 0x2e3   : > { %v5423_v56 = vadd.f32 %v2639_v52, %v6887_v58  ;;  %v2641_v53 = vpop.f32.mrb[91].mxu0  ;;  %4084 = vmatmul.mubr.bf16.gmra.mrb[68].mxu1 %v6968_v26  ;;  %v2730_v18 = vmax.f32 %v5421_v13, 0.0 }
 0x2e4   : > { %v5424_v0 = vadd.f32 %v2641_v53, %v6891_v55  ;;  %v2731_v6 = vmax.f32 %v5422_v57, 0.0 }
 0x2e5   : > { %v2736_v50 = vmax.f32 %v5423_v56, 0.0 }
 0x2e6   : > { %v2737_v7 = vmax.f32 %v5424_v0, 0.0 }
 0x2e7   : > { %v2790_v8 = vpack.c.bf16 %v2736_v50, %v2730_v18 }
 0x2e8   : > { %v2791_v9 = vpack.c.bf16 %v2737_v7, %v2731_v6  ;;  %v2645_v11 = vpop.f32.mrb[92].mxu0 }
 0x2e9   : > { %v5425_v12 = vadd.f32 %v2645_v11, %v6887_v58  ;;  %v2647_v24 = vpop.f32.mrb[93].mxu0  ;;  %v7013_v11 = vld [vmem:[%s6187_s14] sm:$0x7] }
 0x2ea   : > { %v5426_v16 = vadd.f32 %v2647_v24, %v6891_v55  ;;  %v2649_v21 = vpop.f32.mrb[94].mxu0  ;;  %4093 = vmatprep.mubr.bf16.mxu1 %v2791_v9 }
 0x2eb   : > { %v5427_v25 = vadd.f32 %v2649_v21, %v6887_v58  ;;  %v2651_v1 = vpop.f32.mrb[95].mxu0  ;;  %4094 = vmatmul.mubr.bf16.gmra.mrb[72].mxu1 %v2790_v8  ;;  %v2742_v29 = vmax.f32 %v5425_v12, 0.0 }
 0x2ec   : > { %v5428_v28 = vadd.f32 %v2651_v1, %v6891_v55  ;;  %v2743_v32 = vmax.f32 %v5426_v16, 0.0  ;;  %v7020_v16 = vrot.slane %v7013_v11, %v1236_v3 }
 0x2ed   : > { %v2748_v31 = vmax.f32 %v5427_v25, 0.0 }
 0x2ee   : > { %v2749_v61 = vmax.f32 %v5428_v28, 0.0 }
 0x2ef   : > { %v2796_v5 = vpack.c.bf16 %v2748_v31, %v2742_v29 }
 0x2f0   : > { %v2797_v34 = vpack.c.bf16 %v2749_v61, %v2743_v32 }
 0x2f2   : > { %4103 = vmatprep.mubr.bf16.mxu1 %v2797_v34 }
 0x2f3   : > { %4104 = vmatmul.mubr.bf16.gmra.mrb[76].mxu1 %v2796_v5 }
 0x2f4   : > { %4340 = vmatprep.mubr.bf16.mxu1 %v6905_v27 }
 0x2fb   : > { %4341 = vmatmul.mubr.bf16.vlgmr.msra.gmra.mrb[80].mxu1 %v6903_v54 }
 0x2fc   : > { %4348 = vmatprep.mubr.bf16.mxu1 %v6919_v17 }
 0x303   : > { %4349 = vmatmul.mubr.bf16.gmra.mrb[84].mxu1 %v6917_v38 }
 0x304   : > { %4356 = vmatprep.mubr.bf16.mxu1 %v6933_v59 }
 0x30b   : > { %4357 = vmatmul.mubr.bf16.gmra.mrb[88].mxu1 %v6931_v63 }
 0x30c   : > { %4364 = vmatprep.mubr.bf16.mxu1 %v6947_v23 }
 0x30e   : > { %v5096_v58 = vpop.f32.mrb[96].mxu0 }
 0x30f   : > { %v5097_v55 = vpop.f32.mrb[97].mxu0 }
 0x310   : > { %v5098_v51 = vadd.f32 %v5097_v55, %v5096_v58  ;;  %v5099_v33 = vpop.f32.mrb[98].mxu0 }
 0x311   : > { %v5100_v35 = vpop.f32.mrb[99].mxu0 }
 0x312   : > { %v5101_v37 = vadd.f32 %v5100_v35, %v5099_v33  ;;  %v4149_v1 = vadd.f32 %v5098_v51, %v7020_v16 }
 0x313   : > { %4365 = vmatmul.mubr.bf16.gmra.mrb[92].mxu1 %v6945_v22 }
 0x314   : > { %4372 = vmatprep.mubr.bf16.mxu1 %v6960_v14  ;;  %v4152_v32 = vadd.f32 %v5101_v37, %v7020_v16 }
 0x316   : > { %v5102_v54 = vpop.f32.mrb[100].mxu0 }
 0x317   : > { %v5103_v27 = vpop.f32.mrb[101].mxu0 }
 0x318   : > { %v5104_v17 = vadd.f32 %v5103_v27, %v5102_v54  ;;  %v5105_v38 = vpop.f32.mrb[102].mxu0 }
 0x319   : > { %v5106_v39 = vpop.f32.mrb[103].mxu0 }
 0x31a   : > { %v5107_v59 = vadd.f32 %v5106_v39, %v5105_v38  ;;  %v4157_v33 = vadd.f32 %v5104_v17, %v7020_v16 }
 0x31b   : > { %4373 = vmatmul.mubr.bf16.gmra.mrb[96].mxu1 %v6958_v43 }
 0x31c   : > { %4380 = vmatprep.mubr.bf16.mxu1 %v2785_v20  ;;  %v4160_v27 = vadd.f32 %v5107_v59, %v7020_v16 }
 0x31e   : > { %v5108_v63 = vpop.f32.mrb[104].mxu0 }
 0x31f   : > { %v5109_v23 = vpop.f32.mrb[105].mxu0 }
 0x320   : > { %v6989_v44 = vadd.f32 %v5109_v23, %v5108_v63  ;;  %v5111_v46 = vpop.f32.mrb[106].mxu0 }
 0x321   : > { %v5112_v47 = vpop.f32.mrb[107].mxu0 }
 0x322   : > { %v6991_v48 = vadd.f32 %v5112_v47, %v5111_v46  ;;  %v4165_v23 = vadd.f32 %v6989_v44, %v7020_v16 }
 0x323   : > { %4381 = vmatmul.mubr.bf16.gmra.mrb[100].mxu1 %v6968_v26 }
 0x324   : > { %4388 = vmatprep.mubr.bf16.mxu1 %v2791_v9  ;;  %v4168_v17 = vadd.f32 %v6991_v48, %v7020_v16 }
 0x326   : > { %v5114_v22 = vpop.f32.mrb[108].mxu0 }
 0x327   : > { %v5115_v14 = vpop.f32.mrb[109].mxu0 }
 0x328   : > { %v6994_v15 = vadd.f32 %v5115_v14, %v5114_v22  ;;  %v5117_v62 = vpop.f32.mrb[110].mxu0 }
 0x329   : > { %v5118_v49 = vpop.f32.mrb[111].mxu0 }
 0x32a   : > { %v6996_v10 = vadd.f32 %v5118_v49, %v5117_v62 }
 0x32b   : > { %4389 = vmatmul.mubr.bf16.gmra.mrb[104].mxu1 %v2790_v8 }
 0x32c   : > { %4396 = vmatprep.mubr.bf16.mxu1 %v2797_v34  ;;  %v4176_v44 = vadd.f32 %v6996_v10, %v7020_v16 }
 0x32e   : > { %v5120_v43 = vpop.f32.mrb[112].mxu0 }
 0x32f   : > { %v5121_v41 = vpop.f32.mrb[113].mxu0 }
 0x330   : > { %v6998_v45 = vadd.f32 %v5121_v41, %v5120_v43  ;;  %v5123_v60 = vpop.f32.mrb[114].mxu0  ;;  %v4173_v41 = vadd.f32 %v6994_v15, %v7020_v16 }
 0x331   : > { %v5124_v19 = vpop.f32.mrb[115].mxu0 }
 0x332   : > { %v7000_v30 = vadd.f32 %v5124_v19, %v5123_v60 }
 0x333   : > { %4397 = vmatmul.mubr.bf16.gmra.mrb[108].mxu1 %v2796_v5 }
 0x334   : > { %v4184_v15 = vadd.f32 %v7000_v30, %v7020_v16 }
 0x336   : > { %v5126_v26 = vpop.f32.mrb[116].mxu0 }
 0x337   : > { %v5127_v20 = vpop.f32.mrb[117].mxu0 }
 0x338   : > { %v7002_v40 = vadd.f32 %v5127_v20, %v5126_v26  ;;  %v5129_v13 = vpop.f32.mrb[118].mxu0 }
 0x339   : > { %v5130_v36 = vpop.f32.mrb[119].mxu0 }
 0x33a   : > { %v7004_v57 = vadd.f32 %v5130_v36, %v5129_v13 }
 0x33e   : > { %v5132_v52 = vpop.f32.mrb[120].mxu0 }
 0x33f   : > { %v5133_v56 = vpop.f32.mrb[121].mxu0 }
 0x340   : > { %v7006_v53 = vadd.f32 %v5133_v56, %v5132_v52  ;;  %v5135_v0 = vpop.f32.mrb[122].mxu0  ;;  %v4181_v56 = vadd.f32 %v6998_v45, %v7020_v16  ;;  %v4192_v45 = vadd.f32 %v7004_v57, %v7020_v16 }
 0x341   : > { %v5136_v18 = vpop.f32.mrb[123].mxu0 }
 0x342   : > { %v7008_v50 = vadd.f32 %v5136_v18, %v5135_v0 }
 0x346   : > { %v5138_v6 = vpop.f32.mrb[124].mxu0 }
 0x347   : > { %v5139_v7 = vpop.f32.mrb[125].mxu0 }
 0x348   : > { %v7010_v8 = vadd.f32 %v5139_v7, %v5138_v6  ;;  %v5141_v9 = vpop.f32.mrb[126].mxu0 }
 0x349   : > { %v5142_v12 = vpop.f32.mrb[127].mxu0 }
 0x34a   : > { %v7015_v24 = vadd.f32 %v5142_v12, %v5141_v9 }
 0x34e   : > { %v5160_v21 = vpop.f32.mrb[128].mxu0 }
 0x34f   : > { %v5161_v25 = vpop.f32.mrb[129].mxu0 }
 0x350   : > { %v5162_v28 = vadd.f32 %v5161_v25, %v5160_v21  ;;  %v5163_v29 = vpop.f32.mrb[130].mxu0  ;;  %v4189_v25 = vadd.f32 %v7002_v40, %v7020_v16  ;;  %v4200_v40 = vadd.f32 %v7008_v50, %v7020_v16  ;;  %v7083_v50 = vrot.slane %v7013_v11, %v1228_v2 }
 0x351   : > { %v5164_v31 = vpop.f32.mrb[131].mxu0 }
 0x352   : > { %v7024_v61 = vadd.f32 %v5162_v28, %v4149_v1  ;;  %v5165_v5 = vadd.f32 %v5164_v31, %v5163_v29 }
 0x354   : > { %v7026_v34 = vadd.f32 %v5165_v5, %v4152_v32 }
 0x356   : > { %v5166_v58 = vpop.f32.mrb[132].mxu0 }
 0x357   : > { %v5167_v55 = vpop.f32.mrb[133].mxu0 }
 0x358   : > { %v5168_v3 = vadd.f32 %v5167_v55, %v5166_v58  ;;  %v5169_v35 = vpop.f32.mrb[134].mxu0  ;;  %v4197_v55 = vadd.f32 %v7006_v53, %v7020_v16 }
 0x359   : > { %v5170_v54 = vpop.f32.mrb[135].mxu0 }
 0x35a   : > { %v7030_v51 = vadd.f32 %v5168_v3, %v4157_v33  ;;  %v5171_v38 = vadd.f32 %v5170_v54, %v5169_v35 }
 0x35c   : > { %v7032_v39 = vadd.f32 %v5171_v38, %v4160_v27 }
 0x35e   : > { %v5172_v37 = vpop.f32.mrb[136].mxu0 }
 0x35f   : > { %v5173_v63 = vpop.f32.mrb[137].mxu0 }
 0x360   : > { %v5174_v46 = vadd.f32 %v5173_v63, %v5172_v37  ;;  %v5175_v47 = vpop.f32.mrb[138].mxu0  ;;  %v4205_v63 = vadd.f32 %v7010_v8, %v7020_v16  ;;  %v7092_v8 = vrot.slane %v7013_v11, %v1232_v4 }
 0x361   : > { %v5176_v22 = vpop.f32.mrb[139].mxu0 }
 0x362   : > { %v7038_v14 = vadd.f32 %v5174_v46, %v4165_v23  ;;  %v5177_v62 = vadd.f32 %v5176_v22, %v5175_v47  ;;  %v4208_v47 = vadd.f32 %v7015_v24, %v7020_v16 }
 0x364   : > { %v7040_v59 = vadd.f32 %v5177_v62, %v4168_v17 }
 0x366   : > { %v5178_v49 = vpop.f32.mrb[140].mxu0 }
 0x367   : > { %v5179_v43 = vpop.f32.mrb[141].mxu0 }
 0x368   : > { %v5180_v60 = vadd.f32 %v5179_v43, %v5178_v49  ;;  %v5181_v19 = vpop.f32.mrb[142].mxu0  ;;  %v7095_v43 = vstv %s4406_s18 }
 0x369   : > { %v5182_v26 = vpop.f32.mrb[143].mxu0 }
 0x36a   : > { %v7046_v20 = vadd.f32 %v5180_v60, %v4173_v41  ;;  %v5183_v13 = vadd.f32 %v5182_v26, %v5181_v19 }
 0x36c   : > { %v7048_v48 = vadd.f32 %v5183_v13, %v4176_v44 }
 0x36e   : > { %v5184_v36 = vpop.f32.mrb[144].mxu0 }
 0x36f   : > { %v5185_v52 = vpop.f32.mrb[145].mxu0 }
 0x370   : > { %v5186_v0 = vadd.f32 %v5185_v52, %v5184_v36  ;;  %v5187_v18 = vpop.f32.mrb[146].mxu0 }
 0x371   : > { %v5188_v6 = vpop.f32.mrb[147].mxu0 }
 0x372   : > { %v7054_v7 = vadd.f32 %v5186_v0, %v4181_v56  ;;  %v5189_v9 = vadd.f32 %v5188_v6, %v5187_v18 }
 0x374   : > { %v7056_v10 = vadd.f32 %v5189_v9, %v4184_v15 }
 0x376   : > { %v5190_v12 = vpop.f32.mrb[148].mxu0 }
 0x377   : > { %v5191_v21 = vpop.f32.mrb[149].mxu0 }
 0x378   : > { %v5192_v1 = vadd.f32 %v5191_v21, %v5190_v12  ;;  %v5193_v28 = vpop.f32.mrb[150].mxu0 }
 0x379   : > { %v5194_v29 = vpop.f32.mrb[151].mxu0 }
 0x37a   : > { %v7062_v31 = vadd.f32 %v5192_v1, %v4189_v25  ;;  %v5195_v32 = vadd.f32 %v5194_v29, %v5193_v28 }
 0x37c   : > { %v7064_v30 = vadd.f32 %v5195_v32, %v4192_v45 }
 0x37e   : > { %v5196_v5 = vpop.f32.mrb[152].mxu0 }
 0x37f   : > { %v5197_v58 = vpop.f32.mrb[153].mxu0 }
 0x380   : > { %v5198_v33 = vadd.f32 %v5197_v58, %v5196_v5  ;;  %v5199_v3 = vpop.f32.mrb[154].mxu0 }
 0x381   : > { %v5200_v35 = vpop.f32.mrb[155].mxu0 }
 0x382   : > { %v7070_v54 = vadd.f32 %v5198_v33, %v4197_v55  ;;  %v5201_v57 = vadd.f32 %v5200_v35, %v5199_v3 }
 0x384   : > { %v7072_v27 = vadd.f32 %v5201_v57, %v4200_v40 }
 0x386   : > { %v5202_v38 = vpop.f32.mrb[156].mxu0 }
 0x387   : > { %v5203_v37 = vpop.f32.mrb[157].mxu0 }
 0x388   : > { %v5204_v23 = vadd.f32 %v5203_v37, %v5202_v38  ;;  %v5205_v46 = vpop.f32.mrb[158].mxu0 }
 0x389   : > { %v5206_v53 = vpop.f32.mrb[159].mxu0 }
 0x38a   : > { %v7078_v22 = vadd.f32 %v5204_v23, %v4205_v63  ;;  %v5207_v17 = vadd.f32 %v5206_v53, %v5205_v46 }
 0x38c   : > { %v7085_v62 = vadd.f32 %v5207_v17, %v4208_v47 }
 0x38e   : > { %v4035_v49 = vpop.f32.mrb[48].mxu1 }
 0x38f   : > { %v5429_v24 = vadd.f32 %v4035_v49, %v7083_v50  ;;  %v4037_v16 = vpop.f32.mrb[49].mxu1 }
 0x390   : > { %v5430_v41 = vadd.f32 %v4037_v16, %v7092_v8  ;;  %v4039_v60 = vpop.f32.mrb[50].mxu1 }
 0x391   : > { %v5431_v2 = vadd.f32 %v4039_v60, %v7083_v50  ;;  %v4041_v19 = vpop.f32.mrb[51].mxu1  ;;  %v4408_v44 = vmax.f32 %v5429_v24, %v7095_v43 }
 0x392   : > { %v5432_v26 = vadd.f32 %v4041_v19, %v7092_v8  ;;  %v4409_v4 = vmax.f32 %v5430_v41, %v7095_v43 }
 0x393   : > { %v4411_v42 = vmax.f32 %v5431_v2, %v7095_v43 }
 0x394   : > { %v4412_v11 = vmax.f32 %v5432_v26, %v7095_v43 }
 0x395   : > { %v4456_v13 = vpack.c.bf16 %v4411_v42, %v4408_v44 }
 0x396   : > { %v4457_v36 = vpack.c.bf16 %v4412_v11, %v4409_v4  ;;  %v4045_v52 = vpop.f32.mrb[52].mxu1 }
 0x397   : > { %4480 = vst [vmem:[#allocation2] sm:$0xff] %v4456_v13  ;;  %v5433_v56 = vadd.f32 %v4045_v52, %v7083_v50  ;;  %v4047_v0 = vpop.f32.mrb[53].mxu1 }
 0x398   : > { %4481 = vst [vmem:[#allocation2 + $0x8] sm:$0xff] %v4457_v36  ;;  %v5434_v18 = vadd.f32 %v4047_v0, %v7092_v8  ;;  %v4049_v6 = vpop.f32.mrb[54].mxu1 }
 0x399   : > { %v5435_v15 = vadd.f32 %v4049_v6, %v7083_v50  ;;  %v4051_v9 = vpop.f32.mrb[55].mxu1  ;;  %v4414_v21 = vmax.f32 %v5433_v56, %v7095_v43 }
 0x39a   : > { %v5436_v12 = vadd.f32 %v4051_v9, %v7092_v8  ;;  %v4415_v1 = vmax.f32 %v5434_v18, %v7095_v43 }
 0x39b   : > { %v4417_v25 = vmax.f32 %v5435_v15, %v7095_v43 }
 0x39c   : > { %v4418_v28 = vmax.f32 %v5436_v12, %v7095_v43 }
 0x39d   : > { %v4459_v29 = vpack.c.bf16 %v4417_v25, %v4414_v21 }
 0x39e   : > { %v4460_v45 = vpack.c.bf16 %v4418_v28, %v4415_v1  ;;  %v4055_v32 = vpop.f32.mrb[56].mxu1 }
 0x39f   : > { %4483 = vst [vmem:[#allocation2 + $0x18] sm:$0xff] %v4459_v29  ;;  %v5437_v5 = vadd.f32 %v4055_v32, %v7083_v50  ;;  %v4057_v58 = vpop.f32.mrb[57].mxu1 }
 0x3a0   : > { %4484 = vst [vmem:[#allocation2 + $0x20] sm:$0xff] %v4460_v45  ;;  %v5438_v55 = vadd.f32 %v4057_v58, %v7092_v8  ;;  %v4059_v33 = vpop.f32.mrb[58].mxu1 }
 0x3a1   : > { %v5439_v3 = vadd.f32 %v4059_v33, %v7083_v50  ;;  %v4061_v35 = vpop.f32.mrb[59].mxu1  ;;  %v4420_v57 = vmax.f32 %v5437_v5, %v7095_v43 }
 0x3a2   : > { %v5440_v40 = vadd.f32 %v4061_v35, %v7092_v8  ;;  %v4421_v37 = vmax.f32 %v5438_v55, %v7095_v43 }
 0x3a3   : > { %v4423_v38 = vmax.f32 %v5439_v3, %v7095_v43 }
 0x3a4   : > { %v4424_v63 = vmax.f32 %v5440_v40, %v7095_v43 }
 0x3a5   : > { %v4462_v23 = vpack.c.bf16 %v4423_v38, %v4420_v57 }
 0x3a6   : > { %v4463_v46 = vpack.c.bf16 %v4424_v63, %v4421_v37  ;;  %v4065_v53 = vpop.f32.mrb[60].mxu1 }
 0x3a7   : > { %4486 = vst [vmem:[#allocation2 + $0x30] sm:$0xff] %v4462_v23  ;;  %v5441_v47 = vadd.f32 %v4065_v53, %v7083_v50  ;;  %v4067_v17 = vpop.f32.mrb[61].mxu1 }
 0x3a8   : > { %4487 = vst [vmem:[#allocation2 + $0x38] sm:$0xff] %v4463_v46  ;;  %v5442_v49 = vadd.f32 %v4067_v17, %v7092_v8  ;;  %v4069_v24 = vpop.f32.mrb[62].mxu1 }
 0x3a9   : > { %v5443_v16 = vadd.f32 %v4069_v24, %v7083_v50  ;;  %v4071_v41 = vpop.f32.mrb[63].mxu1  ;;  %v4426_v2 = vmax.f32 %v5441_v47, %v7095_v43 }
 0x3aa   : > { %v5444_v60 = vadd.f32 %v4071_v41, %v7092_v8  ;;  %v4427_v26 = vmax.f32 %v5442_v49, %v7095_v43 }
 0x3ab   : > { %v4429_v19 = vmax.f32 %v5443_v16, %v7095_v43 }
 0x3ac   : > { %v4430_v44 = vmax.f32 %v5444_v60, %v7095_v43 }
 0x3ad   : > { %v4465_v42 = vpack.c.bf16 %v4429_v19, %v4426_v2 }
 0x3ae   : > { %v4466_v4 = vpack.c.bf16 %v4430_v44, %v4427_v26  ;;  %v4075_v11 = vpop.f32.mrb[64].mxu1 }
 0x3af   : > { %4489 = vst [vmem:[#allocation2 + $0x48] sm:$0xff] %v4465_v42  ;;  %v5445_v13 = vadd.f32 %v4075_v11, %v7083_v50  ;;  %v4077_v36 = vpop.f32.mrb[65].mxu1 }
 0x3b0   : > { %4490 = vst [vmem:[#allocation2 + $0x50] sm:$0xff] %v4466_v4  ;;  %v5446_v52 = vadd.f32 %v4077_v36, %v7092_v8  ;;  %v4079_v56 = vpop.f32.mrb[66].mxu1 }
 0x3b1   : > { %v5447_v0 = vadd.f32 %v4079_v56, %v7083_v50  ;;  %v4081_v18 = vpop.f32.mrb[67].mxu1  ;;  %v4432_v15 = vmax.f32 %v5445_v13, %v7095_v43 }
 0x3b2   : > { %v5448_v6 = vadd.f32 %v4081_v18, %v7092_v8  ;;  %v4433_v12 = vmax.f32 %v5446_v52, %v7095_v43 }
 0x3b3   : > { %v4435_v9 = vmax.f32 %v5447_v0, %v7095_v43 }
 0x3b4   : > { %v4436_v21 = vmax.f32 %v5448_v6, %v7095_v43 }
 0x3b5   : > { %v4468_v25 = vpack.c.bf16 %v4435_v9, %v4432_v15 }
 0x3b6   : > { %v4469_v1 = vpack.c.bf16 %v4436_v21, %v4433_v12  ;;  %v4085_v28 = vpop.f32.mrb[68].mxu1 }
 0x3b7   : > { %4492 = vst [vmem:[#allocation2 + $0x60] sm:$0xff] %v4468_v25  ;;  %v5449_v29 = vadd.f32 %v4085_v28, %v7083_v50  ;;  %v4087_v45 = vpop.f32.mrb[69].mxu1 }
 0x3b8   : > { %4493 = vst [vmem:[#allocation2 + $0x68] sm:$0xff] %v4469_v1  ;;  %v5450_v32 = vadd.f32 %v4087_v45, %v7092_v8  ;;  %v4089_v5 = vpop.f32.mrb[70].mxu1 }
 0x3b9   : > { %v5451_v58 = vadd.f32 %v4089_v5, %v7083_v50  ;;  %v4091_v55 = vpop.f32.mrb[71].mxu1  ;;  %v4438_v3 = vmax.f32 %v5449_v29, %v7095_v43 }
 0x3ba   : > { %v5452_v33 = vadd.f32 %v4091_v55, %v7092_v8  ;;  %v4439_v40 = vmax.f32 %v5450_v32, %v7095_v43 }
 0x3bb   : > { %v4441_v35 = vmax.f32 %v5451_v58, %v7095_v43 }
 0x3bc   : > { %v4442_v57 = vmax.f32 %v5452_v33, %v7095_v43 }
 0x3bd   : > { %v4471_v38 = vpack.c.bf16 %v4441_v35, %v4438_v3 }
 0x3be   : > { %v4472_v37 = vpack.c.bf16 %v4442_v57, %v4439_v40  ;;  %v4095_v63 = vpop.f32.mrb[72].mxu1 }
 0x3bf   : > { %4495 = vst [vmem:[#allocation2 + $0x78] sm:$0xff] %v4471_v38  ;;  %v5453_v23 = vadd.f32 %v4095_v63, %v7083_v50  ;;  %v4097_v46 = vpop.f32.mrb[73].mxu1 }
 0x3c0   : > { %4496 = vst [vmem:[#allocation2 + $0x80] sm:$0xff] %v4472_v37  ;;  %v5454_v53 = vadd.f32 %v4097_v46, %v7092_v8  ;;  %v4099_v47 = vpop.f32.mrb[74].mxu1 }
 0x3c1   : > { %v5455_v17 = vadd.f32 %v4099_v47, %v7083_v50  ;;  %v4101_v49 = vpop.f32.mrb[75].mxu1  ;;  %v4444_v16 = vmax.f32 %v5453_v23, %v7095_v43 }
 0x3c2   : > { %v5456_v24 = vadd.f32 %v4101_v49, %v7092_v8  ;;  %v4445_v60 = vmax.f32 %v5454_v53, %v7095_v43 }
 0x3c3   : > { %v4447_v41 = vmax.f32 %v5455_v17, %v7095_v43 }
 0x3c4   : > { %v4448_v2 = vmax.f32 %v5456_v24, %v7095_v43 }
 0x3c5   : > { %v4474_v19 = vpack.c.bf16 %v4447_v41, %v4444_v16 }
 0x3c6   : > { %v4475_v26 = vpack.c.bf16 %v4448_v2, %v4445_v60  ;;  %v4105_v44 = vpop.f32.mrb[76].mxu1 }
 0x3c7   : > { %4498 = vst [vmem:[#allocation2 + $0x90] sm:$0xff] %v4474_v19  ;;  %v5457_v42 = vadd.f32 %v4105_v44, %v7083_v50  ;;  %v4107_v4 = vpop.f32.mrb[77].mxu1 }
 0x3c8   : > { %4499 = vst [vmem:[#allocation2 + $0x98] sm:$0xff] %v4475_v26  ;;  %v5458_v11 = vadd.f32 %v4107_v4, %v7092_v8  ;;  %v4109_v13 = vpop.f32.mrb[78].mxu1 }
 0x3c9   : > { %v5459_v36 = vadd.f32 %v4109_v13, %v7083_v50  ;;  %v4111_v52 = vpop.f32.mrb[79].mxu1  ;;  %v4450_v0 = vmax.f32 %v5457_v42, %v7095_v43 }
 0x3ca   : > { %v5460_v56 = vadd.f32 %v4111_v52, %v7092_v8  ;;  %v4451_v6 = vmax.f32 %v5458_v11, %v7095_v43 }
 0x3cb   : > { %v4453_v18 = vmax.f32 %v5459_v36, %v7095_v43 }
 0x3cc   : > { %v4454_v15 = vmax.f32 %v5460_v56, %v7095_v43 }
 0x3cd   : > { %v4477_v9 = vpack.c.bf16 %v4453_v18, %v4450_v0 }
 0x3ce   : > { %v4478_v12 = vpack.c.bf16 %v4454_v15, %v4451_v6  ;;  %v5224_v21 = vpop.f32.mrb[80].mxu1 }
 0x3cf   : > { %4501 = vst [vmem:[#allocation2 + $0xa8] sm:$0xff] %v4477_v9  ;;  %v5225_v25 = vpop.f32.mrb[81].mxu1 }
 0x3d0   : > { %4502 = vst [vmem:[#allocation2 + $0xb0] sm:$0xff] %v4478_v12  ;;  %v5226_v1 = vadd.f32 %v5225_v25, %v5224_v21  ;;  %v5227_v28 = vpop.f32.mrb[82].mxu1 }
 0x3d1   : > { %v5228_v50 = vpop.f32.mrb[83].mxu1 }
 0x3d2   : > { %v4343_v29 = vadd.f32 %v5226_v1, %v7024_v61  ;;  %v5229_v8 = vadd.f32 %v5228_v50, %v5227_v28 }
 0x3d4   : > { %v4346_v45 = vadd.f32 %v5229_v8, %v7026_v34  ;;  %v4410_v32 = vmax.f32 %v4343_v29, %v7095_v43 }
 0x3d6   : > { %v4413_v5 = vmax.f32 %v4346_v45, %v7095_v43  ;;  %v5230_v58 = vpop.f32.mrb[84].mxu1 }
 0x3d7   : > { %v5231_v55 = vpop.f32.mrb[85].mxu1 }
 0x3d8   : > { %v4458_v33 = vpack.c.bf16 %v4413_v5, %v4410_v32  ;;  %v5232_v3 = vadd.f32 %v5231_v55, %v5230_v58  ;;  %v5233_v35 = vpop.f32.mrb[86].mxu1 }
 0x3d9   : > { %v5234_v40 = vpop.f32.mrb[87].mxu1 }
 0x3da   : > { %4482 = vst [vmem:[#allocation2 + $0x10] sm:$0xff] %v4458_v33  ;;  %v4351_v57 = vadd.f32 %v5232_v3, %v7030_v51  ;;  %v5235_v38 = vadd.f32 %v5234_v40, %v5233_v35 }
 0x3dc   : > { %v4354_v37 = vadd.f32 %v5235_v38, %v7032_v39  ;;  %v4416_v61 = vmax.f32 %v4351_v57, %v7095_v43 }
 0x3de   : > { %v4419_v34 = vmax.f32 %v4354_v37, %v7095_v43  ;;  %v5236_v63 = vpop.f32.mrb[88].mxu1 }
 0x3df   : > { %v5237_v23 = vpop.f32.mrb[89].mxu1 }
 0x3e0   : > { %v4461_v46 = vpack.c.bf16 %v4419_v34, %v4416_v61  ;;  %v5238_v53 = vadd.f32 %v5237_v23, %v5236_v63  ;;  %v5239_v47 = vpop.f32.mrb[90].mxu1 }
 0x3e1   : > { %v5240_v17 = vpop.f32.mrb[91].mxu1 }
 0x3e2   : > { %4485 = vst [vmem:[#allocation2 + $0x28] sm:$0xff] %v4461_v46  ;;  %v4359_v49 = vadd.f32 %v5238_v53, %v7038_v14  ;;  %v5241_v24 = vadd.f32 %v5240_v17, %v5239_v47 }
 0x3e4   : > { %v4362_v16 = vadd.f32 %v5241_v24, %v7040_v59  ;;  %v4422_v51 = vmax.f32 %v4359_v49, %v7095_v43 }
 0x3e6   : > { %v4425_v39 = vmax.f32 %v4362_v16, %v7095_v43  ;;  %v5242_v41 = vpop.f32.mrb[92].mxu1 }
 0x3e7   : > { %v5243_v60 = vpop.f32.mrb[93].mxu1 }
 0x3e8   : > { %v4464_v2 = vpack.c.bf16 %v4425_v39, %v4422_v51  ;;  %v5244_v19 = vadd.f32 %v5243_v60, %v5242_v41  ;;  %v5245_v26 = vpop.f32.mrb[94].mxu1 }
 0x3e9   : > { %v5246_v44 = vpop.f32.mrb[95].mxu1 }
 0x3ea   : > { %4488 = vst [vmem:[#allocation2 + $0x40] sm:$0xff] %v4464_v2  ;;  %v4367_v42 = vadd.f32 %v5244_v19, %v7046_v20  ;;  %v5247_v4 = vadd.f32 %v5246_v44, %v5245_v26 }
 0x3ec   : > { %v4370_v11 = vadd.f32 %v5247_v4, %v7048_v48  ;;  %v4428_v14 = vmax.f32 %v4367_v42, %v7095_v43 }
 0x3ee   : > { %v4431_v59 = vmax.f32 %v4370_v11, %v7095_v43  ;;  %v5248_v13 = vpop.f32.mrb[96].mxu1 }
 0x3ef   : > { %v5249_v36 = vpop.f32.mrb[97].mxu1 }
 0x3f0   : > { %v4467_v52 = vpack.c.bf16 %v4431_v59, %v4428_v14  ;;  %v5250_v56 = vadd.f32 %v5249_v36, %v5248_v13  ;;  %v5251_v0 = vpop.f32.mrb[98].mxu1 }
 0x3f1   : > { %v5252_v18 = vpop.f32.mrb[99].mxu1 }
 0x3f2   : > { %4491 = vst [vmem:[#allocation2 + $0x58] sm:$0xff] %v4467_v52  ;;  %v4375_v6 = vadd.f32 %v5250_v56, %v7054_v7  ;;  %v5253_v15 = vadd.f32 %v5252_v18, %v5251_v0 }
 0x3f4   : > { %v4378_v9 = vadd.f32 %v5253_v15, %v7056_v10  ;;  %v4434_v20 = vmax.f32 %v4375_v6, %v7095_v43 }
 0x3f6   : > { %v4437_v48 = vmax.f32 %v4378_v9, %v7095_v43  ;;  %v5254_v12 = vpop.f32.mrb[100].mxu1 }
 0x3f7   : > { %v5255_v21 = vpop.f32.mrb[101].mxu1 }
 0x3f8   : > { %v4470_v25 = vpack.c.bf16 %v4437_v48, %v4434_v20  ;;  %v5256_v1 = vadd.f32 %v5255_v21, %v5254_v12  ;;  %v5257_v28 = vpop.f32.mrb[102].mxu1 }
 0x3f9   : > { %v5258_v50 = vpop.f32.mrb[103].mxu1 }
 0x3fa   : > { %4494 = vst [vmem:[#allocation2 + $0x70] sm:$0xff] %v4470_v25  ;;  %v4383_v29 = vadd.f32 %v5256_v1, %v7062_v31  ;;  %v5259_v8 = vadd.f32 %v5258_v50, %v5257_v28 }
 0x3fc   : > { %v4386_v45 = vadd.f32 %v5259_v8, %v7064_v30  ;;  %v4440_v7 = vmax.f32 %v4383_v29, %v7095_v43 }
 0x3fe   : > { %v4443_v10 = vmax.f32 %v4386_v45, %v7095_v43  ;;  %v5260_v32 = vpop.f32.mrb[104].mxu1 }
 0x3ff   : > { %v5261_v5 = vpop.f32.mrb[105].mxu1 }
 0x400   : > { %v4473_v58 = vpack.c.bf16 %v4443_v10, %v4440_v7  ;;  %v5262_v55 = vadd.f32 %v5261_v5, %v5260_v32  ;;  %v5263_v33 = vpop.f32.mrb[106].mxu1 }
 0x401   : > { %v5264_v3 = vpop.f32.mrb[107].mxu1 }
 0x402   : > { %4497 = vst [vmem:[#allocation2 + $0x88] sm:$0xff] %v4473_v58  ;;  %v4391_v35 = vadd.f32 %v5262_v55, %v7070_v54  ;;  %v5265_v40 = vadd.f32 %v5264_v3, %v5263_v33 }
 0x404   : > { %v4394_v57 = vadd.f32 %v5265_v40, %v7072_v27  ;;  %v4446_v31 = vmax.f32 %v4391_v35, %v7095_v43 }
 0x406   : > { %v4449_v30 = vmax.f32 %v4394_v57, %v7095_v43  ;;  %v5266_v38 = vpop.f32.mrb[108].mxu1 }
 0x407   : > { %v5267_v37 = vpop.f32.mrb[109].mxu1 }
 0x408   : > { %v4476_v61 = vpack.c.bf16 %v4449_v30, %v4446_v31  ;;  %v5268_v34 = vadd.f32 %v5267_v37, %v5266_v38  ;;  %v5269_v63 = vpop.f32.mrb[110].mxu1 }
 0x409   : > { %v5270_v23 = vpop.f32.mrb[111].mxu1 }
 0x40a   : > { %4500 = vst [vmem:[#allocation2 + $0xa0] sm:$0xff] %v4476_v61  ;;  %v4399_v46 = vadd.f32 %v5268_v34, %v7078_v22  ;;  %v5271_v53 = vadd.f32 %v5270_v23, %v5269_v63 }
 0x40c   : > { %v4402_v47 = vadd.f32 %v5271_v53, %v7085_v62  ;;  %v4452_v54 = vmax.f32 %v4399_v46, %v7095_v43 }
 0x40e   : > { %v4455_v27 = vmax.f32 %v4402_v47, %v7095_v43 }
 0x410   : > { %v4479_v17 = vpack.c.bf16 %v4455_v27, %v4452_v54 }
 0x412   : > { %4503 = vst [vmem:[#allocation2 + $0xb8] sm:$0xff] %v4479_v17 }
 0x413 PF: > { %v4506_v49 = vld [vmem:[#allocation2 + $0x8] sm:$0xff]  ;;  %v4505_v24 = vld [vmem:[#allocation2] sm:$0xff]  ;;  %v4507_v16 = vld [vmem:[#allocation2 + $0x10] sm:$0xff]  ;;  %v6095_v51 = vmov 0.0   ;;  %v6096_v60 = vmov 0   ;;  %vm6097_vm0 = vmmov 0  }
 0x414   : > { %4529 = vmatprep.subr.bf16.mxu0 %v4506_v49  ;;  %5313 = vmatprep.subr.bf16.mxu1 %v6095_v51  ;;  %v4509_v39 = vld [vmem:[#allocation2 + $0x20] sm:$0xff]  ;;  %v4508_v22 = vld [vmem:[#allocation2 + $0x18] sm:$0xff]  ;;  %v4510_v62 = vld [vmem:[#allocation2 + $0x28] sm:$0xff] }
 0x415   : > { %4530 = vmatpush1.bf16.msra.mxu0 %v4505_v24  ;;  %5314 = vmatpush3.bf16.msra.mxu1 %v4507_v16  ;;  %v4512_v41 = vld [vmem:[#allocation2 + $0x38] sm:$0xff]  ;;  %v4511_v43 = vld [vmem:[#allocation2 + $0x30] sm:$0xff]  ;;  %v4513_v2 = vld [vmem:[#allocation2 + $0x40] sm:$0xff] }
 0x416   : > { %4531 = vmatprep.subr.bf16.mxu0 %v4509_v39  ;;  %5315 = vmatprep.subr.bf16.mxu1 %v6095_v51  ;;  %v4515_v19 = vld [vmem:[#allocation2 + $0x50] sm:$0xff]  ;;  %v4514_v26 = vld [vmem:[#allocation2 + $0x48] sm:$0xff]  ;;  %v4516_v44 = vld [vmem:[#allocation2 + $0x58] sm:$0xff] }
 0x417   : > { %4561 = vmatprep.mubr.bf16.mxu0 %v6096_v60  ;;  %5329 = vmatprep.mubr.msk.bf16.mxu1 %vm6097_vm0, %v6095_v51  ;;  %v4518_v42 = vld [vmem:[#allocation2 + $0x68] sm:$0xff]  ;;  %v4517_v4 = vld [vmem:[#allocation2 + $0x60] sm:$0xff]  ;;  %v4519_v11 = vld [vmem:[#allocation2 + $0x70] sm:$0xff] }
 0x418   : > { %v4521_v14 = vld [vmem:[#allocation2 + $0x80] sm:$0xff]  ;;  %v4520_v59 = vld [vmem:[#allocation2 + $0x78] sm:$0xff]  ;;  %v4522_v13 = vld [vmem:[#allocation2 + $0x88] sm:$0xff] }
 0x419   : > { %4532 = vmatpush1.bf16.msra.mxu0 %v4508_v22  ;;  %5316 = vmatpush3.bf16.msra.mxu1 %v4510_v62  ;;  %v4524_v36 = vld [vmem:[#allocation2 + $0x98] sm:$0xff]  ;;  %v4523_v52 = vld [vmem:[#allocation2 + $0x90] sm:$0xff]  ;;  %v4525_v56 = vld [vmem:[#allocation2 + $0xa0] sm:$0xff] }
 0x41a   : > { %4533 = vmatprep.subr.bf16.mxu0 %v4512_v41  ;;  %5317 = vmatprep.subr.bf16.mxu1 %v6095_v51  ;;  %v4527_v0 = vld [vmem:[#allocation2 + $0xb0] sm:$0xff]  ;;  %v4526_v18 = vld [vmem:[#allocation2 + $0xa8] sm:$0xff]  ;;  %v4528_v6 = vld [vmem:[#allocation2 + $0xb8] sm:$0xff] }
 0x41b   : > { %v4504_v15 = vld [vmem:[%s7202_s1] sm:$0xf] }
 0x41d   : > { %4534 = vmatpush1.bf16.msra.mxu0 %v4511_v43  ;;  %5318 = vmatpush3.bf16.msra.mxu1 %v4513_v2 }
 0x41e   : > { %4535 = vmatprep.subr.bf16.mxu0 %v4515_v19  ;;  %5319 = vmatprep.subr.bf16.mxu1 %v6095_v51 }
 0x421   : > { %4536 = vmatpush1.bf16.msra.mxu0 %v4514_v26  ;;  %5320 = vmatpush3.bf16.msra.mxu1 %v4516_v44 }
 0x422   : > { %4537 = vmatprep.subr.bf16.mxu0 %v4518_v42  ;;  %5321 = vmatprep.subr.bf16.mxu1 %v6095_v51 }
 0x425   : > { %4538 = vmatpush1.bf16.msra.mxu0 %v4517_v4  ;;  %5322 = vmatpush3.bf16.msra.mxu1 %v4519_v11 }
 0x426   : > { %4539 = vmatprep.subr.bf16.mxu0 %v4521_v14  ;;  %5323 = vmatprep.subr.bf16.mxu1 %v6095_v51 }
 0x429   : > { %4540 = vmatpush1.bf16.msra.mxu0 %v4520_v59  ;;  %5324 = vmatpush3.bf16.msra.mxu1 %v4522_v13 }
 0x42a   : > { %4541 = vmatprep.subr.bf16.mxu0 %v4524_v36  ;;  %5325 = vmatprep.subr.bf16.mxu1 %v6095_v51 }
 0x42d   : > { %4542 = vmatpush1.bf16.msra.mxu0 %v4523_v52  ;;  %5326 = vmatpush3.bf16.msra.mxu1 %v4525_v56 }
 0x42e   : > { %4543 = vmatprep.subr.bf16.mxu0 %v4527_v0  ;;  %5327 = vmatprep.subr.bf16.mxu1 %v6095_v51 }
 0x431   : > { %4544 = vmatpush1.bf16.msra.mxu0 %v4526_v18  ;;  %5328 = vmatpush3.bf16.msra.mxu1 %v4528_v6 }
 0x434   : > { %4562 = vmatmul.mubr.bf16.vlgmr.msra.gmra.mrb[0].mxu0 %v4504_v15  ;;  %5330 = vmatmul.mubr.bf16.vlgmr.msra.gmra.mrb[0].mxu1 %v4504_v15 }
 0x507   : > { %v4563_v9 = vpop.f32.mrb[0].mxu0  ;;  %v4604_v20 = vpop.f32.mrb[0].mxu1 }
 0x508   : > { %4610 = vst [vmem:[%s6162_s13] sm:$0xff] %v4563_v9  ;;  %4612 = vst [vmem:[%s6162_s13 + $0x10] sm:$0xff] %v4604_v20  ;;  %v4565_v48 = vpop.f32.mrb[1].mxu0  ;;  %v5331_v12 = vpop.f32.mrb[1].mxu1 }
 0x509   : > { %4611 = vst [vmem:[%s6162_s13 + $0x8] sm:$0xff] %v4565_v48  ;;  %v4567_v21 = vpop.f32.mrb[2].mxu0  ;;  %v4607_v25 = vpop.f32.mrb[2].mxu1 }
 0x50a   : > { %v4568_v1 = vpop.f32.mrb[3].mxu0  ;;  %v5332_v28 = vpop.f32.mrb[3].mxu1 }
 0x50b PF: > { %s18_s27 = sadd.s32 1, %s6092_s27  }
 0x50c   : > { %p15_p8 = scmp.ge.s32.totalorder %s18_s27, 8  }
 0x50e   :  { %17 = sbr.rel (!%p15_p8) target bundleno = 1 (0x1), region = 102 }

</bundles_post_ra>
